<compile_context>
chip_gen: v5e
topology: v5e:2x2
jax: 0.10.0
libtpu: 0.0.40
codegen_flags: <defaults>
</compile_context>

<pallas_src>
import jax
import jax.numpy as jnp
from jax.experimental import pallas as pl
from jax.experimental.pallas import tpu as pltpu

C = 64
LATENT = 64
H1 = 14                       # spatial size after the first transposed conv
N_EFF = H1 * H1 * C           # 12544 = folded stage-1 output width (I, J, c)

# (input-shift delta, kernel tap k) pairs for output phase 0 / 1 of a stride-2, kernel-4,
# padding-1 transposed conv (1-D view):
#   out[2m+0] = x[m]*w[1] + x[m-1]*w[3]
#   out[2m+1] = x[m]*w[2] + x[m+1]*w[0]
_PHASE_TAPS = (((0, 1), (-1, 3)),
               ((0, 2), (1, 0)))


# --------------------------------------------------------------------------- reference deconv
def conv_transpose_nchw(x, w, *, stride, pad):
    """PyTorch ConvTranspose2d (weight (Cin,Cout,K,K), no bias) as a dilated conv (exact)."""
    k = w.shape[-1]
    w_flip = jnp.flip(w, axis=(2, 3)).transpose(1, 0, 2, 3)          # (Cout, Cin, K, K)
    return jax.lax.conv_general_dilated(
        x, w_flip, window_strides=(1, 1),
        padding=((k - 1 - pad,) * 2, (k - 1 - pad,) * 2),
        lhs_dilation=(stride, stride),
        dimension_numbers=("NCHW", "OIHW", "NCHW"),
        precision=jax.lax.Precision.HIGHEST)


# --------------------------------------------------------------------------- Pallas kernels
def _stage1_kernel(z_ref, w_ref, b_ref, o_ref):
    # z (B,64) bf16 | w (64, 6272) bf16 | b (1, 6272) f32 | o (B, 6272) f32
    acc = jnp.dot(z_ref[...], w_ref[...], preferred_element_type=jnp.float32)
    o_ref[...] = jnp.maximum(acc + b_ref[...], 0.0)          # f32 epilogue (v5e-safe)


def _stage2_kernel(hp_ref, w_ref, b_ref, o_ref):
    # hp (16,16,64) f32 zero-haloed ReLU activation | w (16,64) f32 packed taps | b (1,1) SMEM
    # o (2,2,14,14) f32 : o[ph, pw, I, J] = full-res output pixel (2I+ph, 2J+pw)
    bias = b_ref[0, 0]
    for ph in range(2):
        for pw in range(2):
            acc = jnp.full((H1, H1), bias, dtype=jnp.float32)
            t = 0
            for aa in range(2):
                dh = _PHASE_TAPS[ph][aa][0]
                for bb in range(2):
                    dw = _PHASE_TAPS[pw][bb][0]
                    x = hp_ref[1 + dh:1 + dh + H1, 1 + dw:1 + dw + H1, :]    # (14,14,64)
                    r = (ph * 2 + pw) * 4 + t
                    w_row = w_ref[r:r + 1, :]                                 # (1,64)
                    acc = acc + jnp.sum(x * w_row, axis=-1)                   # VPU mul + lane reduce
                    t += 1
            o_ref[ph, pw, :, :] = acc


# --------------------------------------------------------------------------- one-time prepack
def prepack(params):
    """Fold fc+Unflatten+deconv1 into (W_eff, b_eff); pack deconv2 taps per output phase."""
    fc_w, fc_b = params["fc_w"], params["fc_b"]            # (6272, 64), (6272,)
    w1, b1 = params["deconv1_w"], params["deconv1_b"]      # (128, 64, 4, 4), (64,)
    w2, b2 = params["deconv2_w"], params["deconv2_b"]      # (64, 1, 4, 4), (1,)

    # Each latent direction (and the fc bias) is a (2C,7,7) map; push through deconv1 (no bias).
    dirs = jnp.concatenate([fc_w.T, fc_b[None, :]], axis=0).reshape(LATENT + 1, 2 * C, 7, 7)
    y = conv_transpose_nchw(dirs, w1, stride=2, pad=1)                 # (65, 64, 14, 14)
    y = y.transpose(0, 2, 3, 1).reshape(LATENT + 1, N_EFF)             # channel-last (I, J, c)
    w_eff = y[:LATENT].astype(jnp.bfloat16)                            # bf16 MXU operand
    b_eff = (y[LATENT] + jnp.tile(b1, H1 * H1)).astype(jnp.float32)[None, :]   # (1, 12544)

    # deconv2 tap rows: row = (ph*2 + pw)*4 + (a*2 + b), 64 channel taps each.
    rows = []
    for ph in range(2):
        for pw in range(2):
            for aa in range(2):
                for bb in range(2):
                    kh = _PHASE_TAPS[ph][aa][1]
                    kw = _PHASE_TAPS[pw][bb][1]
                    rows.append(w2[:, 0, kh, kw])
    w2_packed = jnp.stack(rows, axis=0).astype(jnp.float32)            # (16, 64)
    b2_packed = b2.reshape(1, 1).astype(jnp.float32)
    return {"w_eff": w_eff, "b_eff": b_eff, "w2": w2_packed, "b2": b2_packed}


# --------------------------------------------------------------------------- forward
def gnet_forward(packed, z):
    B = z.shape[0]
    nb = N_EFF // 2                                                    # 6272, multiple of 128

    h1 = pl.pallas_call(
        _stage1_kernel,
        out_shape=jax.ShapeDtypeStruct((B, N_EFF), jnp.float32),
        grid=(2,),
        in_specs=[
            pl.BlockSpec((B, LATENT), lambda j: (0, 0)),
            pl.BlockSpec((LATENT, nb), lambda j: (0, j)),
            pl.BlockSpec((1, nb), lambda j: (0, j)),
        ],
        out_specs=pl.BlockSpec((B, nb), lambda j: (0, j)),
        compiler_params=pltpu.CompilerParams(dimension_semantics=("parallel",)),
    )(z.astype(jnp.bfloat16), packed["w_eff"], packed["b_eff"])

    # Tiny XLA layout glue (~130 KB): channel-last view + 1-pixel zero halo so the stage-2
    # shifted windows are plain static slices (no in-kernel roll/mask needed).
    hp = jnp.pad(h1.reshape(B, H1, H1, C), ((0, 0), (1, 1), (1, 1), (0, 0)))

    phases = pl.pallas_call(
        _stage2_kernel,
        out_shape=jax.ShapeDtypeStruct((B, 2, 2, H1, H1), jnp.float32),
        grid=(B,),
        in_specs=[
            pl.BlockSpec((None, H1 + 2, H1 + 2, C), lambda b: (b, 0, 0, 0)),
            pl.BlockSpec((16, C), lambda b: (0, 0)),
            pl.BlockSpec((1, 1), lambda b: (0, 0), memory_space=pltpu.MemorySpace.SMEM),
        ],
        out_specs=pl.BlockSpec((None, 2, 2, H1, H1), lambda b: (b, 0, 0, 0, 0)),
        compiler_params=pltpu.CompilerParams(dimension_semantics=("parallel",)),
    )(hp, packed["w2"], packed["b2"])

    # Interleave the 2x2 output phases (6 KB): out[2I+ph, 2J+pw] = phases[ph, pw, I, J]
    out = phases.transpose(0, 3, 1, 4, 2).reshape(B, 2 * H1, 2 * H1)
    return out[:, None, :, :]                                          # (B, 1, 28, 28) NCHW


# --------------------------------------------------------------------------- pure-JAX reference
def gnet_reference(params, z):
    h = jnp.matmul(z, params["fc_w"].T, precision=jax.lax.Precision.HIGHEST) + params["fc_b"]
    h = h.reshape(-1, 2 * C, 7, 7)
    h = conv_transpose_nchw(h, params["deconv1_w"], stride=2, pad=1)
    h = jnp.maximum(h + params["deconv1_b"][None, :, None, None], 0.0)
    h = conv_transpose_nchw(h, params["deconv2_w"], stride=2, pad=1)
    return h + params["deconv2_b"][None, :, None, None]


def init_params(key):
    ks = jax.random.split(key, 6)
    s = 0.05
    return {
        "fc_w": jax.random.normal(ks[0], (2 * C * 49, LATENT), jnp.float32) * s,
        "fc_b": jax.random.normal(ks[1], (2 * C * 49,), jnp.float32) * s,
        "deconv1_w": jax.random.normal(ks[2], (2 * C, C, 4, 4), jnp.float32) * s,
        "deconv1_b": jax.random.normal(ks[3], (C,), jnp.float32) * s,
        "deconv2_w": jax.random.normal(ks[4], (C, 1, 4, 4), jnp.float32) * s,
        "deconv2_b": jax.random.normal(ks[5], (1,), jnp.float32) * s,
    }


if __name__ == "__main__":
    key = jax.random.PRNGKey(0)
    pkey, zkey = jax.random.split(key)
    params = init_params(pkey)
    packed = prepack(params)

    z = jax.random.normal(zkey, (2, LATENT), jnp.float32)              # latent input, batch=2

    y = jax.jit(gnet_forward)(packed, z)
    jax.block_until_ready(y)
    assert y.shape == (2, 1, 28, 28) and y.dtype == jnp.float32

    ref = gnet_reference(params, z)
    err = float(jnp.max(jnp.abs(y - ref)))
    assert err < 2e-2, f"mismatch vs reference: max abs err {err}"     # bf16-operand drift only
    print("KERNEL_OK")
</pallas_src>

<mosaic_0001>
module attributes {stable_mosaic.version = 11 : i64} {
  func.func @_stage1_kernel(%arg0: i32, %arg1: memref<2x64xbf16, #tpu.memory_space<vmem>>, %arg2: memref<64x6272xbf16, #tpu.memory_space<vmem>>, %arg3: memref<1x6272xf32, #tpu.memory_space<vmem>>, %arg4: memref<2x6272xf32, #tpu.memory_space<vmem>>) attributes {dimension_semantics = [#tpu.dimension_semantics<parallel>], iteration_bounds = array<i64: 2>, scalar_prefetch = 0 : i64, scratch_operands = 0 : i64, tpu.core_type = #tpu.core_type<tc>, window_params = [{pipeline_mode = #tpu.pipeline_mode<synchronous>, transform_indices = @transform_0, window_bounds = array<i64: 2, 64>}, {transform_indices = @transform_1, window_bounds = array<i64: 64, 6272>}, {transform_indices = @transform_2, window_bounds = array<i64: 1, 6272>}, {transform_indices = @transform_3, window_bounds = array<i64: 2, 6272>}]} {
    %c0 = arith.constant 0 : index
    %c0_0 = arith.constant 0 : index
    %0 = vector.load %arg1[%c0, %c0_0] : memref<2x64xbf16, #tpu.memory_space<vmem>>, vector<2x64xbf16>
    %c0_1 = arith.constant 0 : index
    %c0_2 = arith.constant 0 : index
    %1 = vector.load %arg2[%c0_1, %c0_2] : memref<64x6272xbf16, #tpu.memory_space<vmem>>, vector<64x6272xbf16>
    %cst = arith.constant dense<0.000000e+00> : vector<2x6272xf32>
    %2 = tpu.matmul %0, %1, %cst {dimension_numbers = #tpu.dot_dimension_numbers<[1], [0], [0], [1], [0, 0, 1, 1], [], []>} : vector<2x64xbf16>, vector<64x6272xbf16>, vector<2x6272xf32> -> vector<2x6272xf32>
    %c0_3 = arith.constant 0 : index
    %c0_4 = arith.constant 0 : index
    %3 = vector.load %arg3[%c0_3, %c0_4] : memref<1x6272xf32, #tpu.memory_space<vmem>>, vector<1x6272xf32>
    %4 = vector.broadcast %3 : vector<1x6272xf32> to vector<2x6272xf32>
    %5 = arith.addf %2, %4 : vector<2x6272xf32>
    %cst_5 = arith.constant 0.000000e+00 : f32
    %6 = vector.broadcast %cst_5 : f32 to vector<2x6272xf32>
    %7 = arith.maximumf %5, %6 : vector<2x6272xf32>
    %c0_6 = arith.constant 0 : index
    %c0_7 = arith.constant 0 : index
    %8 = vector.load %arg4[%c0_6, %c0_7] : memref<2x6272xf32, #tpu.memory_space<vmem>>, vector<2x6272xf32>
    tpu.vector_store %arg4[%c0_6, %c0_7], %7 {strides = array<i32>} : memref<2x6272xf32, #tpu.memory_space<vmem>>, vector<2x6272xf32>,
    return
  }
  func.func @transform_0(%arg0: i32) -> (i32, i32) {
    %c0_i32 = arith.constant 0 : i32
    %c0_i32_0 = arith.constant 0 : i32
    %c0_i32_1 = arith.constant 0 : i32
    return %c0_i32, %c0_i32_0 : i32, i32
  }
  func.func @transform_1(%arg0: i32) -> (i32, i32) {
    %c0_i32 = arith.constant 0 : i32
    %c0_i32_0 = arith.constant 0 : i32
    return %c0_i32, %arg0 : i32, i32
  }
  func.func @transform_2(%arg0: i32) -> (i32, i32) {
    %c0_i32 = arith.constant 0 : i32
    %c0_i32_0 = arith.constant 0 : i32
    return %c0_i32, %arg0 : i32, i32
  }
  func.func @transform_3(%arg0: i32) -> (i32, i32) {
    %c0_i32 = arith.constant 0 : i32
    %c0_i32_0 = arith.constant 0 : i32
    return %c0_i32, %arg0 : i32, i32
  }
}

module attributes {stable_mosaic.version = 11 : i64} {
  func.func @_stage2_kernel(%arg0: i32, %arg1: memref<1x16x16x64xf32, #tpu.memory_space<vmem>>, %arg2: memref<16x64xf32, #tpu.memory_space<vmem>>, %arg3: memref<1x1xf32, #tpu.memory_space<smem>>, %arg4: memref<1x2x2x14x14xf32, #tpu.memory_space<vmem>>) attributes {dimension_semantics = [#tpu.dimension_semantics<parallel>], iteration_bounds = array<i64: 2>, scalar_prefetch = 0 : i64, scratch_operands = 0 : i64, tpu.core_type = #tpu.core_type<tc>, window_params = [{transform_indices = @transform_0, window_bounds = array<i64: 1, 16, 16, 64>}, {pipeline_mode = #tpu.pipeline_mode<synchronous>, transform_indices = @transform_1, window_bounds = array<i64: 16, 64>}, {transform_indices = @transform_2, window_bounds = array<i64: 1, 1>}, {transform_indices = @transform_3, window_bounds = array<i64: 1, 2, 2, 14, 14>}]} {
    %c0 = arith.constant 0 : index
    %c0_0 = arith.constant 0 : index
    %0 = memref.load %arg3[%c0, %c0_0] : memref<1x1xf32, #tpu.memory_space<smem>>
    %1 = vector.broadcast %0 : f32 to vector<14x14xf32>
    %c0_1 = arith.constant 0 : index
    %c1 = arith.constant 1 : index
    %c1_2 = arith.constant 1 : index
    %c0_3 = arith.constant 0 : index
    %2 = vector.load %arg1[%c0_1, %c1, %c1_2, %c0_3] : memref<1x16x16x64xf32, #tpu.memory_space<vmem>>, vector<1x14x14x64xf32>
    %3 = vector.shape_cast %2 : vector<1x14x14x64xf32> to vector<14x14x64xf32>
    %c0_4 = arith.constant 0 : index
    %c0_5 = arith.constant 0 : index
    %4 = vector.load %arg2[%c0_4, %c0_5] : memref<16x64xf32, #tpu.memory_space<vmem>>, vector<1x64xf32>
    %5 = vector.shape_cast %4 : vector<1x64xf32> to vector<1x1x64xf32>
    %6 = vector.broadcast %5 : vector<1x1x64xf32> to vector<14x14x64xf32>
    %7 = arith.mulf %3, %6 : vector<14x14x64xf32>
    %cst = arith.constant dense<0.000000e+00> : vector<14x14xf32>
    %8 = vector.multi_reduction <add>, %7, %cst [2] : vector<14x14x64xf32> to vector<14x14xf32>
    %9 = arith.addf %1, %8 : vector<14x14xf32>
    %c0_6 = arith.constant 0 : index
    %c1_7 = arith.constant 1 : index
    %c0_8 = arith.constant 0 : index
    %c0_9 = arith.constant 0 : index
    %10 = vector.load %arg1[%c0_6, %c1_7, %c0_8, %c0_9] : memref<1x16x16x64xf32, #tpu.memory_space<vmem>>, vector<1x14x14x64xf32>
    %11 = vector.shape_cast %10 : vector<1x14x14x64xf32> to vector<14x14x64xf32>
    %c1_10 = arith.constant 1 : index
    %c0_11 = arith.constant 0 : index
    %12 = vector.load %arg2[%c1_10, %c0_11] : memref<16x64xf32, #tpu.memory_space<vmem>>, vector<1x64xf32>
    %13 = vector.shape_cast %12 : vector<1x64xf32> to vector<1x1x64xf32>
    %14 = vector.broadcast %13 : vector<1x1x64xf32> to vector<14x14x64xf32>
    %15 = arith.mulf %11, %14 : vector<14x14x64xf32>
    %cst_12 = arith.constant dense<0.000000e+00> : vector<14x14xf32>
    %16 = vector.multi_reduction <add>, %15, %cst_12 [2] : vector<14x14x64xf32> to vector<14x14xf32>
    %17 = arith.addf %9, %16 : vector<14x14xf32>
    %c0_13 = arith.constant 0 : index
    %c0_14 = arith.constant 0 : index
    %c1_15 = arith.constant 1 : index
    %c0_16 = arith.constant 0 : index
    %18 = vector.load %arg1[%c0_13, %c0_14, %c1_15, %c0_16] : memref<1x16x16x64xf32, #tpu.memory_space<vmem>>, vector<1x14x14x64xf32>
    %19 = vector.shape_cast %18 : vector<1x14x14x64xf32> to vector<14x14x64xf32>
    %c2 = arith.constant 2 : index
    %c0_17 = arith.constant 0 : index
    %20 = vector.load %arg2[%c2, %c0_17] : memref<16x64xf32, #tpu.memory_space<vmem>>, vector<1x64xf32>
    %21 = vector.shape_cast %20 : vector<1x64xf32> to vector<1x1x64xf32>
    %22 = vector.broadcast %21 : vector<1x1x64xf32> to vector<14x14x64xf32>
    %23 = arith.mulf %19, %22 : vector<14x14x64xf32>
    %cst_18 = arith.constant dense<0.000000e+00> : vector<14x14xf32>
    %24 = vector.multi_reduction <add>, %23, %cst_18 [2] : vector<14x14x64xf32> to vector<14x14xf32>
    %25 = arith.addf %17, %24 : vector<14x14xf32>
    %c0_19 = arith.constant 0 : index
    %c0_20 = arith.constant 0 : index
    %c0_21 = arith.constant 0 : index
    %c0_22 = arith.constant 0 : index
    %26 = vector.load %arg1[%c0_19, %c0_20, %c0_21, %c0_22] : memref<1x16x16x64xf32, #tpu.memory_space<vmem>>, vector<1x14x14x64xf32>
    %27 = vector.shape_cast %26 : vector<1x14x14x64xf32> to vector<14x14x64xf32>
    %c3 = arith.constant 3 : index
    %c0_23 = arith.constant 0 : index
    %28 = vector.load %arg2[%c3, %c0_23] : memref<16x64xf32, #tpu.memory_space<vmem>>, vector<1x64xf32>
    %29 = vector.shape_cast %28 : vector<1x64xf32> to vector<1x1x64xf32>
    %30 = vector.broadcast %29 : vector<1x1x64xf32> to vector<14x14x64xf32>
    %31 = arith.mulf %27, %30 : vector<14x14x64xf32>
    %cst_24 = arith.constant dense<0.000000e+00> : vector<14x14xf32>
    %32 = vector.multi_reduction <add>, %31, %cst_24 [2] : vector<14x14x64xf32> to vector<14x14xf32>
    %33 = arith.addf %25, %32 : vector<14x14xf32>
    %c0_25 = arith.constant 0 : index
    %c0_26 = arith.constant 0 : index
    %c0_27 = arith.constant 0 : index
    %c0_28 = arith.constant 0 : index
    %c0_29 = arith.constant 0 : index
    %34 = vector.load %arg4[%c0_25, %c0_26, %c0_27, %c0_28, %c0_29] : memref<1x2x2x14x14xf32, #tpu.memory_space<vmem>>, vector<1x1x1x14x14xf32>
    %35 = vector.shape_cast %34 : vector<1x1x1x14x14xf32> to vector<14x14xf32>
    %36 = vector.shape_cast %33 : vector<14x14xf32> to vector<1x1x1x14x14xf32>
    tpu.vector_store %arg4[%c0_25, %c0_26, %c0_27, %c0_28, %c0_29], %36 {strides = array<i32>} : memref<1x2x2x14x14xf32, #tpu.memory_space<vmem>>, vector<1x1x1x14x14xf32>,
    %37 = vector.broadcast %0 : f32 to vector<14x14xf32>
    %c0_30 = arith.constant 0 : index
    %c1_31 = arith.constant 1 : index
    %c1_32 = arith.constant 1 : index
    %c0_33 = arith.constant 0 : index
    %38 = vector.load %arg1[%c0_30, %c1_31, %c1_32, %c0_33] : memref<1x16x16x64xf32, #tpu.memory_space<vmem>>, vector<1x14x14x64xf32>
    %39 = vector.shape_cast %38 : vector<1x14x14x64xf32> to vector<14x14x64xf32>
    %c4 = arith.constant 4 : index
    %c0_34 = arith.constant 0 : index
    %40 = vector.load %arg2[%c4, %c0_34] : memref<16x64xf32, #tpu.memory_space<vmem>>, vector<1x64xf32>
    %41 = vector.shape_cast %40 : vector<1x64xf32> to vector<1x1x64xf32>
    %42 = vector.broadcast %41 : vector<1x1x64xf32> to vector<14x14x64xf32>
    %43 = arith.mulf %39, %42 : vector<14x14x64xf32>
    %cst_35 = arith.constant dense<0.000000e+00> : vector<14x14xf32>
    %44 = vector.multi_reduction <add>, %43, %cst_35 [2] : vector<14x14x64xf32> to vector<14x14xf32>
    %45 = arith.addf %37, %44 : vector<14x14xf32>
    %c0_36 = arith.constant 0 : index
    %c1_37 = arith.constant 1 : index
    %c2_38 = arith.constant 2 : index
    %c0_39 = arith.constant 0 : index
    %46 = vector.load %arg1[%c0_36, %c1_37, %c2_38, %c0_39] : memref<1x16x16x64xf32, #tpu.memory_space<vmem>>, vector<1x14x14x64xf32>
    %47 = vector.shape_cast %46 : vector<1x14x14x64xf32> to vector<14x14x64xf32>
    %c5 = arith.constant 5 : index
    %c0_40 = arith.constant 0 : index
    %48 = vector.load %arg2[%c5, %c0_40] : memref<16x64xf32, #tpu.memory_space<vmem>>, vector<1x64xf32>
    %49 = vector.shape_cast %48 : vector<1x64xf32> to vector<1x1x64xf32>
    %50 = vector.broadcast %49 : vector<1x1x64xf32> to vector<14x14x64xf32>
    %51 = arith.mulf %47, %50 : vector<14x14x64xf32>
    %cst_41 = arith.constant dense<0.000000e+00> : vector<14x14xf32>
    %52 = vector.multi_reduction <add>, %51, %cst_41 [2] : vector<14x14x64xf32> to vector<14x14xf32>
    %53 = arith.addf %45, %52 : vector<14x14xf32>
    %c0_42 = arith.constant 0 : index
    %c0_43 = arith.constant 0 : index
    %c1_44 = arith.constant 1 : index
    %c0_45 = arith.constant 0 : index
    %54 = vector.load %arg1[%c0_42, %c0_43, %c1_44, %c0_45] : memref<1x16x16x64xf32, #tpu.memory_space<vmem>>, vector<1x14x14x64xf32>
    %55 = vector.shape_cast %54 : vector<1x14x14x64xf32> to vector<14x14x64xf32>
    %c6 = arith.constant 6 : index
    %c0_46 = arith.constant 0 : index
    %56 = vector.load %arg2[%c6, %c0_46] : memref<16x64xf32, #tpu.memory_space<vmem>>, vector<1x64xf32>
    %57 = vector.shape_cast %56 : vector<1x64xf32> to vector<1x1x64xf32>
    %58 = vector.broadcast %57 : vector<1x1x64xf32> to vector<14x14x64xf32>
    %59 = arith.mulf %55, %58 : vector<14x14x64xf32>
    %cst_47 = arith.constant dense<0.000000e+00> : vector<14x14xf32>
    %60 = vector.multi_reduction <add>, %59, %cst_47 [2] : vector<14x14x64xf32> to vector<14x14xf32>
    %61 = arith.addf %53, %60 : vector<14x14xf32>
    %c0_48 = arith.constant 0 : index
    %c0_49 = arith.constant 0 : index
    %c2_50 = arith.constant 2 : index
    %c0_51 = arith.constant 0 : index
    %62 = vector.load %arg1[%c0_48, %c0_49, %c2_50, %c0_51] : memref<1x16x16x64xf32, #tpu.memory_space<vmem>>, vector<1x14x14x64xf32>
    %63 = vector.shape_cast %62 : vector<1x14x14x64xf32> to vector<14x14x64xf32>
    %c7 = arith.constant 7 : index
    %c0_52 = arith.constant 0 : index
    %64 = vector.load %arg2[%c7, %c0_52] : memref<16x64xf32, #tpu.memory_space<vmem>>, vector<1x64xf32>
    %65 = vector.shape_cast %64 : vector<1x64xf32> to vector<1x1x64xf32>
    %66 = vector.broadcast %65 : vector<1x1x64xf32> to vector<14x14x64xf32>
    %67 = arith.mulf %63, %66 : vector<14x14x64xf32>
    %cst_53 = arith.constant dense<0.000000e+00> : vector<14x14xf32>
    %68 = vector.multi_reduction <add>, %67, %cst_53 [2] : vector<14x14x64xf32> to vector<14x14xf32>
    %69 = arith.addf %61, %68 : vector<14x14xf32>
    %c0_54 = arith.constant 0 : index
    %c0_55 = arith.constant 0 : index
    %c1_56 = arith.constant 1 : index
    %c0_57 = arith.constant 0 : index
    %c0_58 = arith.constant 0 : index
    %70 = vector.load %arg4[%c0_54, %c0_55, %c1_56, %c0_57, %c0_58] : memref<1x2x2x14x14xf32, #tpu.memory_space<vmem>>, vector<1x1x1x14x14xf32>
    %71 = vector.shape_cast %70 : vector<1x1x1x14x14xf32> to vector<14x14xf32>
    %72 = vector.shape_cast %69 : vector<14x14xf32> to vector<1x1x1x14x14xf32>
    tpu.vector_store %arg4[%c0_54, %c0_55, %c1_56, %c0_57, %c0_58], %72 {strides = array<i32>} : memref<1x2x2x14x14xf32, #tpu.memory_space<vmem>>, vector<1x1x1x14x14xf32>,
    %73 = vector.broadcast %0 : f32 to vector<14x14xf32>
    %c0_59 = arith.constant 0 : index
    %c1_60 = arith.constant 1 : index
    %c1_61 = arith.constant 1 : index
    %c0_62 = arith.constant 0 : index
    %74 = vector.load %arg1[%c0_59, %c1_60, %c1_61, %c0_62] : memref<1x16x16x64xf32, #tpu.memory_space<vmem>>, vector<1x14x14x64xf32>
    %75 = vector.shape_cast %74 : vector<1x14x14x64xf32> to vector<14x14x64xf32>
    %c8 = arith.constant 8 : index
    %c0_63 = arith.constant 0 : index
    %76 = vector.load %arg2[%c8, %c0_63] : memref<16x64xf32, #tpu.memory_space<vmem>>, vector<1x64xf32>
    %77 = vector.shape_cast %76 : vector<1x64xf32> to vector<1x1x64xf32>
    %78 = vector.broadcast %77 : vector<1x1x64xf32> to vector<14x14x64xf32>
    %79 = arith.mulf %75, %78 : vector<14x14x64xf32>
    %cst_64 = arith.constant dense<0.000000e+00> : vector<14x14xf32>
    %80 = vector.multi_reduction <add>, %79, %cst_64 [2] : vector<14x14x64xf32> to vector<14x14xf32>
    %81 = arith.addf %73, %80 : vector<14x14xf32>
    %c0_65 = arith.constant 0 : index
    %c1_66 = arith.constant 1 : index
    %c0_67 = arith.constant 0 : index
    %c0_68 = arith.constant 0 : index
    %82 = vector.load %arg1[%c0_65, %c1_66, %c0_67, %c0_68] : memref<1x16x16x64xf32, #tpu.memory_space<vmem>>, vector<1x14x14x64xf32>
    %83 = vector.shape_cast %82 : vector<1x14x14x64xf32> to vector<14x14x64xf32>
    %c9 = arith.constant 9 : index
    %c0_69 = arith.constant 0 : index
    %84 = vector.load %arg2[%c9, %c0_69] : memref<16x64xf32, #tpu.memory_space<vmem>>, vector<1x64xf32>
    %85 = vector.shape_cast %84 : vector<1x64xf32> to vector<1x1x64xf32>
    %86 = vector.broadcast %85 : vector<1x1x64xf32> to vector<14x14x64xf32>
    %87 = arith.mulf %83, %86 : vector<14x14x64xf32>
    %cst_70 = arith.constant dense<0.000000e+00> : vector<14x14xf32>
    %88 = vector.multi_reduction <add>, %87, %cst_70 [2] : vector<14x14x64xf32> to vector<14x14xf32>
    %89 = arith.addf %81, %88 : vector<14x14xf32>
    %c0_71 = arith.constant 0 : index
    %c2_72 = arith.constant 2 : index
    %c1_73 = arith.constant 1 : index
    %c0_74 = arith.constant 0 : index
    %90 = vector.load %arg1[%c0_71, %c2_72, %c1_73, %c0_74] : memref<1x16x16x64xf32, #tpu.memory_space<vmem>>, vector<1x14x14x64xf32>
    %91 = vector.shape_cast %90 : vector<1x14x14x64xf32> to vector<14x14x64xf32>
    %c10 = arith.constant 10 : index
    %c0_75 = arith.constant 0 : index
    %92 = vector.load %arg2[%c10, %c0_75] : memref<16x64xf32, #tpu.memory_space<vmem>>, vector<1x64xf32>
    %93 = vector.shape_cast %92 : vector<1x64xf32> to vector<1x1x64xf32>
    %94 = vector.broadcast %93 : vector<1x1x64xf32> to vector<14x14x64xf32>
    %95 = arith.mulf %91, %94 : vector<14x14x64xf32>
    %cst_76 = arith.constant dense<0.000000e+00> : vector<14x14xf32>
    %96 = vector.multi_reduction <add>, %95, %cst_76 [2] : vector<14x14x64xf32> to vector<14x14xf32>
    %97 = arith.addf %89, %96 : vector<14x14xf32>
    %c0_77 = arith.constant 0 : index
    %c2_78 = arith.constant 2 : index
    %c0_79 = arith.constant 0 : index
    %c0_80 = arith.constant 0 : index
    %98 = vector.load %arg1[%c0_77, %c2_78, %c0_79, %c0_80] : memref<1x16x16x64xf32, #tpu.memory_space<vmem>>, vector<1x14x14x64xf32>
    %99 = vector.shape_cast %98 : vector<1x14x14x64xf32> to vector<14x14x64xf32>
    %c11 = arith.constant 11 : index
    %c0_81 = arith.constant 0 : index
    %100 = vector.load %arg2[%c11, %c0_81] : memref<16x64xf32, #tpu.memory_space<vmem>>, vector<1x64xf32>
    %101 = vector.shape_cast %100 : vector<1x64xf32> to vector<1x1x64xf32>
    %102 = vector.broadcast %101 : vector<1x1x64xf32> to vector<14x14x64xf32>
    %103 = arith.mulf %99, %102 : vector<14x14x64xf32>
    %cst_82 = arith.constant dense<0.000000e+00> : vector<14x14xf32>
    %104 = vector.multi_reduction <add>, %103, %cst_82 [2] : vector<14x14x64xf32> to vector<14x14xf32>
    %105 = arith.addf %97, %104 : vector<14x14xf32>
    %c0_83 = arith.constant 0 : index
    %c1_84 = arith.constant 1 : index
    %c0_85 = arith.constant 0 : index
    %c0_86 = arith.constant 0 : index
    %c0_87 = arith.constant 0 : index
    %106 = vector.load %arg4[%c0_83, %c1_84, %c0_85, %c0_86, %c0_87] : memref<1x2x2x14x14xf32, #tpu.memory_space<vmem>>, vector<1x1x1x14x14xf32>
    %107 = vector.shape_cast %106 : vector<1x1x1x14x14xf32> to vector<14x14xf32>
    %108 = vector.shape_cast %105 : vector<14x14xf32> to vector<1x1x1x14x14xf32>
    tpu.vector_store %arg4[%c0_83, %c1_84, %c0_85, %c0_86, %c0_87], %108 {strides = array<i32>} : memref<1x2x2x14x14xf32, #tpu.memory_space<vmem>>, vector<1x1x1x14x14xf32>,
    %109 = vector.broadcast %0 : f32 to vector<14x14xf32>
    %c0_88 = arith.constant 0 : index
    %c1_89 = arith.constant 1 : index
    %c1_90 = arith.constant 1 : index
    %c0_91 = arith.constant 0 : index
    %110 = vector.load %arg1[%c0_88, %c1_89, %c1_90, %c0_91] : memref<1x16x16x64xf32, #tpu.memory_space<vmem>>, vector<1x14x14x64xf32>
    %111 = vector.shape_cast %110 : vector<1x14x14x64xf32> to vector<14x14x64xf32>
    %c12 = arith.constant 12 : index
    %c0_92 = arith.constant 0 : index
    %112 = vector.load %arg2[%c12, %c0_92] : memref<16x64xf32, #tpu.memory_space<vmem>>, vector<1x64xf32>
    %113 = vector.shape_cast %112 : vector<1x64xf32> to vector<1x1x64xf32>
    %114 = vector.broadcast %113 : vector<1x1x64xf32> to vector<14x14x64xf32>
    %115 = arith.mulf %111, %114 : vector<14x14x64xf32>
    %cst_93 = arith.constant dense<0.000000e+00> : vector<14x14xf32>
    %116 = vector.multi_reduction <add>, %115, %cst_93 [2] : vector<14x14x64xf32> to vector<14x14xf32>
    %117 = arith.addf %109, %116 : vector<14x14xf32>
    %c0_94 = arith.constant 0 : index
    %c1_95 = arith.constant 1 : index
    %c2_96 = arith.constant 2 : index
    %c0_97 = arith.constant 0 : index
    %118 = vector.load %arg1[%c0_94, %c1_95, %c2_96, %c0_97] : memref<1x16x16x64xf32, #tpu.memory_space<vmem>>, vector<1x14x14x64xf32>
    %119 = vector.shape_cast %118 : vector<1x14x14x64xf32> to vector<14x14x64xf32>
    %c13 = arith.constant 13 : index
    %c0_98 = arith.constant 0 : index
    %120 = vector.load %arg2[%c13, %c0_98] : memref<16x64xf32, #tpu.memory_space<vmem>>, vector<1x64xf32>
    %121 = vector.shape_cast %120 : vector<1x64xf32> to vector<1x1x64xf32>
    %122 = vector.broadcast %121 : vector<1x1x64xf32> to vector<14x14x64xf32>
    %123 = arith.mulf %119, %122 : vector<14x14x64xf32>
    %cst_99 = arith.constant dense<0.000000e+00> : vector<14x14xf32>
    %124 = vector.multi_reduction <add>, %123, %cst_99 [2] : vector<14x14x64xf32> to vector<14x14xf32>
    %125 = arith.addf %117, %124 : vector<14x14xf32>
    %c0_100 = arith.constant 0 : index
    %c2_101 = arith.constant 2 : index
    %c1_102 = arith.constant 1 : index
    %c0_103 = arith.constant 0 : index
    %126 = vector.load %arg1[%c0_100, %c2_101, %c1_102, %c0_103] : memref<1x16x16x64xf32, #tpu.memory_space<vmem>>, vector<1x14x14x64xf32>
    %127 = vector.shape_cast %126 : vector<1x14x14x64xf32> to vector<14x14x64xf32>
    %c14 = arith.constant 14 : index
    %c0_104 = arith.constant 0 : index
    %128 = vector.load %arg2[%c14, %c0_104] : memref<16x64xf32, #tpu.memory_space<vmem>>, vector<1x64xf32>
    %129 = vector.shape_cast %128 : vector<1x64xf32> to vector<1x1x64xf32>
    %130 = vector.broadcast %129 : vector<1x1x64xf32> to vector<14x14x64xf32>
    %131 = arith.mulf %127, %130 : vector<14x14x64xf32>
    %cst_105 = arith.constant dense<0.000000e+00> : vector<14x14xf32>
    %132 = vector.multi_reduction <add>, %131, %cst_105 [2] : vector<14x14x64xf32> to vector<14x14xf32>
    %133 = arith.addf %125, %132 : vector<14x14xf32>
    %c0_106 = arith.constant 0 : index
    %c2_107 = arith.constant 2 : index
    %c2_108 = arith.constant 2 : index
    %c0_109 = arith.constant 0 : index
    %134 = vector.load %arg1[%c0_106, %c2_107, %c2_108, %c0_109] : memref<1x16x16x64xf32, #tpu.memory_space<vmem>>, vector<1x14x14x64xf32>
    %135 = vector.shape_cast %134 : vector<1x14x14x64xf32> to vector<14x14x64xf32>
    %c15 = arith.constant 15 : index
    %c0_110 = arith.constant 0 : index
    %136 = vector.load %arg2[%c15, %c0_110] : memref<16x64xf32, #tpu.memory_space<vmem>>, vector<1x64xf32>
    %137 = vector.shape_cast %136 : vector<1x64xf32> to vector<1x1x64xf32>
    %138 = vector.broadcast %137 : vector<1x1x64xf32> to vector<14x14x64xf32>
    %139 = arith.mulf %135, %138 : vector<14x14x64xf32>
    %cst_111 = arith.constant dense<0.000000e+00> : vector<14x14xf32>
    %140 = vector.multi_reduction <add>, %139, %cst_111 [2] : vector<14x14x64xf32> to vector<14x14xf32>
    %141 = arith.addf %133, %140 : vector<14x14xf32>
    %c0_112 = arith.constant 0 : index
    %c1_113 = arith.constant 1 : index
    %c1_114 = arith.constant 1 : index
    %c0_115 = arith.constant 0 : index
    %c0_116 = arith.constant 0 : index
    %142 = vector.load %arg4[%c0_112, %c1_113, %c1_114, %c0_115, %c0_116] : memref<1x2x2x14x14xf32, #tpu.memory_space<vmem>>, vector<1x1x1x14x14xf32>
    %143 = vector.shape_cast %142 : vector<1x1x1x14x14xf32> to vector<14x14xf32>
    %144 = vector.shape_cast %141 : vector<14x14xf32> to vector<1x1x1x14x14xf32>
    tpu.vector_store %arg4[%c0_112, %c1_113, %c1_114, %c0_115, %c0_116], %144 {strides = array<i32>} : memref<1x2x2x14x14xf32, #tpu.memory_space<vmem>>, vector<1x1x1x14x14xf32>,
    return
  }
  func.func @transform_0(%arg0: i32) -> (i32, i32, i32, i32) {
    %c0_i32 = arith.constant 0 : i32
    %c0_i32_0 = arith.constant 0 : i32
    %c0_i32_1 = arith.constant 0 : i32
    %c0_i32_2 = arith.constant 0 : i32
    return %arg0, %c0_i32, %c0_i32_0, %c0_i32_1 : i32, i32, i32, i32
  }
  func.func @transform_1(%arg0: i32) -> (i32, i32) {
    %c0_i32 = arith.constant 0 : i32
    %c0_i32_0 = arith.constant 0 : i32
    %c0_i32_1 = arith.constant 0 : i32
    return %c0_i32, %c0_i32_0 : i32, i32
  }
  func.func @transform_2(%arg0: i32) -> (i32, i32) {
    %c0_i32 = arith.constant 0 : i32
    %c0_i32_0 = arith.constant 0 : i32
    %c0_i32_1 = arith.constant 0 : i32
    return %c0_i32, %c0_i32_0 : i32, i32
  }
  func.func @transform_3(%arg0: i32) -> (i32, i32, i32, i32, i32) {
    %c0_i32 = arith.constant 0 : i32
    %c0_i32_0 = arith.constant 0 : i32
    %c0_i32_1 = arith.constant 0 : i32
    %c0_i32_2 = arith.constant 0 : i32
    %c0_i32_3 = arith.constant 0 : i32
    return %arg0, %c0_i32, %c0_i32_0, %c0_i32_1, %c0_i32_2 : i32, i32, i32, i32, i32
  }
}

</mosaic_0001>

<bundles_post_ra>
// kernel: gnet_forward.2
= control target key start
LH: loop header
LB: loop body
LE: loop exit
PB: predicated region body
PF: predicated region fallthrough
CT: control target
= control target key end

     0   :  { %8 = vsyncpa [#allocation3], 0  ;;  %s4384_s0 = inlined_call_operand.vmem [shape: bf16[2,64], index: 0, kind: input, shape index: {}]   ;;  %s4385_s1 = inlined_call_operand.hbm [shape: bf16[64,12544], index: 1, kind: input, shape index: {}]   ;;  %s4386_s2 = inlined_call_operand.hbm [shape: f32[1,12544], index: 2, kind: input, shape index: {}]   ;;  %s4387_s3 = inlined_call_operand.vmem [shape: f32[2,12544], index: 3, kind: output, shape index: {}]  }
   0x1   :  { %10 = vsyncpa [#allocation3 + $0x1], 0 }
   0x2   :  { %11 = vsyncpa [#allocation5], 0 }
   0x3   :  { %13 = vsyncpa [#allocation5 + $0x1], 0  ;;  %s3676_s12 = smov 0   ;;  %s3678_s13 = smov 0  }
   0x4   :  { %s3680_s14 = smov 0   ;;  %s3682_s15 = smov 0  }
   0x5 LB: > { %s2461_s16 = sadd.s32 4294967295, %s3651_s15   ;;  %s3696_s17 = sadd.s32 1, %s3651_s15   ;;  %s3651_s15 = sphi %s3682_s15, %s4394_s15   ;;  %s3647_s14 = sphi %s3680_s14, %s4393_s14   ;;  %s3643_s13 = sphi %s3678_s13, %s4392_s13   ;;  %s3639_s12 = sphi %s3676_s12, %s4391_s12  }
   0x6   : > { %s44_s18 = ssub.s32 %s3651_s15, %s3696_s17  ;;  %s47_s19 = sadd.s32 1, %s3647_s14 }
   0x7   : > { %p45_p0 = scmp.eq.s32.totalorder %s44_s18, 0  ;;  %p54_p1 = scmp.ne.s32.totalorder %s3647_s14, %s3643_s13 }
   0x8   : > { %p55_p2 = scmp.eq.s32.totalorder %s3651_s15, 0  ;;  %p60_p3 = scmp.ne.s32.totalorder %s3643_s13, %s3639_s12 }
   0x9   : > { %s3706_s20 = scalar_select %p45_p0, %s3647_s14, %s47_s19  }
   0xa   : > { %p56_p4 = por %p55_p2, %p54_p1  ;;  %p61_p5 = scmp.eq.s32.totalorder %s2461_s16, 0 }
   0xb   : > { %p3515_p6 = scmp.lt.s32.totalorder %s3651_s15, 2  ;;  %s3716_s22 = sand.u32 1, %s3647_s14  }
   0xc   : > { %p3711_p7 = por %p61_p5, %p60_p3  ;;  %s3500_s23 = smul.u32 1568, %s3716_s22 }
   0xd   : > { %s3303_s24 = smul.u32 196, %s3651_s15  ;;  %p3720_p8 = pnand %p3515_p6, %p56_p4 }
   0xe   : > { %s143_s29 = scalar_lea.vmem [#allocation2], %s3500_s23  ;;  %s140_s5 = scalar_lea.sflag [#allocation3], %s3716_s22 }
   0xf   : > { %s148_s28 = scalar_lea.hbm %s4385_s1, %s3303_s24  ;;  %s151_s30 = sshll.u32 %s143_s29, 4  ;;  %s152_s30 = int_to_ptr.vmem [resolvable:$true] %s151_s30 }
  0x10   : > { %s149_s4 = sshll.u32 %s148_s28, 4  ;;  %p3557_p10 = pneg %p3720_p8  ;;  %s150_s4 = int_to_ptr.hbm [resolvable:$true] %s149_s4 }
  0x11   : > { %s3553_s6 = sshra.s32 %s150_s4, 4  ;;  %s3560_s10 = scalar_lea.hbm %s4385_s1, 3136  ;;  %s3554_s6 = int_to_ptr.hbm [resolvable:$true] %s3553_s6 }
  0x12   : > { %s3555_s7 = scalar_lea.hbm %s3554_s6, 1568  ;;  %p3561_p13 = scmp.lt.s32.totalorder %s3554_s6, %s4385_s1 }
  0x13   : > { %p3556_p9 = scmp.ne.s32.totalorder %s3554_s6, %s3555_s7  ;;  %p3562_p0 = scmp.lt.s32.totalorder %s3560_s10, %s3555_s7 }
  0x15   : > { %p3558_p11 = pnand %p3557_p10, %p3556_p9  ;;  %p3563_p1 = por %p3562_p0, %p3561_p13 }
  0x17   : > { %p3559_p12 = pneg %p3558_p11 }
  0x19   : > { %p3564_p2 = pnand %p3563_p1, %p3559_p12 }
  0x1b   : > { %3567 = shalt.err (!%p3564_p2)
}
  0x1c   : > { %s3653_s18 = smov 6272   ;;  %s3654_s19 = smov 3136  }
  0x1d   : > { %s3655_s23 = smov 196   ;;  %p2466_p3 = scmp.ge.s32.totalorder %s3651_s15, 1 }
  0x1e   : > { %3511 = dma.hbm_to_vmem [thread:$0]  (!%p3720_p8), %s150_s4, 25088, %s152_s30, %s140_s5, %s3653_s18, %s3654_s19, %s3655_s23  }
  0x1f   : > { %p178_p4 = scmp.lt.s32.totalorder %s3651_s15, 3  ;;  %s3501_s24 = smul.u32 49, %s3716_s22 }
  0x20   : > { %s166_s27 = smul.u32 49, %s3651_s15  ;;  %s162_s10 = scalar_lea.sflag [#allocation5], %s3716_s22 }
  0x21   : > { %p3744_p5 = pnand %p2466_p3, %p178_p4  ;;  %s165_s7 = scalar_lea.vmem [#allocation4], %s3501_s24 }
  0x22   : > { %s169_s6 = scalar_lea.hbm %s4386_s2, %s166_s27  ;;  %s173_s8 = sshll.u32 %s165_s7, 4  ;;  %s174_s8 = int_to_ptr.vmem [resolvable:$true] %s173_s8 }
  0x23   : > { %s171_s9 = sshll.u32 %s169_s6, 4  ;;  %s3590_s12 = scalar_lea.hbm %s4386_s2, 98  ;;  %s172_s9 = int_to_ptr.hbm [resolvable:$true] %s171_s9 }
  0x24   : > { %s3583_s30 = sshra.s32 %s172_s9, 4  ;;  %s3584_s30 = int_to_ptr.hbm [resolvable:$true] %s3583_s30 }
  0x25   : > { %s3585_s4 = scalar_lea.hbm %s3584_s30, 49  ;;  %p3591_p12 = scmp.lt.s32.totalorder %s3584_s30, %s4386_s2 }
  0x26   : > { %p3586_p6 = scmp.ne.s32.totalorder %s3584_s30, %s3585_s4  ;;  %p3592_p13 = scmp.lt.s32.totalorder %s3590_s12, %s3585_s4 }
  0x28   : > { %p3588_p9 = pnand %p3586_p6, %p3557_p10  ;;  %p3593_p0 = por %p3592_p13, %p3591_p12 }
  0x2a   : > { %p3589_p11 = pneg %p3588_p9 }
  0x2c   : > { %p3594_p1 = pnand %p3593_p0, %p3589_p11 }
  0x2e   : > { %3597 = shalt.err (!%p3594_p1)
}
  0x2f   : > { %3514 = dma.hbm_to_vmem [thread:$0]  (!%p3720_p8), %s172_s9, 784, %s174_s8, %s162_s10  }
  0x30   : > { %182 = sbr.rel (%p3744_p5) target bundleno = 402 (0x192), region = 32  ;;  %s184_s22 = sand.u32 (!%p3744_p5), 1, %s3643_s13  }
  0x31   : > { %s3502_s23 = smul.u32 (!%p3744_p5), 1568, %s184_s22  ;;  %s185_s24 = scalar_lea.sflag (!%p3744_p5), [#allocation3], %s184_s22 }
  0x33   : > { %s3767_s27 = scalar_lea.vmem (!%p3744_p5), [#allocation2], %s3502_s23 }
  0x35   : > { %3630 = dma.done.wait (%p3711_p7), %s185_s24, 25088  }
  0x36   : > { %3632 = vsyncadd (%p3711_p7), %s185_s24, 4294942208  ;;  %s3503_s28 = smul.u32 49, %s184_s22  ;;  %s195_s29 = scalar_lea.sflag [#allocation5], %s184_s22 }
  0x38   : > { %s3773_s25 = scalar_lea.vmem [#allocation4], %s3503_s28 }
  0x39   : > { %3634 = dma.done.wait (%p3711_p7), %s195_s29, 784  }
  0x3a   : > { %3636 = vsyncadd (%p3711_p7), %s195_s29, 4294966512  ;;  %v3058_v0 = vld [vmem:[%s3767_s27 + $0x498] sm:$0xf]  ;;  %v3475_v1 = vld [vmem:[%s3767_s27 + $0x558] sm:$0xf0]  ;;  %vm1533_vm0 = vcmask 523264  }
  0x3b   : > { %v3451_v2 = vld [vmem:[%s3767_s27 + $0x49c] sm:$0xf]  ;;  %v3059_v3 = vor.u32 %v3475_v1, %v3058_v0  ;;  %v3060_v4 = vld [vmem:[%s3767_s27 + $0x55c] sm:$0xf0]  ;;  %v3476_v6 = vld [vmem:[%s3767_s27 + $0x560] sm:$0xf0] }
  0x3c   : > { %v3066_v5 = vld [vmem:[%s3767_s27 + $0x4a0] sm:$0xf]  ;;  %v3063_v7 = vor.u32 %v3451_v2, %v3060_v4  ;;  %v3452_v9 = vld [vmem:[%s3767_s27 + $0x4a4] sm:$0xf]  ;;  %v3068_v10 = vld [vmem:[%s3767_s27 + $0x564] sm:$0xf0] }
  0x3d   : > { %v3067_v8 = vor.u32 %v3476_v6, %v3066_v5  ;;  %v2862_v11 = vld [vmem:[%s3767_s27 + $0x310] sm:$0xf]  ;;  %1541 = vmatpush.bf16.msra.mxu0 %v3059_v3  ;;  %v3071_v12 = vor.u32 %v3452_v9, %v3068_v10  ;;  %v3426_v13 = vld [vmem:[%s3767_s27 + $0x3d0] sm:$0xf0]  ;;  %v2864_v15 = vld [vmem:[%s3767_s27 + $0x3d4] sm:$0xf0] }
  0x3e   : > { %v3402_v14 = vld [vmem:[%s3767_s27 + $0x314] sm:$0xf]  ;;  %1554 = vmatpush.bf16.msra.mxu1 %v3063_v7  ;;  %v2863_v16 = vor.u32 %v3426_v13, %v2862_v11  ;;  %v2870_v18 = vld [vmem:[%s3767_s27 + $0x318] sm:$0xf]  ;;  %v3427_v19 = vld [vmem:[%s3767_s27 + $0x3d8] sm:$0xf0] }
  0x3f   : > { %1567 = vmatpush.bf16.msra.mxu2 %v3067_v8  ;;  %v2867_v17 = vor.u32 %v3402_v14, %v2864_v15  ;;  %v3403_v20 = vld [vmem:[%s3767_s27 + $0x31c] sm:$0xf]  ;;  %1580 = vmatpush.bf16.msra.mxu3 %v3071_v12  ;;  %v2871_v21 = vor.u32 %v3427_v19, %v2870_v18  ;;  %v2872_v22 = vld [vmem:[%s3767_s27 + $0x3dc] sm:$0xf0]  ;;  %v2666_v23 = vld [vmem:[%s3767_s27 + $0x188] sm:$0xf] }
  0x40   : > { %v3377_v24 = vld [vmem:[%s3767_s27 + $0x248] sm:$0xf0]  ;;  %v2875_v25 = vor.u32 %v3403_v20, %v2872_v22  ;;  %v2668_v27 = vld [vmem:[%s3767_s27 + $0x24c] sm:$0xf0]  ;;  %v3378_v30 = vld [vmem:[%s3767_s27 + $0x250] sm:$0xf0] }
  0x41   : > { %v3353_v26 = vld [vmem:[%s3767_s27 + $0x18c] sm:$0xf]  ;;  %v2674_v28 = vld [vmem:[%s3767_s27 + $0x190] sm:$0xf]  ;;  %1542 = vmatpush.bf16.msra.mxu0 %v2863_v16  ;;  %v2667_v29 = vor.u32 %v3377_v24, %v2666_v23  ;;  %v3354_v31 = vld [vmem:[%s3767_s27 + $0x194] sm:$0xf] }
  0x42   : > { %v2676_v32 = vld [vmem:[%s3767_s27 + $0x254] sm:$0xf0]  ;;  %1555 = vmatpush.bf16.msra.mxu1 %v2867_v17  ;;  %v2671_v33 = vor.u32 %v3353_v26, %v2668_v27  ;;  %v2675_v34 = vor.u32 %v3378_v30, %v2674_v28  ;;  %v2470_v35 = vld [vmem:[%s3767_s27] sm:$0xf]  ;;  %v3328_v36 = vld [vmem:[%s3767_s27 + $0xc0] sm:$0xf0] }
  0x43   : > { %1568 = vmatpush.bf16.msra.mxu2 %v2871_v21  ;;  %v3304_v37 = vld [vmem:[%s3767_s27 + $0x4] sm:$0xf]  ;;  %1581 = vmatpush.bf16.msra.mxu3 %v2875_v25  ;;  %v2679_v38 = vor.u32 %v3354_v31, %v2676_v32  ;;  %v2472_v39 = vld [vmem:[%s3767_s27 + $0xc4] sm:$0xf0]  ;;  %v3329_v41 = vld [vmem:[%s3767_s27 + $0xc8] sm:$0xf0]  ;;  %v2471_v44 = vor.u32 %v3328_v36, %v2470_v35 }
  0x44   : > { %v2478_v40 = vld [vmem:[%s3767_s27 + $0x8] sm:$0xf]  ;;  %v3305_v42 = vld [vmem:[%s3767_s27 + $0xc] sm:$0xf]  ;;  %v2480_v43 = vld [vmem:[%s3767_s27 + $0xcc] sm:$0xf0]  ;;  %v2475_v48 = vor.u32 %v3304_v37, %v2472_v39 }
  0x45   : > { %1543 = vmatpush.bf16.msra.mxu0 %v2667_v29  ;;  %v3074_v45 = vld [vmem:[%s3767_s27 + $0x4a8] sm:$0xf]  ;;  %v3477_v46 = vld [vmem:[%s3767_s27 + $0x568] sm:$0xf0]  ;;  %v2479_v49 = vor.u32 %v3329_v41, %v2478_v40  ;;  %v3076_v50 = vld [vmem:[%s3767_s27 + $0x56c] sm:$0xf0]  ;;  %v2483_v51 = vor.u32 %v3305_v42, %v2480_v43 }
  0x46   : > { %v3453_v47 = vld [vmem:[%s3767_s27 + $0x4ac] sm:$0xf]  ;;  %1556 = vmatpush.bf16.msra.mxu1 %v2671_v33  ;;  %v3075_v52 = vor.u32 %v3477_v46, %v3074_v45  ;;  %v3082_v53 = vld [vmem:[%s3767_s27 + $0x4b0] sm:$0xf]  ;;  %v3478_v54 = vld [vmem:[%s3767_s27 + $0x570] sm:$0xf0] }
  0x47   : > { %1569 = vmatpush.bf16.msra.mxu2 %v2675_v34  ;;  %1582 = vmatpush.bf16.msra.mxu3 %v2679_v38  ;;  %v3454_v55 = vld [vmem:[%s3767_s27 + $0x4b4] sm:$0xf]  ;;  %v3079_v56 = vor.u32 %v3453_v47, %v3076_v50  ;;  %v3084_v57 = vld [vmem:[%s3767_s27 + $0x574] sm:$0xf0]  ;;  %v2878_v58 = vld [vmem:[%s3767_s27 + $0x320] sm:$0xf]  ;;  %v3083_v63 = vor.u32 %v3478_v54, %v3082_v53 }
  0x48   : > { %v3428_v59 = vld [vmem:[%s3767_s27 + $0x3e0] sm:$0xf0]  ;;  %v3824_v60 = vld [vmem:[%s4384_s0] sm:$0x1]  ;;  %v2880_v62 = vld [vmem:[%s3767_s27 + $0x3e4] sm:$0xf0]  ;;  %v3087_v0 = vor.u32 %v3454_v55, %v3084_v57 }
  0x49   : > { %1544 = vmatpush.bf16.msra.mxu0 %v2471_v44  ;;  %v3404_v61 = vld [vmem:[%s3767_s27 + $0x324] sm:$0xf]  ;;  %v2879_v1 = vor.u32 %v3428_v59, %v2878_v58  ;;  %v2886_v2 = vld [vmem:[%s3767_s27 + $0x328] sm:$0xf]  ;;  %v3429_v3 = vld [vmem:[%s3767_s27 + $0x3e8] sm:$0xf0] }
  0x4a   : > { %1557 = vmatpush.bf16.msra.mxu1 %v2475_v48  ;;  %v3405_v4 = vld [vmem:[%s3767_s27 + $0x32c] sm:$0xf]  ;;  %v2883_v5 = vor.u32 %v3404_v61, %v2880_v62  ;;  %v2888_v6 = vld [vmem:[%s3767_s27 + $0x3ec] sm:$0xf0]  ;;  %v2682_v7 = vld [vmem:[%s3767_s27 + $0x198] sm:$0xf]  ;;  %v2887_v11 = vor.u32 %v3429_v3, %v2886_v2 }
  0x4b   : > { %1570 = vmatpush.bf16.msra.mxu2 %v2479_v49  ;;  %1583 = vmatpush.bf16.msra.mxu3 %v2483_v51  ;;  %v3379_v8 = vld [vmem:[%s3767_s27 + $0x258] sm:$0xf0]  ;;  %v2684_v10 = vld [vmem:[%s3767_s27 + $0x25c] sm:$0xf0]  ;;  %v2891_v13 = vor.u32 %v3405_v4, %v2888_v6  ;;  %v3380_v15 = vld [vmem:[%s3767_s27 + $0x260] sm:$0xf0] }
  0x4c   : > { %3252 = vmatmul.msk.bf16.vlgmr.msra.gmra.mxu0 %vm1533_vm0, %v3824_v60  ;;  %v3355_v9 = vld [vmem:[%s3767_s27 + $0x19c] sm:$0xf]  ;;  %v2690_v12 = vld [vmem:[%s3767_s27 + $0x1a0] sm:$0xf]  ;;  %v2683_v14 = vor.u32 %v3379_v8, %v2682_v7  ;;  %v3356_v16 = vld [vmem:[%s3767_s27 + $0x1a4] sm:$0xf] }
  0x4d   : > { %1593 = vmatpush.bf16.msrb.mxu0 %v3075_v52  ;;  %3253 = vmatmul.msk.bf16.vlgmr.msra.gmra.mxu1 %vm1533_vm0, %v3824_v60  ;;  %v2692_v17 = vld [vmem:[%s3767_s27 + $0x264] sm:$0xf0]  ;;  %v2687_v18 = vor.u32 %v3355_v9, %v2684_v10  ;;  %v2486_v19 = vld [vmem:[%s3767_s27 + $0x10] sm:$0xf]  ;;  %v3330_v20 = vld [vmem:[%s3767_s27 + $0xd0] sm:$0xf0]  ;;  %v2691_v25 = vor.u32 %v3380_v15, %v2690_v12 }
  0x4e   : > { %1606 = vmatpush.bf16.msrb.mxu1 %v3079_v56  ;;  %3254 = vmatmul.msk.bf16.vlgmr.msra.gmra.mxu2 %vm1533_vm0, %v3824_v60  ;;  %v3306_v21 = vld [vmem:[%s3767_s27 + $0x14] sm:$0xf]  ;;  %v2488_v22 = vld [vmem:[%s3767_s27 + $0xd4] sm:$0xf0]  ;;  %v3479_v24 = vld [vmem:[%s3767_s27 + $0x578] sm:$0xf0]  ;;  %v2695_v28 = vor.u32 %v3356_v16, %v2692_v17  ;;  %v2487_v29 = vor.u32 %v3330_v20, %v2486_v19 }
  0x4f   : > { %3255 = vmatmul.msk.bf16.vlgmr.msra.gmra.mxu3 %vm1533_vm0, %v3824_v60  ;;  %1619 = vmatpush.bf16.msrb.mxu2 %v3083_v63  ;;  %v3090_v23 = vld [vmem:[%s3767_s27 + $0x4b8] sm:$0xf]  ;;  %v3455_v26 = vld [vmem:[%s3767_s27 + $0x4bc] sm:$0xf]  ;;  %v3092_v27 = vld [vmem:[%s3767_s27 + $0x57c] sm:$0xf0]  ;;  %v2491_v33 = vor.u32 %v3306_v21, %v2488_v22 }
  0x50   : > { %1632 = vmatpush.bf16.msrb.mxu3 %v3087_v0  ;;  %v2494_v30 = vld [vmem:[%s3767_s27 + $0x18] sm:$0xf]  ;;  %v3331_v31 = vld [vmem:[%s3767_s27 + $0xd8] sm:$0xf0]  ;;  %v2496_v34 = vld [vmem:[%s3767_s27 + $0xdc] sm:$0xf0]  ;;  %v3091_v35 = vor.u32 %v3479_v24, %v3090_v23  ;;  %v3095_v38 = vor.u32 %v3455_v26, %v3092_v27 }
  0x51   : > { %1594 = vmatpush.bf16.msrb.mxu0 %v2879_v1  ;;  %v3307_v32 = vld [vmem:[%s3767_s27 + $0x1c] sm:$0xf]  ;;  %v3098_v36 = vld [vmem:[%s3767_s27 + $0x4c0] sm:$0xf]  ;;  %v3480_v37 = vld [vmem:[%s3767_s27 + $0x580] sm:$0xf0]  ;;  %v2495_v41 = vor.u32 %v3331_v31, %v2494_v30 }
  0x52   : > { %1607 = vmatpush.bf16.msrb.mxu1 %v2883_v5  ;;  %v3456_v39 = vld [vmem:[%s3767_s27 + $0x4c4] sm:$0xf]  ;;  %v3100_v40 = vld [vmem:[%s3767_s27 + $0x584] sm:$0xf0]  ;;  %v2499_v42 = vor.u32 %v3307_v32, %v2496_v34  ;;  %v3099_v43 = vor.u32 %v3480_v37, %v3098_v36  ;;  %v2894_v44 = vld [vmem:[%s3767_s27 + $0x330] sm:$0xf] }
  0x53   : > { %1620 = vmatpush.bf16.msrb.mxu2 %v2887_v11  ;;  %v3430_v45 = vld [vmem:[%s3767_s27 + $0x3f0] sm:$0xf0]  ;;  %v3103_v47 = vor.u32 %v3456_v39, %v3100_v40  ;;  %v2896_v48 = vld [vmem:[%s3767_s27 + $0x3f4] sm:$0xf0]  ;;  %v3431_v50 = vld [vmem:[%s3767_s27 + $0x3f8] sm:$0xf0] }
  0x54   : > { %1633 = vmatpush.bf16.msrb.mxu3 %v2891_v13  ;;  %v3406_v46 = vld [vmem:[%s3767_s27 + $0x334] sm:$0xf]  ;;  %v2902_v49 = vld [vmem:[%s3767_s27 + $0x338] sm:$0xf]  ;;  %v3407_v51 = vld [vmem:[%s3767_s27 + $0x33c] sm:$0xf]  ;;  %v2895_v53 = vor.u32 %v3430_v45, %v2894_v44 }
  0x55   : > { %1595 = vmatpush.bf16.msrb.mxu0 %v2683_v14  ;;  %v2904_v52 = vld [vmem:[%s3767_s27 + $0x3fc] sm:$0xf0]  ;;  %v2899_v54 = vor.u32 %v3406_v46, %v2896_v48  ;;  %v2903_v55 = vor.u32 %v3431_v50, %v2902_v49  ;;  %v2698_v56 = vld [vmem:[%s3767_s27 + $0x1a8] sm:$0xf]  ;;  %v3381_v57 = vld [vmem:[%s3767_s27 + $0x268] sm:$0xf0] }
  0x56   : > { %1608 = vmatpush.bf16.msrb.mxu1 %v2687_v18  ;;  %v3357_v58 = vld [vmem:[%s3767_s27 + $0x1ac] sm:$0xf]  ;;  %v2907_v59 = vor.u32 %v3407_v51, %v2904_v52  ;;  %v2700_v61 = vld [vmem:[%s3767_s27 + $0x26c] sm:$0xf0]  ;;  %v3382_v63 = vld [vmem:[%s3767_s27 + $0x270] sm:$0xf0]  ;;  %v2699_v2 = vor.u32 %v3381_v57, %v2698_v56 }
  0x57   : > { %1621 = vmatpush.bf16.msrb.mxu2 %v2691_v25  ;;  %v2706_v62 = vld [vmem:[%s3767_s27 + $0x1b0] sm:$0xf]  ;;  %v3358_v0 = vld [vmem:[%s3767_s27 + $0x1b4] sm:$0xf]  ;;  %v2708_v1 = vld [vmem:[%s3767_s27 + $0x274] sm:$0xf0]  ;;  %v2703_v5 = vor.u32 %v3357_v58, %v2700_v61 }
  0x58   : > { %1634 = vmatpush.bf16.msrb.mxu3 %v2695_v28  ;;  %v2502_v3 = vld [vmem:[%s3767_s27 + $0x20] sm:$0xf]  ;;  %v3332_v4 = vld [vmem:[%s3767_s27 + $0xe0] sm:$0xf0]  ;;  %v2707_v6 = vor.u32 %v3382_v63, %v2706_v62  ;;  %v2504_v8 = vld [vmem:[%s3767_s27 + $0xe4] sm:$0xf0]  ;;  %v2711_v10 = vor.u32 %v3358_v0, %v2708_v1 }
  0x59   : > { %1596 = vmatpush.bf16.msrb.mxu0 %v2487_v29  ;;  %v3308_v7 = vld [vmem:[%s3767_s27 + $0x24] sm:$0xf]  ;;  %v2510_v9 = vld [vmem:[%s3767_s27 + $0x28] sm:$0xf]  ;;  %v3333_v11 = vld [vmem:[%s3767_s27 + $0xe8] sm:$0xf0]  ;;  %v2503_v17 = vor.u32 %v3332_v4, %v2502_v3 }
  0x5a   : > { %1609 = vmatpush.bf16.msrb.mxu1 %v2491_v33  ;;  %v3309_v12 = vld [vmem:[%s3767_s27 + $0x2c] sm:$0xf]  ;;  %v2512_v13 = vld [vmem:[%s3767_s27 + $0xec] sm:$0xf0]  ;;  %v3106_v14 = vld [vmem:[%s3767_s27 + $0x4c8] sm:$0xf]  ;;  %v2507_v21 = vor.u32 %v3308_v7, %v2504_v8  ;;  %v2511_v22 = vor.u32 %v3333_v11, %v2510_v9 }
  0x5b   : > { %1622 = vmatpush.bf16.msrb.mxu2 %v2495_v41  ;;  %v3481_v15 = vld [vmem:[%s3767_s27 + $0x588] sm:$0xf0]  ;;  %v3108_v18 = vld [vmem:[%s3767_s27 + $0x58c] sm:$0xf0]  ;;  %v3482_v20 = vld [vmem:[%s3767_s27 + $0x590] sm:$0xf0]  ;;  %v2515_v25 = vor.u32 %v3309_v12, %v2512_v13 }
  0x5c   : > { %1635 = vmatpush.bf16.msrb.mxu3 %v2499_v42  ;;  %3256 = vmatmul.msk.bf16.vlgmr.msrb.gmra.mxu0 %vm1533_vm0, %v3824_v60  ;;  %v3457_v16 = vld [vmem:[%s3767_s27 + $0x4cc] sm:$0xf]  ;;  %v3114_v19 = vld [vmem:[%s3767_s27 + $0x4d0] sm:$0xf]  ;;  %v3458_v23 = vld [vmem:[%s3767_s27 + $0x4d4] sm:$0xf]  ;;  %v3107_v26 = vor.u32 %v3481_v15, %v3106_v14 }
  0x5d   : > { %1645 = vmatpush.bf16.msra.mxu0 %v3091_v35  ;;  %3257 = vmatmul.msk.bf16.vlgmr.msrb.gmra.mxu1 %vm1533_vm0, %v3824_v60  ;;  %v3116_v24 = vld [vmem:[%s3767_s27 + $0x594] sm:$0xf0]  ;;  %v3111_v27 = vor.u32 %v3457_v16, %v3108_v18  ;;  %v3115_v28 = vor.u32 %v3482_v20, %v3114_v19  ;;  %v2910_v30 = vld [vmem:[%s3767_s27 + $0x340] sm:$0xf]  ;;  %v3432_v31 = vld [vmem:[%s3767_s27 + $0x400] sm:$0xf0] }
  0x5e   : > { %1658 = vmatpush.bf16.msra.mxu1 %v3095_v38  ;;  %3258 = vmatmul.msk.bf16.vlgmr.msrb.gmra.mxu2 %vm1533_vm0, %v3824_v60  ;;  %v3119_v29 = vor.u32 %v3458_v23, %v3116_v24  ;;  %v3408_v32 = vld [vmem:[%s3767_s27 + $0x344] sm:$0xf]  ;;  %v2912_v33 = vld [vmem:[%s3767_s27 + $0x404] sm:$0xf0]  ;;  %v3433_v35 = vld [vmem:[%s3767_s27 + $0x408] sm:$0xf0]  ;;  %v2911_v38 = vor.u32 %v3432_v31, %v2910_v30 }
  0x5f   : > { %1671 = vmatpush.bf16.msra.mxu2 %v3099_v43  ;;  %3259 = vmatmul.msk.bf16.vlgmr.msrb.gmra.mxu3 %vm1533_vm0, %v3824_v60  ;;  %v2918_v34 = vld [vmem:[%s3767_s27 + $0x348] sm:$0xf]  ;;  %v3409_v36 = vld [vmem:[%s3767_s27 + $0x34c] sm:$0xf]  ;;  %v2920_v37 = vld [vmem:[%s3767_s27 + $0x40c] sm:$0xf0]  ;;  %v2915_v39 = vor.u32 %v3408_v32, %v2912_v33 }
  0x60   : > { %1684 = vmatpush.bf16.msra.mxu3 %v3103_v47  ;;  %v2919_v40 = vor.u32 %v3433_v35, %v2918_v34  ;;  %v2714_v41 = vld [vmem:[%s3767_s27 + $0x1b8] sm:$0xf]  ;;  %v3383_v42 = vld [vmem:[%s3767_s27 + $0x278] sm:$0xf0]  ;;  %v2923_v44 = vor.u32 %v3409_v36, %v2920_v37  ;;  %v2716_v45 = vld [vmem:[%s3767_s27 + $0x27c] sm:$0xf0] }
  0x61   : > { %1646 = vmatpush.bf16.msra.mxu0 %v2895_v53  ;;  %v3359_v43 = vld [vmem:[%s3767_s27 + $0x1bc] sm:$0xf]  ;;  %v2722_v46 = vld [vmem:[%s3767_s27 + $0x1c0] sm:$0xf]  ;;  %v3384_v47 = vld [vmem:[%s3767_s27 + $0x280] sm:$0xf0]  ;;  %v2715_v50 = vor.u32 %v3383_v42, %v2714_v41 }
  0x62   : > { %1659 = vmatpush.bf16.msra.mxu1 %v2899_v54  ;;  %v3360_v48 = vld [vmem:[%s3767_s27 + $0x1c4] sm:$0xf]  ;;  %v2724_v49 = vld [vmem:[%s3767_s27 + $0x284] sm:$0xf0]  ;;  %v2518_v51 = vld [vmem:[%s3767_s27 + $0x30] sm:$0xf]  ;;  %v2719_v53 = vor.u32 %v3359_v43, %v2716_v45  ;;  %v2723_v54 = vor.u32 %v3384_v47, %v2722_v46 }
  0x63   : > { %1672 = vmatpush.bf16.msra.mxu2 %v2903_v55  ;;  %v3334_v52 = vld [vmem:[%s3767_s27 + $0xf0] sm:$0xf0]  ;;  %v2520_v56 = vld [vmem:[%s3767_s27 + $0xf4] sm:$0xf0]  ;;  %v2727_v58 = vor.u32 %v3360_v48, %v2724_v49  ;;  %v3311_v61 = vld [vmem:[%s3767_s27 + $0x3c] sm:$0xf] }
  0x64   : > { %1685 = vmatpush.bf16.msra.mxu3 %v2907_v59  ;;  %v3310_v55 = vld [vmem:[%s3767_s27 + $0x34] sm:$0xf]  ;;  %v2526_v57 = vld [vmem:[%s3767_s27 + $0x38] sm:$0xf]  ;;  %v3335_v59 = vld [vmem:[%s3767_s27 + $0xf8] sm:$0xf0] }
  0x65   : > { %1647 = vmatpush.bf16.msra.mxu0 %v2699_v2  ;;  %v2528_v62 = vld [vmem:[%s3767_s27 + $0xfc] sm:$0xf0]  ;;  %v3122_v63 = vld [vmem:[%s3767_s27 + $0x4d8] sm:$0xf]  ;;  %v3483_v0 = vld [vmem:[%s3767_s27 + $0x598] sm:$0xf0]  ;;  %v2519_v2 = vor.u32 %v3334_v52, %v2518_v51  ;;  %v2527_v7 = vor.u32 %v3335_v59, %v2526_v57 }
  0x66   : > { %1660 = vmatpush.bf16.msra.mxu1 %v2703_v5  ;;  %v3459_v1 = vld [vmem:[%s3767_s27 + $0x4dc] sm:$0xf]  ;;  %v3124_v3 = vld [vmem:[%s3767_s27 + $0x59c] sm:$0xf0]  ;;  %v3484_v5 = vld [vmem:[%s3767_s27 + $0x5a0] sm:$0xf0]  ;;  %v3123_v11 = vor.u32 %v3483_v0, %v3122_v63 }
  0x67   : > { %1673 = vmatpush.bf16.msra.mxu2 %v2707_v6  ;;  %v3130_v4 = vld [vmem:[%s3767_s27 + $0x4e0] sm:$0xf]  ;;  %v2523_v6 = vor.u32 %v3310_v55, %v2520_v56  ;;  %v3460_v8 = vld [vmem:[%s3767_s27 + $0x4e4] sm:$0xf]  ;;  %v3132_v9 = vld [vmem:[%s3767_s27 + $0x5a4] sm:$0xf0]  ;;  %v3127_v12 = vor.u32 %v3459_v1, %v3124_v3 }
  0x68   : > { %1686 = vmatpush.bf16.msra.mxu3 %v2711_v10  ;;  %v2531_v10 = vor.u32 %v3311_v61, %v2528_v62  ;;  %v3131_v13 = vor.u32 %v3484_v5, %v3130_v4  ;;  %v3135_v14 = vor.u32 %v3460_v8, %v3132_v9  ;;  %v2926_v15 = vld [vmem:[%s3767_s27 + $0x350] sm:$0xf]  ;;  %v3434_v16 = vld [vmem:[%s3767_s27 + $0x410] sm:$0xf0]  ;;  %v2928_v18 = vld [vmem:[%s3767_s27 + $0x414] sm:$0xf0] }
  0x69   : > { %1648 = vmatpush.bf16.msra.mxu0 %v2503_v17  ;;  %v3410_v17 = vld [vmem:[%s3767_s27 + $0x354] sm:$0xf]  ;;  %v2934_v19 = vld [vmem:[%s3767_s27 + $0x358] sm:$0xf]  ;;  %v3435_v20 = vld [vmem:[%s3767_s27 + $0x418] sm:$0xf0]  ;;  %v2927_v23 = vor.u32 %v3434_v16, %v2926_v15 }
  0x6a   : > { %1661 = vmatpush.bf16.msra.mxu1 %v2507_v21  ;;  %v3411_v21 = vld [vmem:[%s3767_s27 + $0x35c] sm:$0xf]  ;;  %v2931_v24 = vor.u32 %v3410_v17, %v2928_v18  ;;  %v2732_v30 = vld [vmem:[%s3767_s27 + $0x28c] sm:$0xf0]  ;;  %v3386_v32 = vld [vmem:[%s3767_s27 + $0x290] sm:$0xf0] }
  0x6b   : > { %1674 = vmatpush.bf16.msra.mxu2 %v2511_v22  ;;  %v2936_v22 = vld [vmem:[%s3767_s27 + $0x41c] sm:$0xf0]  ;;  %v2738_v31 = vld [vmem:[%s3767_s27 + $0x1d0] sm:$0xf]  ;;  %v3362_v33 = vld [vmem:[%s3767_s27 + $0x1d4] sm:$0xf] }
  0x6c   : > { %1687 = vmatpush.bf16.msra.mxu3 %v2515_v25  ;;  %3260 = vmatmul.msk.bf16.vlgmr.msra.gmra.mxu0 %vm1533_vm0, %v3824_v60  ;;  %v2935_v25 = vor.u32 %v3435_v20, %v2934_v19  ;;  %v2740_v34 = vld [vmem:[%s3767_s27 + $0x294] sm:$0xf0]  ;;  %v2534_v36 = vld [vmem:[%s3767_s27 + $0x40] sm:$0xf]  ;;  %v3336_v37 = vld [vmem:[%s3767_s27 + $0x100] sm:$0xf0] }
  0x6d   : > { %1697 = vmatpush.bf16.msrb.mxu0 %v3107_v26  ;;  %3261 = vmatmul.msk.bf16.vlgmr.msra.gmra.mxu1 %vm1533_vm0, %v3824_v60  ;;  %v2730_v26 = vld [vmem:[%s3767_s27 + $0x1c8] sm:$0xf]  ;;  %v2743_v43 = vor.u32 %v3362_v33, %v2740_v34  ;;  %v3313_v45 = vld [vmem:[%s3767_s27 + $0x4c] sm:$0xf]  ;;  %v2544_v46 = vld [vmem:[%s3767_s27 + $0x10c] sm:$0xf0] }
  0x6e   : > { %1710 = vmatpush.bf16.msrb.mxu1 %v3111_v27  ;;  %3262 = vmatmul.msk.bf16.vlgmr.msra.gmra.mxu2 %vm1533_vm0, %v3824_v60  ;;  %v3385_v27 = vld [vmem:[%s3767_s27 + $0x288] sm:$0xf0]  ;;  %v2536_v41 = vld [vmem:[%s3767_s27 + $0x104] sm:$0xf0]  ;;  %v3140_v51 = vld [vmem:[%s3767_s27 + $0x5ac] sm:$0xf0] }
  0x6f   : > { %1723 = vmatpush.bf16.msrb.mxu2 %v3115_v28  ;;  %3263 = vmatmul.msk.bf16.vlgmr.msra.gmra.mxu3 %vm1533_vm0, %v3824_v60  ;;  %v3361_v28 = vld [vmem:[%s3767_s27 + $0x1cc] sm:$0xf]  ;;  %v2731_v35 = vor.u32 %v3385_v27, %v2730_v26  ;;  %v2542_v42 = vld [vmem:[%s3767_s27 + $0x48] sm:$0xf]  ;;  %v3146_v52 = vld [vmem:[%s3767_s27 + $0x4f0] sm:$0xf] }
  0x70   : > { %1736 = vmatpush.bf16.msrb.mxu3 %v3119_v29  ;;  %v2939_v29 = vor.u32 %v3411_v21, %v2936_v22  ;;  %v3138_v47 = vld [vmem:[%s3767_s27 + $0x4e8] sm:$0xf]  ;;  %v3485_v48 = vld [vmem:[%s3767_s27 + $0x5a8] sm:$0xf0]  ;;  %v3462_v56 = vld [vmem:[%s3767_s27 + $0x4f4] sm:$0xf] }
  0x71   : > { %1698 = vmatpush.bf16.msrb.mxu0 %v2911_v38  ;;  %v2735_v38 = vor.u32 %v3361_v28, %v2732_v30  ;;  %v3461_v49 = vld [vmem:[%s3767_s27 + $0x4ec] sm:$0xf]  ;;  %v3148_v57 = vld [vmem:[%s3767_s27 + $0x5b4] sm:$0xf0]  ;;  %v3139_v59 = vor.u32 %v3485_v48, %v3138_v47  ;;  %v2942_v0 = vld [vmem:[%s3767_s27 + $0x360] sm:$0xf] }
  0x72   : > { %1711 = vmatpush.bf16.msrb.mxu1 %v2915_v39  ;;  %v2739_v39 = vor.u32 %v3386_v32, %v2738_v31  ;;  %v3143_v61 = vor.u32 %v3461_v49, %v3140_v51  ;;  %v3151_v63 = vor.u32 %v3462_v56, %v3148_v57  ;;  %v3436_v1 = vld [vmem:[%s3767_s27 + $0x420] sm:$0xf0]  ;;  %v2944_v3 = vld [vmem:[%s3767_s27 + $0x424] sm:$0xf0]  ;;  %v3437_v5 = vld [vmem:[%s3767_s27 + $0x428] sm:$0xf0] }
  0x73   : > { %1724 = vmatpush.bf16.msrb.mxu2 %v2919_v40  ;;  %v3312_v40 = vld [vmem:[%s3767_s27 + $0x44] sm:$0xf]  ;;  %v2950_v4 = vld [vmem:[%s3767_s27 + $0x368] sm:$0xf]  ;;  %v2943_v8 = vor.u32 %v3436_v1, %v2942_v0  ;;  %v2748_v15 = vld [vmem:[%s3767_s27 + $0x29c] sm:$0xf0] }
  0x74   : > { %1737 = vmatpush.bf16.msrb.mxu3 %v2923_v44  ;;  %v3337_v44 = vld [vmem:[%s3767_s27 + $0x108] sm:$0xf0]  ;;  %v2754_v16 = vld [vmem:[%s3767_s27 + $0x1e0] sm:$0xf]  ;;  %v3388_v17 = vld [vmem:[%s3767_s27 + $0x2a0] sm:$0xf0] }
  0x75   : > { %1699 = vmatpush.bf16.msrb.mxu0 %v2715_v50  ;;  %v2535_v50 = vor.u32 %v3336_v37, %v2534_v36  ;;  %v2543_v55 = vor.u32 %v3337_v44, %v2542_v42  ;;  %v3364_v18 = vld [vmem:[%s3767_s27 + $0x1e4] sm:$0xf]  ;;  %v2756_v19 = vld [vmem:[%s3767_s27 + $0x2a4] sm:$0xf0]  ;;  %v2550_v21 = vld [vmem:[%s3767_s27 + $0x50] sm:$0xf] }
  0x76   : > { %1712 = vmatpush.bf16.msrb.mxu1 %v2719_v53  ;;  %v3486_v53 = vld [vmem:[%s3767_s27 + $0x5b0] sm:$0xf0]  ;;  %v2552_v26 = vld [vmem:[%s3767_s27 + $0x114] sm:$0xf0]  ;;  %v2759_v28 = vor.u32 %v3364_v18, %v2756_v19  ;;  %v3315_v30 = vld [vmem:[%s3767_s27 + $0x5c] sm:$0xf] }
  0x77   : > { %1725 = vmatpush.bf16.msrb.mxu2 %v2723_v54  ;;  %v2539_v54 = vor.u32 %v3312_v40, %v2536_v41  ;;  %v3147_v62 = vor.u32 %v3486_v53, %v3146_v52  ;;  %v3338_v22 = vld [vmem:[%s3767_s27 + $0x110] sm:$0xf0]  ;;  %v2558_v27 = vld [vmem:[%s3767_s27 + $0x58] sm:$0xf]  ;;  %v2560_v31 = vld [vmem:[%s3767_s27 + $0x11c] sm:$0xf0] }
  0x78   : > { %1738 = vmatpush.bf16.msrb.mxu3 %v2727_v58  ;;  %v2547_v58 = vor.u32 %v3313_v45, %v2544_v46  ;;  %v3154_v32 = vld [vmem:[%s3767_s27 + $0x4f8] sm:$0xf]  ;;  %v3487_v33 = vld [vmem:[%s3767_s27 + $0x5b8] sm:$0xf0]  ;;  %v3156_v36 = vld [vmem:[%s3767_s27 + $0x5bc] sm:$0xf0] }
  0x79   : > { %1700 = vmatpush.bf16.msrb.mxu0 %v2519_v2  ;;  %v3412_v2 = vld [vmem:[%s3767_s27 + $0x364] sm:$0xf]  ;;  %v3463_v34 = vld [vmem:[%s3767_s27 + $0x4fc] sm:$0xf]  ;;  %v3162_v37 = vld [vmem:[%s3767_s27 + $0x500] sm:$0xf]  ;;  %v3155_v44 = vor.u32 %v3487_v33, %v3154_v32 }
  0x7a   : > { %1713 = vmatpush.bf16.msrb.mxu1 %v2523_v6  ;;  %v3413_v6 = vld [vmem:[%s3767_s27 + $0x36c] sm:$0xf]  ;;  %v2947_v9 = vor.u32 %v3412_v2, %v2944_v3  ;;  %v3464_v41 = vld [vmem:[%s3767_s27 + $0x504] sm:$0xf]  ;;  %v3164_v42 = vld [vmem:[%s3767_s27 + $0x5c4] sm:$0xf0]  ;;  %v3159_v45 = vor.u32 %v3463_v34, %v3156_v36 }
  0x7b   : > { %1726 = vmatpush.bf16.msrb.mxu2 %v2527_v7  ;;  %v2952_v7 = vld [vmem:[%s3767_s27 + $0x42c] sm:$0xf0]  ;;  %v3167_v47 = vor.u32 %v3464_v41, %v3164_v42  ;;  %v3438_v49 = vld [vmem:[%s3767_s27 + $0x430] sm:$0xf0]  ;;  %v2960_v51 = vld [vmem:[%s3767_s27 + $0x434] sm:$0xf0] }
  0x7c   : > { %1739 = vmatpush.bf16.msrb.mxu3 %v2531_v10  ;;  %3264 = vmatmul.msk.bf16.vlgmr.msrb.gmra.mxu0 %vm1533_vm0, %v3824_v60  ;;  %v2951_v10 = vor.u32 %v3437_v5, %v2950_v4  ;;  %v2958_v48 = vld [vmem:[%s3767_s27 + $0x370] sm:$0xf]  ;;  %v2966_v52 = vld [vmem:[%s3767_s27 + $0x378] sm:$0xf]  ;;  %v3439_v53 = vld [vmem:[%s3767_s27 + $0x438] sm:$0xf0] }
  0x7d   : > { %1749 = vmatpush.bf16.msra.mxu0 %v3123_v11  ;;  %3265 = vmatmul.msk.bf16.vlgmr.msrb.gmra.mxu1 %vm1533_vm0, %v3824_v60  ;;  %v2746_v11 = vld [vmem:[%s3767_s27 + $0x1d8] sm:$0xf]  ;;  %v2959_v56 = vor.u32 %v3438_v49, %v2958_v48  ;;  %v2764_v0 = vld [vmem:[%s3767_s27 + $0x2ac] sm:$0xf0]  ;;  %v3390_v2 = vld [vmem:[%s3767_s27 + $0x2b0] sm:$0xf0] }
  0x7e   : > { %1762 = vmatpush.bf16.msra.mxu1 %v3127_v12  ;;  %3266 = vmatmul.msk.bf16.vlgmr.msrb.gmra.mxu2 %vm1533_vm0, %v3824_v60  ;;  %v3387_v12 = vld [vmem:[%s3767_s27 + $0x298] sm:$0xf0]  ;;  %v2770_v1 = vld [vmem:[%s3767_s27 + $0x1f0] sm:$0xf]  ;;  %v3366_v3 = vld [vmem:[%s3767_s27 + $0x1f4] sm:$0xf] }
  0x7f   : > { %1775 = vmatpush.bf16.msra.mxu2 %v3131_v13  ;;  %3267 = vmatmul.msk.bf16.vlgmr.msrb.gmra.mxu3 %vm1533_vm0, %v3824_v60  ;;  %v3363_v13 = vld [vmem:[%s3767_s27 + $0x1dc] sm:$0xf]  ;;  %v2747_v20 = vor.u32 %v3387_v12, %v2746_v11  ;;  %v2772_v4 = vld [vmem:[%s3767_s27 + $0x2b4] sm:$0xf0]  ;;  %v2568_v11 = vld [vmem:[%s3767_s27 + $0x124] sm:$0xf0] }
  0x80   : > { %1788 = vmatpush.bf16.msra.mxu3 %v3135_v14  ;;  %v2955_v14 = vor.u32 %v3413_v6, %v2952_v7  ;;  %v2566_v6 = vld [vmem:[%s3767_s27 + $0x60] sm:$0xf]  ;;  %v3340_v7 = vld [vmem:[%s3767_s27 + $0x120] sm:$0xf0]  ;;  %v2574_v12 = vld [vmem:[%s3767_s27 + $0x68] sm:$0xf] }
  0x81   : > { %1750 = vmatpush.bf16.msra.mxu0 %v2927_v23  ;;  %v2751_v23 = vor.u32 %v3363_v13, %v2748_v15  ;;  %v2775_v13 = vor.u32 %v3366_v3, %v2772_v4  ;;  %v3317_v15 = vld [vmem:[%s3767_s27 + $0x6c] sm:$0xf]  ;;  %v2974_v33 = vld [vmem:[%s3767_s27 + $0x380] sm:$0xf]  ;;  %v3440_v34 = vld [vmem:[%s3767_s27 + $0x440] sm:$0xf0] }
  0x82   : > { %1763 = vmatpush.bf16.msra.mxu1 %v2931_v24  ;;  %v2755_v24 = vor.u32 %v3388_v17, %v2754_v16  ;;  %v2576_v16 = vld [vmem:[%s3767_s27 + $0x12c] sm:$0xf0]  ;;  %v3170_v17 = vld [vmem:[%s3767_s27 + $0x508] sm:$0xf]  ;;  %v3489_v18 = vld [vmem:[%s3767_s27 + $0x5c8] sm:$0xf0]  ;;  %v2975_v41 = vor.u32 %v3440_v34, %v2974_v33 }
  0x83   : > { %1776 = vmatpush.bf16.msra.mxu2 %v2935_v25  ;;  %v3314_v25 = vld [vmem:[%s3767_s27 + $0x54] sm:$0xf]  ;;  %v3465_v19 = vld [vmem:[%s3767_s27 + $0x50c] sm:$0xf]  ;;  %v2976_v36 = vld [vmem:[%s3767_s27 + $0x444] sm:$0xf0] }
  0x84   : > { %1789 = vmatpush.bf16.msra.mxu3 %v2939_v29  ;;  %v3339_v29 = vld [vmem:[%s3767_s27 + $0x118] sm:$0xf0]  ;;  %v2780_v48 = vld [vmem:[%s3767_s27 + $0x2bc] sm:$0xf0]  ;;  %v2796_v33 = vld [vmem:[%s3767_s27 + $0x2cc] sm:$0xf0] }
  0x85   : > { %1751 = vmatpush.bf16.msra.mxu0 %v2731_v35  ;;  %v2551_v35 = vor.u32 %v3338_v22, %v2550_v21  ;;  %v2559_v40 = vor.u32 %v3339_v29, %v2558_v27  ;;  %v3172_v21 = vld [vmem:[%s3767_s27 + $0x5cc] sm:$0xf0]  ;;  %v3180_v27 = vld [vmem:[%s3767_s27 + $0x5d4] sm:$0xf0]  ;;  %v3171_v29 = vor.u32 %v3489_v18, %v3170_v17  ;;  %v2786_v49 = vld [vmem:[%s3767_s27 + $0x200] sm:$0xf] }
  0x86   : > { %1764 = vmatpush.bf16.msra.mxu1 %v2735_v38  ;;  %v3488_v38 = vld [vmem:[%s3767_s27 + $0x5c0] sm:$0xf0]  ;;  %v3178_v22 = vld [vmem:[%s3767_s27 + $0x510] sm:$0xf]  ;;  %v3491_v3 = vld [vmem:[%s3767_s27 + $0x5d8] sm:$0xf0] }
  0x87   : > { %1777 = vmatpush.bf16.msra.mxu2 %v2739_v39  ;;  %v2555_v39 = vor.u32 %v3314_v25, %v2552_v26  ;;  %v3163_v46 = vor.u32 %v3488_v38, %v3162_v37  ;;  %v3466_v26 = vld [vmem:[%s3767_s27 + $0x514] sm:$0xf]  ;;  %v2982_v37 = vld [vmem:[%s3767_s27 + $0x388] sm:$0xf]  ;;  %v3441_v38 = vld [vmem:[%s3767_s27 + $0x448] sm:$0xf0] }
  0x88   : > { %1790 = vmatpush.bf16.msra.mxu3 %v2743_v43  ;;  %v2563_v43 = vor.u32 %v3315_v30, %v2560_v31  ;;  %v3175_v30 = vor.u32 %v3465_v19, %v3172_v21  ;;  %v3183_v32 = vor.u32 %v3466_v26, %v3180_v27  ;;  %v3467_v4 = vld [vmem:[%s3767_s27 + $0x51c] sm:$0xf]  ;;  %v2990_v18 = vld [vmem:[%s3767_s27 + $0x390] sm:$0xf]  ;;  %v3442_v19 = vld [vmem:[%s3767_s27 + $0x450] sm:$0xf0] }
  0x89   : > { %1752 = vmatpush.bf16.msra.mxu0 %v2535_v50  ;;  %v3414_v50 = vld [vmem:[%s3767_s27 + $0x374] sm:$0xf]  ;;  %v2992_v21 = vld [vmem:[%s3767_s27 + $0x454] sm:$0xf0]  ;;  %v2991_v26 = vor.u32 %v3442_v19, %v2990_v18  ;;  %v2802_v34 = vld [vmem:[%s3767_s27 + $0x210] sm:$0xf] }
  0x8a   : > { %1765 = vmatpush.bf16.msra.mxu1 %v2539_v54  ;;  %v3415_v54 = vld [vmem:[%s3767_s27 + $0x37c] sm:$0xf]  ;;  %v2963_v57 = vor.u32 %v3414_v50, %v2960_v51  ;;  %v3392_v50 = vld [vmem:[%s3767_s27 + $0x2c0] sm:$0xf0]  ;;  %s4132_s6 = smul.u32 49, %s2461_s16  ;;  %vm2307_vm1 = vcmask 1041408  }
  0x8b   : > { %1778 = vmatpush.bf16.msra.mxu2 %v2543_v55  ;;  %v2968_v55 = vld [vmem:[%s3767_s27 + $0x43c] sm:$0xf0]  ;;  %v3368_v51 = vld [vmem:[%s3767_s27 + $0x204] sm:$0xf]  ;;  %v2810_v18 = vld [vmem:[%s3767_s27 + $0x218] sm:$0xf] }
  0x8c   : > { %1791 = vmatpush.bf16.msra.mxu3 %v2547_v58  ;;  %3268 = vmatmul.msk.bf16.vlgmr.msra.gmra.mxu0 %vm1533_vm0, %v3824_v60  ;;  %v2967_v58 = vor.u32 %v3439_v53, %v2966_v52  ;;  %v2788_v52 = vld [vmem:[%s3767_s27 + $0x2c4] sm:$0xf0]  ;;  %p230_p7 = scmp.lt.s32.totalorder %s4132_s6, 97  ;;  %v3395_v19 = vld [vmem:[%s3767_s27 + $0x2d8] sm:$0xf0]  ;;  %vm2309_vm2 = vcmask 1045508  }
  0x8d   : > { %1801 = vmatpush.bf16.msrb.mxu0 %v3139_v59  ;;  %3269 = vmatmul.msk.bf16.vlgmr.msra.gmra.mxu1 %vm1533_vm0, %v3824_v60  ;;  %v2762_v59 = vld [vmem:[%s3767_s27 + $0x1e8] sm:$0xf]  ;;  %vm2311_vm3 = vcmask 1043456  }
  0x8e   : > { %1814 = vmatpush.bf16.msrb.mxu1 %v3143_v61  ;;  %3270 = vmatmul.msk.bf16.vlgmr.msra.gmra.mxu2 %vm1533_vm0, %v3824_v60  ;;  %v3389_v61 = vld [vmem:[%s3767_s27 + $0x2a8] sm:$0xf0]  ;;  %s4396_s6 = smov (!%p230_p7, %s4132_s6), 97 }
  0x8f   : > { %1827 = vmatpush.bf16.msrb.mxu2 %v3147_v62  ;;  %3271 = vmatmul.msk.bf16.vlgmr.msra.gmra.mxu3 %vm1533_vm0, %v3824_v60  ;;  %v3365_v62 = vld [vmem:[%s3767_s27 + $0x1ec] sm:$0xf]  ;;  %v2763_v5 = vor.u32 %v3389_v61, %v2762_v59  ;;  %v2584_v59 = vld [vmem:[%s3767_s27 + $0x134] sm:$0xf0]  ;;  %s2467_s7 = sshll.u32 %s4396_s6, 1 }
  0x90   : > { %1840 = vmatpush.bf16.msrb.mxu3 %v3151_v63  ;;  %v2971_v63 = vor.u32 %v3415_v54, %v2968_v55  ;;  %v2582_v54 = vld [vmem:[%s3767_s27 + $0x70] sm:$0xf]  ;;  %v3342_v55 = vld [vmem:[%s3767_s27 + $0x130] sm:$0xf0]  ;;  %v2590_v61 = vld [vmem:[%s3767_s27 + $0x78] sm:$0xf]  ;;  %s4211_s10 = scalar_lea.vmem %s4387_s3, %s2467_s7 }
  0x91   : > { %1802 = vmatpush.bf16.msrb.mxu0 %v2943_v8  ;;  %v2767_v8 = vor.u32 %v3365_v62, %v2764_v0  ;;  %v2791_v62 = vor.u32 %v3368_v51, %v2788_v52  ;;  %v3319_v0 = vld [vmem:[%s3767_s27 + $0x7c] sm:$0xf]  ;;  %v3469_v51 = vld [vmem:[%s3767_s27 + $0x52c] sm:$0xf] }
  0x92   : > { %1815 = vmatpush.bf16.msrb.mxu1 %v2947_v9  ;;  %v2771_v9 = vor.u32 %v3390_v2, %v2770_v1  ;;  %v2592_v1 = vld [vmem:[%s3767_s27 + $0x13c] sm:$0xf0]  ;;  %v3186_v2 = vld [vmem:[%s3767_s27 + $0x518] sm:$0xf] }
  0x93   : > { %1828 = vmatpush.bf16.msrb.mxu2 %v2951_v10  ;;  %v3316_v10 = vld [vmem:[%s3767_s27 + $0x64] sm:$0xf] }
  0x94   : > { %1841 = vmatpush.bf16.msrb.mxu3 %v2955_v14  ;;  %v3341_v14 = vld [vmem:[%s3767_s27 + $0x128] sm:$0xf0] }
  0x95   : > { %1803 = vmatpush.bf16.msrb.mxu0 %v2747_v20  ;;  %v2567_v20 = vor.u32 %v3340_v7, %v2566_v6  ;;  %v2575_v25 = vor.u32 %v3341_v14, %v2574_v12  ;;  %v3188_v6 = vld [vmem:[%s3767_s27 + $0x5dc] sm:$0xf0]  ;;  %v3196_v12 = vld [vmem:[%s3767_s27 + $0x5e4] sm:$0xf0]  ;;  %v3187_v14 = vor.u32 %v3491_v3, %v3186_v2 }
  0x96   : > { %1816 = vmatpush.bf16.msrb.mxu1 %v2751_v23  ;;  %v3490_v23 = vld [vmem:[%s3767_s27 + $0x5d0] sm:$0xf0]  ;;  %v3194_v7 = vld [vmem:[%s3767_s27 + $0x520] sm:$0xf] }
  0x97   : > { %1829 = vmatpush.bf16.msrb.mxu2 %v2755_v24  ;;  %v2571_v24 = vor.u32 %v3316_v10, %v2568_v11  ;;  %v3179_v31 = vor.u32 %v3490_v23, %v3178_v22  ;;  %v3468_v11 = vld [vmem:[%s3767_s27 + $0x524] sm:$0xf]  ;;  %v2998_v22 = vld [vmem:[%s3767_s27 + $0x398] sm:$0xf]  ;;  %v3443_v23 = vld [vmem:[%s3767_s27 + $0x458] sm:$0xf0] }
  0x98   : > { %1842 = vmatpush.bf16.msrb.mxu3 %v2759_v28  ;;  %v2579_v28 = vor.u32 %v3317_v15, %v2576_v16  ;;  %v3191_v15 = vor.u32 %v3467_v4, %v3188_v6  ;;  %v3199_v17 = vor.u32 %v3468_v11, %v3196_v12  ;;  %v3006_v4 = vld [vmem:[%s3767_s27 + $0x3a0] sm:$0xf]  ;;  %v3420_v6 = vld [vmem:[%s3767_s27 + $0x3a4] sm:$0xf]  ;;  %v3421_v11 = vld [vmem:[%s3767_s27 + $0x3ac] sm:$0xf] }
  0x99   : > { %1804 = vmatpush.bf16.msrb.mxu0 %v2551_v35  ;;  %v3416_v35 = vld [vmem:[%s3767_s27 + $0x384] sm:$0xf]  ;;  %v3016_v12 = vld [vmem:[%s3767_s27 + $0x46c] sm:$0xf0] }
  0x9a   : > { %1817 = vmatpush.bf16.msrb.mxu1 %v2555_v39  ;;  %v3417_v39 = vld [vmem:[%s3767_s27 + $0x38c] sm:$0xf]  ;;  %v2979_v42 = vor.u32 %v3416_v35, %v2976_v36  ;;  %v3394_v35 = vld [vmem:[%s3767_s27 + $0x2d0] sm:$0xf0] }
  0x9b   : > { %1830 = vmatpush.bf16.msrb.mxu2 %v2559_v40  ;;  %v2984_v40 = vld [vmem:[%s3767_s27 + $0x44c] sm:$0xf0]  ;;  %v3370_v36 = vld [vmem:[%s3767_s27 + $0x214] sm:$0xf] }
  0x9c   : > { %1843 = vmatpush.bf16.msrb.mxu3 %v2563_v43  ;;  %3272 = vmatmul.msk.bf16.vlgmr.msrb.gmra.mxu0 %vm1533_vm0, %v3824_v60  ;;  %v2983_v43 = vor.u32 %v3441_v38, %v2982_v37  ;;  %v2804_v37 = vld [vmem:[%s3767_s27 + $0x2d4] sm:$0xf0] }
  0x9d   : > { %1853 = vmatpush.bf16.msra.mxu0 %v3155_v44  ;;  %3273 = vmatmul.msk.bf16.vlgmr.msrb.gmra.mxu1 %vm1533_vm0, %v3824_v60  ;;  %v2778_v44 = vld [vmem:[%s3767_s27 + $0x1f8] sm:$0xf] }
  0x9e   : > { %1866 = vmatpush.bf16.msra.mxu1 %v3159_v45  ;;  %3274 = vmatmul.msk.bf16.vlgmr.msrb.gmra.mxu2 %vm1533_vm0, %v3824_v60  ;;  %v3391_v45 = vld [vmem:[%s3767_s27 + $0x2b8] sm:$0xf0] }
  0x9f   : > { %1879 = vmatpush.bf16.msra.mxu2 %v3163_v46  ;;  %3275 = vmatmul.msk.bf16.vlgmr.msrb.gmra.mxu3 %vm1533_vm0, %v3824_v60  ;;  %v3367_v46 = vld [vmem:[%s3767_s27 + $0x1fc] sm:$0xf]  ;;  %v2779_v53 = vor.u32 %v3391_v45, %v2778_v44  ;;  %v2606_v44 = vld [vmem:[%s3767_s27 + $0x88] sm:$0xf]  ;;  %v2807_v45 = vor.u32 %v3370_v36, %v2804_v37  ;;  %v2616_v37 = vld [vmem:[%s3767_s27 + $0x154] sm:$0xf0] }
  0xa0   : > { %1892 = vmatpush.bf16.msra.mxu3 %v3167_v47  ;;  %v2987_v47 = vor.u32 %v3417_v39, %v2984_v40  ;;  %v2598_v39 = vld [vmem:[%s3767_s27 + $0x80] sm:$0xf]  ;;  %v3344_v40 = vld [vmem:[%s3767_s27 + $0x140] sm:$0xf0] }
  0xa1   : > { %1854 = vmatpush.bf16.msra.mxu0 %v2959_v56  ;;  %v2783_v56 = vor.u32 %v3367_v46, %v2780_v48  ;;  %v3345_v46 = vld [vmem:[%s3767_s27 + $0x148] sm:$0xf0]  ;;  %v2608_v48 = vld [vmem:[%s3767_s27 + $0x14c] sm:$0xf0]  ;;  %v2599_v52 = vor.u32 %v3344_v40, %v2598_v39  ;;  %v3347_v39 = vld [vmem:[%s3767_s27 + $0x158] sm:$0xf0] }
  0xa2   : > { %1867 = vmatpush.bf16.msra.mxu1 %v2963_v57  ;;  %v2787_v57 = vor.u32 %v3392_v50, %v2786_v49  ;;  %v3202_v49 = vld [vmem:[%s3767_s27 + $0x528] sm:$0xf]  ;;  %v3493_v50 = vld [vmem:[%s3767_s27 + $0x5e8] sm:$0xf0] }
  0xa3   : > { %1880 = vmatpush.bf16.msra.mxu2 %v2967_v58  ;;  %v3318_v58 = vld [vmem:[%s3767_s27 + $0x74] sm:$0xf] }
  0xa4   : > { %1893 = vmatpush.bf16.msra.mxu3 %v2971_v63  ;;  %v3343_v63 = vld [vmem:[%s3767_s27 + $0x138] sm:$0xf0] }
  0xa5   : > { %1855 = vmatpush.bf16.msra.mxu0 %v2763_v5  ;;  %v2583_v5 = vor.u32 %v3342_v55, %v2582_v54  ;;  %v2591_v10 = vor.u32 %v3343_v63, %v2590_v61  ;;  %v3210_v54 = vld [vmem:[%s3767_s27 + $0x530] sm:$0xf]  ;;  %v3494_v55 = vld [vmem:[%s3767_s27 + $0x5f0] sm:$0xf0]  ;;  %v3212_v61 = vld [vmem:[%s3767_s27 + $0x5f4] sm:$0xf0]  ;;  %v3203_v63 = vor.u32 %v3493_v50, %v3202_v49 }
  0xa6   : > { %1868 = vmatpush.bf16.msra.mxu1 %v2767_v8  ;;  %v3492_v8 = vld [vmem:[%s3767_s27 + $0x5e0] sm:$0xf0]  ;;  %v3471_v49 = vld [vmem:[%s3767_s27 + $0x53c] sm:$0xf] }
  0xa7   : > { %1881 = vmatpush.bf16.msra.mxu2 %v2771_v9  ;;  %v2587_v9 = vor.u32 %v3318_v58, %v2584_v59  ;;  %v3195_v16 = vor.u32 %v3492_v8, %v3194_v7  ;;  %v2607_v58 = vor.u32 %v3345_v46, %v2606_v44  ;;  %v3470_v59 = vld [vmem:[%s3767_s27 + $0x534] sm:$0xf]  ;;  %v3008_v7 = vld [vmem:[%s3767_s27 + $0x464] sm:$0xf0] }
  0xa8   : > { %1894 = vmatpush.bf16.msra.mxu3 %v2775_v13  ;;  %v2595_v13 = vor.u32 %v3319_v0, %v2592_v1  ;;  %v3211_v1 = vor.u32 %v3494_v55, %v3210_v54  ;;  %v3215_v3 = vor.u32 %v3470_v59, %v3212_v61  ;;  %v3014_v8 = vld [vmem:[%s3767_s27 + $0x3a8] sm:$0xf]  ;;  %v3220_v54 = vld [vmem:[%s3767_s27 + $0x5fc] sm:$0xf0] }
  0xa9   : > { %1856 = vmatpush.bf16.msra.mxu0 %v2567_v20  ;;  %v3418_v20 = vld [vmem:[%s3767_s27 + $0x394] sm:$0xf]  ;;  %v3226_v55 = vld [vmem:[%s3767_s27 + $0x540] sm:$0xf] }
  0xaa   : > { %1869 = vmatpush.bf16.msra.mxu1 %v2571_v24  ;;  %v3419_v24 = vld [vmem:[%s3767_s27 + $0x39c] sm:$0xf]  ;;  %v2995_v27 = vor.u32 %v3418_v20, %v2992_v21 }
  0xab   : > { %1882 = vmatpush.bf16.msra.mxu2 %v2575_v25  ;;  %v3000_v25 = vld [vmem:[%s3767_s27 + $0x45c] sm:$0xf0]  ;;  %v3371_v20 = vld [vmem:[%s3767_s27 + $0x21c] sm:$0xf] }
  0xac   : > { %1895 = vmatpush.bf16.msra.mxu3 %v2579_v28  ;;  %3276 = vmatmul.msk.bf16.vlgmr.msra.gmra.mxu0 %vm1533_vm0, %v3824_v60  ;;  %v2999_v28 = vor.u32 %v3443_v23, %v2998_v22  ;;  %v4173_v22 = vld [vmem:[%s4384_s0] sm:$0x1]  ;;  %v3019_v23 = vor.u32 %v3421_v11, %v3016_v12  ;;  %v3022_v11 = vld [vmem:[%s3767_s27 + $0x3b0] sm:$0xf]  ;;  %v3446_v12 = vld [vmem:[%s3767_s27 + $0x470] sm:$0xf0] }
  0xad   : > { %1905 = vmatpush.bf16.msrb.mxu0 %v3171_v29  ;;  %3277 = vmatmul.msk.bf16.vlgmr.msra.gmra.mxu1 %vm1533_vm0, %v3824_v60  ;;  %v2794_v29 = vld [vmem:[%s3767_s27 + $0x208] sm:$0xf] }
  0xae   : > { %1918 = vmatpush.bf16.msrb.mxu1 %v3175_v30  ;;  %3278 = vmatmul.msk.bf16.vlgmr.msra.gmra.mxu2 %vm1533_vm0, %v3824_v60  ;;  %v3393_v30 = vld [vmem:[%s3767_s27 + $0x2c8] sm:$0xf0] }
  0xaf   : > { %1931 = vmatpush.bf16.msrb.mxu2 %v3179_v31  ;;  %3279 = vmatmul.msk.bf16.vlgmr.msra.gmra.mxu3 %vm1533_vm0, %v3824_v60  ;;  %v3369_v31 = vld [vmem:[%s3767_s27 + $0x20c] sm:$0xf]  ;;  %v2795_v38 = vor.u32 %v3393_v30, %v2794_v29  ;;  %v3372_v29 = vld [vmem:[%s3767_s27 + $0x224] sm:$0xf]  ;;  %v2820_v30 = vld [vmem:[%s3767_s27 + $0x2e4] sm:$0xf0] }
  0xb0   : > { %1944 = vmatpush.bf16.msrb.mxu3 %v3183_v32  ;;  %v3003_v32 = vor.u32 %v3419_v24, %v3000_v25  ;;  %v2812_v24 = vld [vmem:[%s3767_s27 + $0x2dc] sm:$0xf0] }
  0xb1   : > { %1906 = vmatpush.bf16.msrb.mxu0 %v2975_v41  ;;  %v2799_v41 = vor.u32 %v3369_v31, %v2796_v33  ;;  %v2818_v25 = vld [vmem:[%s3767_s27 + $0x220] sm:$0xf]  ;;  %v2811_v31 = vor.u32 %v3395_v19, %v2810_v18  ;;  %v3346_v33 = vld [vmem:[%s3767_s27 + $0x150] sm:$0xf0]  ;;  %v3030_v18 = vld [vmem:[%s3767_s27 + $0x3b8] sm:$0xf] }
  0xb2   : > { %1919 = vmatpush.bf16.msrb.mxu1 %v2979_v42  ;;  %v2803_v42 = vor.u32 %v3394_v35, %v2802_v34  ;;  %v3322_v34 = vld [vmem:[%s3767_s27 + $0x94] sm:$0xf]  ;;  %v2815_v35 = vor.u32 %v3371_v20, %v2812_v24  ;;  %v3447_v19 = vld [vmem:[%s3767_s27 + $0x478] sm:$0xf0] }
  0xb3   : > { %1932 = vmatpush.bf16.msrb.mxu2 %v2983_v43  ;;  %v2600_v43 = vld [vmem:[%s3767_s27 + $0x144] sm:$0xf0]  ;;  %v2619_v59 = vor.u32 %v3322_v34, %v2616_v37  ;;  %v3423_v24 = vld [vmem:[%s3767_s27 + $0x3bc] sm:$0xf]  ;;  %v2834_v37 = vld [vmem:[%s3767_s27 + $0x230] sm:$0xf] }
  0xb4   : > { %1945 = vmatpush.bf16.msrb.mxu3 %v2987_v47  ;;  %v3321_v47 = vld [vmem:[%s3767_s27 + $0x8c] sm:$0xf] }
  0xb5   : > { %1907 = vmatpush.bf16.msrb.mxu0 %v2779_v53  ;;  %v3204_v53 = vld [vmem:[%s3767_s27 + $0x5ec] sm:$0xf0] }
  0xb6   : > { %1920 = vmatpush.bf16.msrb.mxu1 %v2783_v56  ;;  %v4147_v56 = vld [vmem:[%s3773_s25] sm:$0xff]  ;;  %v3207_v0 = vor.u32 %v3469_v51, %v3204_v53 }
  0xb7   : > { %1933 = vmatpush.bf16.msrb.mxu2 %v2787_v57  ;;  %v452_v2 = vperm.slane %v4147_v56, 1 }
  0xb8   : > { %1946 = vmatpush.bf16.msrb.mxu3 %v2791_v62  ;;  %v2611_v62 = vor.u32 %v3321_v47, %v2608_v48  ;;  %v3218_v47 = vld [vmem:[%s3767_s27 + $0x538] sm:$0xf]  ;;  %v3495_v48 = vld [vmem:[%s3767_s27 + $0x5f8] sm:$0xf0] }
  0xb9   : > { %1908 = vmatpush.bf16.msrb.mxu0 %v2583_v5  ;;  %v3444_v5 = vld [vmem:[%s3767_s27 + $0x460] sm:$0xf0] }
  0xba   : > { %1921 = vmatpush.bf16.msrb.mxu1 %v2587_v9  ;;  %v3445_v9 = vld [vmem:[%s3767_s27 + $0x468] sm:$0xf0] }
  0xbb   : > { %1934 = vmatpush.bf16.msrb.mxu2 %v2591_v10 }
  0xbc   : > { %1947 = vmatpush.bf16.msrb.mxu3 %v2595_v13  ;;  %3280 = vmatmul.msk.bf16.vlgmr.msrb.gmra.mxu0 %vm1533_vm0, %v3824_v60  ;;  %v451_v13 = vperm.slane %v4147_v56, 0 }
  0xbd   : > { %1957 = vmatpush.bf16.msra.mxu0 %v3187_v14  ;;  %3281 = vmatmul.msk.bf16.vlgmr.msrb.gmra.mxu1 %vm1533_vm0, %v3824_v60 }
  0xbe   : > { %1970 = vmatpush.bf16.msra.mxu1 %v3191_v15  ;;  %3282 = vmatmul.msk.bf16.vlgmr.msrb.gmra.mxu2 %vm1533_vm0, %v3824_v60  ;;  %v3007_v15 = vor.u32 %v3444_v5, %v3006_v4  ;;  %v3223_v5 = vor.u32 %v3471_v49, %v3220_v54  ;;  %v3349_v49 = vld [vmem:[%s3767_s27 + $0x168] sm:$0xf0]  ;;  %v2640_v54 = vld [vmem:[%s3767_s27 + $0x16c] sm:$0xf0] }
  0xbf   : > { %1983 = vmatpush.bf16.msra.mxu2 %v3195_v16  ;;  %3283 = vmatmul.msk.bf16.vlgmr.msrb.gmra.mxu3 %vm1533_vm0, %v3824_v60  ;;  %v3320_v60 = vld [vmem:[%s3767_s27 + $0x84] sm:$0xf]  ;;  %v3011_v16 = vor.u32 %v3420_v6, %v3008_v7 }
  0xc0   : > { %1996 = vmatpush.bf16.msra.mxu3 %v3199_v17  ;;  %v2603_v57 = vor.u32 %v3320_v60, %v2600_v43  ;;  %v3015_v17 = vor.u32 %v3445_v9, %v3014_v8  ;;  %v3323_v60 = vld [vmem:[%s3767_s27 + $0x9c] sm:$0xf]  ;;  %v2624_v43 = vld [vmem:[%s3767_s27 + $0x15c] sm:$0xf0]  ;;  %v456_v9 = vperm.slane %v4147_v56, 5 }
  0xc1   : > { %1958 = vmatpush.bf16.msra.mxu0 %v2991_v26  ;;  %v3396_v26 = vld [vmem:[%s3767_s27 + $0x2e0] sm:$0xf0] }
  0xc2   : > { %1971 = vmatpush.bf16.msra.mxu1 %v2995_v27  ;;  %v453_v27 = vperm.slane %v4147_v56, 2  ;;  %v2819_v36 = vor.u32 %v3396_v26, %v2818_v25  ;;  %v3032_v25 = vld [vmem:[%s3767_s27 + $0x47c] sm:$0xf0]  ;;  %v455_v26 = vperm.slane %v4147_v56, 4 }
  0xc3   : > { %1984 = vmatpush.bf16.msra.mxu2 %v2999_v28  ;;  %v454_v28 = vperm.slane %v4147_v56, 3 }
  0xc4   : > { %1997 = vmatpush.bf16.msra.mxu3 %v3003_v32  ;;  %v2614_v32 = vld [vmem:[%s3767_s27 + $0x90] sm:$0xf] }
  0xc5   : > { %1959 = vmatpush.bf16.msra.mxu0 %v2795_v38  ;;  %v2622_v38 = vld [vmem:[%s3767_s27 + $0x98] sm:$0xf]  ;;  %v2615_v53 = vor.u32 %v3346_v33, %v2614_v32  ;;  %v3397_v32 = vld [vmem:[%s3767_s27 + $0x2e8] sm:$0xf0] }
  0xc6   : > { %1972 = vmatpush.bf16.msra.mxu1 %v2799_v41  ;;  %v2623_v61 = vor.u32 %v3347_v39, %v2622_v38  ;;  %v3373_v33 = vld [vmem:[%s3767_s27 + $0x22c] sm:$0xf]  ;;  %v3398_v38 = vld [vmem:[%s3767_s27 + $0x2f0] sm:$0xf0]  ;;  %v457_v39 = vperm.slane %v4147_v56, 6 }
  0xc7   : > { %1985 = vmatpush.bf16.msra.mxu2 %v2803_v42  ;;  %v2823_v42 = vor.u32 %v3372_v29, %v2820_v30  ;;  %v3031_v30 = vor.u32 %v3447_v19, %v3030_v18 }
  0xc8   : > { %1998 = vmatpush.bf16.msra.mxu3 %v2807_v45 }
  0xc9   : > { %1960 = vmatpush.bf16.msra.mxu0 %v2599_v52  ;;  %v1546_v10 = vpop.f32.mrf.mxu0 }
  0xca   : > { %1973 = vmatpush.bf16.msra.mxu1 %v2603_v57  ;;  %v1559_v14 = vpop.f32.mrf.mxu1  ;;  %v1547_v50 = vadd.f32 %v1546_v10, %v451_v13  ;;  %v3496_v57 = vld [vmem:[%s3767_s27 + $0x600] sm:$0xf0]  ;;  %v3422_v13 = vld [vmem:[%s3767_s27 + $0x3b4] sm:$0xf] }
  0xcb   : > { %1986 = vmatpush.bf16.msra.mxu2 %v2607_v58  ;;  %v1560_v21 = vadd.f32 %v1559_v14, %v452_v2  ;;  %v2627_v2 = vor.u32 %v3323_v60, %v2624_v43  ;;  %v3227_v6 = vor.u32 %v3496_v57, %v3226_v55  ;;  %v2630_v43 = vld [vmem:[%s3767_s27 + $0xa0] sm:$0xf] }
  0xcc   : > { %1999 = vmatpush.bf16.msra.mxu3 %v2611_v62  ;;  %3284 = vmatmul.msk.bf16.vlgmr.msra.gmra.mxu0 %vm1533_vm0, %v4173_v22  ;;  %v3472_v62 = vld [vmem:[%s3767_s27 + $0x544] sm:$0xf]  ;;  %v2174_v7 = vmax.f32 %v1547_v50, 0.0 }
  0xcd   : > { %2009 = vmatpush.bf16.msrb.mxu0 %v3203_v63  ;;  %3285 = vmatmul.msk.bf16.vlgmr.msra.gmra.mxu1 %vm1533_vm0, %v4173_v22  ;;  %v2175_v40 = vmax.f32 %v1560_v21, 0.0  ;;  %v3228_v63 = vld [vmem:[%s3767_s27 + $0x604] sm:$0xf0] }
  0xce   : > { %2022 = vmatpush.bf16.msrb.mxu1 %v3207_v0  ;;  %3286 = vmatmul.msk.bf16.vlgmr.msra.gmra.mxu2 %vm1533_vm0, %v4173_v22  ;;  %v3231_v10 = vor.u32 %v3472_v62, %v3228_v63  ;;  %v3473_v62 = vld [vmem:[%s3767_s27 + $0x54c] sm:$0xf] }
  0xcf   : > { %2035 = vmatpush.bf16.msrb.mxu2 %v3211_v1  ;;  %3287 = vmatmul.msk.bf16.vlgmr.msra.gmra.mxu3 %vm1533_vm0, %v4173_v22  ;;  %v2271_v0 = vrot.slane %v2175_v40, 6  ;;  %v458_v40 = vperm.slane %v4147_v56, 7  ;;  %v2632_v56 = vld [vmem:[%s3767_s27 + $0x164] sm:$0xf0] }
  0xd0   : > { %2048 = vmatpush.bf16.msrb.mxu3 %v3215_v3  ;;  %v3219_v3 = vor.u32 %v3495_v48, %v3218_v47  ;;  %v2835_v47 = vor.u32 %v3398_v38, %v2834_v37  ;;  %v2638_v48 = vld [vmem:[%s3767_s27 + $0xa8] sm:$0xf]  ;;  %v3048_v37 = vld [vmem:[%s3767_s27 + $0x48c] sm:$0xf0] }
  0xd1   : > { %2010 = vmatpush.bf16.msrb.mxu0 %v3007_v15  ;;  %v1572_v41 = vpop.f32.mrf.mxu2  ;;  %v1548_v46 = vpop.f32.mrf.mxu0  ;;  %v2308_v14 = vsel %vm2307_vm1, %v2174_v7, %v2271_v0  ;;  %v4259_v7 = vld [vmem:[%s3773_s25 + $0x8] sm:$0xff] }
  0xd2   : > { %2023 = vmatpush.bf16.msrb.mxu1 %v3011_v16  ;;  %v1573_v44 = vadd.f32 %v1572_v41, %v453_v27  ;;  %v1585_v45 = vpop.f32.mrf.mxu3  ;;  %v1561_v52 = vpop.f32.mrf.mxu1  ;;  %v3374_v41 = vld [vmem:[%s3767_s27 + $0x234] sm:$0xf] }
  0xd3   : > { %2036 = vmatpush.bf16.msrb.mxu2 %v3015_v17  ;;  %v1586_v51 = vadd.f32 %v1585_v45, %v454_v28  ;;  %v3024_v17 = vld [vmem:[%s3767_s27 + $0x474] sm:$0xf0]  ;;  %v3023_v28 = vor.u32 %v3446_v12, %v3022_v11  ;;  %v3324_v45 = vld [vmem:[%s3767_s27 + $0xa4] sm:$0xf] }
  0xd4   : > { %2049 = vmatpush.bf16.msrb.mxu3 %v3019_v23  ;;  %v2176_v58 = vmax.f32 %v1573_v44, 0.0  ;;  %v3027_v29 = vor.u32 %v3422_v13, %v3024_v17  ;;  %v3348_v44 = vld [vmem:[%s3767_s27 + $0x160] sm:$0xf0]  ;;  %v3244_v11 = vld [vmem:[%s3767_s27 + $0x614] sm:$0xf0] }
  0xd5   : > { %2011 = vmatpush.bf16.msrb.mxu0 %v2811_v31  ;;  %v2177_v1 = vmax.f32 %v1586_v51, 0.0  ;;  %v2826_v31 = vld [vmem:[%s3767_s27 + $0x228] sm:$0xf] }
  0xd6   : > { %2024 = vmatpush.bf16.msrb.mxu1 %v2815_v35  ;;  %v2272_v4 = vrot.slane %v2176_v58, 4  ;;  %v3035_v35 = vor.u32 %v3423_v24, %v3032_v25  ;;  %v2827_v60 = vor.u32 %v3397_v32, %v2826_v31  ;;  %v3038_v24 = vld [vmem:[%s3767_s27 + $0x3c0] sm:$0xf]  ;;  %v3448_v25 = vld [vmem:[%s3767_s27 + $0x480] sm:$0xf0] }
  0xd7   : > { %2037 = vmatpush.bf16.msrb.mxu2 %v2819_v36  ;;  %v2273_v8 = vrot.slane %v2177_v1, 2  ;;  %v2828_v36 = vld [vmem:[%s3767_s27 + $0x2ec] sm:$0xf0]  ;;  %v3046_v31 = vld [vmem:[%s3767_s27 + $0x3c8] sm:$0xf] }
  0xd8   : > { %2050 = vmatpush.bf16.msrb.mxu3 %v2823_v42  ;;  %v2836_v42 = vld [vmem:[%s3767_s27 + $0x2f4] sm:$0xf0]  ;;  %v2831_v46 = vor.u32 %v3373_v33, %v2828_v36  ;;  %v3449_v32 = vld [vmem:[%s3767_s27 + $0x488] sm:$0xf0] }
  0xd9   : > { %2012 = vmatpush.bf16.msrb.mxu0 %v2615_v53  ;;  %v2310_v15 = vsel %vm2309_vm2, %v2272_v4, %v2273_v8  ;;  %v1574_v16 = vpop.f32.mrf.mxu2  ;;  %v1598_v23 = vpop.f32.mrf.mxu0  ;;  %v2839_v52 = vor.u32 %v3374_v41, %v2836_v42  ;;  %v3325_v53 = vld [vmem:[%s3767_s27 + $0xac] sm:$0xf]  ;;  %v3242_v4 = vld [vmem:[%s3767_s27 + $0x550] sm:$0xf]  ;;  %v2635_v8 = vor.u32 %v3324_v45, %v2632_v56  ;;  %v3047_v41 = vor.u32 %v3449_v32, %v3046_v31  ;;  %v2842_v42 = vld [vmem:[%s3767_s27 + $0x238] sm:$0xf] }
  0xda   : > { %2025 = vmatpush.bf16.msrb.mxu1 %v2619_v59  ;;  %v2312_v20 = vsel %vm2311_vm3, %v2308_v14, %v2310_v15  ;;  %v1587_v21 = vpop.f32.mrf.mxu3  ;;  %v1611_v27 = vpop.f32.mrf.mxu1  ;;  %v3234_v59 = vld [vmem:[%s3767_s27 + $0x548] sm:$0xf]  ;;  %v1599_v63 = vadd.f32 %v1598_v23, %v455_v26  ;;  %v2643_v14 = vor.u32 %v3325_v53, %v2640_v54  ;;  %v3424_v26 = vld [vmem:[%s3767_s27 + $0x3c4] sm:$0xf]  ;;  %v3425_v36 = vld [vmem:[%s3767_s27 + $0x3cc] sm:$0xf] }
  0xdb   : > { %2038 = vmatpush.bf16.msrb.mxu2 %v2623_v61  ;;  %2358 = vst [vmem:[%s4211_s10] sm:$0xff] %v2312_v20  ;;  %v1612_v34 = vadd.f32 %v1611_v27, %v456_v9  ;;  %v3497_v61 = vld [vmem:[%s3767_s27 + $0x608] sm:$0xf0]  ;;  %v2639_v9 = vor.u32 %v3349_v49, %v2638_v48  ;;  %v460_v21 = vperm.slane %v4259_v7, 1  ;;  %v3051_v45 = vor.u32 %v3425_v36, %v3048_v37  ;;  %v3400_v56 = vld [vmem:[%s3767_s27 + $0x300] sm:$0xf0] }
  0xdc   : > { %2051 = vmatpush.bf16.msrb.mxu3 %v2627_v2  ;;  %3288 = vmatmul.msk.bf16.vlgmr.msrb.gmra.mxu0 %vm1533_vm0, %v4173_v22  ;;  %v2631_v2 = vor.u32 %v3348_v44, %v2630_v43  ;;  %v3235_v15 = vor.u32 %v3497_v61, %v3234_v59  ;;  %v2178_v19 = vmax.f32 %v1599_v63, 0.0  ;;  %v3375_v43 = vld [vmem:[%s3767_s27 + $0x23c] sm:$0xf]  ;;  %v461_v48 = vperm.slane %v4259_v7, 2  ;;  %v3376_v49 = vld [vmem:[%s3767_s27 + $0x244] sm:$0xf] }
  0xdd   : > { %2061 = vmatpush.bf16.msra.mxu0 %v3219_v3  ;;  %3289 = vmatmul.msk.bf16.vlgmr.msrb.gmra.mxu1 %vm1533_vm0, %v4173_v22  ;;  %v2179_v50 = vmax.f32 %v1612_v34, 0.0  ;;  %v3236_v3 = vld [vmem:[%s3767_s27 + $0x60c] sm:$0xf0]  ;;  %v3326_v59 = vld [vmem:[%s3767_s27 + $0xb4] sm:$0xf]  ;;  %v464_v31 = vperm.slane %v4259_v7, 5 }
  0xde   : > { %2074 = vmatpush.bf16.msra.mxu1 %v3223_v5  ;;  %3290 = vmatmul.msk.bf16.vlgmr.msrb.gmra.mxu2 %vm1533_vm0, %v4173_v22  ;;  %v3498_v5 = vld [vmem:[%s3767_s27 + $0x610] sm:$0xf0]  ;;  %v3239_v17 = vor.u32 %v3473_v62, %v3236_v3  ;;  %v2646_v54 = vld [vmem:[%s3767_s27 + $0xb0] sm:$0xf]  ;;  %v2648_v61 = vld [vmem:[%s3767_s27 + $0x174] sm:$0xf0] }
  0xdf   : > { %2087 = vmatpush.bf16.msra.mxu2 %v3227_v6  ;;  %3291 = vmatmul.msk.bf16.vlgmr.msrb.gmra.mxu3 %vm1533_vm0, %v4173_v22  ;;  %v2274_v12 = vrot.slane %v2179_v50, 6  ;;  %v3243_v18 = vor.u32 %v3498_v5, %v3242_v4  ;;  %v2852_v50 = vld [vmem:[%s3767_s27 + $0x304] sm:$0xf0]  ;;  %v2654_v62 = vld [vmem:[%s3767_s27 + $0xb8] sm:$0xf] }
  0xe0   : > { %2100 = vmatpush.bf16.msra.mxu3 %v3231_v10  ;;  %v3474_v10 = vld [vmem:[%s3767_s27 + $0x554] sm:$0xf]  ;;  %v3327_v3 = vld [vmem:[%s3767_s27 + $0xbc] sm:$0xf]  ;;  %v2858_v37 = vld [vmem:[%s3767_s27 + $0x248] sm:$0xf] }
  0xe1   : > { %2062 = vmatpush.bf16.msra.mxu0 %v3023_v28  ;;  %v1624_v51 = vpop.f32.mrf.mxu2  ;;  %v1600_v58 = vpop.f32.mrf.mxu0  ;;  %v3247_v23 = vor.u32 %v3474_v10, %v3244_v11  ;;  %v2313_v27 = vsel %vm2307_vm1, %v2178_v19, %v2274_v12  ;;  %v3499_v10 = vld [vmem:[%s3767_s27 + $0x618] sm:$0xf0] }
  0xe2   : > { %2075 = vmatpush.bf16.msra.mxu1 %v3027_v29  ;;  %v1625_v55 = vadd.f32 %v1624_v51, %v457_v39  ;;  %v1637_v57 = vpop.f32.mrf.mxu3  ;;  %v1613_v1 = vpop.f32.mrf.mxu1  ;;  %v3039_v39 = vor.u32 %v3448_v25, %v3038_v24  ;;  %v459_v51 = vperm.slane %v4259_v7, 0 }
  0xe3   : > { %2088 = vmatpush.bf16.msra.mxu2 %v3031_v30  ;;  %v1638_v0 = vadd.f32 %v1637_v57, %v458_v40  ;;  %v3040_v30 = vld [vmem:[%s3767_s27 + $0x484] sm:$0xf0]  ;;  %v2855_v1 = vor.u32 %v3376_v49, %v2852_v50 }
  0xe4   : > { %2101 = vmatpush.bf16.msra.mxu3 %v3035_v35  ;;  %v2180_v6 = vmax.f32 %v1625_v55, 0.0  ;;  %v3043_v40 = vor.u32 %v3424_v26, %v3040_v30  ;;  %v3350_v55 = vld [vmem:[%s3767_s27 + $0x170] sm:$0xf0]  ;;  %v3054_v26 = vld [vmem:[%s3767_s27 + $0x3d0] sm:$0xf] }
  0xe5   : > { %2063 = vmatpush.bf16.msra.mxu0 %v2827_v60  ;;  %v2181_v13 = vmax.f32 %v1638_v0, 0.0  ;;  %v3399_v60 = vld [vmem:[%s3767_s27 + $0x2f8] sm:$0xf0] }
  0xe6   : > { %2076 = vmatpush.bf16.msra.mxu1 %v2831_v46  ;;  %v2275_v16 = vrot.slane %v2180_v6, 4  ;;  %v2844_v46 = vld [vmem:[%s3767_s27 + $0x2fc] sm:$0xf0]  ;;  %v2843_v53 = vor.u32 %v3399_v60, %v2842_v42  ;;  %v466_v42 = vperm.slane %v4259_v7, 7 }
  0xe7   : > { %2089 = vmatpush.bf16.msra.mxu2 %v2835_v47  ;;  %v2276_v20 = vrot.slane %v2181_v13, 2  ;;  %v2850_v47 = vld [vmem:[%s3767_s27 + $0x240] sm:$0xf]  ;;  %v2847_v57 = vor.u32 %v3375_v43, %v2844_v46 }
  0xe8   : > { %2102 = vmatpush.bf16.msra.mxu3 %v2839_v52  ;;  %v462_v52 = vperm.slane %v4259_v7, 3  ;;  %v2851_v58 = vor.u32 %v3400_v56, %v2850_v47  ;;  %v2662_v43 = vld [vmem:[%s3767_s27 + $0xc0] sm:$0xf] }
  0xe9   : > { %2064 = vmatpush.bf16.msra.mxu0 %v2631_v2  ;;  %v2314_v28 = vsel %vm2309_vm2, %v2275_v16, %v2276_v20  ;;  %v1626_v29 = vpop.f32.mrf.mxu2  ;;  %v1650_v35 = vpop.f32.mrf.mxu0  ;;  %v3351_v2 = vld [vmem:[%s3767_s27 + $0x178] sm:$0xf0]  ;;  %v2651_v16 = vor.u32 %v3326_v59, %v2648_v61 }
  0xea   : > { %2077 = vmatpush.bf16.msra.mxu1 %v2635_v8  ;;  %v2315_v33 = vsel %vm2311_vm3, %v2313_v27, %v2314_v28  ;;  %v1639_v34 = vpop.f32.mrf.mxu3  ;;  %v1663_v38 = vpop.f32.mrf.mxu1  ;;  %v2656_v8 = vld [vmem:[%s3767_s27 + $0x17c] sm:$0xf0]  ;;  %v1651_v11 = vadd.f32 %v1650_v35, %v459_v51  ;;  %v3450_v27 = vld [vmem:[%s3767_s27 + $0x490] sm:$0xf0] }
  0xeb   : > { %2090 = vmatpush.bf16.msra.mxu2 %v2639_v9  ;;  %2359 = vst [vmem:[%s4211_s10 + $0x8] sm:$0xff] %v2315_v33  ;;  %v1664_v44 = vadd.f32 %v1663_v38, %v460_v21  ;;  %v3250_v9 = vld [vmem:[%s3767_s27 + $0x558] sm:$0xf]  ;;  %v2659_v20 = vor.u32 %v3327_v3, %v2656_v8  ;;  %v3055_v36 = vor.u32 %v3450_v27, %v3054_v26  ;;  %v3401_v38 = vld [vmem:[%s3767_s27 + $0x308] sm:$0xf0] }
  0xec   : > { %2103 = vmatpush.bf16.msra.mxu3 %v2643_v14  ;;  %3292 = vmatmul.msk.bf16.vlgmr.msra.gmra.mxu0 %vm1533_vm0, %v4173_v22  ;;  %v2647_v14 = vor.u32 %v3350_v55, %v2646_v54  ;;  %v3251_v21 = vor.u32 %v3499_v10, %v3250_v9  ;;  %v2182_v24 = vmax.f32 %v1651_v11, 0.0  ;;  %v2859_v60 = vor.u32 %v3401_v38, %v2858_v37 }
  0xed   : > { %2113 = vmatpush.bf16.msrb.mxu0 %v3235_v15  ;;  %3293 = vmatmul.msk.bf16.vlgmr.msra.gmra.mxu1 %vm1533_vm0, %v4173_v22  ;;  %v2183_v63 = vmax.f32 %v1664_v44, 0.0  ;;  %v3352_v44 = vld [vmem:[%s3767_s27 + $0x180] sm:$0xf0] }
  0xee   : > { %2126 = vmatpush.bf16.msrb.mxu1 %v3239_v17  ;;  %3294 = vmatmul.msk.bf16.vlgmr.msra.gmra.mxu2 %vm1533_vm0, %v4173_v22  ;;  %v2655_v17 = vor.u32 %v3351_v2, %v2654_v62 }
  0xef   : > { %2139 = vmatpush.bf16.msrb.mxu2 %v3243_v18  ;;  %3295 = vmatmul.msk.bf16.vlgmr.msra.gmra.mxu3 %vm1533_vm0, %v4173_v22  ;;  %v2277_v18 = vrot.slane %v2183_v63, 6 }
  0xf0   : > { %2152 = vmatpush.bf16.msrb.mxu3 %v3247_v23 }
  0xf1   : > { %2114 = vmatpush.bf16.msrb.mxu0 %v3039_v39  ;;  %v1676_v0 = vpop.f32.mrf.mxu2  ;;  %v1652_v6 = vpop.f32.mrf.mxu0  ;;  %v2316_v28 = vsel %vm2307_vm1, %v2182_v24, %v2277_v18 }
  0xf2   : > { %2127 = vmatpush.bf16.msrb.mxu1 %v3043_v40  ;;  %v1677_v4 = vadd.f32 %v1676_v0, %v461_v48  ;;  %v1689_v5 = vpop.f32.mrf.mxu3  ;;  %v1665_v13 = vpop.f32.mrf.mxu1  ;;  %v465_v40 = vperm.slane %v4259_v7, 6 }
  0xf3   : > { %2140 = vmatpush.bf16.msrb.mxu2 %v3047_v41  ;;  %v1690_v12 = vadd.f32 %v1689_v5, %v462_v52  ;;  %v463_v41 = vperm.slane %v4259_v7, 4  ;;  %v2663_v52 = vor.u32 %v3352_v44, %v2662_v43 }
  0xf4   : > { %2153 = vmatpush.bf16.msrb.mxu3 %v3051_v45  ;;  %v2184_v15 = vmax.f32 %v1677_v4, 0.0 }
  0xf5   : > { %2115 = vmatpush.bf16.msrb.mxu0 %v2843_v53  ;;  %v2185_v19 = vmax.f32 %v1690_v12, 0.0 }
  0xf6   : > { %2128 = vmatpush.bf16.msrb.mxu1 %v2847_v57  ;;  %v2278_v23 = vrot.slane %v2184_v15, 4  ;;  %v439_v57 = vld [vmem:[%s3773_s25 + $0x10] sm:$0xff] }
  0xf7   : > { %2141 = vmatpush.bf16.msrb.mxu2 %v2851_v58  ;;  %v2279_v25 = vrot.slane %v2185_v19, 2  ;;  %v468_v0 = vperm.slane %v439_v57, 1  ;;  %v469_v6 = vperm.slane %v439_v57, 2  ;;  %v467_v8 = vperm.slane %v439_v57, 0 }
  0xf8   : > { %2154 = vmatpush.bf16.msrb.mxu3 %v2855_v1  ;;  %v470_v9 = vperm.slane %v439_v57, 3  ;;  %v472_v27 = vperm.slane %v439_v57, 5 }
  0xf9   : > { %2116 = vmatpush.bf16.msrb.mxu0 %v2647_v14  ;;  %v2317_v29 = vsel %vm2309_vm2, %v2278_v23, %v2279_v25  ;;  %v1678_v30 = vpop.f32.mrf.mxu2  ;;  %v1702_v34 = vpop.f32.mrf.mxu0 }
  0xfa   : > { %2129 = vmatpush.bf16.msrb.mxu1 %v2651_v16  ;;  %v2318_v32 = vsel %vm2311_vm3, %v2316_v28, %v2317_v29  ;;  %v1691_v33 = vpop.f32.mrf.mxu3  ;;  %v1715_v35 = vpop.f32.mrf.mxu1  ;;  %v1703_v49 = vadd.f32 %v1702_v34, %v463_v41  ;;  %v471_v34 = vperm.slane %v439_v57, 4 }
  0xfb   : > { %2142 = vmatpush.bf16.msrb.mxu2 %v2655_v17  ;;  %2360 = vst [vmem:[%s4211_s10 + $0x10] sm:$0xff] %v2318_v32  ;;  %v1716_v39 = vadd.f32 %v1715_v35, %v464_v31  ;;  %v473_v33 = vperm.slane %v439_v57, 6  ;;  %v474_v35 = vperm.slane %v439_v57, 7 }
  0xfc   : > { %2155 = vmatpush.bf16.msrb.mxu3 %v2659_v20  ;;  %3296 = vmatmul.msk.bf16.vlgmr.msrb.gmra.mxu0 %vm1533_vm0, %v4173_v22  ;;  %v2186_v58 = vmax.f32 %v1703_v49, 0.0 }
  0xfd   : > { %2165 = vmatpush.bf16.msra.mxu0 %v3251_v21  ;;  %3297 = vmatmul.msk.bf16.vlgmr.msrb.gmra.mxu1 %vm1533_vm0, %v4173_v22  ;;  %v2187_v45 = vmax.f32 %v1716_v39, 0.0 }
  0xfe   : > { %3298 = vmatmul.msk.bf16.vlgmr.msrb.gmra.mxu2 %vm1533_vm0, %v4173_v22 }
  0xff   : > { %3299 = vmatmul.msk.bf16.vlgmr.msrb.gmra.mxu3 %vm1533_vm0, %v4173_v22  ;;  %v2280_v54 = vrot.slane %v2187_v45, 6 }
 0x101   : > { %2166 = vmatpush.bf16.msra.mxu0 %v3055_v36  ;;  %v1728_v46 = vpop.f32.mrf.mxu2  ;;  %v1704_v48 = vpop.f32.mrf.mxu0  ;;  %v2319_v61 = vsel %vm2307_vm1, %v2186_v58, %v2280_v54 }
 0x102   : > { %v1729_v47 = vadd.f32 %v1728_v46, %v465_v40  ;;  %v1741_v56 = vpop.f32.mrf.mxu3  ;;  %v1717_v51 = vpop.f32.mrf.mxu1 }
 0x103   : > { %v1742_v50 = vadd.f32 %v1741_v56, %v466_v42 }
 0x104   : > { %v2188_v53 = vmax.f32 %v1729_v47, 0.0  ;;  %v440_v47 = vld [vmem:[%s3773_s25 + $0x18] sm:$0xff] }
 0x105   : > { %2167 = vmatpush.bf16.msra.mxu0 %v2859_v60  ;;  %v2189_v55 = vmax.f32 %v1742_v50, 0.0  ;;  %v477_v58 = vperm.slane %v440_v47, 2 }
 0x106   : > { %v2281_v7 = vrot.slane %v2188_v53, 4 }
 0x107   : > { %v2282_v59 = vrot.slane %v2189_v55, 2 }
 0x109   : > { %2168 = vmatpush.bf16.msra.mxu0 %v2663_v52  ;;  %v2320_v62 = vsel %vm2309_vm2, %v2281_v7, %v2282_v59  ;;  %v1730_v63 = vpop.f32.mrf.mxu2  ;;  %v1754_v3 = vpop.f32.mrf.mxu0  ;;  %v476_v52 = vperm.slane %v440_v47, 1  ;;  %v475_v59 = vperm.slane %v440_v47, 0 }
 0x10a   : > { %v2321_v1 = vsel %vm2311_vm3, %v2319_v61, %v2320_v62  ;;  %v1743_v2 = vpop.f32.mrf.mxu3  ;;  %v1767_v4 = vpop.f32.mrf.mxu1  ;;  %v1755_v15 = vadd.f32 %v1754_v3, %v467_v8  ;;  %v478_v61 = vperm.slane %v440_v47, 3 }
 0x10b   : > { %2361 = vst [vmem:[%s4211_s10 + $0x18] sm:$0xff] %v2321_v1  ;;  %v1768_v5 = vadd.f32 %v1767_v4, %v468_v0 }
 0x10c   : > { %3300 = vmatmul.msk.bf16.vlgmr.msra.gmra.mxu0 %vm1533_vm0, %v4173_v22  ;;  %v2190_v23 = vmax.f32 %v1755_v15, 0.0 }
 0x10d   : > { %v2191_v10 = vmax.f32 %v1768_v5, 0.0 }
 0x10f   : > { %v2283_v19 = vrot.slane %v2191_v10, 6 }
 0x111   : > { %v1780_v11 = vpop.f32.mrf.mxu2  ;;  %v1756_v14 = vpop.f32.mrf.mxu0  ;;  %v2322_v22 = vsel %vm2307_vm1, %v2190_v23, %v2283_v19  ;;  %v481_v23 = vperm.slane %v440_v47, 6 }
 0x112   : > { %v1781_v12 = vadd.f32 %v1780_v11, %v469_v6  ;;  %v1793_v13 = vpop.f32.mrf.mxu3  ;;  %v1769_v17 = vpop.f32.mrf.mxu1 }
 0x113   : > { %v1794_v16 = vadd.f32 %v1793_v13, %v470_v9 }
 0x114   : > { %v2192_v18 = vmax.f32 %v1781_v12, 0.0 }
 0x115   : > { %v2193_v20 = vmax.f32 %v1794_v16, 0.0  ;;  %v480_v16 = vperm.slane %v440_v47, 5 }
 0x116   : > { %v2284_v21 = vrot.slane %v2192_v18, 4 }
 0x117   : > { %v2285_v24 = vrot.slane %v2193_v20, 2 }
 0x119   : > { %v2323_v25 = vsel %vm2309_vm2, %v2284_v21, %v2285_v24  ;;  %v1782_v26 = vpop.f32.mrf.mxu2  ;;  %v1806_v30 = vpop.f32.mrf.mxu0  ;;  %v479_v24 = vperm.slane %v440_v47, 4 }
 0x11a   : > { %v2324_v28 = vsel %vm2311_vm3, %v2322_v22, %v2323_v25  ;;  %v1795_v29 = vpop.f32.mrf.mxu3  ;;  %v1819_v31 = vpop.f32.mrf.mxu1  ;;  %v1807_v41 = vadd.f32 %v1806_v30, %v471_v34  ;;  %v482_v22 = vperm.slane %v440_v47, 7 }
 0x11b   : > { %2362 = vst [vmem:[%s4211_s10 + $0x20] sm:$0xff] %v2324_v28  ;;  %v1820_v32 = vadd.f32 %v1819_v31, %v472_v27 }
 0x11c   : > { %v2194_v56 = vmax.f32 %v1807_v41, 0.0 }
 0x11d   : > { %v2195_v36 = vmax.f32 %v1820_v32, 0.0 }
 0x11f   : > { %v2286_v44 = vrot.slane %v2195_v36, 6 }
 0x121   : > { %v1832_v37 = vpop.f32.mrf.mxu2  ;;  %v1808_v40 = vpop.f32.mrf.mxu0  ;;  %v2325_v49 = vsel %vm2307_vm1, %v2194_v56, %v2286_v44 }
 0x122   : > { %v1833_v38 = vadd.f32 %v1832_v37, %v473_v33  ;;  %v1845_v39 = vpop.f32.mrf.mxu3  ;;  %v1821_v60 = vpop.f32.mrf.mxu1  ;;  %v441_v37 = vld [vmem:[%s3773_s25 + $0x20] sm:$0xff] }
 0x123   : > { %v1846_v42 = vadd.f32 %v1845_v39, %v474_v35  ;;  %v484_v60 = vperm.slane %v441_v37, 1  ;;  %v485_v56 = vperm.slane %v441_v37, 2 }
 0x124   : > { %v2196_v43 = vmax.f32 %v1833_v38, 0.0 }
 0x125   : > { %v2197_v45 = vmax.f32 %v1846_v42, 0.0 }
 0x126   : > { %v2287_v46 = vrot.slane %v2196_v43, 4 }
 0x127   : > { %v2288_v48 = vrot.slane %v2197_v45, 2 }
 0x129   : > { %v2326_v50 = vsel %vm2309_vm2, %v2287_v46, %v2288_v48  ;;  %v1834_v51 = vpop.f32.mrf.mxu2  ;;  %v1858_v55 = vpop.f32.mrf.mxu0  ;;  %v483_v48 = vperm.slane %v441_v37, 0 }
 0x12a   : > { %v2327_v53 = vsel %vm2311_vm3, %v2325_v49, %v2326_v50  ;;  %v1847_v54 = vpop.f32.mrf.mxu3  ;;  %v1871_v7 = vpop.f32.mrf.mxu1  ;;  %v1859_v3 = vadd.f32 %v1858_v55, %v475_v59  ;;  %v486_v49 = vperm.slane %v441_v37, 3 }
 0x12b   : > { %2363 = vst [vmem:[%s4211_s10 + $0x28] sm:$0xff] %v2327_v53  ;;  %v1872_v57 = vadd.f32 %v1871_v7, %v476_v52 }
 0x12c   : > { %v2198_v11 = vmax.f32 %v1859_v3, 0.0 }
 0x12d   : > { %v2199_v62 = vmax.f32 %v1872_v57, 0.0 }
 0x12f   : > { %v2289_v8 = vrot.slane %v2199_v62, 6 }
 0x131   : > { %v1884_v63 = vpop.f32.mrf.mxu2  ;;  %v1860_v2 = vpop.f32.mrf.mxu0  ;;  %v2328_v13 = vsel %vm2307_vm1, %v2198_v11, %v2289_v8  ;;  %v489_v11 = vperm.slane %v441_v37, 6 }
 0x132   : > { %v1885_v0 = vadd.f32 %v1884_v63, %v477_v58  ;;  %v1897_v1 = vpop.f32.mrf.mxu3  ;;  %v1873_v5 = vpop.f32.mrf.mxu1 }
 0x133   : > { %v1898_v4 = vadd.f32 %v1897_v1, %v478_v61 }
 0x134   : > { %v2200_v6 = vmax.f32 %v1885_v0, 0.0 }
 0x135   : > { %v2201_v9 = vmax.f32 %v1898_v4, 0.0  ;;  %v488_v4 = vperm.slane %v441_v37, 5 }
 0x136   : > { %v2290_v10 = vrot.slane %v2200_v6, 4 }
 0x137   : > { %v2291_v12 = vrot.slane %v2201_v9, 2 }
 0x139   : > { %v2329_v14 = vsel %vm2309_vm2, %v2290_v10, %v2291_v12  ;;  %v1886_v15 = vpop.f32.mrf.mxu2  ;;  %v1910_v19 = vpop.f32.mrf.mxu0  ;;  %v487_v12 = vperm.slane %v441_v37, 4 }
 0x13a   : > { %v2330_v17 = vsel %vm2311_vm3, %v2328_v13, %v2329_v14  ;;  %v1899_v18 = vpop.f32.mrf.mxu3  ;;  %v1923_v20 = vpop.f32.mrf.mxu1  ;;  %v1911_v30 = vadd.f32 %v1910_v19, %v479_v24  ;;  %v490_v13 = vperm.slane %v441_v37, 7 }
 0x13b   : > { %2364 = vst [vmem:[%s4211_s10 + $0x30] sm:$0xff] %v2330_v17  ;;  %v1924_v21 = vadd.f32 %v1923_v20, %v480_v16 }
 0x13c   : > { %v2202_v38 = vmax.f32 %v1911_v30, 0.0 }
 0x13d   : > { %v2203_v25 = vmax.f32 %v1924_v21, 0.0 }
 0x13f   : > { %v2292_v34 = vrot.slane %v2203_v25, 6 }
 0x141   : > { %v1936_v26 = vpop.f32.mrf.mxu2  ;;  %v1912_v29 = vpop.f32.mrf.mxu0  ;;  %v2331_v40 = vsel %vm2307_vm1, %v2202_v38, %v2292_v34 }
 0x142   : > { %v1937_v27 = vadd.f32 %v1936_v26, %v481_v23  ;;  %v1949_v28 = vpop.f32.mrf.mxu3  ;;  %v1925_v32 = vpop.f32.mrf.mxu1  ;;  %v442_v26 = vld [vmem:[%s3773_s25 + $0x28] sm:$0xff] }
 0x143   : > { %v1950_v31 = vadd.f32 %v1949_v28, %v482_v22  ;;  %v492_v32 = vperm.slane %v442_v26, 1  ;;  %v493_v38 = vperm.slane %v442_v26, 2 }
 0x144   : > { %v2204_v33 = vmax.f32 %v1937_v27, 0.0 }
 0x145   : > { %v2205_v35 = vmax.f32 %v1950_v31, 0.0 }
 0x146   : > { %v2293_v36 = vrot.slane %v2204_v33, 4 }
 0x147   : > { %v2294_v39 = vrot.slane %v2205_v35, 2 }
 0x149   : > { %v2332_v41 = vsel %vm2309_vm2, %v2293_v36, %v2294_v39  ;;  %v1938_v42 = vpop.f32.mrf.mxu2  ;;  %v1962_v45 = vpop.f32.mrf.mxu0  ;;  %v491_v39 = vperm.slane %v442_v26, 0 }
 0x14a   : > { %v2333_v43 = vsel %vm2311_vm3, %v2331_v40, %v2332_v41  ;;  %v1951_v44 = vpop.f32.mrf.mxu3  ;;  %v1975_v46 = vpop.f32.mrf.mxu1  ;;  %v1963_v55 = vadd.f32 %v1962_v45, %v483_v48  ;;  %v494_v40 = vperm.slane %v442_v26, 3 }
 0x14b   : > { %2365 = vst [vmem:[%s4211_s10 + $0x38] sm:$0xff] %v2333_v43  ;;  %v1976_v47 = vadd.f32 %v1975_v46, %v484_v60 }
 0x14c   : > { %v2206_v63 = vmax.f32 %v1963_v55, 0.0 }
 0x14d   : > { %v2207_v50 = vmax.f32 %v1976_v47, 0.0 }
 0x14f   : > { %v2295_v59 = vrot.slane %v2207_v50, 6 }
 0x151   : > { %v1988_v51 = vpop.f32.mrf.mxu2  ;;  %v1964_v54 = vpop.f32.mrf.mxu0  ;;  %v2334_v1 = vsel %vm2307_vm1, %v2206_v63, %v2295_v59  ;;  %v497_v63 = vperm.slane %v442_v26, 6 }
 0x152   : > { %v1989_v52 = vadd.f32 %v1988_v51, %v485_v56  ;;  %v2001_v53 = vpop.f32.mrf.mxu3  ;;  %v1977_v57 = vpop.f32.mrf.mxu1 }
 0x153   : > { %v2002_v7 = vadd.f32 %v2001_v53, %v486_v49 }
 0x154   : > { %v2208_v58 = vmax.f32 %v1989_v52, 0.0 }
 0x155   : > { %v2209_v61 = vmax.f32 %v2002_v7, 0.0  ;;  %v496_v7 = vperm.slane %v442_v26, 5 }
 0x156   : > { %v2296_v62 = vrot.slane %v2208_v58, 4 }
 0x157   : > { %v2297_v0 = vrot.slane %v2209_v61, 2 }
 0x159   : > { %v2335_v2 = vsel %vm2309_vm2, %v2296_v62, %v2297_v0  ;;  %v1990_v3 = vpop.f32.mrf.mxu2  ;;  %v2014_v8 = vpop.f32.mrf.mxu0  ;;  %v495_v0 = vperm.slane %v442_v26, 4 }
 0x15a   : > { %v2336_v5 = vsel %vm2311_vm3, %v2334_v1, %v2335_v2  ;;  %v2003_v6 = vpop.f32.mrf.mxu3  ;;  %v2027_v9 = vpop.f32.mrf.mxu1  ;;  %v2015_v19 = vadd.f32 %v2014_v8, %v487_v12  ;;  %v498_v1 = vperm.slane %v442_v26, 7 }
 0x15b   : > { %2366 = vst [vmem:[%s4211_s10 + $0x40] sm:$0xff] %v2336_v5  ;;  %v2028_v10 = vadd.f32 %v2027_v9, %v488_v4 }
 0x15c   : > { %v2210_v27 = vmax.f32 %v2015_v19, 0.0 }
 0x15d   : > { %v2211_v14 = vmax.f32 %v2028_v10, 0.0 }
 0x15f   : > { %v2298_v24 = vrot.slane %v2211_v14, 6 }
 0x161   : > { %v2040_v15 = vpop.f32.mrf.mxu2  ;;  %v2016_v18 = vpop.f32.mrf.mxu0  ;;  %v2337_v29 = vsel %vm2307_vm1, %v2210_v27, %v2298_v24 }
 0x162   : > { %v2041_v16 = vadd.f32 %v2040_v15, %v489_v11  ;;  %v2053_v17 = vpop.f32.mrf.mxu3  ;;  %v2029_v21 = vpop.f32.mrf.mxu1 }
 0x163   : > { %v2054_v20 = vadd.f32 %v2053_v17, %v490_v13  ;;  %v3551_v17 = vld [vmem:[%s3773_s25 + $0x30] ss:$0 sm:$0xff] }
 0x164   : > { %v2212_v23 = vmax.f32 %v2041_v16, 0.0 }
 0x165   : > { %v2213_v22 = vmax.f32 %v2054_v20, 0.0 }
 0x166   : > { %v2299_v25 = vrot.slane %v2212_v23, 4 }
 0x167   : > { %v2300_v28 = vrot.slane %v2213_v22, 2 }
 0x169   : > { %v2338_v30 = vsel %vm2309_vm2, %v2299_v25, %v2300_v28  ;;  %v2042_v31 = vpop.f32.mrf.mxu2  ;;  %v2066_v35 = vpop.f32.mrf.mxu0 }
 0x16a   : > { %v2339_v33 = vsel %vm2311_vm3, %v2337_v29, %v2338_v30  ;;  %v2055_v34 = vpop.f32.mrf.mxu3  ;;  %v2079_v36 = vpop.f32.mrf.mxu1  ;;  %v2067_v45 = vadd.f32 %v2066_v35, %v491_v39 }
 0x16b   : > { %2367 = vst [vmem:[%s4211_s10 + $0x48] sm:$0xff] %v2339_v33  ;;  %v2080_v37 = vadd.f32 %v2079_v36, %v492_v32 }
 0x16c   : > { %v2214_v51 = vmax.f32 %v2067_v45, 0.0 }
 0x16d   : > { %v2215_v41 = vmax.f32 %v2080_v37, 0.0 }
 0x16f   : > { %v2301_v48 = vrot.slane %v2215_v41, 6 }
 0x171   : > { %v2092_v42 = vpop.f32.mrf.mxu2  ;;  %v2068_v44 = vpop.f32.mrf.mxu0  ;;  %v2340_v53 = vsel %vm2307_vm1, %v2214_v51, %v2301_v48 }
 0x172   : > { %v2093_v60 = vadd.f32 %v2092_v42, %v493_v38  ;;  %v2105_v43 = vpop.f32.mrf.mxu3  ;;  %v2081_v47 = vpop.f32.mrf.mxu1 }
 0x173   : > { %v2106_v46 = vadd.f32 %v2105_v43, %v494_v40 }
 0x174   : > { %v2216_v56 = vmax.f32 %v2093_v60, 0.0 }
 0x175   : > { %v2217_v49 = vmax.f32 %v2106_v46, 0.0 }
 0x176   : > { %v2302_v50 = vrot.slane %v2216_v56, 4 }
 0x177   : > { %v2303_v52 = vrot.slane %v2217_v49, 2 }
 0x179   : > { %v2341_v54 = vsel %vm2309_vm2, %v2302_v50, %v2303_v52  ;;  %v2094_v55 = vpop.f32.mrf.mxu2  ;;  %v2118_v59 = vpop.f32.mrf.mxu0 }
 0x17a   : > { %v2342_v57 = vsel %vm2311_vm3, %v2340_v53, %v2341_v54  ;;  %v2107_v58 = vpop.f32.mrf.mxu3  ;;  %v2131_v61 = vpop.f32.mrf.mxu1  ;;  %v2119_v8 = vadd.f32 %v2118_v59, %v495_v0 }
 0x17b   : > { %2368 = vst [vmem:[%s4211_s10 + $0x50] sm:$0xff] %v2342_v57  ;;  %v2132_v62 = vadd.f32 %v2131_v61, %v496_v7 }
 0x17c   : > { %v2218_v15 = vmax.f32 %v2119_v8, 0.0 }
 0x17d   : > { %v2219_v2 = vmax.f32 %v2132_v62, 0.0 }
 0x17f   : > { %v2304_v12 = vrot.slane %v2219_v2, 6 }
 0x181   : > { %v2144_v3 = vpop.f32.mrf.mxu2  ;;  %v2120_v6 = vpop.f32.mrf.mxu0  ;;  %v2343_v18 = vsel %vm2307_vm1, %v2218_v15, %v2304_v12 }
 0x182   : > { %v2145_v4 = vadd.f32 %v2144_v3, %v497_v63  ;;  %v2157_v5 = vpop.f32.mrf.mxu3  ;;  %v2133_v10 = vpop.f32.mrf.mxu1 }
 0x183   : > { %v2158_v9 = vadd.f32 %v2157_v5, %v498_v1 }
 0x184   : > { %v2220_v11 = vmax.f32 %v2145_v4, 0.0 }
 0x185   : > { %v2221_v13 = vmax.f32 %v2158_v9, 0.0 }
 0x186   : > { %v2305_v14 = vrot.slane %v2220_v11, 4 }
 0x187   : > { %v2306_v16 = vrot.slane %v2221_v13, 2 }
 0x189   : > { %v2344_v19 = vsel %vm2309_vm2, %v2305_v14, %v2306_v16  ;;  %v2146_v20 = vpop.f32.mrf.mxu2  ;;  %v2170_v24 = vpop.f32.mrf.mxu0 }
 0x18a   : > { %v2345_v21 = vsel %vm2311_vm3, %v2343_v18, %v2344_v19  ;;  %v2159_v23 = vpop.f32.mrf.mxu3  ;;  %v2171_v22 = vadd.f32 %v3551_v17, %v2170_v24 }
 0x18b   : > { %2369 = vst [vmem:[%s4211_s10 + $0x58] sm:$0xff] %v2345_v21 }
 0x18c   : > { %v2222_v25 = vmax.f32 %v2171_v22, 0.0 }
 0x18e   : > { %2370 = vst [vmem:[%s4211_s10 + $0x60] sm:$0x3] %v2222_v25 }
 0x191   : > { %v2172_v26 = vpop.f32.mrf.mxu0 }
 0x192 PF: > { %p16_p8 = scmp.ge.s32.totalorder %s3696_s17, 4   ;;  %s4391_s12 = smov %s3643_s13 }
 0x193   : > { %s4392_s13 = smov %s3647_s14  ;;  %s4393_s14 = smov %s3706_s20 }
 0x194   : > { %s4394_s15 = smov %s3696_s17  ;;  %18 = sbr.rel (!%p16_p8) target bundleno = 5 (0x5), region = 85 }
 0x199   :  { %2393 = vsyncpa [#allocation3], 1 }
 0x19a   :  { %2395 = vsyncpa [#allocation3 + $0x1], 1 }
 0x19b   :  { %2396 = vsyncpa [#allocation5], 1 }
 0x19c   :  { %2398 = vsyncpa [#allocation5 + $0x1], 1 }

// kernel: gnet_forward.3
= control target key start
LH: loop header
LB: loop body
LE: loop exit
PB: predicated region body
PF: predicated region fallthrough
CT: control target
= control target key end

     0   :  { %s6978_s0 = inlined_call_operand.vmem [shape: f32[2,16,16,64], index: 0, kind: input, shape index: {}]   ;;  %s6979_s1 = inlined_call_operand.hbm [shape: f32[16,64], index: 1, kind: input, shape index: {}]   ;;  %s6980_s2 = inlined_call_operand.<no memory space> [shape: f32[1,1], index: 2, kind: input, shape index: {}]   ;;  %s6981_s3 = inlined_call_operand.vmem [shape: f32[2,2,2,14,14], index: 3, kind: output, shape index: {}]  }
   0x1   :  { %8 = sst [smem:[#allocation2]] %s6980_s2 }
   0x2   :  { %9 = vsyncpa [#allocation4], 0  ;;  %s3804_s14 = smov 0  }
   0x3 LB: > { %s125_s17 = sshll.u32 %s6979_s1, 4  ;;  %s3342_s18 = sadd.s32 4294967295, %s3776_s14   ;;  %s3776_s14 = sphi %s3804_s14, %s15_s14   ;;  %s126_s17 = int_to_ptr.hbm [resolvable:$true] %s125_s17 }
   0x4   : > { %p3344_p0 = scmp.ge.s32.totalorder %s3776_s14, 1  ;;  %p114_p1 = scmp.lt.s32.totalorder %s3776_s14, 3 }
   0x5   : > { %p3707_p2 = scmp.eq.s32.totalorder %s3342_s18, 0  ;;  %s3778_s2 = smov [#allocation3]  }
   0x6   : > { %p115_p3 = pnand %p3344_p0, %p114_p1  ;;  %s127_s19 = sshll.u32 %s3778_s2, 4  ;;  %s128_s19 = int_to_ptr.vmem [resolvable:$true] %s127_s19 }
   0x7   : > { %s3779_s20 = smov 128   ;;  %s3780_s21 = smov 8  }
   0x8   : > { %p3703_p4 = pneg %p115_p3  ;;  %154 = sbr.rel (%p115_p3) target bundleno = 1339 (0x53b), region = 32 }
   0xa   : > { %p3704_p5 = pnand %p3707_p2, %p3703_p4 }
   0xc   : > { %3706 = dma.hbm_to_vmem [thread:$0]  (!%p3704_p5), %s126_s17, 256, %s128_s19, [#allocation4], %s3779_s20, %s3779_s20, %s3780_s21  }
   0xd   : > { %3771 = dma.done.wait (%p3707_p2), [#allocation4], 256  }
   0xe   : > { %3773 = vsyncadd (%p3707_p2), [#allocation4], 4294967040  ;;  %p179_p6 = scmp.lt.s32.totalorder %s3342_s18, 1  ;;  %v3826_v1 = vld [vmem:[#allocation3] ss:$0 sm:$0xff]  ;;  %vm250_vm0 = vcmask 523264  }
   0xf   : > { %vm254_vm1 = vcmask 521216   ;;  %s189_s26 = sld [smem:[#allocation2]]  ;;  %vm907_vm2 = vcmask 130112   ;;  %vm948_vm3 = vcmask 1041409   ;;  %vm950_vm4 = vcmask 1042434  }
  0x10   : > { %s7363_s18 = smov (!%p179_p6, %s3342_s18), 1  ;;  %vm952_vm5 = vcmask 1043459   ;;  %vm954_vm6 = vcmask 1044484   ;;  %vm956_vm7 = vcmask 1045509   ;;  %vm958_vm8 = vcmask 1046534  }
  0x11   : > { %s3697_s22 = sshll.u32 %s7363_s18, 8  ;;  %s3698_s27 = sshll.u32 %s7363_s18, 6  ;;  %vm960_vm9 = vcmask 1047559   ;;  %vm969_vm10 = vcmask 113664   ;;  %vm971_vm11 = vcmask 111616  }
  0x12   : > { %s3821_s25 = scalar_lea.vmem %s6978_s0, %s3697_s22  ;;  %s4718_s30 = scalar_lea.vmem %s6981_s3, %s3698_s27 }
  0x13   : > { %v3824_v0 = vld [vmem:[%s3821_s25 + $0x31] sm:$0xff]  ;;  %v3829_v2 = vld [vmem:[%s3821_s25 + $0x21] sm:$0xff]  ;;  %v3358_v7 = vld [vmem:[%s3821_s25 + $0x39] sm:$0x3f] }
  0x14   : > { %v3832_v3 = vld [vmem:[%s3821_s25 + $0x11] sm:$0xff]  ;;  %v226_v4 = vmul.f32 %v3826_v1, %v3824_v0  ;;  %v224_v5 = vmul.f32 %v3826_v1, %v3829_v2  ;;  %v3356_v8 = vld [vmem:[%s3821_s25 + $0x29] sm:$0x3f]  ;;  %v3354_v12 = vld [vmem:[%s3821_s25 + $0x19] sm:$0x3f]  ;;  %v227_v13 = vmul.f32 %v3826_v1, %v3358_v7 }
  0x15   : > { %v222_v6 = vmul.f32 %v3826_v1, %v3832_v3  ;;  %v225_v14 = vmul.f32 %v3826_v1, %v3356_v8  ;;  %v223_v15 = vmul.f32 %v3826_v1, %v3354_v12  ;;  %v3850_v16 = vld [vmem:[%s3821_s25 + $0x51] sm:$0xff]  ;;  %v3360_v19 = vld [vmem:[%s3821_s25 + $0x49] sm:$0x3f]  ;;  %v3857_v21 = vld [vmem:[%s3821_s25 + $0x41] sm:$0xff] }
  0x16   : > { %v264_v9 = vsel %vm250_vm0, %v226_v4, 0.0  ;;  %v258_v10 = vsel %vm250_vm0, %v224_v5, 0.0  ;;  %v267_v17 = vsel %vm254_vm1, %v227_v13, 0.0  ;;  %v230_v22 = vmul.f32 %v3826_v1, %v3850_v16  ;;  %v3364_v28 = vld [vmem:[%s3821_s25 + $0x69] sm:$0x3f]  ;;  %v3869_v29 = vld [vmem:[%s3821_s25 + $0x61] sm:$0xff] }
  0x17   : > { %v251_v11 = vsel %vm250_vm0, %v222_v6, 0.0  ;;  %265 = vadd.xlane.f32.xlu2 %v264_v9  ;;  %259 = vadd.xlane.f32.xlu1 %v258_v10  ;;  %v261_v18 = vsel %vm254_vm1, %v225_v14, 0.0  ;;  %v255_v20 = vsel %vm254_vm1, %v223_v15, 0.0  ;;  %v229_v23 = vmul.f32 %v3826_v1, %v3360_v19  ;;  %v3362_v30 = vld [vmem:[%s3821_s25 + $0x59] sm:$0x3f]  ;;  %v3880_v37 = vld [vmem:[%s3821_s25 + $0x81] sm:$0xff] }
  0x18   : > { %252 = vadd.xlane.f32.xlu0 %v251_v11  ;;  %v228_v24 = vmul.f32 %v3826_v1, %v3857_v21  ;;  %v276_v25 = vsel %vm250_vm0, %v230_v22, 0.0  ;;  %v233_v31 = vmul.f32 %v3826_v1, %v3364_v28  ;;  %v232_v32 = vmul.f32 %v3826_v1, %v3869_v29  ;;  %v3366_v38 = vld [vmem:[%s3821_s25 + $0x79] sm:$0x3f]  ;;  %v3884_v39 = vld [vmem:[%s3821_s25 + $0x71] sm:$0xff]  ;;  %v3368_v48 = vld [vmem:[%s3821_s25 + $0x89] sm:$0x3f] }
  0x19   : > { %v273_v26 = vsel %vm254_vm1, %v229_v23, 0.0  ;;  %v231_v33 = vmul.f32 %v3826_v1, %v3362_v30  ;;  %v236_v40 = vmul.f32 %v3826_v1, %v3880_v37  ;;  %v235_v41 = vmul.f32 %v3826_v1, %v3366_v38  ;;  %v3370_v46 = vld [vmem:[%s3821_s25 + $0x99] sm:$0x3f]  ;;  %v3896_v47 = vld [vmem:[%s3821_s25 + $0x91] sm:$0xff]  ;;  %v3372_v56 = vld [vmem:[%s3821_s25 + $0xa9] sm:$0x3f] }
  0x1a   : > { %v270_v27 = vsel %vm250_vm0, %v228_v24, 0.0  ;;  %v285_v34 = vsel %vm254_vm1, %v233_v31, 0.0  ;;  %v282_v35 = vsel %vm250_vm0, %v232_v32, 0.0  ;;  %v234_v42 = vmul.f32 %v3826_v1, %v3884_v39  ;;  %v3907_v55 = vld [vmem:[%s3821_s25 + $0xb1] sm:$0xff]  ;;  %v3911_v57 = vld [vmem:[%s3821_s25 + $0xa1] sm:$0xff] }
  0x1b   : > { %v279_v36 = vsel %vm254_vm1, %v231_v33, 0.0  ;;  %v294_v43 = vsel %vm250_vm0, %v236_v40, 0.0  ;;  %v291_v44 = vsel %vm254_vm1, %v235_v41, 0.0  ;;  %v239_v49 = vmul.f32 %v3826_v1, %v3370_v46  ;;  %v3376_v4 = vld [vmem:[%s3821_s25 + $0xc9] sm:$0x3f]  ;;  %v3923_v5 = vld [vmem:[%s3821_s25 + $0xc1] sm:$0xff] }
  0x1c   : > { %v288_v45 = vsel %vm250_vm0, %v234_v42, 0.0  ;;  %v238_v50 = vmul.f32 %v3826_v1, %v3896_v47  ;;  %v237_v51 = vmul.f32 %v3826_v1, %v3368_v48  ;;  %v242_v58 = vmul.f32 %v3826_v1, %v3907_v55  ;;  %v3374_v6 = vld [vmem:[%s3821_s25 + $0xb9] sm:$0x3f]  ;;  %v3379_v13 = vld [vmem:[%s3821_s25 + $0xe1] sm:$0xff]  ;;  %v3936_v15 = vld [vmem:[%s3821_s25 + $0xd1] sm:$0xff] }
  0x1d   : > { %v303_v52 = vsel %vm254_vm1, %v239_v49, 0.0  ;;  %v241_v59 = vmul.f32 %v3826_v1, %v3372_v56  ;;  %v240_v60 = vmul.f32 %v3826_v1, %v3911_v57  ;;  %v245_v7 = vmul.f32 %v3826_v1, %v3376_v4  ;;  %v3378_v14 = vld [vmem:[%s3821_s25 + $0xd9] sm:$0x3f]  ;;  %v3944_v23 = vld [vmem:[#allocation3 + $0x1] ss:$0 sm:$0xff] }
  0x1e   : > { %v300_v53 = vsel %vm250_vm0, %v238_v50, 0.0  ;;  %v297_v54 = vsel %vm254_vm1, %v237_v51, 0.0  ;;  %v312_v61 = vsel %vm250_vm0, %v242_v58, 0.0  ;;  %v244_v8 = vmul.f32 %v3826_v1, %v3923_v5  ;;  %v3964_v38 = vld [vmem:[%s3821_s25 + $0x20] sm:$0xff]  ;;  %v3386_v48 = vld [vmem:[%s3821_s25 + $0x38] sm:$0x3f] }
  0x1f   : > { %268 = vadd.xlane.f32.xlu2 %v267_v17  ;;  %262 = vadd.xlane.f32.xlu1 %v261_v18  ;;  %v309_v62 = vsel %vm254_vm1, %v241_v59, 0.0  ;;  %v306_v63 = vsel %vm250_vm0, %v240_v60, 0.0  ;;  %v243_v9 = vmul.f32 %v3826_v1, %v3374_v6  ;;  %v321_v10 = vsel %vm254_vm1, %v245_v7, 0.0  ;;  %v3976_v46 = vld [vmem:[%s3821_s25 + $0x40] sm:$0xff]  ;;  %v3390_v58 = vld [vmem:[%s3821_s25 + $0x58] sm:$0x3f] }
  0x20   : > { %256 = vadd.xlane.f32.xlu0 %v255_v20  ;;  %v318_v11 = vsel %vm250_vm0, %v244_v8, 0.0  ;;  %v248_v17 = vmul.f32 %v3826_v1, %v3379_v13  ;;  %v247_v18 = vmul.f32 %v3826_v1, %v3378_v14  ;;  %v246_v19 = vmul.f32 %v3826_v1, %v3936_v15  ;;  %v3987_v56 = vld [vmem:[%s3821_s25 + $0x60] sm:$0xff]  ;;  %v3991_v59 = vld [vmem:[%s3821_s25 + $0x50] sm:$0xff]  ;;  %v3394_v7 = vld [vmem:[%s3821_s25 + $0x78] sm:$0x3f] }
  0x21   : > { %v315_v12 = vsel %vm254_vm1, %v243_v9, 0.0  ;;  %v396_v41 = vmul.f32 %v3944_v23, %v3964_v38  ;;  %v400_v50 = vmul.f32 %v3944_v23, %v3976_v46  ;;  %v399_v51 = vmul.f32 %v3944_v23, %v3386_v48  ;;  %v4003_v8 = vld [vmem:[%s3821_s25 + $0x70] sm:$0xff]  ;;  %v3392_v9 = vld [vmem:[%s3821_s25 + $0x68] sm:$0x3f]  ;;  %v4047_v48 = vld [vmem:[%s3821_s25 + $0xc0] sm:$0xff] }
  0x22   : > { %v330_v20 = vsel %vm250_vm0, %v248_v17, 0.0  ;;  %v327_v22 = vsel %vm254_vm1, %v247_v18, 0.0  ;;  %v324_v24 = vsel %vm250_vm0, %v246_v19, 0.0  ;;  %v404_v60 = vmul.f32 %v3944_v23, %v3987_v56  ;;  %v4014_v18 = vld [vmem:[%s3821_s25 + $0x90] sm:$0xff]  ;;  %v3396_v19 = vld [vmem:[%s3821_s25 + $0x88] sm:$0x3f] }
  0x27   : > { %277 = vadd.xlane.f32.xlu2 %v276_v25  ;;  %274 = vadd.xlane.f32.xlu1 %v273_v26  ;;  %v3382_v25 = vld [vmem:[%s3821_s25 + $0x18] sm:$0x3f]  ;;  %v3949_v26 = vld [vmem:[%s3821_s25 + $0x10] sm:$0xff] }
  0x28   : > { %271 = vadd.xlane.f32.xlu0 %v270_v27  ;;  %v3380_v27 = vld [vmem:[%s3821_s25 + $0xe9] sm:$0x3f]  ;;  %v395_v28 = vmul.f32 %v3944_v23, %v3382_v25  ;;  %v394_v30 = vmul.f32 %v3944_v23, %v3949_v26 }
  0x29   : > { %v249_v31 = vmul.f32 %v3826_v1, %v3380_v27 }
  0x2a   : > { %v425_v32 = vsel %vm254_vm1, %v395_v28, 0.0  ;;  %v422_v33 = vsel %vm250_vm0, %v394_v30, 0.0 }
  0x2f   : > { %286 = vadd.xlane.f32.xlu2 %v285_v34  ;;  %283 = vadd.xlane.f32.xlu1 %v282_v35  ;;  %v333_v34 = vsel %vm254_vm1, %v249_v31, 0.0  ;;  %v3960_v35 = vld [vmem:[%s3821_s25 + $0x30] sm:$0xff]  ;;  %v3400_v31 = vld [vmem:[%s3821_s25 + $0xa8] sm:$0x3f] }
  0x30   : > { %280 = vadd.xlane.f32.xlu0 %v279_v36  ;;  %v3384_v36 = vld [vmem:[%s3821_s25 + $0x28] sm:$0x3f]  ;;  %v398_v1 = vmul.f32 %v3944_v23, %v3960_v35 }
  0x31   : > { %v397_v40 = vmul.f32 %v3944_v23, %v3384_v36 }
  0x32   : > { %v434_v42 = vsel %vm250_vm0, %v398_v1, 0.0 }
  0x37   : > { %295 = vadd.xlane.f32.xlu2 %v294_v43  ;;  %292 = vadd.xlane.f32.xlu1 %v291_v44  ;;  %v431_v43 = vsel %vm254_vm1, %v397_v40, 0.0  ;;  %v428_v44 = vsel %vm250_vm0, %v396_v41, 0.0 }
  0x38   : > { %289 = vadd.xlane.f32.xlu0 %v288_v45  ;;  %v3388_v45 = vld [vmem:[%s3821_s25 + $0x48] sm:$0x3f] }
  0x39   : > { %v401_v49 = vmul.f32 %v3944_v23, %v3388_v45 }
  0x3f   : > { %304 = vadd.xlane.f32.xlu2 %v303_v52  ;;  %301 = vadd.xlane.f32.xlu1 %v300_v53  ;;  %v443_v52 = vsel %vm254_vm1, %v401_v49, 0.0  ;;  %v440_v53 = vsel %vm250_vm0, %v400_v50, 0.0  ;;  %v3402_v49 = vld [vmem:[%s3821_s25 + $0xb8] sm:$0x3f]  ;;  %v4051_v50 = vld [vmem:[%s3821_s25 + $0xb0] sm:$0xff] }
  0x40   : > { %298 = vadd.xlane.f32.xlu0 %v297_v54  ;;  %v437_v54 = vsel %vm254_vm1, %v399_v51, 0.0  ;;  %v416_v51 = vmul.f32 %v3944_v23, %v4047_v48 }
  0x47   : > { %313 = vadd.xlane.f32.xlu2 %v312_v61  ;;  %310 = vadd.xlane.f32.xlu1 %v309_v62  ;;  %v403_v61 = vmul.f32 %v3944_v23, %v3390_v58  ;;  %v402_v62 = vmul.f32 %v3944_v23, %v3991_v59 }
  0x48   : > { %307 = vadd.xlane.f32.xlu0 %v306_v63  ;;  %v452_v63 = vsel %vm250_vm0, %v404_v60, 0.0 }
  0x49   : > { %v449_v4 = vsel %vm254_vm1, %v403_v61, 0.0  ;;  %v446_v6 = vsel %vm250_vm0, %v402_v62, 0.0  ;;  %v488_v61 = vsel %vm250_vm0, %v416_v51, 0.0  ;;  %v535_v51 = vld [vmem:[%s3821_s25 + $0x9] sm:$0x3f] }
  0x4f   : > { %322 = vadd.xlane.f32.xlu2 %v321_v10  ;;  %319 = vadd.xlane.f32.xlu1 %v318_v11  ;;  %v407_v10 = vmul.f32 %v3944_v23, %v3394_v7  ;;  %v406_v11 = vmul.f32 %v3944_v23, %v4003_v8  ;;  %v3404_v7 = vld [vmem:[%s3821_s25 + $0xc8] sm:$0x3f] }
  0x50   : > { %316 = vadd.xlane.f32.xlu0 %v315_v12  ;;  %v405_v12 = vmul.f32 %v3944_v23, %v3392_v9 }
  0x51   : > { %v461_v13 = vsel %vm254_vm1, %v407_v10, 0.0  ;;  %v458_v14 = vsel %vm250_vm0, %v406_v11, 0.0  ;;  %v417_v11 = vmul.f32 %v3944_v23, %v3404_v7 }
  0x52   : > { %v455_v17 = vsel %vm254_vm1, %v405_v12, 0.0 }
  0x57   : > { %331 = vadd.xlane.f32.xlu2 %v330_v20  ;;  %328 = vadd.xlane.f32.xlu1 %v327_v22  ;;  %v4018_v20 = vld [vmem:[%s3821_s25 + $0x80] sm:$0xff]  ;;  %v410_v22 = vmul.f32 %v3944_v23, %v4014_v18 }
  0x58   : > { %325 = vadd.xlane.f32.xlu0 %v324_v24  ;;  %v409_v24 = vmul.f32 %v3944_v23, %v3396_v19  ;;  %v408_v25 = vmul.f32 %v3944_v23, %v4018_v20 }
  0x59   : > { %v470_v27 = vsel %vm250_vm0, %v410_v22, 0.0  ;;  %v4084_v22 = vld [vmem:[#allocation3 + $0x2] ss:$0 sm:$0xff] }
  0x5a   : > { %v467_v28 = vsel %vm254_vm1, %v409_v24, 0.0  ;;  %v464_v30 = vsel %vm250_vm0, %v408_v25, 0.0  ;;  %v491_v24 = vsel %vm254_vm1, %v417_v11, 0.0  ;;  %v534_v25 = vld [vmem:[%s3821_s25 + $0x1] sm:$0xff] }
  0x5f   : > { %426 = vadd.xlane.f32.xlu2 %v425_v32  ;;  %423 = vadd.xlane.f32.xlu1 %v422_v33  ;;  %v4030_v32 = vld [vmem:[%s3821_s25 + $0xa0] sm:$0xff]  ;;  %v3398_v33 = vld [vmem:[%s3821_s25 + $0x98] sm:$0x3f] }
  0x60   : > { %334 = vadd.xlane.f32.xlu0 %v333_v34  ;;  %v413_v34 = vmul.f32 %v3944_v23, %v3400_v31  ;;  %v412_v36 = vmul.f32 %v3944_v23, %v4030_v32  ;;  %v411_v1 = vmul.f32 %v3944_v23, %v3398_v33 }
  0x62   : > { %v473_v45 = vsel %vm254_vm1, %v411_v1, 0.0 }
  0x67   : > { %435 = vadd.xlane.f32.xlu2 %v434_v42  ;;  %432 = vadd.xlane.f32.xlu1 %v431_v43  ;;  %v479_v43 = vsel %vm254_vm1, %v413_v34, 0.0 }
  0x68   : > { %429 = vadd.xlane.f32.xlu0 %v428_v44  ;;  %v476_v44 = vsel %vm250_vm0, %v412_v36, 0.0 }
  0x6f   : > { %444 = vadd.xlane.f32.xlu2 %v443_v52  ;;  %441 = vadd.xlane.f32.xlu1 %v440_v53  ;;  %v415_v52 = vmul.f32 %v3944_v23, %v3402_v49  ;;  %v414_v53 = vmul.f32 %v3944_v23, %v4051_v50  ;;  %v537_v49 = vld [vmem:[%s3821_s25 + $0x19] sm:$0x3f] }
  0x70   : > { %438 = vadd.xlane.f32.xlu0 %v437_v54 }
  0x71   : > { %v485_v62 = vsel %vm254_vm1, %v415_v52, 0.0  ;;  %v566_v52 = vmul.f32 %v4084_v22, %v3832_v3  ;;  %v570_v3 = vmul.f32 %v4084_v22, %v3824_v0  ;;  %v541_v0 = vld [vmem:[%s3821_s25 + $0x39] sm:$0x3f] }
  0x73   : > { %v598_v7 = vsel %vm250_vm0, %v566_v52, 0.0 }
  0x77   : > { %453 = vadd.xlane.f32.xlu2 %v452_v63  ;;  %450 = vadd.xlane.f32.xlu1 %v449_v4  ;;  %v482_v63 = vsel %vm250_vm0, %v414_v53, 0.0  ;;  %v3406_v4 = vld [vmem:[%s3821_s25 + $0xd8] sm:$0x3f]  ;;  %v565_v53 = vmul.f32 %v4084_v22, %v535_v51 }
  0x78   : > { %447 = vadd.xlane.f32.xlu0 %v446_v6  ;;  %v4069_v6 = vld [vmem:[%s3821_s25 + $0xd0] sm:$0xff]  ;;  %v419_v9 = vmul.f32 %v3944_v23, %v3406_v4 }
  0x79   : > { %v418_v10 = vmul.f32 %v3944_v23, %v4069_v6 }
  0x7b   : > { %v494_v19 = vsel %vm250_vm0, %v418_v10, 0.0  ;;  %v539_v10 = vld [vmem:[%s3821_s25 + $0x29] sm:$0x3f] }
  0x7c   : > { %v569_v11 = vmul.f32 %v4084_v22, %v539_v10 }
  0x7f   : > { %462 = vadd.xlane.f32.xlu2 %v461_v13  ;;  %459 = vadd.xlane.f32.xlu1 %v458_v14 }
  0x80   : > { %456 = vadd.xlane.f32.xlu0 %v455_v17  ;;  %v497_v17 = vsel %vm254_vm1, %v419_v9, 0.0  ;;  %v595_v9 = vsel %vm254_vm1, %v565_v53, 0.0  ;;  %v545_v53 = vld [vmem:[%s3821_s25 + $0x59] sm:$0x3f] }
  0x87   : > { %471 = vadd.xlane.f32.xlu2 %v470_v27  ;;  %468 = vadd.xlane.f32.xlu1 %v467_v28  ;;  %v3408_v27 = vld [vmem:[%s3821_s25 + $0xe8] sm:$0x3f]  ;;  %v3407_v28 = vld [vmem:[%s3821_s25 + $0xe0] sm:$0xff] }
  0x88   : > { %465 = vadd.xlane.f32.xlu0 %v464_v30  ;;  %v564_v30 = vmul.f32 %v4084_v22, %v534_v25  ;;  %v421_v31 = vmul.f32 %v3944_v23, %v3408_v27  ;;  %v420_v33 = vmul.f32 %v3944_v23, %v3407_v28  ;;  %v567_v23 = vmul.f32 %v4084_v22, %v537_v49 }
  0x89   : > { %v610_v27 = vsel %vm250_vm0, %v570_v3, 0.0  ;;  %v607_v28 = vsel %vm254_vm1, %v569_v11, 0.0 }
  0x8a   : > { %v4037_v40 = vpop.xlane.xlu2 %265  ;;  %v4039_v41 = vpop.xlane.xlu1 %259  ;;  %v601_v4 = vsel %vm254_vm1, %v567_v23, 0.0 }
  0x8b   : > { %v4041_v42 = vpop.xlane.xlu0 %252 }
  0x8f   : > { %480 = vadd.xlane.f32.xlu2 %v479_v43  ;;  %477 = vadd.xlane.f32.xlu1 %v476_v44  ;;  %v592_v43 = vsel %vm250_vm0, %v564_v30, 0.0  ;;  %v503_v44 = vsel %vm254_vm1, %v421_v31, 0.0  ;;  %v543_v31 = vld [vmem:[%s3821_s25 + $0x49] sm:$0x3f] }
  0x90   : > { %474 = vadd.xlane.f32.xlu0 %v473_v45  ;;  %v500_v45 = vsel %vm250_vm0, %v420_v33, 0.0  ;;  %v572_v33 = vmul.f32 %v4084_v22, %v3857_v21  ;;  %v576_v21 = vmul.f32 %v4084_v22, %v3869_v29  ;;  %v547_v29 = vld [vmem:[%s3821_s25 + $0x69] sm:$0x3f] }
  0x92   : > { %v4058_v54 = vpop.xlane.xlu2 %268  ;;  %v4060_v58 = vpop.xlane.xlu1 %262  ;;  %v616_v23 = vsel %vm250_vm0, %v572_v33, 0.0  ;;  %v628_v11 = vsel %vm250_vm0, %v576_v21, 0.0  ;;  %v580_v21 = vmul.f32 %v4084_v22, %v3880_v37 }
  0x93   : > { %v4062_v60 = vpop.xlane.xlu0 %256 }
  0x97   : > { %489 = vadd.xlane.f32.xlu2 %v488_v61  ;;  %486 = vadd.xlane.f32.xlu1 %v485_v62 }
  0x98   : > { %483 = vadd.xlane.f32.xlu0 %v482_v63 }
  0x9a   : > { %v4076_v12 = vpop.xlane.xlu2 %277  ;;  %v4078_v13 = vpop.xlane.xlu1 %274 }
  0x9b   : > { %v4080_v14 = vpop.xlane.xlu0 %271 }
  0x9f   : > { %498 = vadd.xlane.f32.xlu2 %v497_v17  ;;  %495 = vadd.xlane.f32.xlu1 %v494_v19  ;;  %v568_v17 = vmul.f32 %v4084_v22, %v3829_v2  ;;  %v573_v2 = vmul.f32 %v4084_v22, %v543_v31  ;;  %v577_v31 = vmul.f32 %v4084_v22, %v547_v29  ;;  %v555_v29 = vld [vmem:[%s3821_s25 + $0xa9] sm:$0x3f] }
  0xa0   : > { %492 = vadd.xlane.f32.xlu0 %v491_v24  ;;  %v585_v37 = vmul.f32 %v4084_v22, %v555_v29 }
  0xa1   : > { %v604_v30 = vsel %vm250_vm0, %v568_v17, 0.0  ;;  %v619_v51 = vsel %vm254_vm1, %v573_v2, 0.0 }
  0xa2   : > { %v4093_v34 = vpop.xlane.xlu2 %286  ;;  %v4095_v36 = vpop.xlane.xlu1 %283 }
  0xa3   : > { %v4097_v1 = vpop.xlane.xlu0 %280 }
  0xa7   : > { %593 = vadd.xlane.f32.xlu2 %v592_v43  ;;  %504 = vadd.xlane.f32.xlu1 %v503_v44  ;;  %v571_v43 = vmul.f32 %v4084_v22, %v541_v0 }
  0xa8   : > { %501 = vadd.xlane.f32.xlu0 %v500_v45 }
  0xa9   : > { %v613_v52 = vsel %vm254_vm1, %v571_v43, 0.0 }
  0xaa   : > { %v4108_v61 = vpop.xlane.xlu2 %295  ;;  %v4110_v62 = vpop.xlane.xlu1 %292 }
  0xab   : > { %v4112_v63 = vpop.xlane.xlu0 %289 }
  0xaf   : > { %602 = vadd.xlane.f32.xlu2 %v601_v4  ;;  %599 = vadd.xlane.f32.xlu1 %v598_v7  ;;  %v575_v4 = vmul.f32 %v4084_v22, %v545_v53  ;;  %v574_v7 = vmul.f32 %v4084_v22, %v3850_v16 }
  0xb0   : > { %596 = vadd.xlane.f32.xlu0 %v595_v9 }
  0xb1   : > { %v625_v17 = vsel %vm254_vm1, %v575_v4, 0.0 }
  0xb2   : > { %v4123_v19 = vpop.xlane.xlu2 %304  ;;  %v4125_v24 = vpop.xlane.xlu1 %301 }
  0xb3   : > { %7025 = vst [vmem:[#allocation6_spill] sm:$0xff] %v4123_v19  ;;  %v4127_v25 = vpop.xlane.xlu0 %298  ;;  %v4527_v19 = vstv %s189_s26 }
  0xb4   : > { %7026 = vst [vmem:[#allocation7_spill] sm:$0xff] %v4125_v24 }
  0xb5   : > { %7078 = vst [vmem:[#allocation59_spill] sm:$0xff] %v4527_v19 }
  0xb7   : > { %611 = vadd.xlane.f32.xlu2 %v610_v27  ;;  %608 = vadd.xlane.f32.xlu1 %v607_v28  ;;  %v622_v27 = vsel %vm250_vm0, %v574_v7, 0.0  ;;  %v549_v28 = vld [vmem:[%s3821_s25 + $0x79] sm:$0x3f] }
  0xb8   : > { %605 = vadd.xlane.f32.xlu0 %v604_v30  ;;  %v579_v16 = vmul.f32 %v4084_v22, %v549_v28  ;;  %v578_v30 = vmul.f32 %v4084_v22, %v3884_v39  ;;  %v582_v39 = vmul.f32 %v4084_v22, %v3896_v47  ;;  %v640_v28 = vsel %vm250_vm0, %v580_v21, 0.0  ;;  %v553_v47 = vld [vmem:[%s3821_s25 + $0x99] sm:$0x3f] }
  0xba   : > { %v4138_v44 = vpop.xlane.xlu2 %313  ;;  %v4140_v45 = vpop.xlane.xlu1 %310  ;;  %v637_v43 = vsel %vm254_vm1, %v579_v16, 0.0  ;;  %v584_v16 = vmul.f32 %v4084_v22, %v3911_v57  ;;  %v588_v57 = vmul.f32 %v4084_v22, %v3923_v5  ;;  %v559_v5 = vld [vmem:[%s3821_s25 + $0xc9] sm:$0x3f] }
  0xbb   : > { %7027 = vst [vmem:[#allocation8_spill] sm:$0xff] %v4138_v44  ;;  %v4142_v49 = vpop.xlane.xlu0 %307 }
  0xbc   : > { %7028 = vst [vmem:[#allocation9_spill] sm:$0xff] %v4140_v45 }
  0xbd   : > { %7029 = vst [vmem:[#allocation10_spill] sm:$0xff] %v4142_v49 }
  0xbf   : > { %620 = vadd.xlane.f32.xlu2 %v619_v51  ;;  %617 = vadd.xlane.f32.xlu1 %v616_v23  ;;  %v634_v51 = vsel %vm250_vm0, %v578_v30, 0.0  ;;  %v631_v23 = vsel %vm254_vm1, %v577_v31, 0.0  ;;  %v583_v30 = vmul.f32 %v4084_v22, %v553_v47  ;;  %v664_v47 = vsel %vm250_vm0, %v588_v57, 0.0 }
  0xc0   : > { %614 = vadd.xlane.f32.xlu0 %v613_v52  ;;  %v551_v52 = vld [vmem:[%s3821_s25 + $0x89] sm:$0x3f] }
  0xc1   : > { %v581_v53 = vmul.f32 %v4084_v22, %v551_v52  ;;  %v652_v52 = vsel %vm250_vm0, %v584_v16, 0.0 }
  0xc2   : > { %v4153_v9 = vpop.xlane.xlu2 %322  ;;  %v4155_v10 = vpop.xlane.xlu1 %319 }
  0xc3   : > { %7030 = vst [vmem:[#allocation11_spill] sm:$0xff] %v4153_v9  ;;  %v4157_v3 = vpop.xlane.xlu0 %316 }
  0xc4   : > { %7031 = vst [vmem:[#allocation12_spill] sm:$0xff] %v4155_v10 }
  0xc5   : > { %7032 = vst [vmem:[#allocation13_spill] sm:$0xff] %v4157_v3 }
  0xc7   : > { %629 = vadd.xlane.f32.xlu2 %v628_v11  ;;  %626 = vadd.xlane.f32.xlu1 %v625_v17  ;;  %v646_v17 = vsel %vm250_vm0, %v582_v39, 0.0  ;;  %v649_v39 = vsel %vm254_vm1, %v583_v30, 0.0  ;;  %v561_v30 = vld [vmem:[%s3821_s25 + $0xd9] sm:$0x3f] }
  0xc8   : > { %623 = vadd.xlane.f32.xlu0 %v622_v27  ;;  %v643_v27 = vsel %vm254_vm1, %v581_v53, 0.0  ;;  %v557_v53 = vld [vmem:[%s3821_s25 + $0xb9] sm:$0x3f] }
  0xc9   : > { %v587_v21 = vmul.f32 %v4084_v22, %v557_v53 }
  0xca   : > { %v4168_v0 = vpop.xlane.xlu2 %331  ;;  %v4170_v2 = vpop.xlane.xlu1 %328 }
  0xcb   : > { %7033 = vst [vmem:[#allocation14_spill] sm:$0xff] %v4168_v0  ;;  %v4172_v33 = vpop.xlane.xlu0 %325 }
  0xcc   : > { %7034 = vst [vmem:[#allocation15_spill] sm:$0xff] %v4170_v2 }
  0xcd   : > { %7035 = vst [vmem:[#allocation16_spill] sm:$0xff] %v4172_v33 }
  0xcf   : > { %638 = vadd.xlane.f32.xlu2 %v637_v43  ;;  %635 = vadd.xlane.f32.xlu1 %v634_v51 }
  0xd0   : > { %632 = vadd.xlane.f32.xlu0 %v631_v23  ;;  %v655_v23 = vsel %vm254_vm1, %v585_v37, 0.0  ;;  %v661_v37 = vsel %vm254_vm1, %v587_v21, 0.0 }
  0xd2   : > { %v4183_v4 = vpop.xlane.xlu2 %426  ;;  %v4185_v7 = vpop.xlane.xlu1 %423 }
  0xd3   : > { %v4187_v11 = vpop.xlane.xlu0 %334 }
  0xd4   : > { %7036 = vst [vmem:[#allocation17_spill] sm:$0xff] %v4187_v11 }
  0xd7   : > { %647 = vadd.xlane.f32.xlu2 %v646_v17  ;;  %644 = vadd.xlane.f32.xlu1 %v643_v27  ;;  %v586_v17 = vmul.f32 %v4084_v22, %v3907_v55  ;;  %v591_v55 = vmul.f32 %v4084_v22, %v561_v30 }
  0xd8   : > { %641 = vadd.xlane.f32.xlu0 %v640_v28 }
  0xd9   : > { %v658_v16 = vsel %vm250_vm0, %v586_v17, 0.0  ;;  %v673_v21 = vsel %vm254_vm1, %v591_v55, 0.0 }
  0xda   : > { %v4198_v31 = vpop.xlane.xlu2 %435  ;;  %v4200_v43 = vpop.xlane.xlu1 %432 }
  0xdb   : > { %v4202_v51 = vpop.xlane.xlu0 %429 }
  0xdf   : > { %656 = vadd.xlane.f32.xlu2 %v655_v23  ;;  %653 = vadd.xlane.f32.xlu1 %v652_v52  ;;  %v590_v23 = vmul.f32 %v4084_v22, %v3936_v15  ;;  %v589_v52 = vmul.f32 %v4084_v22, %v559_v5  ;;  %v704_v15 = vld [vmem:[%s3821_s25] sm:$0xff] }
  0xe0   : > { %650 = vadd.xlane.f32.xlu0 %v649_v39 }
  0xe1   : > { %v670_v17 = vsel %vm250_vm0, %v590_v23, 0.0 }
  0xe2   : > { %v4213_v27 = vpop.xlane.xlu2 %444  ;;  %v4215_v28 = vpop.xlane.xlu1 %441 }
  0xe3   : > { %v4217_v29 = vpop.xlane.xlu0 %438 }
  0xe7   : > { %665 = vadd.xlane.f32.xlu2 %v664_v47  ;;  %662 = vadd.xlane.f32.xlu1 %v661_v37  ;;  %v4236_v47 = vld [vmem:[#allocation3 + $0x3] ss:$0 sm:$0xff]  ;;  %v667_v37 = vsel %vm254_vm1, %v589_v52, 0.0 }
  0xe8   : > { %659 = vadd.xlane.f32.xlu0 %v658_v16  ;;  %v705_v16 = vld [vmem:[%s3821_s25 + $0x8] sm:$0x3f]  ;;  %v736_v22 = vmul.f32 %v4236_v47, %v3949_v26  ;;  %v734_v5 = vmul.f32 %v4236_v47, %v704_v15 }
  0xe9   : > { %v735_v30 = vmul.f32 %v4236_v47, %v705_v16  ;;  %v738_v16 = vmul.f32 %v4236_v47, %v3964_v38  ;;  %v742_v38 = vmul.f32 %v4236_v47, %v3976_v46  ;;  %v713_v46 = vld [vmem:[%s3821_s25 + $0x48] sm:$0x3f] }
  0xea   : > { %v4228_v39 = vpop.xlane.xlu2 %453  ;;  %v4230_v53 = vpop.xlane.xlu1 %450  ;;  %v768_v52 = vsel %vm250_vm0, %v736_v22, 0.0 }
  0xeb   : > { %v4232_v57 = vpop.xlane.xlu0 %447  ;;  %v765_v33 = vsel %vm254_vm1, %v735_v30, 0.0 }
  0xef   : > { %674 = vadd.xlane.f32.xlu2 %v673_v21  ;;  %671 = vadd.xlane.f32.xlu1 %v670_v17  ;;  %v762_v21 = vsel %vm250_vm0, %v734_v5, 0.0  ;;  %v709_v17 = vld [vmem:[%s3821_s25 + $0x28] sm:$0x3f] }
  0xf0   : > { %668 = vadd.xlane.f32.xlu0 %v667_v37  ;;  %v707_v37 = vld [vmem:[%s3821_s25 + $0x18] sm:$0x3f]  ;;  %v739_v26 = vmul.f32 %v4236_v47, %v709_v17 }
  0xf1   : > { %v737_v15 = vmul.f32 %v4236_v47, %v707_v37  ;;  %v740_v37 = vmul.f32 %v4236_v47, %v3960_v35 }
  0xf2   : > { %v4245_v55 = vpop.xlane.xlu2 %462  ;;  %v4247_v23 = vpop.xlane.xlu1 %459  ;;  %v777_v5 = vsel %vm254_vm1, %v739_v26, 0.0 }
  0xf3   : > { %v4249_v11 = vpop.xlane.xlu0 %456 }
  0xf7   : > { %769 = vadd.xlane.f32.xlu2 %v768_v52  ;;  %766 = vadd.xlane.f32.xlu1 %v765_v33  ;;  %v774_v52 = vsel %vm250_vm0, %v738_v16, 0.0  ;;  %v771_v33 = vsel %vm254_vm1, %v737_v15, 0.0  ;;  %v786_v15 = vsel %vm250_vm0, %v742_v38, 0.0 }
  0xf8   : > { %763 = vadd.xlane.f32.xlu0 %v762_v21  ;;  %v711_v21 = vld [vmem:[%s3821_s25 + $0x38] sm:$0x3f] }
  0xf9   : > { %v741_v17 = vmul.f32 %v4236_v47, %v711_v21  ;;  %v744_v21 = vmul.f32 %v4236_v47, %v3991_v59  ;;  %v748_v59 = vmul.f32 %v4236_v47, %v4003_v8  ;;  %v719_v8 = vld [vmem:[%s3821_s25 + $0x78] sm:$0x3f] }
  0xfa   : > { %v4260_v2 = vpop.xlane.xlu2 %471  ;;  %v4262_v22 = vpop.xlane.xlu1 %468 }
  0xfb   : > { %7037 = vst [vmem:[#allocation18_spill] sm:$0xff] %v4260_v2  ;;  %v4264_v30 = vpop.xlane.xlu0 %465 }
  0xff   : > { %778 = vadd.xlane.f32.xlu2 %v777_v5  ;;  %775 = vadd.xlane.f32.xlu1 %v774_v52  ;;  %v783_v5 = vsel %vm254_vm1, %v741_v17, 0.0  ;;  %v780_v52 = vsel %vm250_vm0, %v740_v37, 0.0 }
 0x100   : > { %772 = vadd.xlane.f32.xlu0 %v771_v33  ;;  %v715_v33 = vld [vmem:[%s3821_s25 + $0x58] sm:$0x3f] }
 0x101   : > { %v745_v35 = vmul.f32 %v4236_v47, %v715_v33 }
 0x102   : > { %v4275_v2 = vpop.xlane.xlu2 %480  ;;  %v4277_v26 = vpop.xlane.xlu1 %477 }
 0x103   : > { %7038 = vst [vmem:[#allocation19_spill] sm:$0xff] %v4275_v2  ;;  %v4279_v16 = vpop.xlane.xlu0 %474  ;;  %v795_v37 = vsel %vm254_vm1, %v745_v35, 0.0 }
 0x104   : > { %7039 = vst [vmem:[#allocation20_spill] sm:$0xff] %v4277_v26  ;;  %v743_v26 = vmul.f32 %v4236_v47, %v713_v46  ;;  %v746_v46 = vmul.f32 %v4236_v47, %v3987_v56 }
 0x105   : > { %7040 = vst [vmem:[#allocation21_spill] sm:$0xff] %v4279_v16 }
 0x107   : > { %787 = vadd.xlane.f32.xlu2 %v786_v15  ;;  %784 = vadd.xlane.f32.xlu1 %v783_v5  ;;  %v792_v15 = vsel %vm250_vm0, %v744_v21, 0.0  ;;  %v789_v5 = vsel %vm254_vm1, %v743_v26, 0.0  ;;  %v804_v26 = vsel %vm250_vm0, %v748_v59, 0.0 }
 0x108   : > { %781 = vadd.xlane.f32.xlu0 %v780_v52  ;;  %v717_v52 = vld [vmem:[%s3821_s25 + $0x68] sm:$0x3f] }
 0x109   : > { %v747_v33 = vmul.f32 %v4236_v47, %v717_v52  ;;  %v750_v52 = vmul.f32 %v4236_v47, %v4018_v20  ;;  %v754_v20 = vmul.f32 %v4236_v47, %v4030_v32  ;;  %v725_v32 = vld [vmem:[%s3821_s25 + $0xa8] sm:$0x3f] }
 0x10a   : > { %v4290_v16 = vpop.xlane.xlu2 %489  ;;  %v4292_v38 = vpop.xlane.xlu1 %486 }
 0x10b   : > { %7041 = vst [vmem:[#allocation22_spill] sm:$0xff] %v4290_v16  ;;  %v4294_v17 = vpop.xlane.xlu0 %483 }
 0x10c   : > { %7042 = vst [vmem:[#allocation23_spill] sm:$0xff] %v4292_v38 }
 0x10d   : > { %7043 = vst [vmem:[#allocation24_spill] sm:$0xff] %v4294_v17 }
 0x10f   : > { %796 = vadd.xlane.f32.xlu2 %v795_v37  ;;  %793 = vadd.xlane.f32.xlu1 %v792_v15  ;;  %v801_v37 = vsel %vm254_vm1, %v747_v33, 0.0  ;;  %v798_v15 = vsel %vm250_vm0, %v746_v46, 0.0 }
 0x110   : > { %790 = vadd.xlane.f32.xlu0 %v789_v5  ;;  %v721_v5 = vld [vmem:[%s3821_s25 + $0x88] sm:$0x3f] }
 0x111   : > { %v751_v56 = vmul.f32 %v4236_v47, %v721_v5 }
 0x112   : > { %v4305_v17 = vpop.xlane.xlu2 %498  ;;  %v4307_v35 = vpop.xlane.xlu1 %495 }
 0x113   : > { %7044 = vst [vmem:[#allocation25_spill] sm:$0xff] %v4305_v17  ;;  %v4309_v21 = vpop.xlane.xlu0 %492  ;;  %v813_v46 = vsel %vm254_vm1, %v751_v56, 0.0 }
 0x114   : > { %7045 = vst [vmem:[#allocation26_spill] sm:$0xff] %v4307_v35  ;;  %v749_v35 = vmul.f32 %v4236_v47, %v719_v8  ;;  %v752_v8 = vmul.f32 %v4236_v47, %v4014_v18 }
 0x115   : > { %7046 = vst [vmem:[#allocation27_spill] sm:$0xff] %v4309_v21 }
 0x117   : > { %805 = vadd.xlane.f32.xlu2 %v804_v26  ;;  %802 = vadd.xlane.f32.xlu1 %v801_v37  ;;  %v810_v26 = vsel %vm250_vm0, %v750_v52, 0.0  ;;  %v807_v37 = vsel %vm254_vm1, %v749_v35, 0.0  ;;  %v822_v35 = vsel %vm250_vm0, %v754_v20, 0.0 }
 0x118   : > { %799 = vadd.xlane.f32.xlu0 %v798_v15  ;;  %v723_v15 = vld [vmem:[%s3821_s25 + $0x98] sm:$0x3f] }
 0x119   : > { %v753_v5 = vmul.f32 %v4236_v47, %v723_v15  ;;  %v756_v15 = vmul.f32 %v4236_v47, %v4051_v50  ;;  %v760_v50 = vmul.f32 %v4236_v47, %v4069_v6  ;;  %v3410_v6 = vld [vmem:[%s3821_s25 + $0x19] sm:$0x3f] }
 0x11a   : > { %v4320_v21 = vpop.xlane.xlu2 %593  ;;  %v4322_v59 = vpop.xlane.xlu1 %504 }
 0x11b   : > { %7047 = vst [vmem:[#allocation28_spill] sm:$0xff] %v4322_v59  ;;  %v4324_v33 = vpop.xlane.xlu0 %501  ;;  %v828_v38 = vsel %vm250_vm0, %v756_v15, 0.0 }
 0x11c   : > { %7048 = vst [vmem:[#allocation29_spill] sm:$0xff] %v4324_v33  ;;  %v755_v33 = vmul.f32 %v4236_v47, %v725_v32 }
 0x11f   : > { %814 = vadd.xlane.f32.xlu2 %v813_v46  ;;  %811 = vadd.xlane.f32.xlu1 %v810_v26  ;;  %v819_v46 = vsel %vm254_vm1, %v753_v5, 0.0  ;;  %v816_v26 = vsel %vm250_vm0, %v752_v8, 0.0 }
 0x120   : > { %808 = vadd.xlane.f32.xlu0 %v807_v37  ;;  %v727_v37 = vld [vmem:[%s3821_s25 + $0xb8] sm:$0x3f] }
 0x121   : > { %v757_v18 = vmul.f32 %v4236_v47, %v727_v37  ;;  %v758_v37 = vmul.f32 %v4236_v47, %v4047_v48  ;;  %v731_v48 = vld [vmem:[%s3821_s25 + $0xd8] sm:$0x3f] }
 0x122   : > { %v4335_v59 = vpop.xlane.xlu2 %602  ;;  %v4337_v56 = vpop.xlane.xlu1 %599 }
 0x123   : > { %v4339_v52 = vpop.xlane.xlu0 %596  ;;  %v831_v8 = vsel %vm254_vm1, %v757_v18, 0.0 }
 0x127   : > { %823 = vadd.xlane.f32.xlu2 %v822_v35  ;;  %820 = vadd.xlane.f32.xlu1 %v819_v46  ;;  %v825_v35 = vsel %vm254_vm1, %v755_v33, 0.0  ;;  %v729_v46 = vld [vmem:[%s3821_s25 + $0xc8] sm:$0x3f]  ;;  %v840_v33 = vsel %vm250_vm0, %v760_v50, 0.0 }
 0x128   : > { %817 = vadd.xlane.f32.xlu0 %v816_v26  ;;  %v759_v26 = vmul.f32 %v4236_v47, %v729_v46  ;;  %v4378_v46 = vld [vmem:[%s3821_s25 + $0x11] sm:$0xff] }
 0x129   : > { %7049 = vst [vmem:[#allocation30_spill] sm:$0xff] %v4378_v46 }
 0x12a   : > { %v4350_v17 = vpop.xlane.xlu2 %611  ;;  %v4352_v20 = vpop.xlane.xlu1 %608 }
 0x12b   : > { %v4354_v5 = vpop.xlane.xlu0 %605 }
 0x12f   : > { %832 = vadd.xlane.f32.xlu2 %v831_v8  ;;  %829 = vadd.xlane.f32.xlu1 %v828_v38  ;;  %v837_v8 = vsel %vm254_vm1, %v759_v26, 0.0  ;;  %v4373_v38 = vld [vmem:[#allocation3 + $0x4] ss:$0 sm:$0xff]  ;;  %v761_v26 = vmul.f32 %v4236_v47, %v731_v48 }
 0x130   : > { %826 = vadd.xlane.f32.xlu0 %v825_v35  ;;  %v834_v35 = vsel %vm250_vm0, %v758_v37, 0.0  ;;  %v1004_v16 = vmul.f32 %v4373_v38, %v3410_v6  ;;  %v1003_v50 = vmul.f32 %v4373_v38, %v4378_v46  ;;  %v4399_v6 = vld [vmem:[%s3821_s25 + $0x21] sm:$0xff] }
 0x131   : > { %7051 = vst [vmem:[#allocation32_spill] sm:$0xff] %v4399_v6  ;;  %v1005_v48 = vmul.f32 %v4373_v38, %v4399_v6 }
 0x132   : > { %v4365_v32 = vpop.xlane.xlu2 %620  ;;  %v4367_v18 = vpop.xlane.xlu1 %617  ;;  %v1034_v3 = vsel %vm254_vm1, %v1004_v16, 0.0  ;;  %v1031_v10 = vsel %vm250_vm0, %v1003_v50, 0.0 }
 0x133   : > { %v4369_v15 = vpop.xlane.xlu0 %614 }
 0x137   : > { %841 = vadd.xlane.f32.xlu2 %v840_v33  ;;  %838 = vadd.xlane.f32.xlu1 %v837_v8  ;;  %v843_v33 = vsel %vm254_vm1, %v761_v26, 0.0  ;;  %v4395_v8 = vld [vmem:[%s3821_s25 + $0x31] sm:$0xff] }
 0x138   : > { %835 = vadd.xlane.f32.xlu0 %v834_v35  ;;  %7050 = vst [vmem:[#allocation31_spill] sm:$0xff] %v4395_v8  ;;  %v3412_v35 = vld [vmem:[%s3821_s25 + $0x29] sm:$0x3f]  ;;  %v1007_v47 = vmul.f32 %v4373_v38, %v4395_v8  ;;  %v4417_v8 = vld [vmem:[%s3821_s25 + $0x41] sm:$0xff] }
 0x139   : > { %v1006_v16 = vmul.f32 %v4373_v38, %v3412_v35  ;;  %7054 = vst [vmem:[#allocation35_spill] sm:$0xff] %v4417_v8  ;;  %v3414_v35 = vld [vmem:[%s3821_s25 + $0x39] sm:$0x3f]  ;;  %v1009_v49 = vmul.f32 %v4373_v38, %v4417_v8 }
 0x13a   : > { %v4385_v2 = vpop.xlane.xlu2 %629  ;;  %v4387_v37 = vpop.xlane.xlu1 %626  ;;  %v1043_v9 = vsel %vm250_vm0, %v1007_v47, 0.0  ;;  %v1008_v47 = vmul.f32 %v4373_v38, %v3414_v35 }
 0x13b   : > { %v4389_v0 = vpop.xlane.xlu0 %623  ;;  %v1049_v24 = vsel %vm250_vm0, %v1009_v49, 0.0 }
 0x13f   : > { %1035 = vadd.xlane.f32.xlu2 %v1034_v3  ;;  %1032 = vadd.xlane.f32.xlu1 %v1031_v10  ;;  %v1040_v3 = vsel %vm254_vm1, %v1006_v16, 0.0  ;;  %v1037_v10 = vsel %vm250_vm0, %v1005_v48, 0.0 }
 0x140   : > { %844 = vadd.xlane.f32.xlu0 %v843_v33  ;;  %v3416_v33 = vld [vmem:[%s3821_s25 + $0x49] sm:$0x3f] }
 0x141   : > { %v1010_v6 = vmul.f32 %v4373_v38, %v3416_v33  ;;  %v4438_v33 = vld [vmem:[%s3821_s25 + $0x51] sm:$0xff] }
 0x142   : > { %v4406_v50 = vpop.xlane.xlu2 %638  ;;  %v4408_v26 = vpop.xlane.xlu1 %635  ;;  %7059 = vst [vmem:[#allocation40_spill] sm:$0xff] %v4438_v33  ;;  %v1011_v49 = vmul.f32 %v4373_v38, %v4438_v33 }
 0x143   : > { %7052 = vst [vmem:[#allocation33_spill] sm:$0xff] %v4406_v50  ;;  %v4410_v46 = vpop.xlane.xlu0 %632  ;;  %v1052_v44 = vsel %vm254_vm1, %v1010_v6, 0.0 }
 0x144   : > { %7053 = vst [vmem:[#allocation34_spill] sm:$0xff] %v4410_v46  ;;  %v4538_v46 = vld [vmem:[%s3821_s25 + $0xd1] sm:$0xff] }
 0x145   : > { %7079 = vst [vmem:[#allocation60_spill] sm:$0xff] %v4538_v46 }
 0x147   : > { %1044 = vadd.xlane.f32.xlu2 %v1043_v9  ;;  %1041 = vadd.xlane.f32.xlu1 %v1040_v3  ;;  %v1046_v9 = vsel %vm254_vm1, %v1008_v47, 0.0  ;;  %v4434_v3 = vld [vmem:[%s3821_s25 + $0x61] sm:$0xff] }
 0x148   : > { %1038 = vadd.xlane.f32.xlu0 %v1037_v10  ;;  %7058 = vst [vmem:[#allocation39_spill] sm:$0xff] %v4434_v3  ;;  %v3418_v10 = vld [vmem:[%s3821_s25 + $0x59] sm:$0x3f]  ;;  %v1013_v35 = vmul.f32 %v4373_v38, %v4434_v3  ;;  %v4456_v3 = vld [vmem:[%s3821_s25 + $0x71] sm:$0xff] }
 0x149   : > { %v1012_v6 = vmul.f32 %v4373_v38, %v3418_v10  ;;  %7063 = vst [vmem:[#allocation44_spill] sm:$0xff] %v4456_v3  ;;  %v3420_v10 = vld [vmem:[%s3821_s25 + $0x69] sm:$0x3f] }
 0x14a   : > { %v4424_v16 = vpop.xlane.xlu2 %647  ;;  %v4426_v48 = vpop.xlane.xlu1 %644 }
 0x14b   : > { %7055 = vst [vmem:[#allocation36_spill] sm:$0xff] %v4424_v16  ;;  %v4428_v45 = vpop.xlane.xlu0 %641 }
 0x14c   : > { %7056 = vst [vmem:[#allocation37_spill] sm:$0xff] %v4426_v48  ;;  %v1061_v48 = vsel %vm250_vm0, %v1013_v35, 0.0  ;;  %v1014_v35 = vmul.f32 %v4373_v38, %v3420_v10 }
 0x14d   : > { %7057 = vst [vmem:[#allocation38_spill] sm:$0xff] %v4428_v45 }
 0x14f   : > { %1053 = vadd.xlane.f32.xlu2 %v1052_v44  ;;  %1050 = vadd.xlane.f32.xlu1 %v1049_v24  ;;  %v1058_v44 = vsel %vm254_vm1, %v1012_v6, 0.0  ;;  %v1055_v24 = vsel %vm250_vm0, %v1011_v49, 0.0 }
 0x150   : > { %1047 = vadd.xlane.f32.xlu0 %v1046_v9  ;;  %v3422_v9 = vld [vmem:[%s3821_s25 + $0x79] sm:$0x3f] }
 0x151   : > { %v1016_v33 = vmul.f32 %v4373_v38, %v3422_v9  ;;  %v4477_v9 = vld [vmem:[%s3821_s25 + $0x81] sm:$0xff] }
 0x152   : > { %v4445_v47 = vpop.xlane.xlu2 %656  ;;  %v4447_v8 = vpop.xlane.xlu1 %653  ;;  %7068 = vst [vmem:[#allocation49_spill] sm:$0xff] %v4477_v9 }
 0x153   : > { %7060 = vst [vmem:[#allocation41_spill] sm:$0xff] %v4445_v47  ;;  %v4449_v45 = vpop.xlane.xlu0 %650 }
 0x154   : > { %7061 = vst [vmem:[#allocation42_spill] sm:$0xff] %v4447_v8  ;;  %v1015_v8 = vmul.f32 %v4373_v38, %v4456_v3 }
 0x155   : > { %7062 = vst [vmem:[#allocation43_spill] sm:$0xff] %v4449_v45  ;;  %v1070_v45 = vsel %vm254_vm1, %v1016_v33, 0.0 }
 0x156   : > { %v1067_v16 = vsel %vm250_vm0, %v1015_v8, 0.0  ;;  %v1017_v8 = vmul.f32 %v4373_v38, %v4477_v9 }
 0x157   : > { %1062 = vadd.xlane.f32.xlu2 %v1061_v48  ;;  %1059 = vadd.xlane.f32.xlu1 %v1058_v44  ;;  %v1064_v48 = vsel %vm254_vm1, %v1014_v35, 0.0  ;;  %v4473_v44 = vld [vmem:[%s3821_s25 + $0x91] sm:$0xff] }
 0x158   : > { %1056 = vadd.xlane.f32.xlu0 %v1055_v24  ;;  %7067 = vst [vmem:[#allocation48_spill] sm:$0xff] %v4473_v44  ;;  %v3424_v24 = vld [vmem:[%s3821_s25 + $0x89] sm:$0x3f]  ;;  %v1019_v10 = vmul.f32 %v4373_v38, %v4473_v44  ;;  %v4495_v44 = vld [vmem:[%s3821_s25 + $0xa1] sm:$0xff] }
 0x159   : > { %v1018_v33 = vmul.f32 %v4373_v38, %v3424_v24  ;;  %7072 = vst [vmem:[#allocation53_spill] sm:$0xff] %v4495_v44  ;;  %v3426_v24 = vld [vmem:[%s3821_s25 + $0x99] sm:$0x3f] }
 0x15a   : > { %v4463_v6 = vpop.xlane.xlu2 %665  ;;  %v4465_v49 = vpop.xlane.xlu1 %662 }
 0x15b   : > { %7064 = vst [vmem:[#allocation45_spill] sm:$0xff] %v4463_v6  ;;  %v4467_v47 = vpop.xlane.xlu0 %659 }
 0x15c   : > { %7065 = vst [vmem:[#allocation46_spill] sm:$0xff] %v4465_v49  ;;  %v1079_v49 = vsel %vm250_vm0, %v1019_v10, 0.0  ;;  %v1020_v10 = vmul.f32 %v4373_v38, %v3426_v24 }
 0x15d   : > { %7066 = vst [vmem:[#allocation47_spill] sm:$0xff] %v4467_v47 }
 0x15f   : > { %1071 = vadd.xlane.f32.xlu2 %v1070_v45  ;;  %1068 = vadd.xlane.f32.xlu1 %v1067_v16  ;;  %v1076_v45 = vsel %vm254_vm1, %v1018_v33, 0.0  ;;  %v1073_v16 = vsel %vm250_vm0, %v1017_v8, 0.0 }
 0x160   : > { %1065 = vadd.xlane.f32.xlu0 %v1064_v48  ;;  %v3428_v48 = vld [vmem:[%s3821_s25 + $0xa9] sm:$0x3f] }
 0x161   : > { %v1022_v9 = vmul.f32 %v4373_v38, %v3428_v48  ;;  %v3430_v48 = vld [vmem:[%s3821_s25 + $0xb9] sm:$0x3f] }
 0x162   : > { %v4484_v35 = vpop.xlane.xlu2 %674  ;;  %v4486_v3 = vpop.xlane.xlu1 %671  ;;  %v1024_v6 = vmul.f32 %v4373_v38, %v3430_v48 }
 0x163   : > { %7069 = vst [vmem:[#allocation50_spill] sm:$0xff] %v4484_v35  ;;  %v4488_v47 = vpop.xlane.xlu0 %668  ;;  %v1021_v35 = vmul.f32 %v4373_v38, %v4495_v44  ;;  %v4516_v44 = vld [vmem:[%s3821_s25 + $0xb1] sm:$0xff] }
 0x164   : > { %7070 = vst [vmem:[#allocation51_spill] sm:$0xff] %v4486_v3 }
 0x165   : > { %7071 = vst [vmem:[#allocation52_spill] sm:$0xff] %v4488_v47  ;;  %v1088_v47 = vsel %vm254_vm1, %v1022_v9, 0.0  ;;  %v1023_v9 = vmul.f32 %v4373_v38, %v4516_v44 }
 0x166   : > { %7075 = vst [vmem:[#allocation56_spill] sm:$0xff] %v4516_v44  ;;  %v338_v44 = vadd.f32 %v4039_v41, %v4527_v19  ;;  %v342_v41 = vadd.f32 %v4080_v14, %v4527_v19 }
 0x167   : > { %1080 = vadd.xlane.f32.xlu2 %v1079_v49  ;;  %1077 = vadd.xlane.f32.xlu1 %v1076_v45  ;;  %v1085_v49 = vsel %vm250_vm0, %v1021_v35, 0.0  ;;  %v1082_v45 = vsel %vm254_vm1, %v1020_v10, 0.0  ;;  %v1091_v48 = vsel %vm250_vm0, %v1023_v9, 0.0  ;;  %v344_v9 = vadd.f32 %v4076_v12, %v4527_v19 }
 0x168   : > { %1074 = vadd.xlane.f32.xlu0 %v1073_v16  ;;  %v4512_v16 = vld [vmem:[%s3821_s25 + $0xc1] sm:$0xff]  ;;  %v345_v12 = vadd.f32 %v4097_v1, %v4527_v19 }
 0x169   : > { %7074 = vst [vmem:[#allocation55_spill] sm:$0xff] %v4512_v16  ;;  %v1025_v24 = vmul.f32 %v4373_v38, %v4512_v16  ;;  %v3434_v16 = vld [vmem:[%s3821_s25 + $0xd9] sm:$0x3f] }
 0x16a   : > { %v4502_v33 = vpop.xlane.xlu2 %769  ;;  %v4504_v8 = vpop.xlane.xlu1 %766 }
 0x16b   : > { %v4506_v3 = vpop.xlane.xlu0 %763 }
 0x16c   : > { %7073 = vst [vmem:[#allocation54_spill] sm:$0xff] %v4506_v3  ;;  %v343_v3 = vadd.f32 %v4078_v13, %v4527_v19  ;;  %v350_v13 = vadd.f32 %v4108_v61, %v4527_v19 }
 0x16f   : > { %1089 = vadd.xlane.f32.xlu2 %v1088_v47  ;;  %1086 = vadd.xlane.f32.xlu1 %v1085_v49  ;;  %v1097_v47 = vsel %vm250_vm0, %v1025_v24, 0.0  ;;  %v1094_v49 = vsel %vm254_vm1, %v1024_v6, 0.0  ;;  %v339_v6 = vadd.f32 %v4060_v58, %v4527_v19  ;;  %v3432_v24 = vld [vmem:[%s3821_s25 + $0xc9] sm:$0x3f]  ;;  %v1027_v58 = vmul.f32 %v4373_v38, %v4538_v46 }
 0x170   : > { %1083 = vadd.xlane.f32.xlu0 %v1082_v45  ;;  %v340_v45 = vadd.f32 %v4037_v40, %v4527_v19  ;;  %v337_v40 = vadd.f32 %v4062_v60, %v4527_v19  ;;  %v346_v60 = vadd.f32 %v4095_v36, %v4527_v19  ;;  %v1026_v14 = vmul.f32 %v4373_v38, %v3432_v24 }
 0x171   : > { %v508_v24 = vadd.f32 %v4202_v51, %v338_v44  ;;  %v1103_v46 = vsel %vm250_vm0, %v1027_v58, 0.0  ;;  %v4596_v44 = vld [vmem:[%s3821_s25 + $0x12] sm:$0xff] }
 0x172   : > { %v4523_v35 = vpop.xlane.xlu2 %778  ;;  %v4525_v10 = vpop.xlane.xlu1 %775  ;;  %v1100_v51 = vsel %vm254_vm1, %v1026_v14, 0.0 }
 0x173   : > { %7076 = vst [vmem:[#allocation57_spill] sm:$0xff] %v4523_v35  ;;  %v4529_v50 = vpop.xlane.xlu0 %772  ;;  %v341_v35 = vadd.f32 %v4058_v54, %v4527_v19  ;;  %v1028_v54 = vmul.f32 %v4373_v38, %v3434_v16  ;;  %v348_v16 = vadd.f32 %v4112_v63, %v4527_v19 }
 0x174   : > { %7077 = vst [vmem:[#allocation58_spill] sm:$0xff] %v4525_v10  ;;  %v336_v10 = vadd.f32 %v4041_v42, %v4527_v19  ;;  %v347_v42 = vadd.f32 %v4093_v34, %v4527_v19  ;;  %v349_v34 = vadd.f32 %v4110_v62, %v4527_v19  ;;  %v509_v62 = vadd.f32 %v4200_v43, %v339_v6  ;;  %v3435_v6 = vld [vmem:[%s3821_s25 + $0xe1] sm:$0xff] }
 0x175   : > { %v902_v43 = vlaneseq }
 0x176   : > { %v506_v61 = vadd.f32 %v4185_v7, %v336_v10  ;;  %v511_v7 = vadd.f32 %v4217_v29, %v341_v35  ;;  %v3436_v10 = vld [vmem:[%s3821_s25 + $0xe9] sm:$0x3f] }
 0x177   : > { %1098 = vadd.xlane.f32.xlu2 %v1097_v47  ;;  %1095 = vadd.xlane.f32.xlu1 %v1094_v49  ;;  %v351_v47 = vadd.f32 %v4127_v25, %v4527_v19  ;;  %v507_v49 = vadd.f32 %v4183_v4, %v337_v40  ;;  %v513_v25 = vadd.f32 %v4213_v27, %v343_v3  ;;  %v1106_v40 = vsel %vm254_vm1, %v1028_v54, 0.0  ;;  %v4590_v19 = vld [vmem:[#allocation3 + $0x5] ss:$0 sm:$0xff] }
 0x178   : > { %1092 = vadd.xlane.f32.xlu0 %v1091_v48  ;;  %v510_v48 = vadd.f32 %v4198_v31, %v340_v45  ;;  %v512_v4 = vadd.f32 %v4215_v28, %v342_v41  ;;  %v516_v31 = vadd.f32 %v4228_v39, %v346_v60  ;;  %v515_v27 = vadd.f32 %v4230_v53, %v345_v12  ;;  %v3440_v12 = vld [vmem:[%s3821_s25 + $0x2a] sm:$0x3f] }
 0x179   : > { %v514_v28 = vadd.f32 %v4232_v57, %v344_v9  ;;  %v519_v3 = vadd.f32 %v4245_v55, %v349_v34  ;;  %v518_v45 = vadd.f32 %v4247_v23, %v348_v16  ;;  %v517_v41 = vadd.f32 %v4249_v11, %v347_v42  ;;  %v7082_v34 = vld [vmem:[#allocation54_spill] sm:$0xff] }
 0x17a   : > { %v4576_v36 = vpop.xlane.xlu2 %787  ;;  %v4578_v1 = vpop.xlane.xlu1 %784  ;;  %v4606_v29 = vadd.f32 %v4262_v22, %v351_v47  ;;  %v520_v39 = vadd.f32 %v4264_v30, %v350_v13  ;;  %v676_v35 = vadd.f32 %v4320_v21, %v506_v61  ;;  %v679_v53 = vadd.f32 %v4335_v59, %v509_v62  ;;  %v3438_v47 = vld [vmem:[%s3821_s25 + $0x1a] sm:$0x3f]  ;;  %v7085_v62 = vld [vmem:[#allocation34_spill] sm:$0xff] }
 0x17b   : > { %v4584_v63 = vpop.xlane.xlu0 %781  ;;  %v1173_v57 = vmul.f32 %v4590_v19, %v4596_v44  ;;  %v1030_v55 = vmul.f32 %v4373_v38, %v3436_v10  ;;  %v678_v11 = vadd.f32 %v4337_v56, %v508_v24  ;;  %v677_v23 = vadd.f32 %v4339_v52, %v507_v49  ;;  %v7083_v49 = vld [vmem:[#allocation57_spill] sm:$0xff]  ;;  %v7084_v61 = vld [vmem:[#allocation58_spill] sm:$0xff] }
 0x17c   : > { %v4616_v22 = vand.u32 127, %v902_v43  ;;  %v1029_v30 = vmul.f32 %v4373_v38, %v3435_v6  ;;  %v682_v21 = vadd.f32 %v4350_v17, %v512_v4  ;;  %v681_v59 = vadd.f32 %v4352_v20, %v511_v7  ;;  %v4629_v17 = vld [vmem:[%s3821_s25 + $0x22] sm:$0xff] }
 0x17d   : > { %v685_v9 = vadd.f32 %v4365_v32, %v515_v27  ;;  %v684_v58 = vadd.f32 %v4367_v18, %v514_v28  ;;  %v683_v56 = vadd.f32 %v4369_v15, %v513_v25  ;;  %v688_v52 = vadd.f32 %v4385_v2, %v518_v45 }
 0x17e   : > { %7080 = vst [vmem:[#allocation61_spill] sm:$0xff] %v4616_v22  ;;  %v849_v60 = vadd.f32 %v4529_v50, %v679_v53  ;;  %v687_v20 = vadd.f32 %v4387_v37, %v517_v41  ;;  %v1201_v32 = vsel %vm250_vm0, %v1173_v57, 0.0  ;;  %v1112_v13 = vsel %vm254_vm1, %v1030_v55, 0.0  ;;  %v4666_v41 = vld [vmem:[%s3821_s25 + $0x42] sm:$0xff] }
 0x17f   : > { %1107 = vadd.xlane.f32.xlu2 %v1106_v40  ;;  %1104 = vadd.xlane.f32.xlu1 %v1103_v46  ;;  %v680_v46 = vadd.f32 %v4354_v5, %v510_v48  ;;  %v686_v5 = vadd.f32 %v4389_v0, %v516_v31  ;;  %v4636_v18 = vadd.f32 %v4408_v26, %v520_v39  ;;  %v4640_v15 = vadd.s32 4294967288, %v4616_v22 }
 0x180   : > { %1101 = vadd.xlane.f32.xlu0 %v1100_v51  ;;  %v848_v2 = vadd.f32 %v4502_v33, %v678_v11  ;;  %v1109_v50 = vsel %vm250_vm0, %v1029_v30, 0.0  ;;  %v847_v14 = vadd.f32 %v4504_v8, %v677_v23  ;;  %v846_v37 = vadd.f32 %v7082_v34, %v676_v35 }
 0x181   : > { %7081 = vst [vmem:[#allocation62_spill] sm:$0xff] %v4640_v15  ;;  %v1176_v0 = vmul.f32 %v4590_v19, %v3440_v12  ;;  %v1175_v16 = vmul.f32 %v4590_v19, %v4629_v17  ;;  %v851_v26 = vadd.f32 %v7083_v49, %v681_v59  ;;  %v850_v48 = vadd.f32 %v7084_v61, %v680_v46  ;;  %v4677_v46 = vld [vmem:[%s3821_s25 + $0x32] sm:$0xff] }
 0x182   : > { %v797_v42 = vpop.xlane.xlu2 %796  ;;  %v794_v54 = vpop.xlane.xlu1 %793  ;;  %v910_v33 = vperm.slane %v849_v60, %v4640_v15  ;;  %v689_v24 = vadd.f32 %v7085_v62, %v519_v3  ;;  %v853_v8 = vadd.f32 %v4578_v1, %v683_v56  ;;  %v852_v25 = vadd.f32 %v4584_v63, %v682_v21  ;;  %v3442_v21 = vld [vmem:[%s3821_s25 + $0x3a] sm:$0x3f] }
 0x183   : > { %v791_v38 = vpop.xlane.xlu0 %790  ;;  %v909_v4 = vperm.slane %v848_v2, %v4616_v22  ;;  %v1174_v7 = vmul.f32 %v4590_v19, %v3438_v47  ;;  %v906_v31 = vperm.slane %v847_v14, %v4640_v15  ;;  %v904_v43 = vperm.slane %v846_v37, %v4616_v22 }
 0x184   : > { %v855_v40 = vadd.f32 %v791_v38, %v685_v9  ;;  %v1210_v27 = vsel %vm254_vm1, %v1176_v0, 0.0  ;;  %v1207_v1 = vsel %vm250_vm0, %v1175_v16, 0.0  ;;  %v913_v63 = vperm.slane %v851_v26, %v4640_v15 }
 0x185   : > { %v912_v28 = vperm.slane %v850_v48, %v4616_v22  ;;  %v911_v3 = vsel %vm907_vm2, %v910_v33, %v909_v4  ;;  %v854_v45 = vadd.f32 %v4576_v36, %v684_v58  ;;  %v916_v39 = vperm.slane %v853_v8, %v4640_v15  ;;  %v3446_v48 = vld [vmem:[%s3821_s25 + $0x5a] sm:$0x3f]  ;;  %v4709_v33 = vld [vmem:[%s3821_s25 + $0x52] sm:$0xff]  ;;  %v3444_v8 = vld [vmem:[%s3821_s25 + $0x4a] sm:$0x3f] }
 0x186   : > { %v915_v35 = vperm.slane %v852_v25, %v4616_v22  ;;  %v857_v53 = vadd.f32 %v797_v42, %v687_v20  ;;  %v856_v57 = vadd.f32 %v794_v54, %v686_v5  ;;  %v919_v55 = vperm.slane %v855_v40, %v4640_v15 }
 0x187   : > { %1202 = vadd.xlane.f32.xlu2 %v1201_v32  ;;  %1113 = vadd.xlane.f32.xlu1 %v1112_v13  ;;  %v1204_v30 = vsel %vm254_vm1, %v1174_v7, 0.0  ;;  %v908_v59 = vsel %vm907_vm2, %v906_v31, %v904_v43  ;;  %v1179_v36 = vmul.f32 %v4590_v19, %v4666_v41  ;;  %v914_v9 = vsel %vm907_vm2, %v913_v63, %v912_v28  ;;  %v7086_v32 = vld [vmem:[#allocation33_spill] sm:$0xff] }
 0x188   : > { %1110 = vadd.xlane.f32.xlu0 %v1109_v50  ;;  %v949_v42 = vsel %vm948_vm3, %v911_v3, %v908_v59  ;;  %v918_v54 = vperm.slane %v854_v45, %v4616_v22  ;;  %v917_v58 = vsel %vm907_vm2, %v916_v39, %v915_v35  ;;  %v922_v56 = vperm.slane %v857_v53, %v4640_v15  ;;  %v4735_v45 = vld [vmem:[%s3821_s25 + $0x72] sm:$0xff]  ;;  %v4739_v39 = vld [vmem:[%s3821_s25 + $0x62] sm:$0xff] }
 0x189   : > { %v1178_v60 = vmul.f32 %v4590_v19, %v3442_v21  ;;  %v1177_v5 = vmul.f32 %v4590_v19, %v4677_v46  ;;  %v691_v13 = vadd.f32 %v7086_v32, %v4606_v29  ;;  %v951_v2 = vsel %vm950_vm4, %v914_v9, %v949_v42  ;;  %v7087_v35 = vld [vmem:[#allocation59_spill] sm:$0xff]  ;;  %v7088_v53 = vld [vmem:[#allocation6_spill] sm:$0xff]  ;;  %v7091_v21 = vld [vmem:[#allocation9_spill] sm:$0xff] }
 0x18a   : > { %v806_v51 = vpop.xlane.xlu2 %805  ;;  %v803_v10 = vpop.xlane.xlu1 %802  ;;  %v920_v38 = vsel %vm907_vm2, %v919_v55, %v918_v54  ;;  %v953_v37 = vsel %vm952_vm5, %v917_v58, %v951_v2  ;;  %v1219_v16 = vsel %vm250_vm0, %v1179_v36, 0.0  ;;  %v1182_v7 = vmul.f32 %v4590_v19, %v3446_v48  ;;  %v7089_v55 = vld [vmem:[#allocation7_spill] sm:$0xff]  ;;  %v7092_v36 = vld [vmem:[#allocation10_spill] sm:$0xff]  ;;  %v7102_v48 = vld [vmem:[#allocation20_spill] sm:$0xff] }
 0x18b   : > { %v800_v6 = vpop.xlane.xlu0 %799  ;;  %v859_v11 = vadd.f32 %v803_v10, %v689_v24  ;;  %v860_v50 = vadd.f32 %v806_v51, %v4636_v18  ;;  %v955_v29 = vsel %vm954_vm6, %v920_v38, %v953_v37  ;;  %v1216_v18 = vsel %vm254_vm1, %v1178_v60, 0.0  ;;  %v7093_v58 = vld [vmem:[#allocation11_spill] sm:$0xff]  ;;  %v7095_v38 = vld [vmem:[#allocation13_spill] sm:$0xff] }
 0x18c   : > { %v858_v23 = vadd.f32 %v800_v6, %v688_v52  ;;  %v921_v52 = vperm.slane %v856_v57, %v4616_v22  ;;  %v1213_v61 = vsel %vm250_vm0, %v1177_v5, 0.0  ;;  %v1181_v31 = vmul.f32 %v4590_v19, %v4709_v33  ;;  %v3448_v6 = vld [vmem:[%s3821_s25 + $0x6a] sm:$0x3f]  ;;  %v7096_v5 = vld [vmem:[#allocation14_spill] sm:$0xff] }
 0x18d   : > { %v925_v12 = vperm.slane %v859_v11, %v4640_v15  ;;  %v927_v62 = vperm.slane %v860_v50, %v4616_v22  ;;  %v1180_v51 = vmul.f32 %v4590_v19, %v3444_v8  ;;  %v1228_v63 = vsel %vm254_vm1, %v1182_v7, 0.0  ;;  %v7098_v50 = vld [vmem:[#allocation16_spill] sm:$0xff]  ;;  %v7105_v7 = vld [vmem:[#allocation23_spill] sm:$0xff] }
 0x18e   : > { %v924_v20 = vperm.slane %v858_v23, %v4616_v22  ;;  %v923_v47 = vsel %vm907_vm2, %v922_v56, %v921_v52  ;;  %v1225_v28 = vsel %vm250_vm0, %v1181_v31, 0.0  ;;  %v353_v57 = vadd.f32 %v7088_v53, %v7087_v35  ;;  %v7090_v23 = vld [vmem:[#allocation8_spill] sm:$0xff]  ;;  %v7107_v53 = vld [vmem:[#allocation25_spill] sm:$0xff] }
 0x18f   : > { %1211 = vadd.xlane.f32.xlu2 %v1210_v27  ;;  %1208 = vadd.xlane.f32.xlu1 %v1207_v1  ;;  %v957_v25 = vsel %vm956_vm7, %v923_v47, %v955_v29  ;;  %v1222_v3 = vsel %vm254_vm1, %v1180_v51, 0.0  ;;  %v352_v11 = vadd.f32 %v7089_v55, %v7087_v35  ;;  %v355_v59 = vadd.f32 %v7091_v21, %v7087_v35  ;;  %v7094_v52 = vld [vmem:[#allocation12_spill] sm:$0xff]  ;;  %v7109_v21 = vld [vmem:[#allocation27_spill] sm:$0xff] }
 0x190   : > { %1205 = vadd.xlane.f32.xlu0 %v1204_v30  ;;  %v926_v26 = vsel %vm907_vm2, %v925_v12, %v924_v20  ;;  %v356_v30 = vadd.f32 %v7090_v23, %v7087_v35  ;;  %v354_v9 = vadd.f32 %v7092_v36, %v7087_v35  ;;  %v1185_v42 = vmul.f32 %v4590_v19, %v4735_v45  ;;  %v7110_v36 = vld [vmem:[#allocation29_spill] sm:$0xff] }
 0x191   : > { %v959_v4 = vsel %vm958_vm8, %v926_v26, %v957_v25  ;;  %v1184_v54 = vmul.f32 %v4590_v19, %v3448_v6  ;;  %v359_v56 = vadd.f32 %v7093_v58, %v7087_v35  ;;  %v358_v60 = vadd.f32 %v7094_v52, %v7087_v35  ;;  %v7101_v26 = vld [vmem:[#allocation19_spill] sm:$0xff]  ;;  %v7111_v58 = vld [vmem:[#allocation36_spill] sm:$0xff] }
 0x192   : > { %v4695_v14 = vpop.xlane.xlu2 %814  ;;  %v4697_v34 = vpop.xlane.xlu1 %811  ;;  %v357_v12 = vadd.f32 %v7095_v38, %v7087_v35  ;;  %v1183_v20 = vmul.f32 %v4590_v19, %v4739_v39  ;;  %v362_v32 = vadd.f32 %v7096_v5, %v7087_v35  ;;  %v360_v37 = vadd.f32 %v7098_v50, %v7087_v35  ;;  %v7113_v38 = vld [vmem:[#allocation41_spill] sm:$0xff] }
 0x193   : > { %v809_v0 = vpop.xlane.xlu0 %808  ;;  %v1234_v51 = vsel %vm254_vm1, %v1184_v54, 0.0  ;;  %v3450_v54 = vld [vmem:[%s3821_s25 + $0x7a] sm:$0x3f] }
 0x194   : > { %v861_v49 = vadd.f32 %v809_v0, %v691_v13  ;;  %v7097_v13 = vld [vmem:[#allocation15_spill] sm:$0xff]  ;;  %v7099_v0 = vld [vmem:[#allocation17_spill] sm:$0xff]  ;;  %v527_v31 = vadd.f32 %v7105_v7, %v357_v12 }
 0x195   : > { %v361_v2 = vadd.f32 %v7097_v13, %v7087_v35  ;;  %v7114_v13 = vld [vmem:[#allocation37_spill] sm:$0xff] }
 0x196   : > { %v928_v24 = vperm.slane %v861_v49, %v4640_v15  ;;  %v7100_v49 = vld [vmem:[#allocation18_spill] sm:$0xff]  ;;  %v697_v12 = vadd.f32 %v7113_v38, %v527_v31 }
 0x197   : > { %1220 = vadd.xlane.f32.xlu2 %v1219_v16  ;;  %1217 = vadd.xlane.f32.xlu1 %v1216_v18  ;;  %v363_v16 = vadd.f32 %v7099_v0, %v7087_v35  ;;  %v522_v18 = vadd.f32 %v7100_v49, %v352_v11  ;;  %v531_v55 = vadd.f32 %v7107_v53, %v361_v2  ;;  %v7108_v11 = vld [vmem:[#allocation26_spill] sm:$0xff]  ;;  %v7117_v49 = vld [vmem:[#allocation45_spill] sm:$0xff] }
 0x198   : > { %v929_v40 = vsel %vm907_vm2, %v928_v24, %v927_v62  ;;  %1214 = vadd.xlane.f32.xlu0 %v1213_v61  ;;  %v525_v61 = vadd.f32 %v7101_v26, %v355_v59  ;;  %v524_v62 = vadd.f32 %v7102_v48, %v354_v9  ;;  %v7103_v24 = vld [vmem:[#allocation21_spill] sm:$0xff]  ;;  %v530_v23 = vadd.f32 %v7108_v11, %v360_v37  ;;  %v7115_v2 = vld [vmem:[#allocation38_spill] sm:$0xff] }
 0x199   : > { %v961_v43 = vsel %vm960_vm9, %v929_v40, %v959_v4  ;;  %v523_v8 = vadd.f32 %v7103_v24, %v353_v57  ;;  %v7104_v4 = vld [vmem:[#allocation22_spill] sm:$0xff]  ;;  %v1231_v57 = vsel %vm250_vm0, %v1183_v20, 0.0  ;;  %v529_v59 = vadd.f32 %v7109_v21, %v359_v56  ;;  %v7121_v21 = vld [vmem:[#allocation28_spill] sm:$0xff] }
 0x19a   : > { %970 = vst.msk [vmem:[%s4718_s30] sm:$0xff] %vm969_vm10, %v961_v43  ;;  %v4729_v10 = vpop.xlane.xlu2 %823  ;;  %v821_v27 = vpop.xlane.xlu1 %820  ;;  %v528_v40 = vadd.f32 %v7104_v4, %v358_v60  ;;  %v1237_v43 = vsel %vm250_vm0, %v1185_v42, 0.0  ;;  %v532_v9 = vadd.f32 %v7110_v36, %v362_v32  ;;  %v694_v52 = vadd.f32 %v7111_v58, %v524_v62  ;;  %v7112_v42 = vld [vmem:[#allocation43_spill] sm:$0xff]  ;;  %v7116_v37 = vld [vmem:[#allocation42_spill] sm:$0xff] }
 0x19b   : > { %v818_v1 = vpop.xlane.xlu0 %817  ;;  %v695_v60 = vadd.f32 %v7112_v42, %v525_v61  ;;  %v693_v20 = vadd.f32 %v7114_v13, %v523_v8  ;;  %v692_v56 = vadd.f32 %v7115_v2, %v522_v18  ;;  %v700_v26 = vadd.f32 %v7117_v49, %v530_v23  ;;  %v7118_v62 = vld [vmem:[#allocation46_spill] sm:$0xff]  ;;  %v7119_v4 = vld [vmem:[#allocation47_spill] sm:$0xff] }
 0x19c   : > { %v864_v32 = vadd.f32 %v818_v1, %v694_v52  ;;  %v1186_v48 = vmul.f32 %v4590_v19, %v3450_v54  ;;  %v699_v24 = vadd.f32 %v7118_v62, %v529_v59  ;;  %v698_v7 = vadd.f32 %v7119_v4, %v528_v40  ;;  %v7120_v1 = vld [vmem:[#allocation52_spill] sm:$0xff]  ;;  %v4820_v52 = vld [vmem:[%s3821_s25 + $0x92] sm:$0xff] }
 0x19d   : > { %v865_v50 = vadd.f32 %v821_v27, %v695_v60  ;;  %v863_v31 = vadd.f32 %v4695_v14, %v693_v20  ;;  %v862_v8 = vadd.f32 %v4697_v34, %v692_v56  ;;  %v4811_v34 = vld [vmem:[%s3821_s25 + $0xa2] sm:$0xff]  ;;  %v533_v59 = vadd.f32 %v7121_v21, %v363_v16  ;;  %v7122_v42 = vld [vmem:[#allocation51_spill] sm:$0xff]  ;;  %v7123_v20 = vld [vmem:[#allocation50_spill] sm:$0xff] }
 0x19e   : > { %v933_v40 = vperm.slane %v864_v32, %v4616_v22  ;;  %v1191_v60 = vmul.f32 %v4590_v19, %v4811_v34  ;;  %v1189_v13 = vmul.f32 %v4590_v19, %v4820_v52  ;;  %v3460_v21 = vld [vmem:[%s3821_s25 + $0xca] sm:$0x3f] }
 0x19f   : > { %1229 = vadd.xlane.f32.xlu2 %v1228_v63  ;;  %1226 = vadd.xlane.f32.xlu1 %v1225_v28  ;;  %v3452_v63 = vld [vmem:[%s3821_s25 + $0x8a] sm:$0x3f]  ;;  %v4780_v28 = vld [vmem:[%s3821_s25 + $0x82] sm:$0xff]  ;;  %v931_v36 = vperm.slane %v863_v31, %v4640_v15  ;;  %v930_v58 = vperm.slane %v862_v8, %v4616_v22  ;;  %v703_v2 = vadd.f32 %v7123_v20, %v533_v59  ;;  %v3458_v31 = vld [vmem:[%s3821_s25 + $0xba] sm:$0x3f] }
 0x1a0   : > { %1223 = vadd.xlane.f32.xlu0 %v1222_v3  ;;  %v7106_v3 = vld [vmem:[#allocation24_spill] sm:$0xff]  ;;  %v1187_v5 = vmul.f32 %v4590_v19, %v4780_v28  ;;  %v4850_v8 = vld [vmem:[%s3821_s25 + $0xb2] sm:$0xff] }
 0x1a1   : > { %v526_v6 = vadd.f32 %v7106_v3, %v356_v30  ;;  %v1188_v30 = vmul.f32 %v4590_v19, %v3452_v63  ;;  %v932_v56 = vsel %vm907_vm2, %v931_v36, %v930_v58  ;;  %v4879_v59 = vld [vmem:[%s3821_s25 + $0xc2] sm:$0xff]  ;;  %v1196_v58 = vmul.f32 %v4590_v19, %v3460_v21 }
 0x1a2   : > { %v833_v47 = vpop.xlane.xlu2 %832  ;;  %v830_v29 = vpop.xlane.xlu1 %829  ;;  %v1243_v3 = vsel %vm250_vm0, %v1187_v5, 0.0 }
 0x1a3   : > { %v827_v25 = vpop.xlane.xlu0 %826  ;;  %v696_v0 = vadd.f32 %v7116_v37, %v526_v6  ;;  %v934_v6 = vperm.slane %v865_v50, %v4640_v15  ;;  %v869_v14 = vadd.f32 %v833_v47, %v699_v24  ;;  %v868_v53 = vadd.f32 %v830_v29, %v698_v7 }
 0x1a4   : > { %v867_v61 = vadd.f32 %v827_v25, %v697_v12  ;;  %v1246_v25 = vsel %vm254_vm1, %v1188_v30, 0.0  ;;  %v702_v47 = vadd.f32 %v7122_v42, %v532_v9  ;;  %v1249_v7 = vsel %vm250_vm0, %v1189_v13, 0.0 }
 0x1a5   : > { %v935_v54 = vsel %vm907_vm2, %v934_v6, %v933_v40  ;;  %v940_v38 = vperm.slane %v869_v14, %v4640_v15  ;;  %v939_v16 = vperm.slane %v868_v53, %v4616_v22  ;;  %v1195_v42 = vmul.f32 %v4590_v19, %v4879_v59 }
 0x1a6   : > { %v937_v11 = vperm.slane %v867_v61, %v4640_v15 }
 0x1a7   : > { %1238 = vadd.xlane.f32.xlu2 %v1237_v43  ;;  %1235 = vadd.xlane.f32.xlu1 %v1234_v51  ;;  %v701_v43 = vadd.f32 %v7120_v1, %v531_v55  ;;  %v866_v51 = vadd.f32 %v4729_v10, %v696_v0  ;;  %v1240_v10 = vsel %vm254_vm1, %v1186_v48, 0.0  ;;  %v962_v0 = vsel %vm948_vm3, %v935_v54, %v932_v56  ;;  %v3456_v1 = vld [vmem:[%s3821_s25 + $0xaa] sm:$0x3f] }
 0x1a8   : > { %1232 = vadd.xlane.f32.xlu0 %v1231_v57  ;;  %v3454_v57 = vld [vmem:[%s3821_s25 + $0x9a] sm:$0x3f]  ;;  %v941_v61 = vsel %vm907_vm2, %v940_v38, %v939_v16  ;;  %v1192_v40 = vmul.f32 %v4590_v19, %v3456_v1  ;;  %v1270_v38 = vsel %vm254_vm1, %v1196_v58, 0.0  ;;  %v1267_v16 = vsel %vm250_vm0, %v1195_v42, 0.0 }
 0x1a9   : > { %v936_v29 = vperm.slane %v866_v51, %v4616_v22  ;;  %v1190_v12 = vmul.f32 %v4590_v19, %v3454_v57  ;;  %v4875_v57 = vld [vmem:[%s3821_s25 + $0xd2] sm:$0xff] }
 0x1aa   : > { %v842_v18 = vpop.xlane.xlu2 %841  ;;  %v839_v27 = vpop.xlane.xlu1 %838  ;;  %v1197_v36 = vmul.f32 %v4590_v19, %v4875_v57 }
 0x1ab   : > { %v836_v63 = vpop.xlane.xlu0 %835  ;;  %v871_v23 = vadd.f32 %v839_v27, %v701_v43  ;;  %v938_v30 = vsel %vm907_vm2, %v937_v11, %v936_v29  ;;  %v872_v50 = vadd.f32 %v842_v18, %v702_v47  ;;  %v1252_v24 = vsel %vm254_vm1, %v1190_v12, 0.0  ;;  %v3464_v12 = vld [vmem:[%s3821_s25 + $0xea] sm:$0x3f] }
 0x1ac   : > { %v870_v55 = vadd.f32 %v836_v63, %v700_v26  ;;  %v1255_v26 = vsel %vm250_vm0, %v1191_v60, 0.0  ;;  %v963_v48 = vsel %vm950_vm4, %v938_v30, %v962_v0  ;;  %v1273_v54 = vsel %vm250_vm0, %v1197_v36, 0.0  ;;  %v3463_v30 = vld [vmem:[%s3821_s25 + $0xe2] sm:$0xff] }
 0x1ad   : > { %v943_v9 = vperm.slane %v871_v23, %v4640_v15  ;;  %v945_v18 = vperm.slane %v872_v50, %v4616_v22  ;;  %v964_v43 = vsel %vm952_vm5, %v941_v61, %v963_v48  ;;  %v1199_v13 = vmul.f32 %v4590_v19, %v3463_v30  ;;  %v1314_v48 = vld [vmem:[%s3821_s25 + $0x9] sm:$0x3f]  ;;  %v7128_v30 = vld [vmem:[#allocation31_spill] sm:$0xff] }
 0x1ae   : > { %v942_v5 = vperm.slane %v870_v55, %v4616_v22 }
 0x1af   : > { %1247 = vadd.xlane.f32.xlu2 %v1246_v25  ;;  %1244 = vadd.xlane.f32.xlu1 %v1243_v3  ;;  %v1194_v25 = vmul.f32 %v4590_v19, %v3458_v31  ;;  %v1193_v3 = vmul.f32 %v4590_v19, %v4850_v8 }
 0x1b0   : > { %1241 = vadd.xlane.f32.xlu0 %v1240_v10  ;;  %v944_v4 = vsel %vm907_vm2, %v943_v9, %v942_v5  ;;  %v1258_v10 = vsel %vm254_vm1, %v1192_v40, 0.0  ;;  %v3462_v9 = vld [vmem:[%s3821_s25 + $0xda] sm:$0x3f]  ;;  %v1200_v5 = vmul.f32 %v4590_v19, %v3464_v12 }
 0x1b1   : > { %v965_v51 = vsel %vm954_vm6, %v944_v4, %v964_v43  ;;  %v1264_v23 = vsel %vm254_vm1, %v1194_v25, 0.0  ;;  %v1261_v55 = vsel %vm250_vm0, %v1193_v3, 0.0  ;;  %v1198_v20 = vmul.f32 %v4590_v19, %v3462_v9  ;;  %v7124_v19 = vld [vmem:[#allocation30_spill] sm:$0xff]  ;;  %v1316_v25 = vld [vmem:[%s3821_s25 + $0x19] sm:$0x3f] }
 0x1b2   : > { %v4837_v32 = vpop.xlane.xlu2 %1035  ;;  %v4839_v37 = vpop.xlane.xlu1 %1032  ;;  %v1282_v0 = vsel %vm254_vm1, %v1200_v5, 0.0 }
 0x1b3   : > { %v845_v49 = vpop.xlane.xlu0 %844  ;;  %v1276_v61 = vsel %vm254_vm1, %v1198_v20, 0.0 }
 0x1b4   : > { %v873_v62 = vadd.f32 %v845_v49, %v703_v2  ;;  %v1279_v49 = vsel %vm250_vm0, %v1199_v13, 0.0 }
 0x1b6   : > { %v946_v27 = vperm.slane %v873_v62, %v4640_v15  ;;  %v1313_v62 = vld [vmem:[%s3821_s25 + $0x1] sm:$0xff] }
 0x1b7   : > { %1256 = vadd.xlane.f32.xlu2 %v1255_v26  ;;  %1253 = vadd.xlane.f32.xlu1 %v1252_v24  ;;  %v4909_v26 = vld [vmem:[#allocation3 + $0x6] ss:$0 sm:$0xff] }
 0x1b8   : > { %v947_v63 = vsel %vm907_vm2, %v946_v27, %v945_v18  ;;  %1250 = vadd.xlane.f32.xlu0 %v1249_v7  ;;  %v1345_v24 = vmul.f32 %v4909_v26, %v7124_v19  ;;  %v1344_v4 = vmul.f32 %v4909_v26, %v1314_v48  ;;  %v1343_v7 = vmul.f32 %v4909_v26, %v1313_v62  ;;  %v1324_v48 = vld [vmem:[%s3821_s25 + $0x59] sm:$0x3f]  ;;  %v1322_v62 = vld [vmem:[%s3821_s25 + $0x49] sm:$0x3f] }
 0x1b9   : > { %v966_v6 = vsel %vm956_vm7, %v947_v63, %v965_v51  ;;  %v1318_v63 = vld [vmem:[%s3821_s25 + $0x29] sm:$0x3f]  ;;  %v1349_v9 = vmul.f32 %v4909_v26, %v7128_v30  ;;  %v1354_v19 = vmul.f32 %v4909_v26, %v1324_v48 }
 0x1ba   : > { %972 = vst.msk [vmem:[%s4718_s30 + $0x8] sm:$0x3f] %vm971_vm11, %v966_v6  ;;  %v4865_v14 = vpop.xlane.xlu2 %1044  ;;  %v4867_v53 = vpop.xlane.xlu1 %1041  ;;  %v1377_v1 = vsel %vm250_vm0, %v1345_v24, 0.0  ;;  %v1374_v43 = vsel %vm254_vm1, %v1344_v4, 0.0  ;;  %v1371_v51 = vsel %vm250_vm0, %v1343_v7, 0.0  ;;  %v1348_v3 = vmul.f32 %v4909_v26, %v1318_v63  ;;  %v7125_v6 = vld [vmem:[#allocation32_spill] sm:$0xff] }
 0x1bb   : > { %v4869_v11 = vpop.xlane.xlu0 %1038  ;;  %v1347_v40 = vmul.f32 %v4909_v26, %v7125_v6  ;;  %v7132_v24 = vld [vmem:[#allocation40_spill] sm:$0xff]  ;;  %v1352_v7 = vmul.f32 %v4909_v26, %v1322_v62  ;;  %v1404_v63 = vsel %vm254_vm1, %v1354_v19, 0.0  ;;  %v1326_v6 = vld [vmem:[%s3821_s25 + $0x69] sm:$0x3f] }
 0x1bc   : > { %v1386_v36 = vsel %vm254_vm1, %v1348_v3, 0.0  ;;  %v1353_v4 = vmul.f32 %v4909_v26, %v7132_v24  ;;  %v7141_v48 = vld [vmem:[#allocation49_spill] sm:$0xff] }
 0x1bd   : > { %v1383_v58 = vsel %vm250_vm0, %v1347_v40, 0.0  ;;  %v1398_v3 = vsel %vm254_vm1, %v1352_v7, 0.0  ;;  %v7136_v40 = vld [vmem:[#allocation44_spill] sm:$0xff]  ;;  %v1359_v62 = vmul.f32 %v4909_v26, %v7141_v48  ;;  %v1336_v48 = vld [vmem:[%s3821_s25 + $0xb9] sm:$0x3f] }
 0x1bf   : > { %1265 = vadd.xlane.f32.xlu2 %v1264_v23  ;;  %1262 = vadd.xlane.f32.xlu1 %v1261_v55  ;;  %v1346_v23 = vmul.f32 %v4909_v26, %v1316_v25  ;;  %v1401_v25 = vsel %vm250_vm0, %v1353_v4, 0.0 }
 0x1c0   : > { %1259 = vadd.xlane.f32.xlu0 %v1258_v10 }
 0x1c1   : > { %v1380_v42 = vsel %vm254_vm1, %v1346_v23, 0.0  ;;  %v1357_v23 = vmul.f32 %v4909_v26, %v7136_v40  ;;  %v7144_v40 = vld [vmem:[#allocation53_spill] sm:$0xff] }
 0x1c2   : > { %v4886_v47 = vpop.xlane.xlu2 %1053  ;;  %v4888_v29 = vpop.xlane.xlu1 %1050 }
 0x1c3   : > { %v4890_v60 = vpop.xlane.xlu0 %1047 }
 0x1c7   : > { %1274 = vadd.xlane.f32.xlu2 %v1273_v54  ;;  %1271 = vadd.xlane.f32.xlu1 %v1270_v38  ;;  %v1320_v54 = vld [vmem:[%s3821_s25 + $0x39] sm:$0x3f] }
 0x1c8   : > { %1268 = vadd.xlane.f32.xlu0 %v1267_v16  ;;  %v7127_v38 = vld [vmem:[#allocation35_spill] sm:$0xff]  ;;  %v1350_v12 = vmul.f32 %v4909_v26, %v1320_v54 }
 0x1c9   : > { %v1351_v16 = vmul.f32 %v4909_v26, %v7127_v38 }
 0x1ca   : > { %v4901_v2 = vpop.xlane.xlu2 %1062  ;;  %v4903_v56 = vpop.xlane.xlu1 %1059 }
 0x1cb   : > { %v4905_v50 = vpop.xlane.xlu0 %1056 }
 0x1cf   : > { %1283 = vadd.xlane.f32.xlu2 %v1282_v0  ;;  %1280 = vadd.xlane.f32.xlu1 %v1279_v49  ;;  %v1395_v0 = vsel %vm250_vm0, %v1351_v16, 0.0  ;;  %v1392_v49 = vsel %vm254_vm1, %v1350_v12, 0.0  ;;  %v1413_v12 = vsel %vm250_vm0, %v1357_v23, 0.0  ;;  %v1363_v23 = vmul.f32 %v4909_v26, %v7144_v40 }
 0x1d0   : > { %1277 = vadd.xlane.f32.xlu0 %v1276_v61  ;;  %v1389_v61 = vsel %vm250_vm0, %v1349_v9, 0.0 }
 0x1d2   : > { %v4918_v31 = vpop.xlane.xlu2 %1071  ;;  %v4920_v18 = vpop.xlane.xlu1 %1068 }
 0x1d3   : > { %v4922_v27 = vpop.xlane.xlu0 %1065 }
 0x1d7   : > { %1378 = vadd.xlane.f32.xlu2 %v1377_v1  ;;  %1375 = vadd.xlane.f32.xlu1 %v1374_v43 }
 0x1d8   : > { %1372 = vadd.xlane.f32.xlu0 %v1371_v51 }
 0x1da   : > { %v4933_v55 = vpop.xlane.xlu2 %1080  ;;  %v4935_v10 = vpop.xlane.xlu1 %1077 }
 0x1db   : > { %7126 = vst [vmem:[#allocation54_spill] sm:$0xff] %v4933_v55  ;;  %v4937_v21 = vpop.xlane.xlu0 %1074 }
 0x1df   : > { %1387 = vadd.xlane.f32.xlu2 %v1386_v36  ;;  %1384 = vadd.xlane.f32.xlu1 %v1383_v58  ;;  %v1356_v36 = vmul.f32 %v4909_v26, %v1326_v6  ;;  %v7137_v58 = vld [vmem:[#allocation39_spill] sm:$0xff] }
 0x1e0   : > { %1381 = vadd.xlane.f32.xlu0 %v1380_v42  ;;  %v1355_v42 = vmul.f32 %v4909_v26, %v7137_v58  ;;  %v1332_v6 = vld [vmem:[%s3821_s25 + $0x99] sm:$0x3f]  ;;  %v7145_v58 = vld [vmem:[#allocation48_spill] sm:$0xff] }
 0x1e1   : > { %v1410_v30 = vsel %vm254_vm1, %v1356_v36, 0.0  ;;  %v1362_v36 = vmul.f32 %v4909_v26, %v1332_v6 }
 0x1e2   : > { %v4948_v5 = vpop.xlane.xlu2 %1089  ;;  %v4950_v13 = vpop.xlane.xlu1 %1086  ;;  %v1407_v9 = vsel %vm250_vm0, %v1355_v42, 0.0  ;;  %v1361_v42 = vmul.f32 %v4909_v26, %v7145_v58 }
 0x1e3   : > { %7129 = vst [vmem:[#allocation57_spill] sm:$0xff] %v4948_v5  ;;  %v4952_v20 = vpop.xlane.xlu0 %1083 }
 0x1e4   : > { %7130 = vst [vmem:[#allocation58_spill] sm:$0xff] %v4950_v13 }
 0x1e5   : > { %7131 = vst [vmem:[#allocation34_spill] sm:$0xff] %v4952_v20 }
 0x1e7   : > { %1396 = vadd.xlane.f32.xlu2 %v1395_v0  ;;  %1393 = vadd.xlane.f32.xlu1 %v1392_v49  ;;  %v1330_v0 = vld [vmem:[%s3821_s25 + $0x89] sm:$0x3f]  ;;  %v1328_v49 = vld [vmem:[%s3821_s25 + $0x79] sm:$0x3f] }
 0x1e8   : > { %1390 = vadd.xlane.f32.xlu0 %v1389_v61  ;;  %v1360_v61 = vmul.f32 %v4909_v26, %v1330_v0  ;;  %v1358_v19 = vmul.f32 %v4909_v26, %v1328_v49  ;;  %v1431_v0 = vsel %vm250_vm0, %v1363_v23, 0.0  ;;  %v1428_v49 = vsel %vm254_vm1, %v1362_v36, 0.0 }
 0x1ea   : > { %v4963_v1 = vpop.xlane.xlu2 %1098  ;;  %v4965_v43 = vpop.xlane.xlu1 %1095 }
 0x1eb   : > { %7133 = vst [vmem:[#allocation33_spill] sm:$0xff] %v4963_v1  ;;  %v4967_v51 = vpop.xlane.xlu0 %1092 }
 0x1ec   : > { %7134 = vst [vmem:[#allocation6_spill] sm:$0xff] %v4965_v43 }
 0x1ed   : > { %7135 = vst [vmem:[#allocation7_spill] sm:$0xff] %v4967_v51 }
 0x1ef   : > { %1405 = vadd.xlane.f32.xlu2 %v1404_v63  ;;  %1402 = vadd.xlane.f32.xlu1 %v1401_v25  ;;  %v1422_v63 = vsel %vm254_vm1, %v1360_v61, 0.0  ;;  %v1419_v25 = vsel %vm250_vm0, %v1359_v62, 0.0  ;;  %v1425_v61 = vsel %vm250_vm0, %v1361_v42, 0.0  ;;  %v1334_v62 = vld [vmem:[%s3821_s25 + $0xa9] sm:$0x3f] }
 0x1f0   : > { %1399 = vadd.xlane.f32.xlu0 %v1398_v3  ;;  %v1416_v3 = vsel %vm254_vm1, %v1358_v19, 0.0  ;;  %v1366_v19 = vmul.f32 %v4909_v26, %v1336_v48 }
 0x1f2   : > { %v4978_v54 = vpop.xlane.xlu2 %1107  ;;  %v4980_v38 = vpop.xlane.xlu1 %1104  ;;  %v1440_v36 = vsel %vm254_vm1, %v1366_v19, 0.0 }
 0x1f3   : > { %7138 = vst [vmem:[#allocation8_spill] sm:$0xff] %v4978_v54  ;;  %v4982_v16 = vpop.xlane.xlu0 %1101 }
 0x1f4   : > { %7139 = vst [vmem:[#allocation9_spill] sm:$0xff] %v4980_v38 }
 0x1f5   : > { %7140 = vst [vmem:[#allocation10_spill] sm:$0xff] %v4982_v16 }
 0x1f7   : > { %1414 = vadd.xlane.f32.xlu2 %v1413_v12  ;;  %1411 = vadd.xlane.f32.xlu1 %v1410_v30 }
 0x1f8   : > { %1408 = vadd.xlane.f32.xlu0 %v1407_v9 }
 0x1fa   : > { %v4993_v24 = vpop.xlane.xlu2 %1202  ;;  %v4995_v4 = vpop.xlane.xlu1 %1113 }
 0x1fb   : > { %7142 = vst [vmem:[#allocation11_spill] sm:$0xff] %v4995_v4  ;;  %v4997_v7 = vpop.xlane.xlu0 %1110  ;;  %v1340_v4 = vld [vmem:[%s3821_s25 + $0xd9] sm:$0x3f] }
 0x1fc   : > { %7143 = vst [vmem:[#allocation12_spill] sm:$0xff] %v4997_v7  ;;  %v1370_v38 = vmul.f32 %v4909_v26, %v1340_v4 }
 0x1ff   : > { %1423 = vadd.xlane.f32.xlu2 %v1422_v63  ;;  %1420 = vadd.xlane.f32.xlu1 %v1419_v25  ;;  %v7146_v63 = vld [vmem:[#allocation56_spill] sm:$0xff] }
 0x200   : > { %1417 = vadd.xlane.f32.xlu0 %v1416_v3  ;;  %v1365_v25 = vmul.f32 %v4909_v26, %v7146_v63  ;;  %v1364_v3 = vmul.f32 %v4909_v26, %v1334_v62  ;;  %v7148_v62 = vld [vmem:[#allocation55_spill] sm:$0xff] }
 0x201   : > { %v1367_v63 = vmul.f32 %v4909_v26, %v7148_v62 }
 0x202   : > { %v5008_v12 = vpop.xlane.xlu2 %1211  ;;  %v5010_v30 = vpop.xlane.xlu1 %1208  ;;  %v1437_v58 = vsel %vm250_vm0, %v1365_v25, 0.0  ;;  %v1434_v42 = vsel %vm254_vm1, %v1364_v3, 0.0 }
 0x203   : > { %v5012_v9 = vpop.xlane.xlu0 %1205 }
 0x207   : > { %1432 = vadd.xlane.f32.xlu2 %v1431_v0  ;;  %1429 = vadd.xlane.f32.xlu1 %v1428_v49  ;;  %v1338_v0 = vld [vmem:[%s3821_s25 + $0xc9] sm:$0x3f]  ;;  %v7147_v49 = vld [vmem:[#allocation60_spill] sm:$0xff] }
 0x208   : > { %1426 = vadd.xlane.f32.xlu0 %v1425_v61  ;;  %v1369_v61 = vmul.f32 %v4909_v26, %v7147_v49  ;;  %v1368_v48 = vmul.f32 %v4909_v26, %v1338_v0  ;;  %v1484_v49 = vld [vmem:[%s3821_s25 + $0xa] sm:$0x3f]  ;;  %v1483_v0 = vld [vmem:[%s3821_s25 + $0x2] sm:$0xff] }
 0x20a   : > { %v5023_v6 = vpop.xlane.xlu2 %1220  ;;  %v5025_v40 = vpop.xlane.xlu1 %1217  ;;  %v1449_v3 = vsel %vm250_vm0, %v1369_v61, 0.0 }
 0x20b   : > { %v5027_v23 = vpop.xlane.xlu0 %1214 }
 0x20f   : > { %1441 = vadd.xlane.f32.xlu2 %v1440_v36  ;;  %1438 = vadd.xlane.f32.xlu1 %v1437_v58  ;;  %v1446_v36 = vsel %vm254_vm1, %v1368_v48, 0.0  ;;  %v5046_v58 = vld [vmem:[#allocation3 + $0x7] ss:$0 sm:$0xff] }
 0x210   : > { %1435 = vadd.xlane.f32.xlu0 %v1434_v42  ;;  %v1443_v42 = vsel %vm250_vm0, %v1367_v63, 0.0  ;;  %v1514_v62 = vmul.f32 %v5046_v58, %v1484_v49  ;;  %v1513_v16 = vmul.f32 %v5046_v58, %v1483_v0  ;;  %v1517_v26 = vmul.f32 %v5046_v58, %v4629_v17  ;;  %v1488_v17 = vld [vmem:[%s3821_s25 + $0x2a] sm:$0x3f] }
 0x212   : > { %v5038_v19 = vpop.xlane.xlu2 %1229  ;;  %v5040_v25 = vpop.xlane.xlu1 %1226  ;;  %v1544_v63 = vsel %vm254_vm1, %v1514_v62, 0.0  ;;  %v1541_v51 = vsel %vm250_vm0, %v1513_v16, 0.0 }
 0x213   : > { %v5042_v7 = vpop.xlane.xlu0 %1223 }
 0x217   : > { %1450 = vadd.xlane.f32.xlu2 %v1449_v3  ;;  %1447 = vadd.xlane.f32.xlu1 %v1446_v36  ;;  %v1452_v3 = vsel %vm254_vm1, %v1370_v38, 0.0  ;;  %v1486_v36 = vld [vmem:[%s3821_s25 + $0x1a] sm:$0x3f]  ;;  %v1553_v38 = vsel %vm250_vm0, %v1517_v26, 0.0 }
 0x218   : > { %1444 = vadd.xlane.f32.xlu0 %v1443_v42  ;;  %v1516_v4 = vmul.f32 %v5046_v58, %v1486_v36  ;;  %v1515_v42 = vmul.f32 %v5046_v58, %v4596_v44  ;;  %v1518_v36 = vmul.f32 %v5046_v58, %v1488_v17  ;;  %v1521_v17 = vmul.f32 %v5046_v58, %v4666_v41 }
 0x21a   : > { %v5055_v61 = vpop.xlane.xlu2 %1238  ;;  %v5057_v48 = vpop.xlane.xlu1 %1235  ;;  %v1550_v62 = vsel %vm254_vm1, %v1516_v4, 0.0 }
 0x21b   : > { %v5059_v54 = vpop.xlane.xlu0 %1232 }
 0x21f   : > { %1545 = vadd.xlane.f32.xlu2 %v1544_v63  ;;  %1542 = vadd.xlane.f32.xlu1 %v1541_v51  ;;  %v1547_v51 = vsel %vm250_vm0, %v1515_v42, 0.0  ;;  %v1490_v63 = vld [vmem:[%s3821_s25 + $0x3a] sm:$0x3f] }
 0x220   : > { %1453 = vadd.xlane.f32.xlu0 %v1452_v3  ;;  %v1520_v44 = vmul.f32 %v5046_v58, %v1490_v63  ;;  %v1519_v3 = vmul.f32 %v5046_v58, %v4677_v46  ;;  %v1523_v46 = vmul.f32 %v5046_v58, %v4709_v33  ;;  %v1494_v33 = vld [vmem:[%s3821_s25 + $0x5a] sm:$0x3f] }
 0x222   : > { %v5070_v49 = vpop.xlane.xlu2 %1247  ;;  %v5072_v0 = vpop.xlane.xlu1 %1244  ;;  %v1562_v42 = vsel %vm254_vm1, %v1520_v44, 0.0 }
 0x223   : > { %7149 = vst [vmem:[#allocation13_spill] sm:$0xff] %v5072_v0  ;;  %v5074_v16 = vpop.xlane.xlu0 %1241 }
 0x227   : > { %1554 = vadd.xlane.f32.xlu2 %v1553_v38  ;;  %1551 = vadd.xlane.f32.xlu1 %v1550_v62  ;;  %v1559_v38 = vsel %vm250_vm0, %v1519_v3, 0.0  ;;  %v1556_v62 = vsel %vm254_vm1, %v1518_v36, 0.0  ;;  %v1571_v36 = vsel %vm250_vm0, %v1523_v46, 0.0 }
 0x228   : > { %1548 = vadd.xlane.f32.xlu0 %v1547_v51  ;;  %v1492_v51 = vld [vmem:[%s3821_s25 + $0x4a] sm:$0x3f] }
 0x229   : > { %v1522_v63 = vmul.f32 %v5046_v58, %v1492_v51  ;;  %v1525_v51 = vmul.f32 %v5046_v58, %v4739_v39  ;;  %v1529_v39 = vmul.f32 %v5046_v58, %v4780_v28  ;;  %v1500_v28 = vld [vmem:[%s3821_s25 + $0x8a] sm:$0x3f] }
 0x22a   : > { %v5085_v43 = vpop.xlane.xlu2 %1256  ;;  %v5087_v26 = vpop.xlane.xlu1 %1253 }
 0x22b   : > { %7150 = vst [vmem:[#allocation14_spill] sm:$0xff] %v5085_v43  ;;  %v5089_v4 = vpop.xlane.xlu0 %1250 }
 0x22c   : > { %7151 = vst [vmem:[#allocation15_spill] sm:$0xff] %v5087_v26 }
 0x22d   : > { %7152 = vst [vmem:[#allocation16_spill] sm:$0xff] %v5089_v4 }
 0x22f   : > { %1563 = vadd.xlane.f32.xlu2 %v1562_v42  ;;  %1560 = vadd.xlane.f32.xlu1 %v1559_v38  ;;  %v1568_v42 = vsel %vm254_vm1, %v1522_v63, 0.0  ;;  %v1565_v38 = vsel %vm250_vm0, %v1521_v17, 0.0 }
 0x230   : > { %1557 = vadd.xlane.f32.xlu0 %v1556_v62  ;;  %v1496_v62 = vld [vmem:[%s3821_s25 + $0x6a] sm:$0x3f] }
 0x231   : > { %v1526_v41 = vmul.f32 %v5046_v58, %v1496_v62 }
 0x232   : > { %v5100_v4 = vpop.xlane.xlu2 %1265  ;;  %v5102_v44 = vpop.xlane.xlu1 %1262 }
 0x233   : > { %7153 = vst [vmem:[#allocation17_spill] sm:$0xff] %v5100_v4  ;;  %v5104_v3 = vpop.xlane.xlu0 %1259  ;;  %v1580_v17 = vsel %vm254_vm1, %v1526_v41, 0.0 }
 0x234   : > { %7154 = vst [vmem:[#allocation18_spill] sm:$0xff] %v5102_v44  ;;  %v1524_v44 = vmul.f32 %v5046_v58, %v1494_v33  ;;  %v1527_v33 = vmul.f32 %v5046_v58, %v4735_v45 }
 0x235   : > { %7155 = vst [vmem:[#allocation19_spill] sm:$0xff] %v5104_v3 }
 0x237   : > { %1572 = vadd.xlane.f32.xlu2 %v1571_v36  ;;  %1569 = vadd.xlane.f32.xlu1 %v1568_v42  ;;  %v1577_v36 = vsel %vm250_vm0, %v1525_v51, 0.0  ;;  %v1574_v42 = vsel %vm254_vm1, %v1524_v44, 0.0  ;;  %v1589_v44 = vsel %vm250_vm0, %v1529_v39, 0.0 }
 0x238   : > { %1566 = vadd.xlane.f32.xlu0 %v1565_v38  ;;  %v1498_v38 = vld [vmem:[%s3821_s25 + $0x7a] sm:$0x3f] }
 0x239   : > { %v1528_v62 = vmul.f32 %v5046_v58, %v1498_v38  ;;  %v1531_v38 = vmul.f32 %v5046_v58, %v4820_v52  ;;  %v1535_v52 = vmul.f32 %v5046_v58, %v4850_v8  ;;  %v1506_v8 = vld [vmem:[%s3821_s25 + $0xba] sm:$0x3f] }
 0x23a   : > { %v5115_v3 = vpop.xlane.xlu2 %1274  ;;  %v5117_v46 = vpop.xlane.xlu1 %1271 }
 0x23b   : > { %7156 = vst [vmem:[#allocation20_spill] sm:$0xff] %v5115_v3  ;;  %v5119_v63 = vpop.xlane.xlu0 %1268 }
 0x23c   : > { %7157 = vst [vmem:[#allocation21_spill] sm:$0xff] %v5117_v46  ;;  %v1536_v46 = vmul.f32 %v5046_v58, %v1506_v8 }
 0x23d   : > { %7158 = vst [vmem:[#allocation22_spill] sm:$0xff] %v5119_v63 }
 0x23f   : > { %1581 = vadd.xlane.f32.xlu2 %v1580_v17  ;;  %1578 = vadd.xlane.f32.xlu1 %v1577_v36  ;;  %v1586_v17 = vsel %vm254_vm1, %v1528_v62, 0.0  ;;  %v1583_v36 = vsel %vm250_vm0, %v1527_v33, 0.0 }
 0x240   : > { %1575 = vadd.xlane.f32.xlu0 %v1574_v42  ;;  %v1502_v42 = vld [vmem:[%s3821_s25 + $0x9a] sm:$0x3f] }
 0x241   : > { %v1532_v45 = vmul.f32 %v5046_v58, %v1502_v42 }
 0x242   : > { %v5130_v63 = vpop.xlane.xlu2 %1283  ;;  %v5132_v41 = vpop.xlane.xlu1 %1280 }
 0x243   : > { %7159 = vst [vmem:[#allocation23_spill] sm:$0xff] %v5130_v63  ;;  %v5134_v51 = vpop.xlane.xlu0 %1277  ;;  %v1598_v33 = vsel %vm254_vm1, %v1532_v45, 0.0 }
 0x244   : > { %7160 = vst [vmem:[#allocation24_spill] sm:$0xff] %v5132_v41  ;;  %v1530_v41 = vmul.f32 %v5046_v58, %v1500_v28  ;;  %v1533_v28 = vmul.f32 %v5046_v58, %v4811_v34 }
 0x245   : > { %7161 = vst [vmem:[#allocation25_spill] sm:$0xff] %v5134_v51 }
 0x247   : > { %1590 = vadd.xlane.f32.xlu2 %v1589_v44  ;;  %1587 = vadd.xlane.f32.xlu1 %v1586_v17  ;;  %v1595_v44 = vsel %vm250_vm0, %v1531_v38, 0.0  ;;  %v1592_v17 = vsel %vm254_vm1, %v1530_v41, 0.0  ;;  %v1607_v41 = vsel %vm250_vm0, %v1535_v52, 0.0 }
 0x248   : > { %1584 = vadd.xlane.f32.xlu0 %v1583_v36  ;;  %v1504_v36 = vld [vmem:[%s3821_s25 + $0xaa] sm:$0x3f] }
 0x249   : > { %v1534_v42 = vmul.f32 %v5046_v58, %v1504_v36  ;;  %v1537_v36 = vmul.f32 %v5046_v58, %v4879_v59  ;;  %v1510_v59 = vld [vmem:[%s3821_s25 + $0xda] sm:$0x3f] }
 0x24a   : > { %v5145_v63 = vpop.xlane.xlu2 %1378  ;;  %v5147_v39 = vpop.xlane.xlu1 %1375  ;;  %v1540_v8 = vmul.f32 %v5046_v58, %v1510_v59 }
 0x24b   : > { %v5149_v62 = vpop.xlane.xlu0 %1372  ;;  %v1613_v4 = vsel %vm250_vm0, %v1537_v36, 0.0 }
 0x24c   : > { %v1622_v1 = vsel %vm254_vm1, %v1540_v8, 0.0 }
 0x24f   : > { %1599 = vadd.xlane.f32.xlu2 %v1598_v33  ;;  %1596 = vadd.xlane.f32.xlu1 %v1595_v44  ;;  %v1604_v33 = vsel %vm254_vm1, %v1534_v42, 0.0  ;;  %v1601_v44 = vsel %vm250_vm0, %v1533_v28, 0.0 }
 0x250   : > { %1593 = vadd.xlane.f32.xlu0 %v1592_v17  ;;  %v1508_v17 = vld [vmem:[%s3821_s25 + $0xca] sm:$0x3f] }
 0x251   : > { %v1538_v34 = vmul.f32 %v5046_v58, %v1508_v17 }
 0x252   : > { %v5160_v51 = vpop.xlane.xlu2 %1387  ;;  %v5162_v45 = vpop.xlane.xlu1 %1384 }
 0x253   : > { %v5164_v38 = vpop.xlane.xlu0 %1381  ;;  %v1616_v28 = vsel %vm254_vm1, %v1538_v34, 0.0  ;;  %v1539_v34 = vmul.f32 %v5046_v58, %v4875_v57 }
 0x257   : > { %1608 = vadd.xlane.f32.xlu2 %v1607_v41  ;;  %1605 = vadd.xlane.f32.xlu1 %v1604_v33  ;;  %v5183_v41 = vld [vmem:[#allocation3 + $0x8] ss:$0 sm:$0xff]  ;;  %v1610_v33 = vsel %vm254_vm1, %v1536_v46, 0.0 }
 0x258   : > { %1602 = vadd.xlane.f32.xlu0 %v1601_v44  ;;  %v3467_v44 = vld [vmem:[%s3821_s25 + $0x11] sm:$0xff] }
 0x259   : > { %v1770_v17 = vmul.f32 %v5183_v41, %v3467_v44  ;;  %v3468_v44 = vld [vmem:[%s3821_s25 + $0x19] sm:$0x3f] }
 0x25a   : > { %v5175_v3 = vpop.xlane.xlu2 %1396  ;;  %v5177_v52 = vpop.xlane.xlu1 %1393  ;;  %v1771_v59 = vmul.f32 %v5183_v41, %v3468_v44 }
 0x25b   : > { %v5179_v42 = vpop.xlane.xlu0 %1390  ;;  %v1798_v46 = vsel %vm250_vm0, %v1770_v17, 0.0 }
 0x25f   : > { %1617 = vadd.xlane.f32.xlu2 %v1616_v28  ;;  %1614 = vadd.xlane.f32.xlu1 %v1613_v4  ;;  %v1619_v4 = vsel %vm250_vm0, %v1539_v34, 0.0  ;;  %v3470_v28 = vld [vmem:[%s3821_s25 + $0x29] sm:$0x3f] }
 0x260   : > { %1611 = vadd.xlane.f32.xlu0 %v1610_v33  ;;  %v5203_v33 = vld [vmem:[%s3821_s25 + $0x21] sm:$0xff]  ;;  %v1773_v57 = vmul.f32 %v5183_v41, %v3470_v28  ;;  %v5224_v28 = vld [vmem:[%s3821_s25 + $0x31] sm:$0xff] }
 0x261   : > { %7164 = vst [vmem:[#allocation29_spill] sm:$0xff] %v5203_v33  ;;  %v1772_v58 = vmul.f32 %v5183_v41, %v5203_v33 }
 0x262   : > { %v5192_v36 = vpop.xlane.xlu2 %1405  ;;  %v5194_v26 = vpop.xlane.xlu1 %1402  ;;  %v1807_v20 = vsel %vm254_vm1, %v1773_v57, 0.0  ;;  %7169 = vst [vmem:[#allocation38_spill] sm:$0xff] %v5224_v28 }
 0x263   : > { %7162 = vst [vmem:[#allocation26_spill] sm:$0xff] %v5192_v36  ;;  %v5196_v43 = vpop.xlane.xlu0 %1399  ;;  %v1804_v13 = vsel %vm250_vm0, %v1772_v58, 0.0  ;;  %v1774_v58 = vmul.f32 %v5183_v41, %v5224_v28 }
 0x264   : > { %7163 = vst [vmem:[#allocation27_spill] sm:$0xff] %v5194_v26 }
 0x267   : > { %1799 = vadd.xlane.f32.xlu2 %v1798_v46  ;;  %1623 = vadd.xlane.f32.xlu1 %v1622_v1  ;;  %v1801_v1 = vsel %vm254_vm1, %v1771_v59, 0.0  ;;  %v5220_v46 = vld [vmem:[%s3821_s25 + $0x41] sm:$0xff] }
 0x268   : > { %1620 = vadd.xlane.f32.xlu0 %v1619_v4  ;;  %7168 = vst [vmem:[#allocation37_spill] sm:$0xff] %v5220_v46  ;;  %v3472_v4 = vld [vmem:[%s3821_s25 + $0x39] sm:$0x3f]  ;;  %v1776_v44 = vmul.f32 %v5183_v41, %v5220_v46  ;;  %v5242_v46 = vld [vmem:[%s3821_s25 + $0x51] sm:$0xff] }
 0x269   : > { %v1775_v57 = vmul.f32 %v5183_v41, %v3472_v4  ;;  %7173 = vst [vmem:[#allocation47_spill] sm:$0xff] %v5242_v46  ;;  %v3474_v4 = vld [vmem:[%s3821_s25 + $0x49] sm:$0x3f] }
 0x26a   : > { %v5210_v17 = vpop.xlane.xlu2 %1414  ;;  %v5212_v8 = vpop.xlane.xlu1 %1411  ;;  %v1816_v55 = vsel %vm250_vm0, %v1776_v44, 0.0  ;;  %v1777_v44 = vmul.f32 %v5183_v41, %v3474_v4 }
 0x26b   : > { %7165 = vst [vmem:[#allocation36_spill] sm:$0xff] %v5210_v17  ;;  %v5214_v34 = vpop.xlane.xlu0 %1408 }
 0x26c   : > { %7166 = vst [vmem:[#allocation43_spill] sm:$0xff] %v5212_v8  ;;  %v1119_v8 = vadd.f32 %v4865_v14, %v7087_v35  ;;  %v1121_v14 = vadd.f32 %v4888_v29, %v7087_v35 }
 0x26d   : > { %7167 = vst [vmem:[#allocation41_spill] sm:$0xff] %v5214_v34 }
 0x26f   : > { %1808 = vadd.xlane.f32.xlu2 %v1807_v20  ;;  %1805 = vadd.xlane.f32.xlu1 %v1804_v13  ;;  %v1813_v20 = vsel %vm254_vm1, %v1775_v57, 0.0  ;;  %v1810_v13 = vsel %vm250_vm0, %v1774_v58, 0.0 }
 0x270   : > { %1802 = vadd.xlane.f32.xlu0 %v1801_v1  ;;  %v3476_v1 = vld [vmem:[%s3821_s25 + $0x59] sm:$0x3f] }
 0x271   : > { %v1779_v28 = vmul.f32 %v5183_v41, %v3476_v1  ;;  %v5263_v1 = vld [vmem:[%s3821_s25 + $0x61] sm:$0xff] }
 0x272   : > { %v5231_v59 = vpop.xlane.xlu2 %1423  ;;  %v5233_v33 = vpop.xlane.xlu1 %1420  ;;  %7178 = vst [vmem:[#allocation30_spill] sm:$0xff] %v5263_v1 }
 0x273   : > { %7170 = vst [vmem:[#allocation42_spill] sm:$0xff] %v5231_v59  ;;  %v5235_v5 = vpop.xlane.xlu0 %1417  ;;  %v1825_v17 = vsel %vm254_vm1, %v1779_v28, 0.0 }
 0x274   : > { %7171 = vst [vmem:[#allocation45_spill] sm:$0xff] %v5233_v33  ;;  %v1778_v33 = vmul.f32 %v5183_v41, %v5242_v46 }
 0x275   : > { %7172 = vst [vmem:[#allocation46_spill] sm:$0xff] %v5235_v5 }
 0x276   : > { %v1822_v5 = vsel %vm250_vm0, %v1778_v33, 0.0  ;;  %v1780_v33 = vmul.f32 %v5183_v41, %v5263_v1 }
 0x277   : > { %1817 = vadd.xlane.f32.xlu2 %v1816_v55  ;;  %1814 = vadd.xlane.f32.xlu1 %v1813_v20  ;;  %v1819_v55 = vsel %vm254_vm1, %v1777_v44, 0.0  ;;  %v5259_v20 = vld [vmem:[%s3821_s25 + $0x71] sm:$0xff] }
 0x278   : > { %1811 = vadd.xlane.f32.xlu0 %v1810_v13  ;;  %7177 = vst [vmem:[#allocation50_spill] sm:$0xff] %v5259_v20  ;;  %v3478_v13 = vld [vmem:[%s3821_s25 + $0x69] sm:$0x3f]  ;;  %v1782_v4 = vmul.f32 %v5183_v41, %v5259_v20  ;;  %v5281_v20 = vld [vmem:[%s3821_s25 + $0x81] sm:$0xff] }
 0x279   : > { %v1781_v28 = vmul.f32 %v5183_v41, %v3478_v13  ;;  %7182 = vst [vmem:[#allocation40_spill] sm:$0xff] %v5281_v20  ;;  %v3480_v13 = vld [vmem:[%s3821_s25 + $0x79] sm:$0x3f] }
 0x27a   : > { %v5249_v57 = vpop.xlane.xlu2 %1432  ;;  %v5251_v58 = vpop.xlane.xlu1 %1429 }
 0x27b   : > { %7174 = vst [vmem:[#allocation52_spill] sm:$0xff] %v5249_v57  ;;  %v5253_v59 = vpop.xlane.xlu0 %1426  ;;  %v1834_v57 = vsel %vm250_vm0, %v1782_v4, 0.0  ;;  %v1783_v4 = vmul.f32 %v5183_v41, %v3480_v13 }
 0x27c   : > { %7175 = vst [vmem:[#allocation28_spill] sm:$0xff] %v5251_v58 }
 0x27d   : > { %7176 = vst [vmem:[#allocation51_spill] sm:$0xff] %v5253_v59 }
 0x27f   : > { %1826 = vadd.xlane.f32.xlu2 %v1825_v17  ;;  %1823 = vadd.xlane.f32.xlu1 %v1822_v5  ;;  %v1831_v17 = vsel %vm254_vm1, %v1781_v28, 0.0  ;;  %v1828_v5 = vsel %vm250_vm0, %v1780_v33, 0.0 }
 0x280   : > { %1820 = vadd.xlane.f32.xlu0 %v1819_v55  ;;  %v3482_v55 = vld [vmem:[%s3821_s25 + $0x89] sm:$0x3f] }
 0x281   : > { %v1785_v1 = vmul.f32 %v5183_v41, %v3482_v55  ;;  %v5302_v55 = vld [vmem:[%s3821_s25 + $0x91] sm:$0xff] }
 0x282   : > { %v5270_v44 = vpop.xlane.xlu2 %1441  ;;  %v5272_v46 = vpop.xlane.xlu1 %1438  ;;  %7187 = vst [vmem:[#allocation48_spill] sm:$0xff] %v5302_v55 }
 0x283   : > { %7179 = vst [vmem:[#allocation32_spill] sm:$0xff] %v5270_v44  ;;  %v5274_v59 = vpop.xlane.xlu0 %1435 }
 0x284   : > { %7180 = vst [vmem:[#allocation35_spill] sm:$0xff] %v5272_v46  ;;  %v1784_v46 = vmul.f32 %v5183_v41, %v5281_v20 }
 0x285   : > { %7181 = vst [vmem:[#allocation31_spill] sm:$0xff] %v5274_v59  ;;  %v1843_v59 = vsel %vm254_vm1, %v1785_v1, 0.0 }
 0x286   : > { %v1840_v58 = vsel %vm250_vm0, %v1784_v46, 0.0  ;;  %v1786_v46 = vmul.f32 %v5183_v41, %v5302_v55 }
 0x287   : > { %1835 = vadd.xlane.f32.xlu2 %v1834_v57  ;;  %1832 = vadd.xlane.f32.xlu1 %v1831_v17  ;;  %v1837_v57 = vsel %vm254_vm1, %v1783_v4, 0.0  ;;  %v5298_v17 = vld [vmem:[%s3821_s25 + $0xa1] sm:$0xff] }
 0x288   : > { %1829 = vadd.xlane.f32.xlu0 %v1828_v5  ;;  %7186 = vst [vmem:[#allocation53_spill] sm:$0xff] %v5298_v17  ;;  %v3484_v5 = vld [vmem:[%s3821_s25 + $0x99] sm:$0x3f]  ;;  %v1788_v13 = vmul.f32 %v5183_v41, %v5298_v17  ;;  %v5320_v17 = vld [vmem:[%s3821_s25 + $0xb1] sm:$0xff] }
 0x289   : > { %v1787_v1 = vmul.f32 %v5183_v41, %v3484_v5  ;;  %7189 = vst [vmem:[#allocation60_spill] sm:$0xff] %v5320_v17  ;;  %v3486_v5 = vld [vmem:[%s3821_s25 + $0xa9] sm:$0x3f] }
 0x28a   : > { %v5288_v28 = vpop.xlane.xlu2 %1450  ;;  %v5290_v33 = vpop.xlane.xlu1 %1447 }
 0x28b   : > { %7183 = vst [vmem:[#allocation44_spill] sm:$0xff] %v5288_v28  ;;  %v5292_v44 = vpop.xlane.xlu0 %1444 }
 0x28c   : > { %7184 = vst [vmem:[#allocation39_spill] sm:$0xff] %v5290_v33 }
 0x28d   : > { %7185 = vst [vmem:[#allocation49_spill] sm:$0xff] %v5292_v44  ;;  %v1852_v44 = vsel %vm250_vm0, %v1788_v13, 0.0  ;;  %v1789_v13 = vmul.f32 %v5183_v41, %v3486_v5  ;;  %v1116_v5 = vadd.f32 %v4837_v32, %v7087_v35 }
 0x28f   : > { %1844 = vadd.xlane.f32.xlu2 %v1843_v59  ;;  %1841 = vadd.xlane.f32.xlu1 %v1840_v58  ;;  %v1849_v59 = vsel %vm254_vm1, %v1787_v1, 0.0  ;;  %v1846_v58 = vsel %vm250_vm0, %v1786_v46, 0.0 }
 0x290   : > { %1838 = vadd.xlane.f32.xlu0 %v1837_v57  ;;  %v3488_v57 = vld [vmem:[%s3821_s25 + $0xb9] sm:$0x3f] }
 0x291   : > { %v1791_v55 = vmul.f32 %v5183_v41, %v3488_v57  ;;  %v5341_v57 = vld [vmem:[%s3821_s25 + $0xc1] sm:$0xff] }
 0x292   : > { %v5309_v4 = vpop.xlane.xlu2 %1545  ;;  %v5311_v20 = vpop.xlane.xlu1 %1542  ;;  %7191 = vst [vmem:[#allocation63_spill] sm:$0xff] %v5341_v57 }
 0x293   : > { %v5313_v28 = vpop.xlane.xlu0 %1453  ;;  %v1861_v0 = vsel %vm254_vm1, %v1791_v55, 0.0  ;;  %v1117_v55 = vadd.f32 %v4869_v11, %v7087_v35  ;;  %v1125_v11 = vadd.f32 %v4901_v2, %v7087_v35  ;;  %v1126_v2 = vadd.f32 %v4922_v27, %v7087_v35 }
 0x294   : > { %7188 = vst [vmem:[#allocation56_spill] sm:$0xff] %v5313_v28  ;;  %v1790_v28 = vmul.f32 %v5183_v41, %v5320_v17  ;;  %v1115_v17 = vadd.f32 %v4839_v37, %v7087_v35  ;;  %v1122_v37 = vadd.f32 %v4886_v47, %v7087_v35  ;;  %v1128_v47 = vadd.f32 %v4918_v31, %v7087_v35 }
 0x295   : > { %v1287_v26 = vadd.f32 %v5010_v30, %v1117_v55  ;;  %v1286_v27 = vadd.f32 %v5012_v9, %v1116_v5  ;;  %v1295_v5 = vadd.f32 %v5059_v54, %v1125_v11 }
 0x296   : > { %v1858_v34 = vsel %vm250_vm0, %v1790_v28, 0.0  ;;  %v1118_v28 = vadd.f32 %v4867_v53, %v7087_v35  ;;  %v1792_v53 = vmul.f32 %v5183_v41, %v5341_v57  ;;  %v1285_v57 = vadd.f32 %v4993_v24, %v1115_v17 }
 0x297   : > { %1853 = vadd.xlane.f32.xlu2 %v1852_v44  ;;  %1850 = vadd.xlane.f32.xlu1 %v1849_v59  ;;  %v1855_v44 = vsel %vm254_vm1, %v1789_v13, 0.0  ;;  %v5337_v59 = vld [vmem:[%s3821_s25 + $0xd1] sm:$0xff]  ;;  %v1289_v24 = vadd.f32 %v5027_v23, %v1119_v8  ;;  %v1292_v30 = vadd.f32 %v5042_v7, %v1122_v37  ;;  %v1457_v7 = vadd.f32 %v5145_v63, %v1287_v26 }
 0x298   : > { %1847 = vadd.xlane.f32.xlu0 %v1846_v58  ;;  %7190 = vst [vmem:[#allocation55_spill] sm:$0xff] %v5337_v59  ;;  %v3490_v58 = vld [vmem:[%s3821_s25 + $0xc9] sm:$0x3f]  ;;  %v1794_v13 = vmul.f32 %v5183_v41, %v5337_v59  ;;  %v1288_v59 = vadd.f32 %v5008_v12, %v1118_v28  ;;  %v1864_v36 = vsel %vm250_vm0, %v1792_v53, 0.0  ;;  %v3492_v28 = vld [vmem:[%s3821_s25 + $0xd9] sm:$0x3f] }
 0x299   : > { %v1793_v32 = vmul.f32 %v5183_v41, %v3490_v58  ;;  %v1127_v58 = vadd.f32 %v4920_v18, %v7087_v35  ;;  %v1795_v54 = vmul.f32 %v5183_v41, %v3492_v28  ;;  %v1462_v63 = vadd.f32 %v5177_v52, %v1292_v30 }
 0x29a   : > { %v5327_v1 = vpop.xlane.xlu2 %1554  ;;  %v5329_v46 = vpop.xlane.xlu1 %1551 }
 0x29b   : > { %v5331_v33 = vpop.xlane.xlu0 %1548  ;;  %v1867_v18 = vsel %vm254_vm1, %v1793_v32, 0.0  ;;  %v1297_v9 = vadd.f32 %v5055_v61, %v1127_v58  ;;  %v1456_v61 = vadd.f32 %v5147_v39, %v1286_v27  ;;  %v5428_v39 = vld [vmem:[%s3821_s25 + $0x20] sm:$0xff] }
 0x29d   : > { %v1626_v52 = vadd.f32 %v5309_v4, %v1456_v61 }
 0x29f   : > { %1862 = vadd.xlane.f32.xlu2 %v1861_v0  ;;  %1859 = vadd.xlane.f32.xlu1 %v1858_v34  ;;  %v1120_v0 = vadd.f32 %v4890_v60, %v7087_v35  ;;  %v1124_v34 = vadd.f32 %v4903_v56, %v7087_v35  ;;  %v1130_v56 = vadd.f32 %v4935_v10, %v7087_v35 }
 0x2a0   : > { %1856 = vadd.xlane.f32.xlu0 %v1855_v44  ;;  %v1123_v44 = vadd.f32 %v4905_v50, %v7087_v35  ;;  %v5384_v50 = vadd.f32 %v4937_v21, %v7087_v35  ;;  %v1291_v10 = vadd.f32 %v5023_v6, %v1121_v14  ;;  %v3494_v21 = vld [vmem:[%s3821_s25 + $0xe9] sm:$0x3f]  ;;  %v5396_v35 = vld [vmem:[%s3821_s25 + $0xe1] sm:$0xff]  ;;  %v1296_v6 = vadd.f32 %v5057_v48, %v1126_v2  ;;  %v7197_v2 = vld [vmem:[#allocation43_spill] sm:$0xff] }
 0x2a1   : > { %v1294_v12 = vadd.f32 %v5038_v19, %v1124_v34  ;;  %v5408_v55 = vadd.f32 %v5070_v49, %v1130_v56  ;;  %v1796_v23 = vmul.f32 %v5183_v41, %v5396_v35  ;;  %v1298_v19 = vadd.f32 %v5074_v16, %v1128_v47  ;;  %v5421_v16 = vld [vmem:[#allocation3 + $0x9] ss:$0 sm:$0xff] }
 0x2a2   : > { %v5372_v29 = vpop.xlane.xlu2 %1563  ;;  %v5374_v60 = vpop.xlane.xlu1 %1560  ;;  %7193 = vst [vmem:[#allocation65_spill] sm:$0xff] %v5384_v50  ;;  %v1290_v50 = vadd.f32 %v5025_v40, %v1120_v0  ;;  %v1293_v17 = vadd.f32 %v5040_v25, %v1123_v44  ;;  %v1797_v40 = vmul.f32 %v5183_v41, %v3494_v21  ;;  %v1458_v25 = vadd.f32 %v5164_v38, %v1288_v59  ;;  %v7195_v44 = vld [vmem:[#allocation27_spill] sm:$0xff] }
 0x2a3   : > { %7192 = vst [vmem:[#allocation64_spill] sm:$0xff] %v5374_v60  ;;  %v1558_v31 = vpop.xlane.xlu0 %1557  ;;  %v1870_v60 = vsel %vm250_vm0, %v1794_v13, 0.0  ;;  %v1455_v48 = vadd.f32 %v5149_v62, %v1285_v57  ;;  %v1627_v41 = vadd.f32 %v5331_v33, %v1457_v7  ;;  %v3496_v62 = vld [vmem:[%s3821_s25 + $0x18] sm:$0x3f]  ;;  %v3495_v57 = vld [vmem:[%s3821_s25 + $0x10] sm:$0xff]  ;;  %v1876_v37 = vsel %vm250_vm0, %v1796_v23, 0.0 }
 0x2a4   : > { %v1460_v49 = vadd.f32 %v5160_v51, %v1290_v50  ;;  %v1463_v26 = vadd.f32 %v5175_v3, %v1293_v17  ;;  %v1628_v38 = vadd.f32 %v5329_v46, %v1458_v25  ;;  %v1461_v51 = vadd.f32 %v5179_v42, %v1291_v10  ;;  %v7198_v50 = vld [vmem:[#allocation41_spill] sm:$0xff]  ;;  %v3500_v25 = vld [vmem:[%s3821_s25 + $0x38] sm:$0x3f] }
 0x2a5   : > { %v1879_v32 = vsel %vm254_vm1, %v1797_v40, 0.0  ;;  %v1464_v3 = vadd.f32 %v5196_v43, %v1294_v12  ;;  %v1625_v46 = vadd.f32 %v5311_v20, %v1455_v48  ;;  %v1873_v33 = vsel %vm254_vm1, %v1795_v54, 0.0  ;;  %v7194_v20 = vld [vmem:[#allocation26_spill] sm:$0xff] }
 0x2a6   : > { %v1942_v0 = vmul.f32 %v5421_v16, %v5428_v39  ;;  %v1941_v42 = vmul.f32 %v5421_v16, %v3496_v62  ;;  %v1940_v53 = vmul.f32 %v5421_v16, %v3495_v57  ;;  %v1685_v11 = vperm.slane %v1628_v38, %v4640_v15 }
 0x2a7   : > { %1871 = vadd.xlane.f32.xlu2 %v1870_v60  ;;  %1868 = vadd.xlane.f32.xlu1 %v1867_v18  ;;  %v1684_v34 = vperm.slane %v1627_v41, %v4616_v22  ;;  %v1632_v43 = vadd.f32 %v5372_v29, %v1462_v63  ;;  %v1466_v4 = vadd.f32 %v7194_v20, %v1296_v6 }
 0x2a8   : > { %1865 = vadd.xlane.f32.xlu0 %v1864_v36  ;;  %v1459_v36 = vadd.f32 %v5162_v45, %v1289_v24  ;;  %v1630_v45 = vadd.f32 %v1558_v31, %v1460_v49  ;;  %v1465_v47 = vadd.f32 %v7195_v44, %v1295_v5  ;;  %v1468_v56 = vadd.f32 %v7197_v2, %v1298_v19 }
 0x2a9   : > { %v1467_v31 = vadd.f32 %v7198_v50, %v1297_v9  ;;  %v1682_v29 = vperm.slane %v1626_v52, %v4640_v15  ;;  %v1681_v10 = vperm.slane %v1625_v46, %v4616_v22  ;;  %v1974_v17 = vsel %vm250_vm0, %v1942_v0, 0.0  ;;  %v5500_v50 = vld [vmem:[%s3821_s25 + $0x50] sm:$0xff] }
 0x2aa   : > { %v1573_v8 = vpop.xlane.xlu2 %1572  ;;  %v1570_v13 = vpop.xlane.xlu1 %1569  ;;  %v1629_v14 = vadd.f32 %v5327_v1, %v1459_v36  ;;  %v7196_v1 = vld [vmem:[#allocation64_spill] sm:$0xff]  ;;  %v1688_v58 = vperm.slane %v1630_v45, %v4640_v15  ;;  %v1686_v28 = vsel %vm907_vm2, %v1685_v11, %v1684_v34  ;;  %v1691_v30 = vperm.slane %v1632_v43, %v4640_v15  ;;  %v5467_v36 = vld [vmem:[%s3821_s25 + $0x30] sm:$0xff] }
 0x2ab   : > { %v1567_v59 = vpop.xlane.xlu0 %1566  ;;  %v1631_v60 = vadd.f32 %v7196_v1, %v1461_v51  ;;  %v1634_v18 = vadd.f32 %v1570_v13, %v1464_v3  ;;  %v1971_v9 = vsel %vm254_vm1, %v1941_v42, 0.0  ;;  %v1968_v5 = vsel %vm250_vm0, %v1940_v53, 0.0  ;;  %v7199_v13 = vld [vmem:[#allocation65_spill] sm:$0xff] }
 0x2ac   : > { %v1633_v27 = vadd.f32 %v1567_v59, %v1463_v26  ;;  %v1687_v21 = vperm.slane %v1629_v14, %v4616_v22  ;;  %v1635_v19 = vadd.f32 %v1573_v8, %v1465_v47  ;;  %v7200_v26 = vld [vmem:[#allocation13_spill] sm:$0xff]  ;;  %v1683_v38 = vsel %vm907_vm2, %v1682_v29, %v1681_v10  ;;  %v7201_v8 = vld [vmem:[#allocation46_spill] sm:$0xff]  ;;  %v7202_v14 = vld [vmem:[#allocation36_spill] sm:$0xff] }
 0x2ad   : > { %v1690_v40 = vperm.slane %v1631_v60, %v4616_v22  ;;  %v1694_v54 = vperm.slane %v1634_v18, %v4640_v15  ;;  %v1299_v63 = vadd.f32 %v7200_v26, %v7199_v13  ;;  %v3498_v59 = vld [vmem:[%s3821_s25 + $0x28] sm:$0x3f]  ;;  %v1470_v62 = vadd.f32 %v7201_v8, %v5408_v55  ;;  %v7206_v13 = vld [vmem:[#allocation58_spill] sm:$0xff] }
 0x2ae   : > { %v1689_v23 = vsel %vm907_vm2, %v1688_v58, %v1687_v21  ;;  %v1693_v61 = vperm.slane %v1633_v27, %v4616_v22  ;;  %v1723_v57 = vsel %vm948_vm3, %v1686_v28, %v1683_v38  ;;  %v1945_v51 = vmul.f32 %v5421_v16, %v3500_v25  ;;  %v5505_v27 = vld [vmem:[%s3821_s25 + $0x40] sm:$0xff]  ;;  %v7204_v25 = vld [vmem:[#allocation54_spill] sm:$0xff] }
 0x2af   : > { %1880 = vadd.xlane.f32.xlu2 %v1879_v32  ;;  %1877 = vadd.xlane.f32.xlu1 %v1876_v37  ;;  %v1692_v45 = vsel %vm907_vm2, %v1691_v30, %v1690_v40  ;;  %v1724_v32 = vsel %vm950_vm4, %v1689_v23, %v1723_v57  ;;  %v1696_v37 = vperm.slane %v1635_v19, %v4616_v22  ;;  %v3506_v23 = vld [vmem:[%s3821_s25 + $0x68] sm:$0x3f]  ;;  %v5522_v19 = vld [vmem:[%s3821_s25 + $0x60] sm:$0xff]  ;;  %v7209_v8 = vld [vmem:[#allocation6_spill] sm:$0xff] }
 0x2b0   : > { %1874 = vadd.xlane.f32.xlu0 %v1873_v33  ;;  %v1944_v3 = vmul.f32 %v5421_v16, %v5467_v36  ;;  %v1695_v52 = vsel %vm907_vm2, %v1694_v54, %v1693_v61  ;;  %v1943_v33 = vmul.f32 %v5421_v16, %v3498_v59  ;;  %v1469_v0 = vadd.f32 %v7202_v14, %v1299_v63  ;;  %v7205_v61 = vld [vmem:[#allocation57_spill] sm:$0xff]  ;;  %v7207_v63 = vld [vmem:[#allocation34_spill] sm:$0xff]  ;;  %v7210_v57 = vld [vmem:[#allocation7_spill] sm:$0xff] }
 0x2b1   : > { %v1725_v34 = vsel %vm952_vm5, %v1692_v45, %v1724_v32  ;;  %v1983_v47 = vsel %vm254_vm1, %v1945_v51, 0.0  ;;  %v1948_v21 = vmul.f32 %v5421_v16, %v5500_v50  ;;  %v1951_v45 = vmul.f32 %v5421_v16, %v3506_v23 }
 0x2b2   : > { %v1582_v24 = vpop.xlane.xlu2 %1581  ;;  %v1579_v12 = vpop.xlane.xlu1 %1578  ;;  %v1980_v1 = vsel %vm250_vm0, %v1944_v3, 0.0  ;;  %v1950_v32 = vmul.f32 %v5421_v16, %v5522_v19 }
 0x2b3   : > { %v1576_v6 = vpop.xlane.xlu0 %1575  ;;  %v1638_v48 = vadd.f32 %v1582_v24, %v1468_v56  ;;  %v1637_v49 = vadd.f32 %v1579_v12, %v1467_v31  ;;  %v1977_v56 = vsel %vm254_vm1, %v1943_v33, 0.0  ;;  %v3502_v31 = vld [vmem:[%s3821_s25 + $0x48] sm:$0x3f] }
 0x2b4   : > { %v1636_v7 = vadd.f32 %v1576_v6, %v1466_v4  ;;  %v1726_v4 = vsel %vm954_vm6, %v1695_v52, %v1725_v34  ;;  %v1947_v24 = vmul.f32 %v5421_v16, %v3502_v31  ;;  %v7212_v52 = vld [vmem:[#allocation9_spill] sm:$0xff]  ;;  %v7220_v31 = vld [vmem:[#allocation18_spill] sm:$0xff]  ;;  %v1998_v23 = vsel %vm250_vm0, %v1950_v32, 0.0 }
 0x2b5   : > { %v1700_v55 = vperm.slane %v1638_v48, %v4640_v15  ;;  %v1699_v46 = vperm.slane %v1637_v49, %v4616_v22  ;;  %v3504_v49 = vld [vmem:[%s3821_s25 + $0x58] sm:$0x3f] }
 0x2b6   : > { %v1697_v41 = vperm.slane %v1636_v7, %v4640_v15  ;;  %v7203_v7 = vld [vmem:[#allocation59_spill] sm:$0xff]  ;;  %v1949_v14 = vmul.f32 %v5421_v16, %v3504_v49 }
 0x2b7   : > { %1975 = vadd.xlane.f32.xlu2 %v1974_v17  ;;  %1972 = vadd.xlane.f32.xlu1 %v1971_v9  ;;  %v1701_v60 = vsel %vm907_vm2, %v1700_v55, %v1699_v46  ;;  %v1946_v17 = vmul.f32 %v5421_v16, %v5505_v27  ;;  %v1992_v9 = vsel %vm250_vm0, %v1948_v21, 0.0  ;;  %v1131_v54 = vadd.f32 %v7204_v25, %v7203_v7  ;;  %v7213_v46 = vld [vmem:[#allocation10_spill] sm:$0xff]  ;;  %v3508_v25 = vld [vmem:[%s3821_s25 + $0x78] sm:$0x3f] }
 0x2b8   : > { %1969 = vadd.xlane.f32.xlu0 %v1968_v5  ;;  %v1698_v42 = vsel %vm907_vm2, %v1697_v41, %v1696_v37  ;;  %v1989_v5 = vsel %vm254_vm1, %v1947_v24, 0.0  ;;  %v1134_v48 = vadd.f32 %v7205_v61, %v7203_v7  ;;  %v1133_v26 = vadd.f32 %v7206_v13, %v7203_v7  ;;  %v7208_v41 = vld [vmem:[#allocation33_spill] sm:$0xff]  ;;  %v7211_v37 = vld [vmem:[#allocation8_spill] sm:$0xff]  ;;  %v5570_v61 = vld [vmem:[%s3821_s25 + $0x70] sm:$0xff] }
 0x2b9   : > { %v1727_v58 = vsel %vm956_vm7, %v1698_v42, %v1726_v4  ;;  %v1986_v40 = vsel %vm250_vm0, %v1946_v17, 0.0  ;;  %v1132_v38 = vadd.f32 %v7207_v63, %v7203_v7  ;;  %v1137_v59 = vadd.f32 %v7208_v41, %v7203_v7  ;;  %v7217_v4 = vld [vmem:[#allocation15_spill] sm:$0xff]  ;;  %v5562_v24 = vld [vmem:[%s3821_s25 + $0x80] sm:$0xff]  ;;  %v7225_v13 = vld [vmem:[#allocation42_spill] sm:$0xff] }
 0x2ba   : > { %v5489_v53 = vpop.xlane.xlu2 %1590  ;;  %v1588_v11 = vpop.xlane.xlu1 %1587  ;;  %v1728_v10 = vsel %vm958_vm8, %v1701_v60, %v1727_v58  ;;  %v1135_v51 = vadd.f32 %v7210_v57, %v7203_v7  ;;  %v1140_v3 = vadd.f32 %v7211_v37, %v7203_v7  ;;  %v1139_v55 = vadd.f32 %v7212_v52, %v7203_v7  ;;  %v7218_v60 = vld [vmem:[#allocation16_spill] sm:$0xff] }
 0x2bb   : > { %v1640_v43 = vadd.f32 %v1588_v11, %v1470_v62  ;;  %v1585_v20 = vpop.xlane.xlu0 %1584  ;;  %v1136_v62 = vadd.f32 %v7209_v8, %v7203_v7  ;;  %v1138_v33 = vadd.f32 %v7213_v46, %v7203_v7  ;;  %v7215_v11 = vld [vmem:[#allocation12_spill] sm:$0xff]  ;;  %v1301_v58 = vadd.f32 %v7218_v60, %v1131_v54  ;;  %v7224_v54 = vld [vmem:[#allocation22_spill] sm:$0xff] }
 0x2bc   : > { %v1639_v44 = vadd.f32 %v1585_v20, %v1469_v0  ;;  %v7214_v0 = vld [vmem:[#allocation11_spill] sm:$0xff]  ;;  %v5553_v34 = vadd.f32 %v7215_v11, %v7203_v7  ;;  %v1307_v49 = vadd.f32 %v7224_v54, %v1137_v59  ;;  %v7226_v63 = vld [vmem:[#allocation28_spill] sm:$0xff]  ;;  %v1953_v59 = vmul.f32 %v5421_v16, %v3508_v25 }
 0x2bd   : > { %v1703_v2 = vperm.slane %v1640_v43, %v4640_v15  ;;  %v1142_v42 = vadd.f32 %v7214_v0, %v7203_v7  ;;  %v7216_v43 = vld [vmem:[#allocation14_spill] sm:$0xff]  ;;  %v7227_v41 = vld [vmem:[#allocation52_spill] sm:$0xff]  ;;  %v1952_v52 = vmul.f32 %v5421_v16, %v5570_v61 }
 0x2be   : > { %v1702_v18 = vperm.slane %v1639_v44, %v4616_v22  ;;  %v1303_v20 = vadd.f32 %v7216_v43, %v1133_v26  ;;  %v1302_v44 = vadd.f32 %v7217_v4, %v1132_v38  ;;  %v1995_v38 = vsel %vm254_vm1, %v1949_v14, 0.0  ;;  %v7232_v43 = vld [vmem:[#allocation23_spill] sm:$0xff]  ;;  %v7233_v4 = vld [vmem:[#allocation32_spill] sm:$0xff] }
 0x2bf   : > { %1984 = vadd.xlane.f32.xlu2 %v1983_v47  ;;  %1981 = vadd.xlane.f32.xlu1 %v1980_v1 }
 0x2c0   : > { %v1704_v29 = vsel %vm907_vm2, %v1703_v2, %v1702_v18  ;;  %1978 = vadd.xlane.f32.xlu0 %v1977_v56  ;;  %v7219_v2 = vld [vmem:[#allocation17_spill] sm:$0xff]  ;;  %v1305_v18 = vadd.f32 %v7220_v31, %v1135_v51  ;;  %v1472_v26 = vadd.f32 %v7225_v13, %v1302_v44  ;;  %v7229_v51 = vld [vmem:[#allocation31_spill] sm:$0xff]  ;;  %v5602_v13 = vld [vmem:[%s3821_s25 + $0x90] sm:$0xff] }
 0x2c1   : > { %v1729_v12 = vsel %vm960_vm9, %v1704_v29, %v1728_v10  ;;  %v1306_v56 = vadd.f32 %v7219_v2, %v1136_v62  ;;  %v7221_v29 = vld [vmem:[#allocation19_spill] sm:$0xff] }
 0x2c2   : > { %3465 = vst.msk [vmem:[%s4718_s30 + $0x10] sm:$0xff] %vm969_vm10, %v1729_v12  ;;  %v1600_v28 = vpop.xlane.xlu2 %1599  ;;  %v1597_v30 = vpop.xlane.xlu1 %1596  ;;  %v1304_v10 = vadd.f32 %v7221_v29, %v1134_v48  ;;  %v7222_v12 = vld [vmem:[#allocation20_spill] sm:$0xff]  ;;  %v1475_v8 = vadd.f32 %v7227_v41, %v1305_v18  ;;  %v7228_v62 = vld [vmem:[#allocation51_spill] sm:$0xff]  ;;  %v7236_v29 = vld [vmem:[#allocation49_spill] sm:$0xff] }
 0x2c3   : > { %v1594_v6 = vpop.xlane.xlu0 %1593  ;;  %v1309_v17 = vadd.f32 %v7222_v12, %v1139_v55  ;;  %v1473_v57 = vadd.f32 %v7228_v62, %v1303_v20  ;;  %v1476_v37 = vadd.f32 %v7229_v51, %v1306_v56  ;;  %v7230_v55 = vld [vmem:[#allocation25_spill] sm:$0xff]  ;;  %v1312_v20 = vadd.f32 %v7232_v43, %v1142_v42  ;;  %v7234_v2 = vld [vmem:[#allocation35_spill] sm:$0xff] }
 0x2c4   : > { %v1474_v48 = vadd.f32 %v7226_v63, %v1304_v10  ;;  %v1310_v46 = vadd.f32 %v7230_v55, %v1140_v3  ;;  %v1642_v11 = vadd.f32 %v1594_v6, %v1472_v26  ;;  %v1477_v56 = vadd.f32 %v7234_v2, %v1307_v49  ;;  %v7235_v31 = vld [vmem:[#allocation39_spill] sm:$0xff]  ;;  %v7239_v55 = vld [vmem:[#allocation44_spill] sm:$0xff] }
 0x2c5   : > { %v1643_v0 = vadd.f32 %v1597_v30, %v1473_v57  ;;  %v1479_v10 = vadd.f32 %v7236_v29, %v1309_v17  ;;  %v5633_v29 = vld [vmem:[%s3821_s25 + $0xb0] sm:$0xff] }
 0x2c6   : > { %v1644_v32 = vadd.f32 %v1600_v28, %v1474_v48  ;;  %v1480_v18 = vadd.f32 %v7235_v31, %v1310_v46  ;;  %v3510_v48 = vld [vmem:[%s3821_s25 + $0x88] sm:$0x3f] }
 0x2c7   : > { %1993 = vadd.xlane.f32.xlu2 %v1992_v9  ;;  %1990 = vadd.xlane.f32.xlu1 %v1989_v5  ;;  %v7223_v9 = vld [vmem:[#allocation21_spill] sm:$0xff] }
 0x2c8   : > { %1987 = vadd.xlane.f32.xlu0 %v1986_v40  ;;  %v1308_v5 = vadd.f32 %v7223_v9, %v1138_v33  ;;  %v2001_v40 = vsel %vm254_vm1, %v1951_v45, 0.0  ;;  %v1954_v45 = vmul.f32 %v5421_v16, %v5562_v24  ;;  %v7231_v33 = vld [vmem:[#allocation45_spill] sm:$0xff]  ;;  %v1709_v6 = vperm.slane %v1644_v32, %v4640_v15 }
 0x2c9   : > { %v1471_v14 = vadd.f32 %v7231_v33, %v1301_v58  ;;  %v1708_v9 = vperm.slane %v1643_v0, %v4616_v22 }
 0x2ca   : > { %v1609_v47 = vpop.xlane.xlu2 %1608  ;;  %v1606_v1 = vpop.xlane.xlu1 %1605  ;;  %v1478_v44 = vadd.f32 %v7233_v4, %v1308_v5  ;;  %v2010_v42 = vsel %vm250_vm0, %v1954_v45, 0.0  ;;  %v1706_v5 = vperm.slane %v1642_v11, %v4640_v15  ;;  %v1956_v45 = vmul.f32 %v5421_v16, %v5602_v13 }
 0x2cb   : > { %v1603_v21 = vpop.xlane.xlu0 %1602  ;;  %v1646_v60 = vadd.f32 %v1606_v1, %v1476_v37  ;;  %v1641_v3 = vadd.f32 %v5489_v53, %v1471_v14  ;;  %v2007_v1 = vsel %vm254_vm1, %v1953_v59, 0.0  ;;  %v1647_v17 = vadd.f32 %v1609_v47, %v1477_v56  ;;  %v3512_v53 = vld [vmem:[%s3821_s25 + $0x98] sm:$0x3f] }
 0x2cc   : > { %v1645_v28 = vadd.f32 %v1603_v21, %v1475_v8  ;;  %v2004_v21 = vsel %vm250_vm0, %v1952_v52, 0.0  ;;  %v7238_v8 = vld [vmem:[#allocation56_spill] sm:$0xff]  ;;  %v1957_v62 = vmul.f32 %v5421_v16, %v3512_v53  ;;  %v1710_v57 = vsel %vm907_vm2, %v1709_v6, %v1708_v9 }
 0x2cd   : > { %v1705_v26 = vperm.slane %v1641_v3, %v4616_v22  ;;  %v1482_v47 = vadd.f32 %v7238_v8, %v1312_v20  ;;  %v1714_v37 = vperm.slane %v1647_v17, %v4616_v22  ;;  %v1955_v52 = vmul.f32 %v5421_v16, %v3510_v48 }
 0x2ce   : > { %v1711_v25 = vperm.slane %v1645_v28, %v4616_v22  ;;  %v2016_v28 = vsel %vm250_vm0, %v1956_v45, 0.0  ;;  %v5682_v45 = vld [vmem:[%s3821_s25 + $0xd0] sm:$0xff] }
 0x2cf   : > { %2002 = vadd.xlane.f32.xlu2 %v2001_v40  ;;  %1999 = vadd.xlane.f32.xlu1 %v1998_v23  ;;  %v1712_v23 = vperm.slane %v1646_v60, %v4640_v15  ;;  %v1707_v51 = vsel %vm907_vm2, %v1706_v5, %v1705_v26  ;;  %v2019_v60 = vsel %vm254_vm1, %v1957_v62, 0.0 }
 0x2d0   : > { %1996 = vadd.xlane.f32.xlu0 %v1995_v38  ;;  %v7237_v38 = vld [vmem:[#allocation24_spill] sm:$0xff]  ;;  %v1730_v11 = vsel %vm948_vm3, %v1710_v57, %v1707_v51 }
 0x2d1   : > { %v1311_v41 = vadd.f32 %v7237_v38, %v5553_v34  ;;  %v1713_v32 = vsel %vm907_vm2, %v1712_v23, %v1711_v25  ;;  %v3518_v25 = vld [vmem:[%s3821_s25 + $0xc8] sm:$0x3f]  ;;  %v5678_v51 = vld [vmem:[%s3821_s25 + $0xe0] sm:$0xff] }
 0x2d2   : > { %v1618_v12 = vpop.xlane.xlu2 %1617  ;;  %v1615_v30 = vpop.xlane.xlu1 %1614  ;;  %v1731_v4 = vsel %vm950_vm4, %v1713_v32, %v1730_v11  ;;  %v1963_v26 = vmul.f32 %v5421_v16, %v3518_v25  ;;  %v1966_v32 = vmul.f32 %v5421_v16, %v5678_v51  ;;  %v5697_v11 = vld [vmem:[#allocation3 + $0xa] ss:$0 sm:$0xff] }
 0x2d3   : > { %v1612_v58 = vpop.xlane.xlu0 %1611  ;;  %v1650_v54 = vadd.f32 %v1618_v12, %v1480_v18  ;;  %v1649_v49 = vadd.f32 %v1615_v30, %v1479_v10  ;;  %v1481_v46 = vadd.f32 %v7239_v55, %v1311_v41  ;;  %v2013_v18 = vsel %vm254_vm1, %v1955_v52, 0.0  ;;  %v3514_v10 = vld [vmem:[%s3821_s25 + $0xa8] sm:$0x3f]  ;;  %v5638_v12 = vld [vmem:[%s3821_s25 + $0xa0] sm:$0xff] }
 0x2d4   : > { %v1648_v40 = vadd.f32 %v1612_v58, %v1478_v44  ;;  %v1960_v58 = vmul.f32 %v5421_v16, %v5633_v29 }
 0x2d5   : > { %v1718_v34 = vperm.slane %v1650_v54, %v4640_v15  ;;  %v1717_v59 = vperm.slane %v1649_v49, %v4616_v22  ;;  %v5661_v54 = vld [vmem:[%s3821_s25 + $0xc0] sm:$0xff]  ;;  %v3516_v49 = vld [vmem:[%s3821_s25 + $0xb8] sm:$0x3f] }
 0x2d6   : > { %v1715_v63 = vperm.slane %v1648_v40, %v4640_v15  ;;  %v2028_v40 = vsel %vm250_vm0, %v1960_v58, 0.0  ;;  %v1961_v48 = vmul.f32 %v5421_v16, %v3516_v49  ;;  %v7241_v58 = vld [vmem:[#allocation37_spill] sm:$0xff] }
 0x2d7   : > { %2011 = vadd.xlane.f32.xlu2 %v2010_v42  ;;  %2008 = vadd.xlane.f32.xlu1 %v2007_v1  ;;  %v1719_v2 = vsel %vm907_vm2, %v1718_v34, %v1717_v59  ;;  %v1959_v42 = vmul.f32 %v5421_v16, %v3514_v10  ;;  %v1964_v59 = vmul.f32 %v5421_v16, %v5682_v45 }
 0x2d8   : > { %2005 = vadd.xlane.f32.xlu0 %v2004_v21  ;;  %v1716_v33 = vsel %vm907_vm2, %v1715_v63, %v1714_v37  ;;  %v1958_v21 = vmul.f32 %v5421_v16, %v5638_v12  ;;  %v1962_v63 = vmul.f32 %v5421_v16, %v5661_v54  ;;  %v2031_v57 = vsel %vm254_vm1, %v1961_v48, 0.0  ;;  %v3520_v37 = vld [vmem:[%s3821_s25 + $0xd8] sm:$0x3f]  ;;  %v3528_v48 = vld [vmem:[%s3821_s25 + $0x49] sm:$0x3f] }
 0x2d9   : > { %v1732_v56 = vsel %vm952_vm5, %v1716_v33, %v1731_v4  ;;  %v2025_v53 = vsel %vm254_vm1, %v1959_v42, 0.0  ;;  %v1965_v34 = vmul.f32 %v5421_v16, %v3520_v37  ;;  %v2046_v33 = vsel %vm250_vm0, %v1966_v32, 0.0  ;;  %v3522_v4 = vld [vmem:[%s3821_s25 + $0xe8] sm:$0x3f] }
 0x2da   : > { %v5622_v14 = vpop.xlane.xlu2 %1799  ;;  %v1624_v0 = vpop.xlane.xlu1 %1623  ;;  %v1733_v6 = vsel %vm954_vm6, %v1719_v2, %v1732_v56  ;;  %v2022_v23 = vsel %vm250_vm0, %v1958_v21, 0.0  ;;  %v2034_v62 = vsel %vm250_vm0, %v1962_v63, 0.0  ;;  %v1967_v2 = vmul.f32 %v5421_v16, %v3522_v4  ;;  %v3530_v63 = vld [vmem:[%s3821_s25 + $0x59] sm:$0x3f]  ;;  %v7247_v4 = vld [vmem:[#allocation50_spill] sm:$0xff] }
 0x2db   : > { %v1652_v43 = vadd.f32 %v1624_v0, %v1482_v47  ;;  %v1621_v20 = vpop.xlane.xlu0 %1620  ;;  %v2037_v47 = vsel %vm254_vm1, %v1963_v26, 0.0  ;;  %v2043_v0 = vsel %vm254_vm1, %v1965_v34, 0.0  ;;  %v2115_v16 = vmul.f32 %v5697_v11, %v7241_v58 }
 0x2dc   : > { %v1651_v44 = vadd.f32 %v1621_v20, %v1481_v46  ;;  %v3524_v20 = vld [vmem:[%s3821_s25 + $0x29] sm:$0x3f]  ;;  %v2116_v37 = vmul.f32 %v5697_v11, %v3528_v48 }
 0x2dd   : > { %v1721_v31 = vperm.slane %v1652_v43, %v4640_v15  ;;  %v2040_v43 = vsel %vm250_vm0, %v1964_v59, 0.0  ;;  %v2151_v25 = vsel %vm250_vm0, %v2115_v16, 0.0 }
 0x2de   : > { %v1720_v3 = vperm.slane %v1651_v44, %v4616_v22  ;;  %v2112_v44 = vmul.f32 %v5697_v11, %v3524_v20  ;;  %v3532_v20 = vld [vmem:[%s3821_s25 + $0x69] sm:$0x3f]  ;;  %v6169_v22 = vld [vmem:[%s3821_s25 + $0xe1] sm:$0xff] }
 0x2df   : > { %2020 = vadd.xlane.f32.xlu2 %v2019_v60  ;;  %2017 = vadd.xlane.f32.xlu1 %v2016_v28  ;;  %v7240_v60 = vld [vmem:[#allocation29_spill] sm:$0xff] }
 0x2e0   : > { %v1722_v30 = vsel %vm907_vm2, %v1721_v31, %v1720_v3  ;;  %2014 = vadd.xlane.f32.xlu0 %v2013_v18  ;;  %v2111_v28 = vmul.f32 %v5697_v11, %v7240_v60  ;;  %v2142_v10 = vsel %vm254_vm1, %v2112_v44, 0.0  ;;  %v2121_v44 = vmul.f32 %v5697_v11, %v7247_v4  ;;  %v7257_v4 = vld [vmem:[#allocation48_spill] sm:$0xff] }
 0x2e1   : > { %v1734_v1 = vsel %vm956_vm7, %v1722_v30, %v1733_v6  ;;  %v2049_v30 = vsel %vm254_vm1, %v1967_v2, 0.0  ;;  %v3526_v6 = vld [vmem:[%s3821_s25 + $0x39] sm:$0x3f]  ;;  %v2120_v60 = vmul.f32 %v5697_v11, %v3532_v20 }
 0x2e2   : > { %3466 = vst.msk [vmem:[%s4718_s30 + $0x18] sm:$0x3f] %vm971_vm11, %v1734_v1  ;;  %v5650_v9 = vpop.xlane.xlu2 %1808  ;;  %v5652_v5 = vpop.xlane.xlu1 %1805  ;;  %v2139_v3 = vsel %vm250_vm0, %v2111_v28, 0.0  ;;  %v2114_v42 = vmul.f32 %v5697_v11, %v3526_v6  ;;  %v7242_v1 = vld [vmem:[#allocation38_spill] sm:$0xff]  ;;  %v2169_v6 = vsel %vm250_vm0, %v2121_v44, 0.0  ;;  %v2125_v44 = vmul.f32 %v5697_v11, %v7257_v4  ;;  %v7262_v4 = vld [vmem:[#allocation55_spill] sm:$0xff] }
 0x2e3   : > { %v5654_v17 = vpop.xlane.xlu0 %1802  ;;  %v2113_v21 = vmul.f32 %v5697_v11, %v7242_v1  ;;  %v7248_v28 = vld [vmem:[#allocation30_spill] sm:$0xff]  ;;  %v2166_v58 = vsel %vm254_vm1, %v2120_v60, 0.0  ;;  %v3534_v1 = vld [vmem:[%s3821_s25 + $0x79] sm:$0x3f] }
 0x2e4   : > { %v2148_v49 = vsel %vm254_vm1, %v2114_v42, 0.0  ;;  %v2119_v2 = vmul.f32 %v5697_v11, %v7248_v28  ;;  %v3536_v42 = vld [vmem:[%s3821_s25 + $0x89] sm:$0x3f] }
 0x2e5   : > { %v2145_v26 = vsel %vm250_vm0, %v2113_v21, 0.0  ;;  %v2124_v21 = vmul.f32 %v5697_v11, %v3536_v42  ;;  %v3542_v42 = vld [vmem:[%s3821_s25 + $0xb9] sm:$0x3f] }
 0x2e6   : > { %v2163_v16 = vsel %vm250_vm0, %v2119_v2, 0.0 }
 0x2e7   : > { %2029 = vadd.xlane.f32.xlu2 %v2028_v40  ;;  %2026 = vadd.xlane.f32.xlu1 %v2025_v53 }
 0x2e8   : > { %2023 = vadd.xlane.f32.xlu0 %v2022_v23 }
 0x2ea   : > { %v5668_v38 = vpop.xlane.xlu2 %1817  ;;  %v5670_v41 = vpop.xlane.xlu1 %1814 }
 0x2eb   : > { %v5672_v8 = vpop.xlane.xlu0 %1811 }
 0x2ef   : > { %2038 = vadd.xlane.f32.xlu2 %v2037_v47  ;;  %2035 = vadd.xlane.f32.xlu1 %v2034_v62  ;;  %v2118_v47 = vmul.f32 %v5697_v11, %v3530_v63  ;;  %v7243_v62 = vld [vmem:[#allocation47_spill] sm:$0xff] }
 0x2f0   : > { %2032 = vadd.xlane.f32.xlu0 %v2031_v57  ;;  %v2117_v57 = vmul.f32 %v5697_v11, %v7243_v62  ;;  %v2178_v62 = vsel %vm254_vm1, %v2124_v21, 0.0  ;;  %v2130_v21 = vmul.f32 %v5697_v11, %v3542_v42 }
 0x2f2   : > { %v5689_v52 = vpop.xlane.xlu2 %1826  ;;  %v5691_v55 = vpop.xlane.xlu1 %1823 }
 0x2f3   : > { %v5693_v46 = vpop.xlane.xlu0 %1820 }
 0x2f7   : > { %2047 = vadd.xlane.f32.xlu2 %v2046_v33  ;;  %2044 = vadd.xlane.f32.xlu1 %v2043_v0  ;;  %v2160_v33 = vsel %vm254_vm1, %v2118_v47, 0.0  ;;  %v2157_v0 = vsel %vm250_vm0, %v2117_v57, 0.0 }
 0x2f8   : > { %2041 = vadd.xlane.f32.xlu0 %v2040_v43  ;;  %v2154_v43 = vsel %vm254_vm1, %v2116_v37, 0.0 }
 0x2fa   : > { %v5706_v56 = vpop.xlane.xlu2 %1835  ;;  %v5708_v31 = vpop.xlane.xlu1 %1832 }
 0x2fb   : > { %v5710_v18 = vpop.xlane.xlu0 %1829 }
 0x2ff   : > { %2143 = vadd.xlane.f32.xlu2 %v2142_v10  ;;  %2140 = vadd.xlane.f32.xlu1 %v2139_v3 }
 0x300   : > { %2050 = vadd.xlane.f32.xlu0 %v2049_v30 }
 0x302   : > { %v5721_v40 = vpop.xlane.xlu2 %1844  ;;  %v5723_v53 = vpop.xlane.xlu1 %1841 }
 0x303   : > { %v5725_v23 = vpop.xlane.xlu0 %1838 }
 0x307   : > { %2152 = vadd.xlane.f32.xlu2 %v2151_v25  ;;  %2149 = vadd.xlane.f32.xlu1 %v2148_v49  ;;  %v7252_v25 = vld [vmem:[#allocation40_spill] sm:$0xff] }
 0x308   : > { %2146 = vadd.xlane.f32.xlu0 %v2145_v26  ;;  %v2123_v49 = vmul.f32 %v5697_v11, %v7252_v25  ;;  %v2122_v26 = vmul.f32 %v5697_v11, %v3534_v1  ;;  %v3540_v1 = vld [vmem:[%s3821_s25 + $0xa9] sm:$0x3f]  ;;  %v7261_v25 = vld [vmem:[#allocation60_spill] sm:$0xff] }
 0x30a   : > { %v5736_v32 = vpop.xlane.xlu2 %1853  ;;  %v5738_v34 = vpop.xlane.xlu1 %1850  ;;  %v2175_v57 = vsel %vm250_vm0, %v2123_v49, 0.0  ;;  %v2172_v37 = vsel %vm254_vm1, %v2122_v26, 0.0  ;;  %v2129_v49 = vmul.f32 %v5697_v11, %v7261_v25  ;;  %v2128_v26 = vmul.f32 %v5697_v11, %v3540_v1 }
 0x30b   : > { %7244 = vst [vmem:[#allocation26_spill] sm:$0xff] %v5736_v32  ;;  %v5740_v59 = vpop.xlane.xlu0 %1847 }
 0x30c   : > { %7245 = vst [vmem:[#allocation27_spill] sm:$0xff] %v5738_v34 }
 0x30d   : > { %7246 = vst [vmem:[#allocation64_spill] sm:$0xff] %v5740_v59 }
 0x30f   : > { %2161 = vadd.xlane.f32.xlu2 %v2160_v33  ;;  %2158 = vadd.xlane.f32.xlu1 %v2157_v0  ;;  %v3538_v33 = vld [vmem:[%s3821_s25 + $0x99] sm:$0x3f]  ;;  %v7256_v0 = vld [vmem:[#allocation53_spill] sm:$0xff] }
 0x310   : > { %2155 = vadd.xlane.f32.xlu0 %v2154_v43  ;;  %v2127_v43 = vmul.f32 %v5697_v11, %v7256_v0  ;;  %v2126_v20 = vmul.f32 %v5697_v11, %v3538_v33  ;;  %v2196_v33 = vsel %vm254_vm1, %v2130_v21, 0.0  ;;  %v2193_v0 = vsel %vm250_vm0, %v2129_v49, 0.0 }
 0x312   : > { %v5751_v10 = vpop.xlane.xlu2 %1862  ;;  %v5753_v3 = vpop.xlane.xlu1 %1859 }
 0x313   : > { %7249 = vst [vmem:[#allocation43_spill] sm:$0xff] %v5751_v10  ;;  %v5755_v30 = vpop.xlane.xlu0 %1856 }
 0x314   : > { %7250 = vst [vmem:[#allocation41_spill] sm:$0xff] %v5753_v3  ;;  %v5986_v3 = vld [vmem:[#allocation3 + $0xc] ss:$0 sm:$0xff] }
 0x315   : > { %7251 = vst [vmem:[#allocation65_spill] sm:$0xff] %v5755_v30 }
 0x317   : > { %2170 = vadd.xlane.f32.xlu2 %v2169_v6  ;;  %2167 = vadd.xlane.f32.xlu1 %v2166_v58  ;;  %v2187_v6 = vsel %vm250_vm0, %v2127_v43, 0.0  ;;  %v2184_v58 = vsel %vm254_vm1, %v2126_v20, 0.0  ;;  %v2190_v43 = vsel %vm254_vm1, %v2128_v26, 0.0  ;;  %v3544_v20 = vld [vmem:[%s3821_s25 + $0xc9] sm:$0x3f] }
 0x318   : > { %2164 = vadd.xlane.f32.xlu0 %v2163_v16  ;;  %v2181_v16 = vsel %vm250_vm0, %v2125_v44, 0.0  ;;  %v2133_v44 = vmul.f32 %v5697_v11, %v7262_v4 }
 0x31a   : > { %v5766_v63 = vpop.xlane.xlu2 %1871  ;;  %v5768_v48 = vpop.xlane.xlu1 %1868  ;;  %v2205_v25 = vsel %vm250_vm0, %v2133_v44, 0.0 }
 0x31b   : > { %7253 = vst [vmem:[#allocation13_spill] sm:$0xff] %v5766_v63  ;;  %v5770_v47 = vpop.xlane.xlu0 %1865 }
 0x31c   : > { %7254 = vst [vmem:[#allocation46_spill] sm:$0xff] %v5768_v48 }
 0x31d   : > { %7255 = vst [vmem:[#allocation36_spill] sm:$0xff] %v5770_v47 }
 0x31f   : > { %2179 = vadd.xlane.f32.xlu2 %v2178_v62  ;;  %2176 = vadd.xlane.f32.xlu1 %v2175_v57 }
 0x320   : > { %2173 = vadd.xlane.f32.xlu0 %v2172_v37 }
 0x322   : > { %v5781_v60 = vpop.xlane.xlu2 %1880  ;;  %v5783_v28 = vpop.xlane.xlu1 %1877 }
 0x323   : > { %7258 = vst [vmem:[#allocation59_spill] sm:$0xff] %v5781_v60  ;;  %v5785_v2 = vpop.xlane.xlu0 %1874 }
 0x324   : > { %7259 = vst [vmem:[#allocation54_spill] sm:$0xff] %v5783_v28 }
 0x325   : > { %7260 = vst [vmem:[#allocation57_spill] sm:$0xff] %v5785_v2 }
 0x327   : > { %2188 = vadd.xlane.f32.xlu2 %v2187_v6  ;;  %2185 = vadd.xlane.f32.xlu1 %v2184_v58  ;;  %v2132_v6 = vmul.f32 %v5697_v11, %v3544_v20  ;;  %v7263_v58 = vld [vmem:[#allocation63_spill] sm:$0xff]  ;;  %v2135_v20 = vmul.f32 %v5697_v11, %v5396_v35 }
 0x328   : > { %2182 = vadd.xlane.f32.xlu0 %v2181_v16  ;;  %v2131_v16 = vmul.f32 %v5697_v11, %v7263_v58  ;;  %v3549_v35 = vld [vmem:[%s3821_s25 + $0xf1] sm:$0xff] }
 0x329   : > { %v2202_v49 = vsel %vm254_vm1, %v2132_v6, 0.0  ;;  %v2211_v2 = vsel %vm250_vm0, %v2135_v20, 0.0 }
 0x32a   : > { %v5796_v62 = vpop.xlane.xlu2 %1975  ;;  %v5798_v57 = vpop.xlane.xlu1 %1972  ;;  %v2199_v26 = vsel %vm250_vm0, %v2131_v16, 0.0 }
 0x32b   : > { %v5800_v37 = vpop.xlane.xlu0 %1969 }
 0x32f   : > { %2197 = vadd.xlane.f32.xlu2 %v2196_v33  ;;  %2194 = vadd.xlane.f32.xlu1 %v2193_v0  ;;  %v3548_v33 = vld [vmem:[%s3821_s25 + $0xe9] sm:$0x3f]  ;;  %v3546_v0 = vld [vmem:[%s3821_s25 + $0xd9] sm:$0x3f] }
 0x330   : > { %2191 = vadd.xlane.f32.xlu0 %v2190_v43  ;;  %v2136_v43 = vmul.f32 %v5697_v11, %v3548_v33  ;;  %v2134_v4 = vmul.f32 %v5697_v11, %v3546_v0 }
 0x332   : > { %v5811_v42 = vpop.xlane.xlu2 %1984  ;;  %v5813_v1 = vpop.xlane.xlu1 %1981  ;;  %v2214_v16 = vsel %vm254_vm1, %v2136_v43, 0.0  ;;  %v2137_v43 = vmul.f32 %v5697_v11, %v3549_v35 }
 0x333   : > { %v5815_v21 = vpop.xlane.xlu0 %1978 }
 0x337   : > { %2206 = vadd.xlane.f32.xlu2 %v2205_v25  ;;  %2203 = vadd.xlane.f32.xlu1 %v2202_v49  ;;  %v5834_v25 = vld [vmem:[#allocation3 + $0xb] ss:$0 sm:$0xff]  ;;  %v2208_v49 = vsel %vm254_vm1, %v2134_v4, 0.0 }
 0x338   : > { %2200 = vadd.xlane.f32.xlu0 %v2199_v26  ;;  %v3550_v26 = vld [vmem:[%s3821_s25 + $0xf9] sm:$0x3f]  ;;  %v2281_v33 = vmul.f32 %v5834_v25, %v5428_v39 }
 0x339   : > { %v2138_v0 = vmul.f32 %v5697_v11, %v3550_v26  ;;  %v2283_v11 = vmul.f32 %v5834_v25, %v5467_v36  ;;  %v2287_v36 = vmul.f32 %v5834_v25, %v5500_v50  ;;  %v3558_v50 = vld [vmem:[%s3821_s25 + $0x58] sm:$0x3f] }
 0x33a   : > { %v5826_v58 = vpop.xlane.xlu2 %1993  ;;  %v5828_v44 = vpop.xlane.xlu1 %1990  ;;  %v2309_v4 = vsel %vm250_vm0, %v2281_v33, 0.0  ;;  %v2288_v48 = vmul.f32 %v5834_v25, %v3558_v50  ;;  %v2291_v50 = vmul.f32 %v5834_v25, %v5570_v61 }
 0x33b   : > { %v5830_v6 = vpop.xlane.xlu0 %1987  ;;  %v2220_v63 = vsel %vm254_vm1, %v2138_v0, 0.0 }
 0x33f   : > { %2215 = vadd.xlane.f32.xlu2 %v2214_v16  ;;  %2212 = vadd.xlane.f32.xlu1 %v2211_v2  ;;  %v2217_v2 = vsel %vm250_vm0, %v2137_v43, 0.0  ;;  %v3554_v16 = vld [vmem:[%s3821_s25 + $0x38] sm:$0x3f] }
 0x340   : > { %2209 = vadd.xlane.f32.xlu0 %v2208_v49  ;;  %v3552_v49 = vld [vmem:[%s3821_s25 + $0x28] sm:$0x3f]  ;;  %v2284_v39 = vmul.f32 %v5834_v25, %v3554_v16 }
 0x341   : > { %v2282_v26 = vmul.f32 %v5834_v25, %v3552_v49  ;;  %v2285_v49 = vmul.f32 %v5834_v25, %v5505_v27 }
 0x342   : > { %v5843_v28 = vpop.xlane.xlu2 %2002  ;;  %v5845_v20 = vpop.xlane.xlu1 %1999  ;;  %v2318_v43 = vsel %vm254_vm1, %v2284_v39, 0.0 }
 0x343   : > { %v5847_v60 = vpop.xlane.xlu0 %1996 }
 0x347   : > { %2310 = vadd.xlane.f32.xlu2 %v2309_v4  ;;  %2221 = vadd.xlane.f32.xlu1 %v2220_v63  ;;  %v2315_v4 = vsel %vm250_vm0, %v2283_v11, 0.0  ;;  %v2312_v63 = vsel %vm254_vm1, %v2282_v26, 0.0  ;;  %v2327_v26 = vsel %vm250_vm0, %v2287_v36, 0.0 }
 0x348   : > { %2218 = vadd.xlane.f32.xlu0 %v2217_v2  ;;  %v3556_v2 = vld [vmem:[%s3821_s25 + $0x48] sm:$0x3f] }
 0x349   : > { %v2286_v16 = vmul.f32 %v5834_v25, %v3556_v2  ;;  %v2289_v2 = vmul.f32 %v5834_v25, %v5522_v19  ;;  %v2293_v19 = vmul.f32 %v5834_v25, %v5562_v24  ;;  %v3564_v24 = vld [vmem:[%s3821_s25 + $0x88] sm:$0x3f] }
 0x34a   : > { %v5858_v35 = vpop.xlane.xlu2 %2011  ;;  %v5860_v33 = vpop.xlane.xlu1 %2008 }
 0x34b   : > { %v5862_v0 = vpop.xlane.xlu0 %2005 }
 0x34f   : > { %2319 = vadd.xlane.f32.xlu2 %v2318_v43  ;;  %2316 = vadd.xlane.f32.xlu1 %v2315_v4  ;;  %v2324_v43 = vsel %vm254_vm1, %v2286_v16, 0.0  ;;  %v2321_v4 = vsel %vm250_vm0, %v2285_v49, 0.0 }
 0x350   : > { %2313 = vadd.xlane.f32.xlu0 %v2312_v63  ;;  %v3560_v63 = vld [vmem:[%s3821_s25 + $0x68] sm:$0x3f] }
 0x351   : > { %v2290_v27 = vmul.f32 %v5834_v25, %v3560_v63 }
 0x352   : > { %v5873_v47 = vpop.xlane.xlu2 %2020  ;;  %v5875_v39 = vpop.xlane.xlu1 %2017 }
 0x353   : > { %7264 = vst [vmem:[#allocation58_spill] sm:$0xff] %v5873_v47  ;;  %v5877_v11 = vpop.xlane.xlu0 %2014  ;;  %v2336_v49 = vsel %vm254_vm1, %v2290_v27, 0.0 }
 0x354   : > { %7265 = vst [vmem:[#allocation34_spill] sm:$0xff] %v5875_v39 }
 0x357   : > { %2328 = vadd.xlane.f32.xlu2 %v2327_v26  ;;  %2325 = vadd.xlane.f32.xlu1 %v2324_v43  ;;  %v2333_v26 = vsel %vm250_vm0, %v2289_v2, 0.0  ;;  %v2330_v43 = vsel %vm254_vm1, %v2288_v48, 0.0  ;;  %v2345_v48 = vsel %vm250_vm0, %v2293_v19, 0.0 }
 0x358   : > { %2322 = vadd.xlane.f32.xlu0 %v2321_v4  ;;  %v3562_v4 = vld [vmem:[%s3821_s25 + $0x78] sm:$0x3f] }
 0x359   : > { %v2292_v63 = vmul.f32 %v5834_v25, %v3562_v4  ;;  %v2295_v4 = vmul.f32 %v5834_v25, %v5602_v13  ;;  %v2299_v13 = vmul.f32 %v5834_v25, %v5633_v29  ;;  %v3570_v29 = vld [vmem:[%s3821_s25 + $0xb8] sm:$0x3f] }
 0x35a   : > { %v5888_v39 = vpop.xlane.xlu2 %2029  ;;  %v5890_v36 = vpop.xlane.xlu1 %2026 }
 0x35b   : > { %7266 = vst [vmem:[#allocation33_spill] sm:$0xff] %v5888_v39  ;;  %v5892_v16 = vpop.xlane.xlu0 %2023 }
 0x35c   : > { %7267 = vst [vmem:[#allocation6_spill] sm:$0xff] %v5890_v36 }
 0x35d   : > { %7268 = vst [vmem:[#allocation7_spill] sm:$0xff] %v5892_v16 }
 0x35f   : > { %2337 = vadd.xlane.f32.xlu2 %v2336_v49  ;;  %2334 = vadd.xlane.f32.xlu1 %v2333_v26  ;;  %v2342_v49 = vsel %vm254_vm1, %v2292_v63, 0.0  ;;  %v2339_v26 = vsel %vm250_vm0, %v2291_v50, 0.0 }
 0x360   : > { %2331 = vadd.xlane.f32.xlu0 %v2330_v43  ;;  %v3566_v43 = vld [vmem:[%s3821_s25 + $0x98] sm:$0x3f] }
 0x361   : > { %v2296_v61 = vmul.f32 %v5834_v25, %v3566_v43 }
 0x362   : > { %v5903_v39 = vpop.xlane.xlu2 %2038  ;;  %v5905_v27 = vpop.xlane.xlu1 %2035 }
 0x363   : > { %7269 = vst [vmem:[#allocation8_spill] sm:$0xff] %v5903_v39  ;;  %v5907_v2 = vpop.xlane.xlu0 %2032  ;;  %v2354_v50 = vsel %vm254_vm1, %v2296_v61, 0.0 }
 0x364   : > { %7270 = vst [vmem:[#allocation9_spill] sm:$0xff] %v5905_v27  ;;  %v2294_v27 = vmul.f32 %v5834_v25, %v3564_v24  ;;  %v2297_v24 = vmul.f32 %v5834_v25, %v5638_v12 }
 0x365   : > { %7271 = vst [vmem:[#allocation10_spill] sm:$0xff] %v5907_v2 }
 0x367   : > { %2346 = vadd.xlane.f32.xlu2 %v2345_v48  ;;  %2343 = vadd.xlane.f32.xlu1 %v2342_v49  ;;  %v2351_v48 = vsel %vm250_vm0, %v2295_v4, 0.0  ;;  %v2348_v49 = vsel %vm254_vm1, %v2294_v27, 0.0  ;;  %v2363_v27 = vsel %vm250_vm0, %v2299_v13, 0.0 }
 0x368   : > { %2340 = vadd.xlane.f32.xlu0 %v2339_v26  ;;  %v3568_v26 = vld [vmem:[%s3821_s25 + $0xa8] sm:$0x3f] }
 0x369   : > { %v2298_v43 = vmul.f32 %v5834_v25, %v3568_v26  ;;  %v2301_v26 = vmul.f32 %v5834_v25, %v5661_v54  ;;  %v2305_v54 = vmul.f32 %v5834_v25, %v5678_v51  ;;  %v3577_v51 = vld [vmem:[%s3821_s25 + $0xf0] sm:$0xff] }
 0x36a   : > { %v5918_v39 = vpop.xlane.xlu2 %2047  ;;  %v5920_v19 = vpop.xlane.xlu1 %2044  ;;  %v2307_v2 = vmul.f32 %v5834_v25, %v3577_v51 }
 0x36b   : > { %7272 = vst [vmem:[#allocation11_spill] sm:$0xff] %v5918_v39  ;;  %v5922_v63 = vpop.xlane.xlu0 %2041  ;;  %v2300_v39 = vmul.f32 %v5834_v25, %v3570_v29  ;;  %v2303_v29 = vmul.f32 %v5834_v25, %v5682_v45 }
 0x36c   : > { %7273 = vst [vmem:[#allocation12_spill] sm:$0xff] %v5920_v19  ;;  %v2387_v47 = vsel %vm250_vm0, %v2307_v2, 0.0 }
 0x36d   : > { %7274 = vst [vmem:[#allocation14_spill] sm:$0xff] %v5922_v63 }
 0x36f   : > { %2355 = vadd.xlane.f32.xlu2 %v2354_v50  ;;  %2352 = vadd.xlane.f32.xlu1 %v2351_v48  ;;  %v2360_v50 = vsel %vm254_vm1, %v2298_v43, 0.0  ;;  %v2357_v48 = vsel %vm250_vm0, %v2297_v24, 0.0 }
 0x370   : > { %2349 = vadd.xlane.f32.xlu0 %v2348_v49  ;;  %v3572_v49 = vld [vmem:[%s3821_s25 + $0xc8] sm:$0x3f] }
 0x371   : > { %v2302_v12 = vmul.f32 %v5834_v25, %v3572_v49 }
 0x372   : > { %v5933_v19 = vpop.xlane.xlu2 %2143  ;;  %v5935_v61 = vpop.xlane.xlu1 %2140 }
 0x373   : > { %v5937_v4 = vpop.xlane.xlu0 %2050  ;;  %v2372_v24 = vsel %vm254_vm1, %v2302_v12, 0.0 }
 0x374   : > { %7275 = vst [vmem:[#allocation15_spill] sm:$0xff] %v5937_v4 }
 0x377   : > { %2364 = vadd.xlane.f32.xlu2 %v2363_v27  ;;  %2361 = vadd.xlane.f32.xlu1 %v2360_v50  ;;  %v2369_v27 = vsel %vm250_vm0, %v2301_v26, 0.0  ;;  %v2366_v50 = vsel %vm254_vm1, %v2300_v39, 0.0  ;;  %v2381_v39 = vsel %vm250_vm0, %v2305_v54, 0.0 }
 0x378   : > { %2358 = vadd.xlane.f32.xlu0 %v2357_v48  ;;  %v3574_v48 = vld [vmem:[%s3821_s25 + $0xd8] sm:$0x3f] }
 0x379   : > { %v2304_v49 = vmul.f32 %v5834_v25, %v3574_v48  ;;  %v3576_v48 = vld [vmem:[%s3821_s25 + $0xe8] sm:$0x3f] }
 0x37a   : > { %v5948_v4 = vpop.xlane.xlu2 %2152  ;;  %v5950_v13 = vpop.xlane.xlu1 %2149  ;;  %v2306_v16 = vmul.f32 %v5834_v25, %v3576_v48 }
 0x37b   : > { %v5952_v43 = vpop.xlane.xlu0 %2146 }
 0x37f   : > { %2373 = vadd.xlane.f32.xlu2 %v2372_v24  ;;  %2370 = vadd.xlane.f32.xlu1 %v2369_v27  ;;  %v2378_v24 = vsel %vm254_vm1, %v2304_v49, 0.0  ;;  %v2375_v27 = vsel %vm250_vm0, %v2303_v29, 0.0 }
 0x380   : > { %2367 = vadd.xlane.f32.xlu0 %v2366_v50  ;;  %v3578_v50 = vld [vmem:[%s3821_s25 + $0xf8] sm:$0x3f] }
 0x381   : > { %v2308_v45 = vmul.f32 %v5834_v25, %v3578_v50  ;;  %v3581_v25 = vld [vmem:[%s3821_s25 + $0x11] sm:$0xff] }
 0x382   : > { %v5963_v12 = vpop.xlane.xlu2 %2161  ;;  %v5965_v63 = vpop.xlane.xlu1 %2158  ;;  %v2538_v2 = vmul.f32 %v5986_v3, %v3581_v25 }
 0x383   : > { %v5967_v26 = vpop.xlane.xlu0 %2155  ;;  %v2390_v36 = vsel %vm254_vm1, %v2308_v45, 0.0 }
 0x387   : > { %2382 = vadd.xlane.f32.xlu2 %v2381_v39  ;;  %2379 = vadd.xlane.f32.xlu1 %v2378_v24  ;;  %v2384_v39 = vsel %vm254_vm1, %v2306_v16, 0.0  ;;  %v5990_v24 = vld [vmem:[%s3821_s25 + $0x21] sm:$0xff] }
 0x388   : > { %2376 = vadd.xlane.f32.xlu0 %v2375_v27  ;;  %7277 = vst [vmem:[#allocation17_spill] sm:$0xff] %v5990_v24  ;;  %v3582_v27 = vld [vmem:[%s3821_s25 + $0x19] sm:$0x3f]  ;;  %v2540_v50 = vmul.f32 %v5986_v3, %v5990_v24 }
 0x389   : > { %v2539_v51 = vmul.f32 %v5986_v3, %v3582_v27  ;;  %v3584_v27 = vld [vmem:[%s3821_s25 + $0x29] sm:$0x3f] }
 0x38a   : > { %v5978_v54 = vpop.xlane.xlu2 %2170  ;;  %v5980_v49 = vpop.xlane.xlu1 %2167  ;;  %v2572_v30 = vsel %vm250_vm0, %v2540_v50, 0.0  ;;  %v2541_v50 = vmul.f32 %v5986_v3, %v3584_v27 }
 0x38b   : > { %v5982_v29 = vpop.xlane.xlu0 %2164  ;;  %v2569_v10 = vsel %vm254_vm1, %v2539_v51, 0.0 }
 0x38c   : > { %7276 = vst [vmem:[#allocation16_spill] sm:$0xff] %v5982_v29 }
 0x38f   : > { %2391 = vadd.xlane.f32.xlu2 %v2390_v36  ;;  %2388 = vadd.xlane.f32.xlu1 %v2387_v47  ;;  %v2566_v47 = vsel %vm250_vm0, %v2538_v2, 0.0  ;;  %v3586_v36 = vld [vmem:[%s3821_s25 + $0x39] sm:$0x3f] }
 0x390   : > { %2385 = vadd.xlane.f32.xlu0 %v2384_v39  ;;  %v6009_v39 = vld [vmem:[%s3821_s25 + $0x31] sm:$0xff]  ;;  %v2543_v25 = vmul.f32 %v5986_v3, %v3586_v36  ;;  %v6030_v36 = vld [vmem:[%s3821_s25 + $0x41] sm:$0xff] }
 0x391   : > { %7281 = vst [vmem:[#allocation21_spill] sm:$0xff] %v6009_v39  ;;  %v2542_v24 = vmul.f32 %v5986_v3, %v6009_v39 }
 0x392   : > { %v5998_v48 = vpop.xlane.xlu2 %2179  ;;  %v6000_v16 = vpop.xlane.xlu1 %2176  ;;  %v2581_v34 = vsel %vm254_vm1, %v2543_v25, 0.0  ;;  %7286 = vst [vmem:[#allocation51_spill] sm:$0xff] %v6030_v36 }
 0x393   : > { %7278 = vst [vmem:[#allocation18_spill] sm:$0xff] %v5998_v48  ;;  %v6002_v45 = vpop.xlane.xlu0 %2173  ;;  %v2578_v32 = vsel %vm250_vm0, %v2542_v24, 0.0  ;;  %v2544_v24 = vmul.f32 %v5986_v3, %v6030_v36 }
 0x394   : > { %7279 = vst [vmem:[#allocation19_spill] sm:$0xff] %v6000_v16 }
 0x395   : > { %7280 = vst [vmem:[#allocation20_spill] sm:$0xff] %v6002_v45 }
 0x397   : > { %2573 = vadd.xlane.f32.xlu2 %v2572_v30  ;;  %2570 = vadd.xlane.f32.xlu1 %v2569_v10  ;;  %v2575_v10 = vsel %vm254_vm1, %v2541_v50, 0.0  ;;  %v6026_v30 = vld [vmem:[%s3821_s25 + $0x51] sm:$0xff] }
 0x398   : > { %2567 = vadd.xlane.f32.xlu0 %v2566_v47  ;;  %7285 = vst [vmem:[#allocation52_spill] sm:$0xff] %v6026_v30  ;;  %v3588_v47 = vld [vmem:[%s3821_s25 + $0x49] sm:$0x3f]  ;;  %v2546_v27 = vmul.f32 %v5986_v3, %v6026_v30  ;;  %v6048_v30 = vld [vmem:[%s3821_s25 + $0x61] sm:$0xff] }
 0x399   : > { %v2545_v25 = vmul.f32 %v5986_v3, %v3588_v47  ;;  %7290 = vst [vmem:[#allocation23_spill] sm:$0xff] %v6048_v30  ;;  %v3590_v47 = vld [vmem:[%s3821_s25 + $0x59] sm:$0x3f] }
 0x39a   : > { %v6016_v51 = vpop.xlane.xlu2 %2188  ;;  %v6018_v2 = vpop.xlane.xlu1 %2185  ;;  %v2590_v48 = vsel %vm250_vm0, %v2546_v27, 0.0  ;;  %v2547_v27 = vmul.f32 %v5986_v3, %v3590_v47 }
 0x39b   : > { %7282 = vst [vmem:[#allocation22_spill] sm:$0xff] %v6016_v51  ;;  %v6020_v59 = vpop.xlane.xlu0 %2182 }
 0x39c   : > { %7283 = vst [vmem:[#allocation42_spill] sm:$0xff] %v6018_v2  ;;  %v6126_v2 = vld [vmem:[%s3821_s25 + $0xc1] sm:$0xff] }
 0x39d   : > { %7284 = vst [vmem:[#allocation28_spill] sm:$0xff] %v6020_v59 }
 0x39e   : > { %7304 = vst [vmem:[#allocation40_spill] sm:$0xff] %v6126_v2 }
 0x39f   : > { %2582 = vadd.xlane.f32.xlu2 %v2581_v34  ;;  %2579 = vadd.xlane.f32.xlu1 %v2578_v32  ;;  %v2587_v34 = vsel %vm254_vm1, %v2545_v25, 0.0  ;;  %v2584_v32 = vsel %vm250_vm0, %v2544_v24, 0.0 }
 0x3a0   : > { %2576 = vadd.xlane.f32.xlu0 %v2575_v10  ;;  %v3592_v10 = vld [vmem:[%s3821_s25 + $0x69] sm:$0x3f] }
 0x3a1   : > { %v2549_v36 = vmul.f32 %v5986_v3, %v3592_v10  ;;  %v6069_v10 = vld [vmem:[%s3821_s25 + $0x71] sm:$0xff] }
 0x3a2   : > { %v6037_v50 = vpop.xlane.xlu2 %2197  ;;  %v6039_v39 = vpop.xlane.xlu1 %2194  ;;  %7295 = vst [vmem:[#allocation24_spill] sm:$0xff] %v6069_v10 }
 0x3a3   : > { %7287 = vst [vmem:[#allocation31_spill] sm:$0xff] %v6037_v50  ;;  %v6041_v51 = vpop.xlane.xlu0 %2191  ;;  %v2599_v50 = vsel %vm254_vm1, %v2549_v36, 0.0 }
 0x3a4   : > { %7288 = vst [vmem:[#allocation25_spill] sm:$0xff] %v6039_v39 }
 0x3a5   : > { %7289 = vst [vmem:[#allocation45_spill] sm:$0xff] %v6041_v51  ;;  %v2548_v51 = vmul.f32 %v5986_v3, %v6048_v30 }
 0x3a7   : > { %2591 = vadd.xlane.f32.xlu2 %v2590_v48  ;;  %2588 = vadd.xlane.f32.xlu1 %v2587_v34  ;;  %v2596_v59 = vsel %vm250_vm0, %v2548_v51, 0.0  ;;  %v2593_v48 = vsel %vm254_vm1, %v2547_v27, 0.0  ;;  %v6065_v34 = vld [vmem:[%s3821_s25 + $0x81] sm:$0xff]  ;;  %v2550_v51 = vmul.f32 %v5986_v3, %v6069_v10 }
 0x3a8   : > { %2585 = vadd.xlane.f32.xlu0 %v2584_v32  ;;  %7294 = vst [vmem:[#allocation49_spill] sm:$0xff] %v6065_v34  ;;  %v3594_v32 = vld [vmem:[%s3821_s25 + $0x79] sm:$0x3f]  ;;  %v2552_v47 = vmul.f32 %v5986_v3, %v6065_v34  ;;  %v6087_v34 = vld [vmem:[%s3821_s25 + $0x91] sm:$0xff] }
 0x3a9   : > { %v2551_v36 = vmul.f32 %v5986_v3, %v3594_v32  ;;  %7299 = vst [vmem:[#allocation37_spill] sm:$0xff] %v6087_v34  ;;  %v3596_v32 = vld [vmem:[%s3821_s25 + $0x89] sm:$0x3f] }
 0x3aa   : > { %v6055_v25 = vpop.xlane.xlu2 %2206  ;;  %v6057_v24 = vpop.xlane.xlu1 %2203 }
 0x3ab   : > { %7291 = vst [vmem:[#allocation32_spill] sm:$0xff] %v6055_v25  ;;  %v6059_v39 = vpop.xlane.xlu0 %2200 }
 0x3ac   : > { %7292 = vst [vmem:[#allocation35_spill] sm:$0xff] %v6057_v24 }
 0x3ad   : > { %7293 = vst [vmem:[#allocation39_spill] sm:$0xff] %v6059_v39  ;;  %v2608_v39 = vsel %vm250_vm0, %v2552_v47, 0.0  ;;  %v2553_v47 = vmul.f32 %v5986_v3, %v3596_v32 }
 0x3af   : > { %2600 = vadd.xlane.f32.xlu2 %v2599_v50  ;;  %2597 = vadd.xlane.f32.xlu1 %v2596_v59  ;;  %v2605_v50 = vsel %vm254_vm1, %v2551_v36, 0.0  ;;  %v2602_v59 = vsel %vm250_vm0, %v2550_v51, 0.0 }
 0x3b0   : > { %2594 = vadd.xlane.f32.xlu0 %v2593_v48  ;;  %v3598_v48 = vld [vmem:[%s3821_s25 + $0x99] sm:$0x3f] }
 0x3b1   : > { %v2555_v10 = vmul.f32 %v5986_v3, %v3598_v48  ;;  %v6108_v48 = vld [vmem:[%s3821_s25 + $0xa1] sm:$0xff] }
 0x3b2   : > { %v6076_v27 = vpop.xlane.xlu2 %2215  ;;  %v6078_v30 = vpop.xlane.xlu1 %2212  ;;  %7303 = vst [vmem:[#allocation30_spill] sm:$0xff] %v6108_v48 }
 0x3b3   : > { %7296 = vst [vmem:[#allocation56_spill] sm:$0xff] %v6076_v27  ;;  %v6080_v25 = vpop.xlane.xlu0 %2209  ;;  %v2554_v27 = vmul.f32 %v5986_v3, %v6087_v34 }
 0x3b4   : > { %7297 = vst [vmem:[#allocation44_spill] sm:$0xff] %v6078_v30 }
 0x3b5   : > { %7298 = vst [vmem:[#allocation29_spill] sm:$0xff] %v6080_v25  ;;  %v2617_v25 = vsel %vm254_vm1, %v2555_v10, 0.0  ;;  %v2614_v24 = vsel %vm250_vm0, %v2554_v27, 0.0  ;;  %v2556_v27 = vmul.f32 %v5986_v3, %v6108_v48  ;;  %v2560_v48 = vmul.f32 %v5986_v3, %v6126_v2 }
 0x3b6   : > { %v1889_v2 = vadd.f32 %v5693_v46, %v7203_v7  ;;  %v1897_v46 = vadd.f32 %v5721_v40, %v7203_v7 }
 0x3b7   : > { %2609 = vadd.xlane.f32.xlu2 %v2608_v39  ;;  %2606 = vadd.xlane.f32.xlu1 %v2605_v50  ;;  %v2611_v39 = vsel %vm254_vm1, %v2553_v47, 0.0  ;;  %v6104_v50 = vld [vmem:[%s3821_s25 + $0xb1] sm:$0xff] }
 0x3b8   : > { %2603 = vadd.xlane.f32.xlu0 %v2602_v59  ;;  %7302 = vst [vmem:[#allocation50_spill] sm:$0xff] %v6104_v50  ;;  %v3600_v59 = vld [vmem:[%s3821_s25 + $0xa9] sm:$0x3f]  ;;  %v2558_v32 = vmul.f32 %v5986_v3, %v6104_v50  ;;  %v3602_v50 = vld [vmem:[%s3821_s25 + $0xb9] sm:$0x3f] }
 0x3b9   : > { %v2557_v10 = vmul.f32 %v5986_v3, %v3600_v59  ;;  %v2559_v16 = vmul.f32 %v5986_v3, %v3602_v50  ;;  %v1888_v50 = vadd.f32 %v5668_v38, %v7203_v7 }
 0x3ba   : > { %v6094_v36 = vpop.xlane.xlu2 %2310  ;;  %v6096_v51 = vpop.xlane.xlu1 %2221 }
 0x3bb   : > { %7300 = vst [vmem:[#allocation38_spill] sm:$0xff] %v6096_v51  ;;  %v6098_v30 = vpop.xlane.xlu0 %2218  ;;  %v2626_v51 = vsel %vm250_vm0, %v2558_v32, 0.0  ;;  %v1882_v32 = vadd.f32 %v5622_v14, %v7203_v7  ;;  %v1887_v14 = vadd.f32 %v5670_v41, %v7203_v7  ;;  %v1894_v41 = vadd.f32 %v5706_v56, %v7203_v7 }
 0x3bc   : > { %7301 = vst [vmem:[#allocation47_spill] sm:$0xff] %v6098_v30  ;;  %v2629_v15 = vsel %vm254_vm1, %v2559_v16, 0.0  ;;  %v1895_v56 = vadd.f32 %v5725_v23, %v7203_v7 }
 0x3bd   : > { %v2052_v16 = vadd.f32 %v5800_v37, %v1882_v32  ;;  %v2057_v45 = vadd.f32 %v5811_v42, %v1887_v14  ;;  %v2058_v37 = vadd.f32 %v5830_v6, %v1888_v50  ;;  %v2064_v6 = vadd.f32 %v5862_v0, %v1894_v41 }
 0x3bf   : > { %2618 = vadd.xlane.f32.xlu2 %v2617_v25  ;;  %2615 = vadd.xlane.f32.xlu1 %v2614_v24  ;;  %v2623_v25 = vsel %vm254_vm1, %v2557_v10, 0.0  ;;  %v2620_v24 = vsel %vm250_vm0, %v2556_v27, 0.0  ;;  %v1885_v10 = vadd.f32 %v5650_v9, %v7203_v7  ;;  %v1884_v27 = vadd.f32 %v5652_v5, %v7203_v7 }
 0x3c0   : > { %2612 = vadd.xlane.f32.xlu0 %v2611_v39  ;;  %v3604_v39 = vld [vmem:[%s3821_s25 + $0xc9] sm:$0x3f]  ;;  %v1886_v9 = vadd.f32 %v5672_v8, %v7203_v7  ;;  %v1891_v5 = vadd.f32 %v5689_v52, %v7203_v7  ;;  %v1893_v8 = vadd.f32 %v5708_v31, %v7203_v7  ;;  %v1892_v52 = vadd.f32 %v5710_v18, %v7203_v7  ;;  %v6180_v31 = vld [vmem:[%s3821_s25 + $0xd1] sm:$0xff] }
 0x3c1   : > { %v2561_v59 = vmul.f32 %v5986_v3, %v3604_v39  ;;  %v1890_v39 = vadd.f32 %v5691_v55, %v7203_v7  ;;  %v3606_v55 = vld [vmem:[%s3821_s25 + $0xd9] sm:$0x3f]  ;;  %v2055_v29 = vadd.f32 %v5815_v21, %v1885_v10  ;;  %v2562_v42 = vmul.f32 %v5986_v3, %v6180_v31 }
 0x3c2   : > { %v6115_v47 = vpop.xlane.xlu2 %2319  ;;  %v6117_v34 = vpop.xlane.xlu1 %2316  ;;  %v2056_v40 = vadd.f32 %v5813_v1, %v1886_v9  ;;  %v2563_v23 = vmul.f32 %v5986_v3, %v3606_v55  ;;  %v2063_v1 = vadd.f32 %v5843_v28, %v1893_v8  ;;  %v2061_v21 = vadd.f32 %v5847_v60, %v1891_v5  ;;  %v7308_v55 = vld [vmem:[#allocation61_spill] sm:$0xff] }
 0x3c3   : > { %v6119_v30 = vpop.xlane.xlu0 %2313  ;;  %v2635_v38 = vsel %vm254_vm1, %v2561_v59, 0.0  ;;  %v2054_v59 = vadd.f32 %v5796_v62, %v1884_v27  ;;  %v2060_v62 = vadd.f32 %v5826_v58, %v1890_v39  ;;  %v6199_v58 = vld [vmem:[#allocation3 + $0xd] ss:$0 sm:$0xff]  ;;  %v2223_v60 = vadd.f32 %v5935_v61, %v2052_v16 }
 0x3c4   : > { %v2641_v14 = vsel %vm254_vm1, %v2563_v23, 0.0  ;;  %v2228_v9 = vadd.f32 %v5967_v26, %v2057_v45  ;;  %v3608_v39 = vld [vmem:[%s3821_s25 + $0xe9] sm:$0x3f]  ;;  %v2232_v45 = vadd.f32 %v5980_v49, %v2061_v21 }
 0x3c5   : > { %v2225_v0 = vadd.f32 %v5952_v43, %v2054_v59  ;;  %v2393_v5 = vadd.f32 %v6094_v36, %v2223_v60  ;;  %v2229_v43 = vadd.f32 %v5965_v63, %v2058_v37  ;;  %v7306_v36 = vld [vmem:[#allocation16_spill] sm:$0xff]  ;;  %v3612_v21 = vld [vmem:[%s3821_s25 + $0x2a] sm:$0x3f] }
 0x3c6   : > { %v7313_v60 = vld [vmem:[#allocation28_spill] sm:$0xff] }
 0x3c7   : > { %2627 = vadd.xlane.f32.xlu2 %v2626_v51  ;;  %2624 = vadd.xlane.f32.xlu1 %v2623_v25  ;;  %v1883_v51 = vadd.f32 %v5654_v17, %v7203_v7  ;;  %v2395_v41 = vadd.f32 %v6117_v34, %v2225_v0  ;;  %v2565_v34 = vmul.f32 %v5986_v3, %v3608_v39 }
 0x3c8   : > { %2621 = vadd.xlane.f32.xlu0 %v2620_v24 }
 0x3c9   : > { %v2053_v18 = vadd.f32 %v5798_v57, %v1883_v51  ;;  %v2059_v57 = vadd.f32 %v5828_v44, %v1889_v2  ;;  %v6202_v44 = vadd.f32 %v5860_v33, %v1895_v56  ;;  %v2067_v2 = vadd.f32 %v5877_v11, %v1897_v46 }
 0x3ca   : > { %v6141_v25 = vpop.xlane.xlu2 %2328  ;;  %v6143_v24 = vpop.xlane.xlu1 %2325  ;;  %v2226_v33 = vadd.f32 %v5950_v13, %v2055_v29  ;;  %v2449_v46 = vperm.slane %v2393_v5, %v7308_v55  ;;  %v2452_v49 = vperm.slane %v2395_v41, %v7308_v55 }
 0x3cb   : > { %7305 = vst [vmem:[#allocation53_spill] sm:$0xff] %v6141_v25  ;;  %v6153_v17 = vpop.xlane.xlu0 %2322  ;;  %v2632_v25 = vsel %vm250_vm0, %v2560_v48, 0.0  ;;  %v1896_v48 = vadd.f32 %v5723_v53, %v7203_v7  ;;  %v2564_v53 = vmul.f32 %v5986_v3, %v6169_v22  ;;  %v2224_v51 = vadd.f32 %v5933_v19, %v2053_v18 }
 0x3cc   : > { %v2230_v11 = vadd.f32 %v5963_v12, %v2059_v57  ;;  %v2638_v19 = vsel %vm250_vm0, %v2562_v42, 0.0  ;;  %v2398_v26 = vadd.f32 %v6143_v24, %v2228_v9 }
 0x3cd   : > { %v2066_v32 = vadd.f32 %v5858_v35, %v1896_v48  ;;  %v2227_v35 = vadd.f32 %v5948_v4, %v2056_v40  ;;  %v2644_v50 = vsel %vm250_vm0, %v2564_v53, 0.0  ;;  %v2394_v13 = vadd.f32 %v6119_v30, %v2224_v51  ;;  %v7307_v30 = vld [vmem:[#allocation20_spill] sm:$0xff]  ;;  %v6241_v40 = vld [vmem:[%s3821_s25 + $0x32] sm:$0xff] }
 0x3ce   : > { %v7311_v51 = vld [vmem:[#allocation19_spill] sm:$0xff] }
 0x3cf   : > { %2636 = vadd.xlane.f32.xlu2 %v2635_v38  ;;  %2633 = vadd.xlane.f32.xlu1 %v2632_v25  ;;  %v3609_v25 = vld [vmem:[%s3821_s25 + $0x12] sm:$0xff]  ;;  %v2396_v38 = vadd.f32 %v6115_v47, %v2226_v33  ;;  %v2397_v29 = vadd.f32 %v6153_v17, %v2227_v35  ;;  %v2231_v47 = vadd.f32 %v7306_v36, %v2060_v62 }
 0x3d0   : > { %2630 = vadd.xlane.f32.xlu0 %v2629_v15  ;;  %v2062_v15 = vadd.f32 %v5845_v20, %v1892_v52  ;;  %v3610_v20 = vld [vmem:[%s3821_s25 + $0x1a] sm:$0x3f]  ;;  %v2708_v4 = vmul.f32 %v6199_v58, %v3609_v25  ;;  %v2234_v52 = vadd.f32 %v7307_v30, %v2063_v1  ;;  %v7309_v17 = vld [vmem:[#allocation62_spill] sm:$0xff]  ;;  %v2237_v35 = vadd.f32 %v7313_v60, %v2066_v32 }
 0x3d1   : > { %v2709_v61 = vmul.f32 %v6199_v58, %v3610_v20  ;;  %v2453_v56 = vperm.slane %v2396_v38, %v7309_v17  ;;  %v2450_v59 = vperm.slane %v2394_v13, %v7309_v17  ;;  %v2456_v53 = vperm.slane %v2398_v26, %v7309_v17  ;;  %v7312_v20 = vld [vmem:[#allocation42_spill] sm:$0xff] }
 0x3d2   : > { %v2338_v10 = vpop.xlane.xlu2 %2337  ;;  %v2335_v27 = vpop.xlane.xlu1 %2334  ;;  %v2233_v12 = vadd.f32 %v5978_v54, %v2062_v15  ;;  %v2736_v24 = vsel %vm250_vm0, %v2708_v4, 0.0  ;;  %v7310_v18 = vld [vmem:[#allocation53_spill] sm:$0xff]  ;;  %v2455_v23 = vperm.slane %v2397_v29, %v7308_v55  ;;  %v2647_v15 = vsel %vm254_vm1, %v2565_v34, 0.0 }
 0x3d3   : > { %v2332_v28 = vpop.xlane.xlu0 %2331  ;;  %v2739_v54 = vsel %vm254_vm1, %v2709_v61, 0.0  ;;  %v2399_v16 = vadd.f32 %v7310_v18, %v2229_v43  ;;  %v2402_v62 = vadd.f32 %v2338_v10, %v2232_v45  ;;  %v2401_v57 = vadd.f32 %v2335_v27, %v2231_v47  ;;  %v7314_v61 = vld [vmem:[#allocation18_spill] sm:$0xff] }
 0x3d4   : > { %v2400_v8 = vadd.f32 %v2332_v28, %v2230_v11  ;;  %v2235_v28 = vadd.f32 %v7311_v51, %v2064_v6  ;;  %v2238_v25 = vadd.f32 %v7312_v20, %v2067_v2  ;;  %v2454_v10 = vsel %vm907_vm2, %v2453_v56, %v2452_v49  ;;  %v3614_v56 = vld [vmem:[%s3821_s25 + $0x3a] sm:$0x3f]  ;;  %v6302_v51 = vld [vmem:[%s3821_s25 + $0x62] sm:$0xff]  ;;  %v7315_v20 = vld [vmem:[#allocation26_spill] sm:$0xff] }
 0x3d5   : > { %v2451_v27 = vsel %vm907_vm2, %v2450_v59, %v2449_v46  ;;  %v2458_v33 = vperm.slane %v2399_v16, %v7308_v55  ;;  %v2457_v0 = vsel %vm907_vm2, %v2456_v53, %v2455_v23  ;;  %v2462_v6 = vperm.slane %v2402_v62, %v7309_v17 }
 0x3d6   : > { %v2459_v37 = vperm.slane %v2400_v8, %v7309_v17  ;;  %v2461_v2 = vperm.slane %v2401_v57, %v7308_v55  ;;  %v2711_v32 = vmul.f32 %v6199_v58, %v3612_v21  ;;  %v2236_v4 = vadd.f32 %v7314_v61, %v6202_v44  ;;  %v7321_v61 = vld [vmem:[#allocation58_spill] sm:$0xff] }
 0x3d7   : > { %2645 = vadd.xlane.f32.xlu2 %v2644_v50  ;;  %2642 = vadd.xlane.f32.xlu1 %v2641_v14  ;;  %v2712_v50 = vmul.f32 %v6199_v58, %v6241_v40  ;;  %v6254_v14 = vld [vmem:[%s3821_s25 + $0x22] sm:$0xff]  ;;  %v2491_v39 = vsel %vm948_vm3, %v2454_v10, %v2451_v27  ;;  %v2713_v62 = vmul.f32 %v6199_v58, %v3614_v56 }
 0x3d8   : > { %2639 = vadd.xlane.f32.xlu0 %v2638_v19  ;;  %v2460_v11 = vsel %vm907_vm2, %v2459_v37, %v2458_v33  ;;  %v2710_v5 = vmul.f32 %v6199_v58, %v6254_v14  ;;  %v2492_v43 = vsel %vm950_vm4, %v2457_v0, %v2491_v39  ;;  %v2463_v36 = vsel %vm907_vm2, %v2462_v6, %v2461_v2  ;;  %v7317_v10 = vld [vmem:[#allocation64_spill] sm:$0xff]  ;;  %v7318_v33 = vld [vmem:[#allocation43_spill] sm:$0xff]  ;;  %v7319_v6 = vld [vmem:[#allocation65_spill] sm:$0xff] }
 0x3d9   : > { %v2748_v45 = vsel %vm250_vm0, %v2712_v50, 0.0  ;;  %v2493_v47 = vsel %vm952_vm5, %v2460_v11, %v2492_v43  ;;  %v2745_v8 = vsel %vm254_vm1, %v2711_v32, 0.0  ;;  %v2751_v60 = vsel %vm254_vm1, %v2713_v62, 0.0  ;;  %v6317_v32 = vld [vmem:[%s3821_s25 + $0x52] sm:$0xff]  ;;  %v7320_v11 = vld [vmem:[#allocation41_spill] sm:$0xff] }
 0x3da   : > { %v2347_v63 = vpop.xlane.xlu2 %2346  ;;  %v2344_v48 = vpop.xlane.xlu1 %2343  ;;  %v2742_v46 = vsel %vm250_vm0, %v2710_v5, 0.0  ;;  %v2494_v49 = vsel %vm954_vm6, %v2463_v36, %v2493_v47  ;;  %v1898_v27 = vadd.f32 %v7317_v10, %v7203_v7  ;;  %v1903_v0 = vadd.f32 %v7318_v33, %v7203_v7  ;;  %v7322_v39 = vld [vmem:[#allocation34_spill] sm:$0xff]  ;;  %v7324_v43 = vld [vmem:[#allocation7_spill] sm:$0xff] }
 0x3db   : > { %v2341_v3 = vpop.xlane.xlu0 %2340  ;;  %v2404_v42 = vadd.f32 %v2344_v48, %v2234_v52  ;;  %v2405_v38 = vadd.f32 %v2347_v63, %v2235_v28  ;;  %v3616_v63 = vld [vmem:[%s3821_s25 + $0x4a] sm:$0x3f]  ;;  %v6282_v48 = vld [vmem:[%s3821_s25 + $0x42] sm:$0xff]  ;;  %v3618_v28 = vld [vmem:[%s3821_s25 + $0x5a] sm:$0x3f]  ;;  %v1901_v2 = vadd.f32 %v7319_v6, %v7203_v7 }
 0x3dc   : > { %v2403_v1 = vadd.f32 %v2341_v3, %v2233_v12  ;;  %v2715_v3 = vmul.f32 %v6199_v58, %v3616_v63  ;;  %v2714_v53 = vmul.f32 %v6199_v58, %v6282_v48  ;;  %v2717_v5 = vmul.f32 %v6199_v58, %v3618_v28  ;;  %v7327_v47 = vld [vmem:[#allocation10_spill] sm:$0xff]  ;;  %v7330_v63 = vld [vmem:[#allocation25_spill] sm:$0xff] }
 0x3dd   : > { %v2465_v19 = vperm.slane %v2404_v42, %v7309_v17  ;;  %v6347_v33 = vld [vmem:[%s3821_s25 + $0x72] sm:$0xff] }
 0x3de   : > { %v2464_v9 = vperm.slane %v2403_v1, %v7308_v55  ;;  %v2754_v21 = vsel %vm250_vm0, %v2714_v53, 0.0 }
 0x3df   : > { %2740 = vadd.xlane.f32.xlu2 %v2739_v54  ;;  %2737 = vadd.xlane.f32.xlu1 %v2736_v24  ;;  %v2467_v54 = vperm.slane %v2405_v38, %v7308_v55  ;;  %v2068_v38 = vadd.f32 %v7322_v39, %v1898_v27  ;;  %v2720_v39 = vmul.f32 %v6199_v58, %v6347_v33 }
 0x3e0   : > { %2648 = vadd.xlane.f32.xlu0 %v2647_v15  ;;  %v2466_v34 = vsel %vm907_vm2, %v2465_v19, %v2464_v9  ;;  %v2757_v15 = vsel %vm254_vm1, %v2715_v3, 0.0  ;;  %v1902_v19 = vadd.f32 %v7320_v11, %v7203_v7  ;;  %v2718_v9 = vmul.f32 %v6199_v58, %v6302_v51  ;;  %v7333_v3 = vld [vmem:[#allocation39_spill] sm:$0xff]  ;;  %v3620_v11 = vld [vmem:[%s3821_s25 + $0x6a] sm:$0x3f] }
 0x3e1   : > { %v2495_v18 = vsel %vm956_vm7, %v2466_v34, %v2494_v49  ;;  %v7328_v34 = vld [vmem:[#allocation22_spill] sm:$0xff] }
 0x3e2   : > { %v2356_v41 = vpop.xlane.xlu2 %2355  ;;  %v2353_v13 = vpop.xlane.xlu1 %2352  ;;  %v2766_v62 = vsel %vm250_vm0, %v2718_v9, 0.0 }
 0x3e3   : > { %v2408_v12 = vadd.f32 %v2356_v41, %v2238_v25  ;;  %v2407_v26 = vadd.f32 %v2353_v13, %v2237_v35  ;;  %v2350_v29 = vpop.xlane.xlu0 %2349  ;;  %v1900_v25 = vadd.f32 %v7315_v20, %v7203_v7  ;;  %v7316_v35 = vld [vmem:[#allocation27_spill] sm:$0xff]  ;;  %v7323_v41 = vld [vmem:[#allocation6_spill] sm:$0xff] }
 0x3e4   : > { %v2406_v44 = vadd.f32 %v2350_v29, %v2236_v4  ;;  %v1899_v50 = vadd.f32 %v7316_v35, %v7203_v7  ;;  %v2071_v13 = vadd.f32 %v7323_v41, %v1901_v2 }
 0x3e5   : > { %v2471_v30 = vperm.slane %v2408_v12, %v7309_v17  ;;  %v2470_v52 = vperm.slane %v2407_v26, %v7308_v55  ;;  %v2070_v12 = vadd.f32 %v7324_v43, %v1900_v25  ;;  %v7325_v26 = vld [vmem:[#allocation46_spill] sm:$0xff]  ;;  %v3622_v25 = vld [vmem:[%s3821_s25 + $0x7a] sm:$0x3f] }
 0x3e6   : > { %v2468_v24 = vperm.slane %v2406_v44, %v7309_v17  ;;  %v2069_v4 = vadd.f32 %v7321_v61, %v1899_v50  ;;  %v1905_v29 = vadd.f32 %v7325_v26, %v7203_v7  ;;  %v2073_v44 = vadd.f32 %v7327_v47, %v1903_v0  ;;  %v7335_v0 = vld [vmem:[#allocation13_spill] sm:$0xff]  ;;  %v7339_v26 = vld [vmem:[#allocation59_spill] sm:$0xff] }
 0x3e7   : > { %v2472_v59 = vsel %vm907_vm2, %v2471_v30, %v2470_v52  ;;  %2749 = vadd.xlane.f32.xlu2 %v2748_v45  ;;  %2746 = vadd.xlane.f32.xlu1 %v2745_v8  ;;  %v7326_v45 = vld [vmem:[#allocation33_spill] sm:$0xff]  ;;  %v2716_v8 = vmul.f32 %v6199_v58, %v6317_v32  ;;  %v2239_v30 = vadd.f32 %v7328_v34, %v2068_v38  ;;  %v7329_v52 = vld [vmem:[#allocation31_spill] sm:$0xff]  ;;  %v7341_v34 = vld [vmem:[#allocation54_spill] sm:$0xff] }
 0x3e8   : > { %v2469_v16 = vsel %vm907_vm2, %v2468_v24, %v2467_v54  ;;  %2743 = vadd.xlane.f32.xlu0 %v2742_v46  ;;  %v2072_v36 = vadd.f32 %v7326_v45, %v1902_v19  ;;  %v2242_v46 = vadd.f32 %v7329_v52, %v2071_v13  ;;  %v2241_v54 = vadd.f32 %v7330_v63, %v2070_v12  ;;  %v7331_v24 = vld [vmem:[#allocation45_spill] sm:$0xff]  ;;  %v7340_v45 = vld [vmem:[#allocation32_spill] sm:$0xff]  ;;  %v7343_v63 = vld [vmem:[#allocation14_spill] sm:$0xff] }
 0x3e9   : > { %v2496_v23 = vsel %vm958_vm8, %v2469_v16, %v2495_v18  ;;  %v2240_v56 = vadd.f32 %v7331_v24, %v2069_v4  ;;  %v7332_v18 = vld [vmem:[#allocation35_spill] sm:$0xff]  ;;  %v2760_v27 = vsel %vm250_vm0, %v2716_v8, 0.0  ;;  %v1906_v6 = vadd.f32 %v7335_v0, %v7203_v7  ;;  %v7338_v38 = vld [vmem:[#allocation29_spill] sm:$0xff] }
 0x3ea   : > { %v2497_v57 = vsel %vm960_vm9, %v2472_v59, %v2496_v23  ;;  %v2365_v37 = vpop.xlane.xlu2 %2364  ;;  %v2362_v42 = vpop.xlane.xlu1 %2361  ;;  %v2244_v16 = vadd.f32 %v7332_v18, %v2073_v44  ;;  %v2243_v53 = vadd.f32 %v7333_v3, %v2072_v36  ;;  %v2721_v9 = vmul.f32 %v6199_v58, %v3622_v25  ;;  %v7342_v52 = vld [vmem:[#allocation57_spill] sm:$0xff] }
 0x3eb   : > { %3579 = vst.msk [vmem:[%s4718_s30 + $0x20] sm:$0xff] %vm969_vm10, %v2497_v57  ;;  %v2359_v1 = vpop.xlane.xlu0 %2358  ;;  %v2763_v57 = vsel %vm254_vm1, %v2717_v5, 0.0  ;;  %v2719_v12 = vmul.f32 %v6199_v58, %v3620_v11  ;;  %v6388_v25 = vld [vmem:[%s3821_s25 + $0x82] sm:$0xff] }
 0x3ec   : > { %v2409_v28 = vadd.f32 %v2359_v1, %v2239_v30  ;;  %v7337_v1 = vld [vmem:[#allocation9_spill] sm:$0xff]  ;;  %v1908_v30 = vadd.f32 %v7341_v34, %v7203_v7  ;;  %v2775_v18 = vsel %vm254_vm1, %v2721_v9, 0.0 }
 0x3ee   : > { %v2473_v4 = vperm.slane %v2409_v28, %v7308_v55 }
 0x3ef   : > { %2758 = vadd.xlane.f32.xlu2 %v2757_v15  ;;  %2755 = vadd.xlane.f32.xlu1 %v2754_v21  ;;  %v2411_v15 = vadd.f32 %v2365_v37, %v2241_v54  ;;  %v2410_v21 = vadd.f32 %v2362_v42, %v2240_v56  ;;  %v7336_v37 = vld [vmem:[#allocation8_spill] sm:$0xff]  ;;  %v2076_v54 = vadd.f32 %v7343_v63, %v1906_v6  ;;  %v3626_v63 = vld [vmem:[%s3821_s25 + $0x9a] sm:$0x3f] }
 0x3f0   : > { %2752 = vadd.xlane.f32.xlu0 %v2751_v60  ;;  %v7334_v60 = vld [vmem:[#allocation36_spill] sm:$0xff]  ;;  %v2075_v42 = vadd.f32 %v7336_v37, %v1905_v29  ;;  %v1909_v29 = vadd.f32 %v7339_v26, %v7203_v7 }
 0x3f1   : > { %v1904_v35 = vadd.f32 %v7334_v60, %v7203_v7  ;;  %v2476_v5 = vperm.slane %v2411_v15, %v7308_v55  ;;  %v2474_v61 = vperm.slane %v2410_v21, %v7309_v17  ;;  %v3624_v15 = vld [vmem:[%s3821_s25 + $0x8a] sm:$0x3f]  ;;  %v7344_v21 = vld [vmem:[#allocation11_spill] sm:$0xff]  ;;  %v7345_v60 = vld [vmem:[#allocation12_spill] sm:$0xff] }
 0x3f2   : > { %v2374_v49 = vpop.xlane.xlu2 %2373  ;;  %v2371_v59 = vpop.xlane.xlu1 %2370  ;;  %v2246_v41 = vadd.f32 %v7338_v38, %v2075_v42  ;;  %v2078_v28 = vadd.f32 %v7344_v21, %v1908_v30  ;;  %v2723_v37 = vmul.f32 %v6199_v58, %v3624_v15  ;;  %v7348_v42 = vld [vmem:[#allocation38_spill] sm:$0xff]  ;;  %v3628_v30 = vld [vmem:[%s3821_s25 + $0xaa] sm:$0x3f] }
 0x3f3   : > { %v2368_v23 = vpop.xlane.xlu0 %2367  ;;  %v2414_v50 = vadd.f32 %v2374_v49, %v2244_v16  ;;  %v2413_v10 = vadd.f32 %v2371_v59, %v2243_v53  ;;  %v2074_v19 = vadd.f32 %v7337_v1, %v1904_v35  ;;  %v2475_v49 = vsel %vm907_vm2, %v2474_v61, %v2473_v4  ;;  %v7350_v4 = vld [vmem:[#allocation56_spill] sm:$0xff] }
 0x3f4   : > { %v2412_v20 = vadd.f32 %v2368_v23, %v2242_v46  ;;  %v1907_v46 = vadd.f32 %v7342_v52, %v7203_v7  ;;  %v2772_v16 = vsel %vm250_vm0, %v2720_v39, 0.0  ;;  %v2722_v61 = vmul.f32 %v6199_v58, %v6388_v25  ;;  %v6411_v52 = vld [vmem:[%s3821_s25 + $0xa2] sm:$0xff] }
 0x3f5   : > { %v2480_v13 = vperm.slane %v2414_v50, %v7309_v17  ;;  %v2479_v43 = vperm.slane %v2413_v10, %v7308_v55  ;;  %v2245_v36 = vadd.f32 %v7340_v45, %v2074_v19  ;;  %v7346_v50 = vld [vmem:[#allocation15_spill] sm:$0xff] }
 0x3f6   : > { %v2477_v2 = vperm.slane %v2412_v20, %v7309_v17  ;;  %v2077_v35 = vadd.f32 %v7345_v60, %v1907_v46  ;;  %v2079_v10 = vadd.f32 %v7346_v50, %v1909_v29  ;;  %v7349_v19 = vld [vmem:[#allocation47_spill] sm:$0xff]  ;;  %v2778_v34 = vsel %vm250_vm0, %v2722_v61, 0.0 }
 0x3f7   : > { %2767 = vadd.xlane.f32.xlu2 %v2766_v62  ;;  %2764 = vadd.xlane.f32.xlu1 %v2763_v57  ;;  %v2481_v3 = vsel %vm907_vm2, %v2480_v13, %v2479_v43  ;;  %v2769_v62 = vsel %vm254_vm1, %v2719_v12, 0.0  ;;  %v6382_v57 = vld [vmem:[%s3821_s25 + $0x92] sm:$0xff]  ;;  %v2249_v9 = vadd.f32 %v7349_v19, %v2078_v28  ;;  %v6436_v28 = vld [vmem:[%s3821_s25 + $0xc2] sm:$0xff]  ;;  %v3632_v19 = vld [vmem:[%s3821_s25 + $0xca] sm:$0x3f] }
 0x3f8   : > { %2761 = vadd.xlane.f32.xlu0 %v2760_v27  ;;  %v2478_v47 = vsel %vm907_vm2, %v2477_v2, %v2476_v5  ;;  %v7347_v27 = vld [vmem:[#allocation44_spill] sm:$0xff]  ;;  %v2724_v11 = vmul.f32 %v6199_v58, %v6382_v57  ;;  %v2250_v1 = vadd.f32 %v7348_v42, %v2079_v10  ;;  %v2248_v39 = vadd.f32 %v7350_v4, %v2077_v35  ;;  %v6440_v60 = vld [vmem:[%s3821_s25 + $0xb2] sm:$0xff]  ;;  %v3634_v42 = vld [vmem:[%s3821_s25 + $0xda] sm:$0x3f] }
 0x3f9   : > { %v2498_v53 = vsel %vm948_vm3, %v2478_v47, %v2475_v49  ;;  %v2247_v0 = vadd.f32 %v7347_v27, %v2076_v54  ;;  %v2726_v49 = vmul.f32 %v6199_v58, %v6411_v52  ;;  %v2730_v35 = vmul.f32 %v6199_v58, %v6436_v28 }
 0x3fa   : > { %v2383_v44 = vpop.xlane.xlu2 %2382  ;;  %v2380_v8 = vpop.xlane.xlu1 %2379  ;;  %v2499_v2 = vsel %vm950_vm4, %v2481_v3, %v2498_v53  ;;  %v2784_v45 = vsel %vm250_vm0, %v2724_v11, 0.0  ;;  %v2728_v10 = vmul.f32 %v6199_v58, %v6440_v60  ;;  %v2731_v61 = vmul.f32 %v6199_v58, %v3632_v19 }
 0x3fb   : > { %v2416_v24 = vadd.f32 %v2380_v8, %v2246_v41  ;;  %v2377_v56 = vpop.xlane.xlu0 %2376  ;;  %v2417_v38 = vadd.f32 %v2383_v44, %v2247_v0  ;;  %v2790_v15 = vsel %vm250_vm0, %v2726_v49, 0.0  ;;  %v7352_v49 = vld [vmem:[#allocation21_spill] sm:$0xff] }
 0x3fc   : > { %v2415_v59 = vadd.f32 %v2377_v56, %v2245_v36  ;;  %v2781_v36 = vsel %vm254_vm1, %v2723_v37, 0.0  ;;  %v2727_v56 = vmul.f32 %v6199_v58, %v3628_v30  ;;  %v2796_v37 = vsel %vm250_vm0, %v2728_v10, 0.0  ;;  %v7353_v10 = vld [vmem:[#allocation52_spill] sm:$0xff] }
 0x3fd   : > { %v2483_v23 = vperm.slane %v2416_v24, %v7309_v17  ;;  %v2485_v44 = vperm.slane %v2417_v38, %v7308_v55 }
 0x3fe   : > { %v2482_v20 = vperm.slane %v2415_v59, %v7308_v55 }
 0x3ff   : > { %2776 = vadd.xlane.f32.xlu2 %v2775_v18  ;;  %2773 = vadd.xlane.f32.xlu1 %v2772_v16  ;;  %v2725_v18 = vmul.f32 %v6199_v58, %v3626_v63 }
 0x400   : > { %v2484_v6 = vsel %vm907_vm2, %v2483_v23, %v2482_v20  ;;  %2770 = vadd.xlane.f32.xlu0 %v2769_v62  ;;  %v2793_v62 = vsel %vm254_vm1, %v2727_v56, 0.0  ;;  %v3630_v20 = vld [vmem:[%s3821_s25 + $0xba] sm:$0x3f]  ;;  %v3638_v56 = vld [vmem:[%s3821_s25 + $0x29] sm:$0x3f] }
 0x401   : > { %v2500_v5 = vsel %vm952_vm5, %v2484_v6, %v2499_v2  ;;  %v2787_v21 = vsel %vm254_vm1, %v2725_v18, 0.0  ;;  %v2729_v50 = vmul.f32 %v6199_v58, %v3630_v20  ;;  %v2802_v2 = vsel %vm250_vm0, %v2730_v35, 0.0 }
 0x402   : > { %v2392_v41 = vpop.xlane.xlu2 %2391  ;;  %v2389_v13 = vpop.xlane.xlu1 %2388 }
 0x403   : > { %v2420_v43 = vadd.f32 %v2392_v41, %v2250_v1  ;;  %v2419_v12 = vadd.f32 %v2389_v13, %v2249_v9  ;;  %v2386_v26 = vpop.xlane.xlu0 %2385  ;;  %v2799_v11 = vsel %vm254_vm1, %v2729_v50, 0.0  ;;  %v6458_v1 = vld [vmem:[%s3821_s25 + $0xd2] sm:$0xff]  ;;  %v2733_v9 = vmul.f32 %v6199_v58, %v3634_v42  ;;  %v3642_v50 = vld [vmem:[%s3821_s25 + $0x49] sm:$0x3f] }
 0x404   : > { %v2418_v29 = vadd.f32 %v2386_v26, %v2248_v39  ;;  %v3636_v26 = vld [vmem:[%s3821_s25 + $0xea] sm:$0x3f] }
 0x405   : > { %v2489_v47 = vperm.slane %v2420_v43, %v7309_v17  ;;  %v2488_v8 = vperm.slane %v2419_v12, %v7308_v55  ;;  %v2811_v41 = vsel %vm254_vm1, %v2733_v9, 0.0  ;;  %v6473_v43 = vld [vmem:[#allocation3 + $0xe] ss:$0 sm:$0xff]  ;;  %v2805_v12 = vsel %vm254_vm1, %v2731_v61, 0.0 }
 0x406   : > { %v2486_v46 = vperm.slane %v2418_v29, %v7309_v17  ;;  %v6478_v29 = vld [vmem:[%s3821_s25 + $0xe2] sm:$0xff]  ;;  %v2879_v18 = vmul.f32 %v6473_v43, %v3638_v56 }
 0x407   : > { %v2490_v54 = vsel %vm907_vm2, %v2489_v47, %v2488_v8  ;;  %2785 = vadd.xlane.f32.xlu2 %v2784_v45  ;;  %2782 = vadd.xlane.f32.xlu1 %v2781_v36  ;;  %v7351_v45 = vld [vmem:[#allocation17_spill] sm:$0xff]  ;;  %v2735_v47 = vmul.f32 %v6199_v58, %v3636_v26  ;;  %v2734_v8 = vmul.f32 %v6199_v58, %v6478_v29  ;;  %v3644_v26 = vld [vmem:[%s3821_s25 + $0x59] sm:$0x3f] }
 0x408   : > { %v2487_v24 = vsel %vm907_vm2, %v2486_v46, %v2485_v44  ;;  %2779 = vadd.xlane.f32.xlu0 %v2778_v34  ;;  %v2878_v36 = vmul.f32 %v6473_v43, %v7351_v45  ;;  %v2909_v35 = vsel %vm254_vm1, %v2879_v18, 0.0 }
 0x409   : > { %v2501_v59 = vsel %vm954_vm6, %v2487_v24, %v2500_v5  ;;  %v2732_v5 = vmul.f32 %v6199_v58, %v6458_v1  ;;  %v2817_v63 = vsel %vm254_vm1, %v2735_v47, 0.0  ;;  %v3640_v24 = vld [vmem:[%s3821_s25 + $0x39] sm:$0x3f] }
 0x40a   : > { %v2502_v16 = vsel %vm956_vm7, %v2490_v54, %v2501_v59  ;;  %v6424_v3 = vpop.xlane.xlu2 %2573  ;;  %v6426_v53 = vpop.xlane.xlu1 %2570  ;;  %v2906_v46 = vsel %vm250_vm0, %v2878_v36, 0.0  ;;  %v2814_v54 = vsel %vm250_vm0, %v2734_v8, 0.0  ;;  %v2881_v58 = vmul.f32 %v6473_v43, %v3640_v24  ;;  %v7355_v36 = vld [vmem:[#allocation23_spill] sm:$0xff] }
 0x40b   : > { %3580 = vst.msk [vmem:[%s4718_s30 + $0x28] sm:$0x3f] %vm971_vm11, %v2502_v16  ;;  %v6430_v23 = vpop.xlane.xlu0 %2567  ;;  %v2808_v13 = vsel %vm250_vm0, %v2732_v5, 0.0  ;;  %v2880_v59 = vmul.f32 %v6473_v43, %v7352_v49  ;;  %v2886_v47 = vmul.f32 %v6473_v43, %v7355_v36  ;;  %v2885_v8 = vmul.f32 %v6473_v43, %v3644_v26  ;;  %v3648_v49 = vld [vmem:[%s3821_s25 + $0x79] sm:$0x3f] }
 0x40d   : > { %v2912_v20 = vsel %vm250_vm0, %v2880_v59, 0.0  ;;  %v2930_v56 = vsel %vm250_vm0, %v2886_v47, 0.0  ;;  %v7356_v59 = vld [vmem:[#allocation49_spill] sm:$0xff] }
 0x40e   : > { %v2890_v18 = vmul.f32 %v6473_v43, %v7356_v59  ;;  %v7359_v59 = vld [vmem:[#allocation50_spill] sm:$0xff] }
 0x40f   : > { %2794 = vadd.xlane.f32.xlu2 %v2793_v62  ;;  %2791 = vadd.xlane.f32.xlu1 %v2790_v15 }
 0x410   : > { %2788 = vadd.xlane.f32.xlu0 %v2787_v21  ;;  %v2915_v21 = vsel %vm254_vm1, %v2881_v58, 0.0  ;;  %v2927_v58 = vsel %vm254_vm1, %v2885_v8, 0.0 }
 0x412   : > { %v6447_v27 = vpop.xlane.xlu2 %2582  ;;  %v6449_v0 = vpop.xlane.xlu1 %2579 }
 0x413   : > { %v6451_v6 = vpop.xlane.xlu0 %2576 }
 0x417   : > { %2803 = vadd.xlane.f32.xlu2 %v2802_v2  ;;  %2800 = vadd.xlane.f32.xlu1 %v2799_v11  ;;  %v2884_v2 = vmul.f32 %v6473_v43, %v7353_v10  ;;  %v2883_v11 = vmul.f32 %v6473_v43, %v3642_v50 }
 0x418   : > { %2797 = vadd.xlane.f32.xlu0 %v2796_v37  ;;  %v7354_v37 = vld [vmem:[#allocation51_spill] sm:$0xff] }
 0x419   : > { %v2882_v42 = vmul.f32 %v6473_v43, %v7354_v37  ;;  %v2924_v61 = vsel %vm250_vm0, %v2884_v2, 0.0 }
 0x41a   : > { %v6465_v4 = vpop.xlane.xlu2 %2591  ;;  %v6467_v39 = vpop.xlane.xlu1 %2588 }
 0x41b   : > { %v6469_v38 = vpop.xlane.xlu0 %2585 }
 0x41f   : > { %2812 = vadd.xlane.f32.xlu2 %v2811_v41  ;;  %2809 = vadd.xlane.f32.xlu1 %v2808_v13  ;;  %v2921_v41 = vsel %vm254_vm1, %v2883_v11, 0.0  ;;  %v2918_v13 = vsel %vm250_vm0, %v2882_v42, 0.0  ;;  %v2942_v11 = vsel %vm250_vm0, %v2890_v18, 0.0  ;;  %v2896_v18 = vmul.f32 %v6473_v43, %v7359_v59 }
 0x420   : > { %2806 = vadd.xlane.f32.xlu0 %v2805_v12  ;;  %v3646_v12 = vld [vmem:[%s3821_s25 + $0x69] sm:$0x3f]  ;;  %v2654_v59 = vadd.f32 %v6449_v0, %v7203_v7 }
 0x421   : > { %v2887_v45 = vmul.f32 %v6473_v43, %v3646_v12  ;;  %v7358_v12 = vld [vmem:[#allocation37_spill] sm:$0xff] }
 0x422   : > { %v6485_v34 = vpop.xlane.xlu2 %2600  ;;  %v6487_v30 = vpop.xlane.xlu1 %2597  ;;  %v2892_v26 = vmul.f32 %v6473_v43, %v7358_v12 }
 0x423   : > { %v6489_v44 = vpop.xlane.xlu0 %2594  ;;  %v2933_v24 = vsel %vm254_vm1, %v2887_v45, 0.0 }
 0x427   : > { %2907 = vadd.xlane.f32.xlu2 %v2906_v46  ;;  %2818 = vadd.xlane.f32.xlu1 %v2817_v63 }
 0x428   : > { %2815 = vadd.xlane.f32.xlu0 %v2814_v54 }
 0x42a   : > { %v6500_v16 = vpop.xlane.xlu2 %2609  ;;  %v6502_v62 = vpop.xlane.xlu1 %2606 }
 0x42b   : > { %v6504_v15 = vpop.xlane.xlu0 %2603 }
 0x42f   : > { %2916 = vadd.xlane.f32.xlu2 %v2915_v21  ;;  %2913 = vadd.xlane.f32.xlu1 %v2912_v20  ;;  %v2889_v21 = vmul.f32 %v6473_v43, %v3648_v49  ;;  %v7357_v20 = vld [vmem:[#allocation24_spill] sm:$0xff]  ;;  %v3654_v49 = vld [vmem:[%s3821_s25 + $0xa9] sm:$0x3f] }
 0x430   : > { %2910 = vadd.xlane.f32.xlu0 %v2909_v35  ;;  %v2888_v35 = vmul.f32 %v6473_v43, %v7357_v20  ;;  %v2651_v20 = vadd.f32 %v6426_v53, %v7203_v7 }
 0x431   : > { %v2939_v37 = vsel %vm254_vm1, %v2889_v21, 0.0  ;;  %v2895_v21 = vmul.f32 %v6473_v43, %v3654_v49 }
 0x432   : > { %v6515_v19 = vpop.xlane.xlu2 %2618  ;;  %v6517_v9 = vpop.xlane.xlu1 %2615  ;;  %v2936_v42 = vsel %vm250_vm0, %v2888_v35, 0.0  ;;  %v2650_v35 = vadd.f32 %v6430_v23, %v7203_v7 }
 0x433   : > { %v6519_v5 = vpop.xlane.xlu0 %2612 }
 0x437   : > { %2925 = vadd.xlane.f32.xlu2 %v2924_v61  ;;  %2922 = vadd.xlane.f32.xlu1 %v2921_v41  ;;  %v3652_v61 = vld [vmem:[%s3821_s25 + $0x99] sm:$0x3f]  ;;  %v3650_v41 = vld [vmem:[%s3821_s25 + $0x89] sm:$0x3f] }
 0x438   : > { %2919 = vadd.xlane.f32.xlu0 %v2918_v13  ;;  %v2893_v13 = vmul.f32 %v6473_v43, %v3652_v61  ;;  %v2891_v45 = vmul.f32 %v6473_v43, %v3650_v41 }
 0x43a   : > { %v6530_v46 = vpop.xlane.xlu2 %2627  ;;  %v6532_v63 = vpop.xlane.xlu1 %2624 }
 0x43b   : > { %v6534_v54 = vpop.xlane.xlu0 %2621 }
 0x43f   : > { %2934 = vadd.xlane.f32.xlu2 %v2933_v24  ;;  %2931 = vadd.xlane.f32.xlu1 %v2930_v56  ;;  %v2951_v24 = vsel %vm254_vm1, %v2893_v13, 0.0  ;;  %v2948_v56 = vsel %vm250_vm0, %v2892_v26, 0.0  ;;  %v2960_v26 = vsel %vm250_vm0, %v2896_v18, 0.0  ;;  %v2653_v18 = vadd.f32 %v6451_v6, %v7203_v7 }
 0x440   : > { %2928 = vadd.xlane.f32.xlu0 %v2927_v58  ;;  %v2945_v58 = vsel %vm254_vm1, %v2891_v45, 0.0  ;;  %v2957_v45 = vsel %vm254_vm1, %v2895_v21, 0.0 }
 0x442   : > { %v6545_v50 = vpop.xlane.xlu2 %2636  ;;  %v6547_v10 = vpop.xlane.xlu1 %2633 }
 0x443   : > { %v6549_v2 = vpop.xlane.xlu0 %2630 }
 0x447   : > { %2943 = vadd.xlane.f32.xlu2 %v2942_v11  ;;  %2940 = vadd.xlane.f32.xlu1 %v2939_v37  ;;  %v7360_v11 = vld [vmem:[#allocation30_spill] sm:$0xff] }
 0x448   : > { %2937 = vadd.xlane.f32.xlu0 %v2936_v42  ;;  %v2894_v37 = vmul.f32 %v6473_v43, %v7360_v11 }
 0x44a   : > { %v6560_v36 = vpop.xlane.xlu2 %2645  ;;  %v6562_v47 = vpop.xlane.xlu1 %2642  ;;  %v2954_v53 = vsel %vm250_vm0, %v2894_v37, 0.0 }
 0x44b   : > { %v6564_v8 = vpop.xlane.xlu0 %2639 }
 0x44f   : > { %2952 = vadd.xlane.f32.xlu2 %v2951_v24  ;;  %2949 = vadd.xlane.f32.xlu1 %v2948_v56  ;;  %v3658_v24 = vld [vmem:[%s3821_s25 + $0xc9] sm:$0x3f]  ;;  %v3656_v56 = vld [vmem:[%s3821_s25 + $0xb9] sm:$0x3f] }
 0x450   : > { %2946 = vadd.xlane.f32.xlu0 %v2945_v58  ;;  %v2899_v23 = vmul.f32 %v6473_v43, %v3658_v24  ;;  %v7361_v58 = vld [vmem:[#allocation40_spill] sm:$0xff]  ;;  %v2897_v21 = vmul.f32 %v6473_v43, %v3656_v56  ;;  %v2657_v56 = vadd.f32 %v6467_v39, %v7203_v7 }
 0x451   : > { %v2898_v49 = vmul.f32 %v6473_v43, %v7361_v58  ;;  %v2900_v58 = vmul.f32 %v6473_v43, %v6180_v31  ;;  %v3663_v31 = vld [vmem:[%s3821_s25 + $0xf1] sm:$0xff] }
 0x452   : > { %v2741_v42 = vpop.xlane.xlu2 %2740  ;;  %v2738_v61 = vpop.xlane.xlu1 %2737  ;;  %v2963_v6 = vsel %vm254_vm1, %v2897_v21, 0.0 }
 0x453   : > { %v6579_v41 = vadd.f32 %v2741_v42, %v2651_v20  ;;  %v6581_v13 = vadd.f32 %v2738_v61, %v2650_v35  ;;  %v6583_v12 = vpop.xlane.xlu0 %2648  ;;  %v2652_v20 = vadd.f32 %v6424_v3, %v7203_v7  ;;  %v2966_v0 = vsel %vm250_vm0, %v2898_v49, 0.0 }
 0x454   : > { %v2902_v3 = vmul.f32 %v6473_v43, %v6169_v22  ;;  %v2655_v49 = vadd.f32 %v6447_v27, %v7203_v7 }
 0x456   : > { %v2978_v39 = vsel %vm250_vm0, %v2902_v3, 0.0 }
 0x457   : > { %2961 = vadd.xlane.f32.xlu2 %v2960_v26  ;;  %2958 = vadd.xlane.f32.xlu1 %v2957_v45  ;;  %v2969_v45 = vsel %vm254_vm1, %v2899_v23, 0.0  ;;  %v2656_v23 = vadd.f32 %v6469_v38, %v7203_v7  ;;  %v2972_v38 = vsel %vm250_vm0, %v2900_v58, 0.0 }
 0x458   : > { %2955 = vadd.xlane.f32.xlu0 %v2954_v53  ;;  %v3660_v53 = vld [vmem:[%s3821_s25 + $0xd9] sm:$0x3f] }
 0x459   : > { %v2901_v24 = vmul.f32 %v6473_v43, %v3660_v53  ;;  %v2659_v53 = vadd.f32 %v6489_v44, %v7203_v7  ;;  %v3666_v44 = vld [vmem:[%s3821_s25 + $0x2a] sm:$0x3f] }
 0x45a   : > { %v2750_v35 = vpop.xlane.xlu2 %2749  ;;  %v2747_v11 = vpop.xlane.xlu1 %2746 }
 0x45b   : > { %v6600_v37 = vadd.f32 %v2750_v35, %v2654_v59  ;;  %v6602_v42 = vadd.f32 %v2747_v11, %v2653_v18  ;;  %v2744_v61 = vpop.xlane.xlu0 %2743  ;;  %v2975_v11 = vsel %vm254_vm1, %v2901_v24, 0.0  ;;  %v2658_v24 = vadd.f32 %v6465_v4, %v7203_v7 }
 0x45c   : > { %v6604_v26 = vadd.f32 %v2744_v61, %v2652_v20  ;;  %v3664_v61 = vld [vmem:[%s3821_s25 + $0xf9] sm:$0x3f] }
 0x45d   : > { %v2905_v27 = vmul.f32 %v6473_v43, %v3664_v61  ;;  %v2662_v61 = vadd.f32 %v6504_v15, %v7203_v7 }
 0x45f   : > { %2970 = vadd.xlane.f32.xlu2 %v2969_v45  ;;  %2967 = vadd.xlane.f32.xlu1 %v2966_v0  ;;  %v3662_v45 = vld [vmem:[%s3821_s25 + $0xe9] sm:$0x3f]  ;;  %v2904_v0 = vmul.f32 %v6473_v43, %v3663_v31 }
 0x460   : > { %2964 = vadd.xlane.f32.xlu0 %v2963_v6  ;;  %v2660_v6 = vadd.f32 %v6487_v30, %v7203_v7  ;;  %v2903_v3 = vmul.f32 %v6473_v43, %v3662_v45  ;;  %v2661_v45 = vadd.f32 %v6485_v34, %v7203_v7 }
 0x461   : > { %v2984_v30 = vsel %vm250_vm0, %v2904_v0, 0.0 }
 0x462   : > { %v2759_v59 = vpop.xlane.xlu2 %2758  ;;  %v2756_v18 = vpop.xlane.xlu1 %2755  ;;  %v2981_v43 = vsel %vm254_vm1, %v2903_v3, 0.0 }
 0x463   : > { %v6621_v21 = vadd.f32 %v2759_v59, %v2657_v56  ;;  %v6623_v22 = vadd.f32 %v2756_v18, %v2656_v23  ;;  %v2753_v20 = vpop.xlane.xlu0 %2752 }
 0x464   : > { %v6625_v35 = vadd.f32 %v2753_v20, %v2655_v49  ;;  %v2987_v20 = vsel %vm254_vm1, %v2905_v27, 0.0 }
 0x467   : > { %2979 = vadd.xlane.f32.xlu2 %v2978_v39  ;;  %2976 = vadd.xlane.f32.xlu1 %v2975_v11  ;;  %v6650_v39 = vld [vmem:[#allocation3 + $0xf] ss:$0 sm:$0xff] }
 0x468   : > { %2973 = vadd.xlane.f32.xlu0 %v2972_v38  ;;  %v3050_v4 = vmul.f32 %v6650_v39, %v6241_v40  ;;  %v3049_v11 = vmul.f32 %v6650_v39, %v3666_v44  ;;  %v2663_v38 = vadd.f32 %v6502_v62, %v7203_v7  ;;  %v3048_v31 = vmul.f32 %v6650_v39, %v6254_v14  ;;  %v3668_v14 = vld [vmem:[%s3821_s25 + $0x3a] sm:$0x3f] }
 0x46a   : > { %v2768_v56 = vpop.xlane.xlu2 %2767  ;;  %v2765_v23 = vpop.xlane.xlu1 %2764  ;;  %v3082_v62 = vsel %vm250_vm0, %v3050_v4, 0.0  ;;  %v3076_v15 = vsel %vm250_vm0, %v3048_v31, 0.0 }
 0x46b   : > { %v6642_v58 = vadd.f32 %v2768_v56, %v2660_v6  ;;  %v6644_v49 = vadd.f32 %v2765_v23, %v2659_v53  ;;  %v2762_v59 = vpop.xlane.xlu0 %2761  ;;  %v3670_v56 = vld [vmem:[%s3821_s25 + $0x4a] sm:$0x3f]  ;;  %v3052_v23 = vmul.f32 %v6650_v39, %v6282_v48 }
 0x46c   : > { %v6646_v18 = vadd.f32 %v2762_v59, %v2658_v24  ;;  %v3079_v24 = vsel %vm254_vm1, %v3049_v11, 0.0  ;;  %v3053_v34 = vmul.f32 %v6650_v39, %v3670_v56  ;;  %v2666_v59 = vadd.f32 %v6517_v9, %v7203_v7 }
 0x46d   : > { %v3088_v9 = vsel %vm250_vm0, %v3052_v23, 0.0 }
 0x46e   : > { %v3091_v48 = vsel %vm254_vm1, %v3053_v34, 0.0 }
 0x46f   : > { %2988 = vadd.xlane.f32.xlu2 %v2987_v20  ;;  %2985 = vadd.xlane.f32.xlu1 %v2984_v30  ;;  %v2665_v20 = vadd.f32 %v6519_v5, %v7203_v7  ;;  %v3051_v30 = vmul.f32 %v6650_v39, %v3668_v14 }
 0x470   : > { %2982 = vadd.xlane.f32.xlu0 %v2981_v43  ;;  %v2664_v43 = vadd.f32 %v6500_v16, %v7203_v7  ;;  %v3056_v16 = vmul.f32 %v6650_v39, %v6302_v51 }
 0x471   : > { %v3085_v5 = vsel %vm254_vm1, %v3051_v30, 0.0  ;;  %v3058_v30 = vmul.f32 %v6650_v39, %v6347_v33 }
 0x472   : > { %v2777_v27 = vpop.xlane.xlu2 %2776  ;;  %v2774_v0 = vpop.xlane.xlu1 %2773 }
 0x473   : > { %v6665_v6 = vadd.f32 %v2777_v27, %v2663_v38  ;;  %v6667_v40 = vadd.f32 %v2774_v0, %v2662_v61  ;;  %v2771_v53 = vpop.xlane.xlu0 %2770  ;;  %v2669_v0 = vadd.f32 %v6532_v63, %v7203_v7  ;;  %v3100_v63 = vsel %vm250_vm0, %v3056_v16, 0.0 }
 0x474   : > { %v6669_v3 = vadd.f32 %v2771_v53, %v2661_v45  ;;  %v3672_v45 = vld [vmem:[%s3821_s25 + $0x5a] sm:$0x3f]  ;;  %v2668_v53 = vadd.f32 %v6534_v54, %v7203_v7 }
 0x475   : > { %v3055_v27 = vmul.f32 %v6650_v39, %v3672_v45 }
 0x477   : > { %3083 = vadd.xlane.f32.xlu2 %v3082_v62  ;;  %3080 = vadd.xlane.f32.xlu1 %v3079_v24  ;;  %v3054_v62 = vmul.f32 %v6650_v39, %v6317_v32  ;;  %v2667_v24 = vadd.f32 %v6515_v19, %v7203_v7  ;;  %v3674_v32 = vld [vmem:[%s3821_s25 + $0x6a] sm:$0x3f] }
 0x478   : > { %3077 = vadd.xlane.f32.xlu0 %v3076_v15 }
 0x479   : > { %v3094_v54 = vsel %vm250_vm0, %v3054_v62, 0.0  ;;  %v2675_v62 = vadd.f32 %v6562_v47, %v7203_v7 }
 0x47a   : > { %v2786_v44 = vpop.xlane.xlu2 %2785  ;;  %v2783_v4 = vpop.xlane.xlu1 %2782 }
 0x47b   : > { %v6686_v11 = vadd.f32 %v2786_v44, %v2666_v59  ;;  %v6688_v38 = vadd.f32 %v2783_v4, %v2665_v20  ;;  %v2780_v61 = vpop.xlane.xlu0 %2779  ;;  %v3097_v59 = vsel %vm254_vm1, %v3055_v27, 0.0  ;;  %v3676_v20 = vld [vmem:[%s3821_s25 + $0x7a] sm:$0x3f]  ;;  %v2671_v44 = vadd.f32 %v6549_v2, %v7203_v7 }
 0x47c   : > { %v6690_v31 = vadd.f32 %v2780_v61, %v2664_v43  ;;  %v3059_v19 = vmul.f32 %v6650_v39, %v3676_v20  ;;  %v2672_v43 = vadd.f32 %v6547_v10, %v7203_v7  ;;  %v3057_v4 = vmul.f32 %v6650_v39, %v3674_v32 }
 0x47d   : > { %v2670_v61 = vadd.f32 %v6530_v46, %v7203_v7  ;;  %v3106_v10 = vsel %vm250_vm0, %v3058_v30, 0.0  ;;  %v3066_v46 = vmul.f32 %v6650_v39, %v6440_v60  ;;  %v3068_v30 = vmul.f32 %v6650_v39, %v6436_v28 }
 0x47e   : > { %v3109_v33 = vsel %vm254_vm1, %v3059_v19, 0.0  ;;  %v3103_v2 = vsel %vm254_vm1, %v3057_v4, 0.0  ;;  %v3686_v19 = vld [vmem:[%s3821_s25 + $0xca] sm:$0x3f]  ;;  %v2676_v4 = vadd.f32 %v6560_v36, %v7203_v7 }
 0x47f   : > { %3092 = vadd.xlane.f32.xlu2 %v3091_v48  ;;  %3089 = vadd.xlane.f32.xlu1 %v3088_v9  ;;  %v3130_v47 = vsel %vm250_vm0, %v3066_v46, 0.0 }
 0x480   : > { %3086 = vadd.xlane.f32.xlu0 %v3085_v5 }
 0x482   : > { %v2795_v15 = vpop.xlane.xlu2 %2794  ;;  %v2792_v56 = vpop.xlane.xlu1 %2791 }
 0x483   : > { %v6707_v14 = vadd.f32 %v2795_v15, %v2669_v0  ;;  %v6709_v51 = vadd.f32 %v2792_v56, %v2668_v53  ;;  %v2789_v34 = vpop.xlane.xlu0 %2788  ;;  %v3682_v0 = vld [vmem:[%s3821_s25 + $0xaa] sm:$0x3f]  ;;  %v3064_v15 = vmul.f32 %v6650_v39, %v6411_v52  ;;  %v2673_v56 = vadd.f32 %v6545_v50, %v7203_v7  ;;  %v3684_v52 = vld [vmem:[%s3821_s25 + $0xba] sm:$0x3f] }
 0x484   : > { %v6711_v23 = vadd.f32 %v2789_v34, %v2667_v24  ;;  %v3065_v53 = vmul.f32 %v6650_v39, %v3682_v0  ;;  %v2674_v24 = vadd.f32 %v6564_v8, %v7203_v7  ;;  %v3069_v50 = vmul.f32 %v6650_v39, %v3686_v19  ;;  %v3688_v0 = vld [vmem:[%s3821_s25 + $0xda] sm:$0x3f] }
 0x485   : > { %v3124_v8 = vsel %vm250_vm0, %v3064_v15, 0.0  ;;  %v3071_v36 = vmul.f32 %v6650_v39, %v3688_v0 }
 0x486   : > { %v3127_v32 = vsel %vm254_vm1, %v3065_v53, 0.0  ;;  %v3139_v28 = vsel %vm254_vm1, %v3069_v50, 0.0 }
 0x487   : > { %3101 = vadd.xlane.f32.xlu2 %v3100_v63  ;;  %3098 = vadd.xlane.f32.xlu1 %v3097_v59 }
 0x488   : > { %3095 = vadd.xlane.f32.xlu0 %v3094_v54 }
 0x48a   : > { %v2804_v48 = vpop.xlane.xlu2 %2803  ;;  %v2801_v9 = vpop.xlane.xlu1 %2800 }
 0x48b   : > { %v6728_v5 = vadd.f32 %v2804_v48, %v2672_v43  ;;  %v6730_v45 = vadd.f32 %v2801_v9, %v2671_v44  ;;  %v2798_v16 = vpop.xlane.xlu0 %2797  ;;  %v2677_v43 = vadd.f32 %v6583_v12, %v7203_v7  ;;  %v3067_v44 = vmul.f32 %v6650_v39, %v3684_v52 }
 0x48c   : > { %v6732_v27 = vadd.f32 %v2798_v16, %v2670_v61  ;;  %v3060_v7 = vmul.f32 %v6650_v39, %v6388_v25  ;;  %v3145_v25 = vsel %vm254_vm1, %v3071_v36, 0.0 }
 0x48d   : > { %v3133_v12 = vsel %vm254_vm1, %v3067_v44, 0.0  ;;  %v3691_v44 = vld [vmem:[%s3821_s25 + $0xf2] sm:$0xff] }
 0x48f   : > { %3110 = vadd.xlane.f32.xlu2 %v3109_v33  ;;  %3107 = vadd.xlane.f32.xlu1 %v3106_v10 }
 0x490   : > { %3104 = vadd.xlane.f32.xlu0 %v3103_v2  ;;  %v3136_v2 = vsel %vm250_vm0, %v3068_v30, 0.0 }
 0x492   : > { %v2813_v34 = vpop.xlane.xlu2 %2812  ;;  %v2810_v63 = vpop.xlane.xlu1 %2809 }
 0x493   : > { %v6749_v59 = vadd.f32 %v2813_v34, %v2675_v62  ;;  %v6751_v60 = vadd.f32 %v2810_v63, %v2674_v24  ;;  %v2807_v54 = vpop.xlane.xlu0 %2806  ;;  %v3112_v34 = vsel %vm250_vm0, %v3060_v7, 0.0 }
 0x494   : > { %v6753_v20 = vadd.f32 %v2807_v54, %v2673_v56  ;;  %v3690_v54 = vld [vmem:[%s3821_s25 + $0xea] sm:$0x3f] }
 0x497   : > { %3131 = vadd.xlane.f32.xlu2 %v3130_v47  ;;  %3128 = vadd.xlane.f32.xlu1 %v3127_v32 }
 0x498   : > { %3125 = vadd.xlane.f32.xlu0 %v3124_v8 }
 0x49a   : > { %v2908_v61 = vpop.xlane.xlu2 %2907  ;;  %v2819_v48 = vpop.xlane.xlu1 %2818 }
 0x49b   : > { %v6769_v9 = vadd.f32 %v2908_v61, %v6581_v13  ;;  %v6771_v16 = vadd.f32 %v2819_v48, %v2677_v43  ;;  %v2816_v33 = vpop.xlane.xlu0 %2815  ;;  %v3070_v13 = vmul.f32 %v6650_v39, %v6458_v1  ;;  %v3678_v1 = vld [vmem:[%s3821_s25 + $0x8a] sm:$0x3f] }
 0x49c   : > { %v6773_v10 = vadd.f32 %v2816_v33, %v2676_v4  ;;  %v3680_v4 = vld [vmem:[%s3821_s25 + $0x9a] sm:$0x3f] }
 0x49d   : > { %v3142_v63 = vsel %vm250_vm0, %v3070_v13, 0.0  ;;  %v3692_v13 = vld [vmem:[%s3821_s25 + $0xfa] sm:$0x3f] }
 0x49f   : > { %3140 = vadd.xlane.f32.xlu2 %v3139_v28  ;;  %3137 = vadd.xlane.f32.xlu1 %v3136_v2 }
 0x4a0   : > { %3134 = vadd.xlane.f32.xlu0 %v3133_v12 }
 0x4a2   : > { %v2917_v46 = vpop.xlane.xlu2 %2916  ;;  %v2914_v53 = vpop.xlane.xlu1 %2913 }
 0x4a3   : > { %v6785_v62 = vadd.f32 %v2917_v46, %v6602_v42  ;;  %v6788_v24 = vadd.f32 %v2914_v53, %v6604_v26  ;;  %v2911_v15 = vpop.xlane.xlu0 %2910  ;;  %v3073_v42 = vmul.f32 %v6650_v39, %v3690_v54  ;;  %v3072_v26 = vmul.f32 %v6650_v39, %v6478_v29 }
 0x4a4   : > { %v6791_v56 = vadd.f32 %v2911_v15, %v6579_v41  ;;  %v3061_v41 = vmul.f32 %v6650_v39, %v3678_v1 }
 0x4a5   : > { %v3151_v30 = vsel %vm254_vm1, %v3073_v42, 0.0  ;;  %v3148_v43 = vsel %vm250_vm0, %v3072_v26, 0.0 }
 0x4a6   : > { %v3115_v29 = vsel %vm254_vm1, %v3061_v41, 0.0 }
 0x4a7   : > { %3113 = vadd.xlane.f32.xlu2 %v3112_v34  ;;  %3146 = vadd.xlane.f32.xlu1 %v3145_v25 }
 0x4a8   : > { %3143 = vadd.xlane.f32.xlu0 %v3142_v63 }
 0x4aa   : > { %v2926_v47 = vpop.xlane.xlu2 %2925  ;;  %v2923_v32 = vpop.xlane.xlu1 %2922 }
 0x4ab   : > { %v6803_v8 = vadd.f32 %v2926_v47, %v6623_v22  ;;  %v6806_v19 = vadd.f32 %v2923_v32, %v6625_v35  ;;  %v2920_v52 = vpop.xlane.xlu0 %2919  ;;  %v3074_v22 = vmul.f32 %v6650_v39, %v3691_v44  ;;  %v3063_v35 = vmul.f32 %v6650_v39, %v3680_v4 }
 0x4ac   : > { %v6809_v50 = vadd.f32 %v2920_v52, %v6600_v37  ;;  %v3062_v37 = vmul.f32 %v6650_v39, %v6382_v57  ;;  %v3075_v57 = vmul.f32 %v6650_v39, %v3692_v13 }
 0x4ad   : > { %v3154_v0 = vsel %vm250_vm0, %v3074_v22, 0.0  ;;  %v3121_v7 = vsel %vm254_vm1, %v3063_v35, 0.0 }
 0x4ae   : > { %v3118_v36 = vsel %vm250_vm0, %v3062_v37, 0.0  ;;  %v3157_v34 = vsel %vm254_vm1, %v3075_v57, 0.0 }
 0x4af   : > { %3152 = vadd.xlane.f32.xlu2 %v3151_v30  ;;  %3149 = vadd.xlane.f32.xlu1 %v3148_v43 }
 0x4b0   : > { %3116 = vadd.xlane.f32.xlu0 %v3115_v29 }
 0x4b2   : > { %v2935_v61 = vpop.xlane.xlu2 %2934  ;;  %v2932_v48 = vpop.xlane.xlu1 %2931 }
 0x4b3   : > { %v6821_v33 = vadd.f32 %v2935_v61, %v6644_v49  ;;  %v6824_v28 = vadd.f32 %v2932_v48, %v6646_v18  ;;  %v2929_v2 = vpop.xlane.xlu0 %2928 }
 0x4b4   : > { %v6827_v12 = vadd.f32 %v2929_v2, %v6621_v21 }
 0x4b7   : > { %3155 = vadd.xlane.f32.xlu2 %v3154_v0  ;;  %3122 = vadd.xlane.f32.xlu1 %v3121_v7 }
 0x4b8   : > { %3119 = vadd.xlane.f32.xlu0 %v3118_v36 }
 0x4ba   : > { %v2944_v49 = vpop.xlane.xlu2 %2943  ;;  %v2941_v46 = vpop.xlane.xlu1 %2940 }
 0x4bb   : > { %v6835_v18 = vadd.f32 %v2944_v49, %v6667_v40  ;;  %v6838_v21 = vadd.f32 %v2941_v46, %v6669_v3  ;;  %v2938_v53 = vpop.xlane.xlu0 %2937 }
 0x4bc   : > { %v6841_v15 = vadd.f32 %v2938_v53, %v6642_v58 }
 0x4c0   : > { %3158 = vadd.xlane.f32.xlu0 %v3157_v34 }
 0x4c2   : > { %v2953_v25 = vpop.xlane.xlu2 %2952  ;;  %v2950_v63 = vpop.xlane.xlu1 %2949 }
 0x4c3   : > { %v6845_v54 = vadd.f32 %v2953_v25, %v6688_v38  ;;  %v6848_v39 = vadd.f32 %v2950_v63, %v6690_v31  ;;  %v2947_v40 = vpop.xlane.xlu0 %2946 }
 0x4c4   : > { %v6851_v1 = vadd.f32 %v2947_v40, %v6665_v6 }
 0x4ca   : > { %v2962_v3 = vpop.xlane.xlu2 %2961  ;;  %v2959_v42 = vpop.xlane.xlu1 %2958 }
 0x4cb   : > { %v6854_v58 = vadd.f32 %v2962_v3, %v6709_v51  ;;  %v6857_v26 = vadd.f32 %v2959_v42, %v6711_v23  ;;  %v2956_v41 = vpop.xlane.xlu0 %2955 }
 0x4cc   : > { %v6860_v47 = vadd.f32 %v2956_v41, %v6686_v11 }
 0x4d2   : > { %v2971_v38 = vpop.xlane.xlu2 %2970  ;;  %v2968_v32 = vpop.xlane.xlu1 %2967 }
 0x4d3   : > { %v6863_v31 = vadd.f32 %v2971_v38, %v6730_v45  ;;  %v6866_v6 = vadd.f32 %v2968_v32, %v6732_v27  ;;  %v2965_v52 = vpop.xlane.xlu0 %2964 }
 0x4d4   : > { %v6869_v30 = vadd.f32 %v2965_v52, %v6707_v14 }
 0x4da   : > { %v2980_v51 = vpop.xlane.xlu2 %2979  ;;  %v2977_v43 = vpop.xlane.xlu1 %2976 }
 0x4db   : > { %v6872_v23 = vadd.f32 %v2980_v51, %v6751_v60  ;;  %v6875_v11 = vadd.f32 %v2977_v43, %v6753_v20  ;;  %v2974_v29 = vpop.xlane.xlu0 %2973 }
 0x4dc   : > { %v6878_v44 = vadd.f32 %v2974_v29, %v6728_v5 }
 0x4e2   : > { %v2989_v45 = vpop.xlane.xlu2 %2988  ;;  %v2986_v4 = vpop.xlane.xlu1 %2985 }
 0x4e3   : > { %v6881_v27 = vadd.f32 %v2989_v45, %v6771_v16  ;;  %v6884_v14 = vadd.f32 %v2986_v4, %v6773_v10  ;;  %v2983_v22 = vpop.xlane.xlu0 %2982 }
 0x4e4   : > { %v6887_v35 = vadd.f32 %v2983_v22, %v6749_v59 }
 0x4ea   : > { %v3084_v60 = vpop.xlane.xlu2 %3083  ;;  %v3081_v37 = vpop.xlane.xlu1 %3080 }
 0x4eb   : > { %v3161_v20 = vadd.f32 %v3081_v37, %v6791_v56  ;;  %v3078_v61 = vpop.xlane.xlu0 %3077  ;;  %v3162_v10 = vadd.f32 %v3084_v60, %v6788_v24 }
 0x4ec   : > { %v3160_v5 = vadd.f32 %v3078_v61, %v6769_v9 }
 0x4ed   : > { %v3217_v48 = vperm.slane %v3161_v20, %v7309_v17  ;;  %v3219_v49 = vperm.slane %v3162_v10, %v7308_v55 }
 0x4ee   : > { %v3216_v2 = vperm.slane %v3160_v5, %v7308_v55 }
 0x4f0   : > { %v3218_v16 = vsel %vm907_vm2, %v3217_v48, %v3216_v2 }
 0x4f2   : > { %v3093_v0 = vpop.xlane.xlu2 %3092  ;;  %v3090_v7 = vpop.xlane.xlu1 %3089 }
 0x4f3   : > { %v3165_v59 = vadd.f32 %v3093_v0, %v6806_v19  ;;  %v3164_v36 = vadd.f32 %v3090_v7, %v6809_v50  ;;  %v3087_v13 = vpop.xlane.xlu0 %3086 }
 0x4f4   : > { %v3163_v56 = vadd.f32 %v3087_v13, %v6785_v62 }
 0x4f5   : > { %v3223_v57 = vperm.slane %v3165_v59, %v7309_v17  ;;  %v3222_v9 = vperm.slane %v3164_v36, %v7308_v55 }
 0x4f6   : > { %v3220_v46 = vperm.slane %v3163_v56, %v7309_v17 }
 0x4f7   : > { %v3224_v53 = vsel %vm907_vm2, %v3223_v57, %v3222_v9 }
 0x4f8   : > { %v3221_v24 = vsel %vm907_vm2, %v3220_v46, %v3219_v49 }
 0x4f9   : > { %v3258_v34 = vsel %vm948_vm3, %v3221_v24, %v3218_v16 }
 0x4fa   : > { %v3102_v19 = vpop.xlane.xlu2 %3101  ;;  %v3099_v25 = vpop.xlane.xlu1 %3098  ;;  %v3259_v50 = vsel %vm950_vm4, %v3224_v53, %v3258_v34 }
 0x4fb   : > { %v3167_v62 = vadd.f32 %v3099_v25, %v6827_v12  ;;  %v3096_v63 = vpop.xlane.xlu0 %3095  ;;  %v3168_v32 = vadd.f32 %v3102_v19, %v6824_v28 }
 0x4fc   : > { %v3166_v40 = vadd.f32 %v3096_v63, %v6803_v8 }
 0x4fd   : > { %v3226_v3 = vperm.slane %v3167_v62, %v7309_v17  ;;  %v3228_v22 = vperm.slane %v3168_v32, %v7308_v55 }
 0x4fe   : > { %v3225_v42 = vperm.slane %v3166_v40, %v7308_v55 }
 0x500   : > { %v3227_v41 = vsel %vm907_vm2, %v3226_v3, %v3225_v42 }
 0x501   : > { %v3260_v38 = vsel %vm952_vm5, %v3227_v41, %v3259_v50 }
 0x502   : > { %v3111_v52 = vpop.xlane.xlu2 %3110  ;;  %v3108_v51 = vpop.xlane.xlu1 %3107 }
 0x503   : > { %v3171_v43 = vadd.f32 %v3111_v52, %v6838_v21  ;;  %v3170_v29 = vadd.f32 %v3108_v51, %v6841_v15  ;;  %v3105_v12 = vpop.xlane.xlu0 %3104 }
 0x504   : > { %v3169_v45 = vadd.f32 %v3105_v12, %v6821_v33 }
 0x505   : > { %v3232_v8 = vperm.slane %v3171_v43, %v7309_v17  ;;  %v3231_v4 = vperm.slane %v3170_v29, %v7308_v55 }
 0x506   : > { %v3229_v60 = vperm.slane %v3169_v45, %v7309_v17 }
 0x507   : > { %v3233_v37 = vsel %vm907_vm2, %v3232_v8, %v3231_v4 }
 0x508   : > { %v3230_v28 = vsel %vm907_vm2, %v3229_v60, %v3228_v22 }
 0x509   : > { %v3261_v20 = vsel %vm954_vm6, %v3230_v28, %v3260_v38 }
 0x50a   : > { %v3132_v21 = vpop.xlane.xlu2 %3131  ;;  %v3129_v61 = vpop.xlane.xlu1 %3128  ;;  %v3262_v15 = vsel %vm956_vm7, %v3233_v37, %v3261_v20 }
 0x50b   : > { %v3177_v33 = vadd.f32 %v3129_v61, %v6857_v26  ;;  %v3126_v5 = vpop.xlane.xlu0 %3125  ;;  %v3178_v0 = vadd.f32 %v3132_v21, %v6854_v58 }
 0x50c   : > { %v3176_v48 = vadd.f32 %v3126_v5, %v6860_v47 }
 0x50d   : > { %v3241_v2 = vperm.slane %v3177_v33, %v7309_v17  ;;  %v3243_v9 = vperm.slane %v3178_v0, %v7308_v55 }
 0x50e   : > { %v3240_v16 = vperm.slane %v3176_v48, %v7308_v55 }
 0x510   : > { %v3242_v10 = vsel %vm907_vm2, %v3241_v2, %v3240_v16 }
 0x512   : > { %v3141_v7 = vpop.xlane.xlu2 %3140  ;;  %v3138_v59 = vpop.xlane.xlu1 %3137 }
 0x513   : > { %v3181_v36 = vadd.f32 %v3141_v7, %v6863_v31  ;;  %v3180_v13 = vadd.f32 %v3138_v59, %v6866_v6  ;;  %v3135_v56 = vpop.xlane.xlu0 %3134 }
 0x514   : > { %v3179_v26 = vadd.f32 %v3135_v56, %v6869_v30 }
 0x515   : > { %v3247_v57 = vperm.slane %v3181_v36, %v7309_v17  ;;  %v3246_v47 = vperm.slane %v3180_v13, %v7308_v55 }
 0x516   : > { %v3244_v49 = vperm.slane %v3179_v26, %v7309_v17 }
 0x517   : > { %v3248_v46 = vsel %vm907_vm2, %v3247_v57, %v3246_v47 }
 0x518   : > { %v3245_v58 = vsel %vm907_vm2, %v3244_v49, %v3243_v9 }
 0x519   : > { %v3265_v53 = vsel %vm948_vm3, %v3245_v58, %v3242_v10 }
 0x51a   : > { %v3114_v31 = vpop.xlane.xlu2 %3113  ;;  %v3147_v24 = vpop.xlane.xlu1 %3146  ;;  %v3266_v6 = vsel %vm950_vm4, %v3248_v46, %v3265_v53 }
 0x51b   : > { %v3183_v30 = vadd.f32 %v3147_v24, %v6875_v11  ;;  %v3144_v34 = vpop.xlane.xlu0 %3143  ;;  %v3172_v40 = vadd.f32 %v3114_v31, %v6835_v18 }
 0x51c   : > { %v3182_v19 = vadd.f32 %v3144_v34, %v6878_v44 }
 0x51d   : > { %v3250_v25 = vperm.slane %v3183_v30, %v7309_v17  ;;  %v3234_v51 = vperm.slane %v3172_v40, %v7308_v55 }
 0x51e   : > { %v3249_v50 = vperm.slane %v3182_v19, %v7308_v55 }
 0x520   : > { %v3251_v62 = vsel %vm907_vm2, %v3250_v25, %v3249_v50 }
 0x521   : > { %v3267_v63 = vsel %vm952_vm5, %v3251_v62, %v3266_v6 }
 0x522   : > { %v3153_v3 = vpop.xlane.xlu2 %3152  ;;  %v3150_v42 = vpop.xlane.xlu1 %3149 }
 0x523   : > { %v3185_v41 = vadd.f32 %v3153_v3, %v6887_v35  ;;  %v3184_v38 = vadd.f32 %v3150_v42, %v6872_v23  ;;  %v3117_v11 = vpop.xlane.xlu0 %3116 }
 0x524   : > { %v3173_v32 = vadd.f32 %v3117_v11, %v6851_v1 }
 0x525   : > { %v3253_v44 = vperm.slane %v3185_v41, %v7309_v17  ;;  %v3252_v52 = vperm.slane %v3184_v38, %v7308_v55 }
 0x526   : > { %v3235_v43 = vperm.slane %v3173_v32, %v7309_v17 }
 0x527   : > { %v3254_v18 = vsel %vm907_vm2, %v3253_v44, %v3252_v52 }
 0x528   : > { %v3268_v29 = vsel %vm954_vm6, %v3254_v18, %v3267_v63  ;;  %v3236_v35 = vsel %vm907_vm2, %v3235_v43, %v3234_v51 }
 0x529   : > { %v3263_v23 = vsel %vm958_vm8, %v3236_v35, %v3262_v15 }
 0x52a   : > { %v3123_v12 = vpop.xlane.xlu1 %3122  ;;  %v3156_v60 = vpop.xlane.xlu2 %3155 }
 0x52b   : > { %v3175_v1 = vadd.f32 %v3123_v12, %v6845_v54  ;;  %v3120_v45 = vpop.xlane.xlu0 %3119  ;;  %v3186_v20 = vadd.f32 %v3156_v60, %v6884_v14 }
 0x52c   : > { %v3174_v8 = vadd.f32 %v3120_v45, %v6848_v39 }
 0x52d   : > { %v3238_v4 = vperm.slane %v3175_v1, %v7309_v17  ;;  %v3255_v61 = vperm.slane %v3186_v20, %v7308_v55 }
 0x52e   : > { %v3237_v22 = vperm.slane %v3174_v8, %v7308_v55 }
 0x530   : > { %v3239_v37 = vsel %vm907_vm2, %v3238_v4, %v3237_v22 }
 0x531   : > { %v3264_v28 = vsel %vm960_vm9, %v3239_v37, %v3263_v23 }
 0x532   : > { %3693 = vst.msk [vmem:[%s4718_s30 + $0x30] sm:$0xff] %vm969_vm10, %v3264_v28 }
 0x533   : > { %v3159_v21 = vpop.xlane.xlu0 %3158 }
 0x534   : > { %v3187_v54 = vadd.f32 %v3159_v21, %v6881_v27 }
 0x536   : > { %v3256_v39 = vperm.slane %v3187_v54, %v7309_v17 }
 0x538   : > { %v3257_v15 = vsel %vm907_vm2, %v3256_v39, %v3255_v61 }
 0x539   : > { %v3269_v33 = vsel %vm956_vm7, %v3257_v15, %v3268_v29 }
 0x53a   : > { %3694 = vst.msk [vmem:[%s4718_s30 + $0x38] sm:$0x3f] %vm971_vm11, %v3269_v33 }
 0x53b PF: > { %s15_s14 = sadd.s32 1, %s3776_s14  }
 0x53c   : > { %p12_p7 = scmp.ge.s32.totalorder %s15_s14, 4  }
 0x53e   :  { %14 = sbr.rel (!%p12_p7) target bundleno = 3 (0x3), region = 72 }
 0x543   :  { %3296 = vsyncpa [#allocation4], 1 }
 0x544   :  { %3298 = vsyncpa [#allocation4 + $0x1], 1 }

</bundles_post_ra>
